<compile_context>
chip_gen: v5e
topology: v5e:2x2
jax: 0.10.0
libtpu: 0.0.40
codegen_flags: <defaults>
</compile_context>

<pallas_src>
import numpy as np
import jax
import jax.numpy as jnp
from jax.experimental import pallas as pl
from jax.experimental.pallas import tpu as pltpu


# -----------------------------------------------------------------------------
# Fused Translator4FactorTransfer kernel
# -----------------------------------------------------------------------------
def _make_translator_kernel(wp, n_rows):
    """wp: padded image width; n_rows: padded-flat slab rows (multiple of 8)."""

    def kernel(x_ref, w1_ref, s1_ref, b1_ref, w2_ref, s2_ref, b2_ref,
               w3_ref, s3_ref, b3_ref, mask_ref, o_ref, buf1, buf2):
        off = wp + 1  # row offset of the slab inside the extended buffers

        def conv_bn_lrelu(src_ref, w_ref, s_ref, b_ref):
            cout = w_ref.shape[2]
            acc = jnp.zeros((n_rows, cout), jnp.float32)
            for k in range(9):                         # 3x3 taps, fully unrolled
                start = (k // 3) * wp + (k % 3)        # static row shift
                patch = src_ref[pl.ds(start, n_rows), :]
                acc = acc + jnp.dot(patch, w_ref[k],
                                    preferred_element_type=jnp.float32)
            y = acc * s_ref[...] + b_ref[...]          # folded conv-bias + eval BN
            y = jnp.where(y >= 0, y, 0.1 * y)          # LeakyReLU(0.1)
            return y * mask_ref[...]                   # re-zero the conv-padding ring

        # Scratch must read as zero everywhere outside the written slab
        buf1[...] = jnp.zeros_like(buf1)
        buf2[...] = jnp.zeros_like(buf2)

        y1 = conv_bn_lrelu(x_ref, w1_ref, s1_ref, b1_ref)
        buf1[pl.ds(off, n_rows), :] = y1
        y2 = conv_bn_lrelu(buf1, w2_ref, s2_ref, b2_ref)
        buf2[pl.ds(off, n_rows), :] = y2
        y3 = conv_bn_lrelu(buf2, w3_ref, s3_ref, b3_ref)
        o_ref[...] = y3.astype(o_ref.dtype)

    return kernel


def translator_forward(x_nchw, params):
    """Translator4FactorTransfer forward (inference) via one fused Pallas kernel.

    x_nchw: (N, C_in, H, W) float32.
    params: list of 3 dicts {w: (3,3,ci,co), scale: (co,), bias: (co,)} with
            eval-mode BatchNorm and the conv bias pre-folded into (scale, bias).
    Returns the "factor": (N, C_out, H, W) float32.
    """
    n, c0, h, w = x_nchw.shape
    c1 = params[1]["w"].shape[-1]
    hp, wp = h + 2, w + 2
    core = hp * wp                                   # padded-image pixel count
    rows = -(-core // 8) * 8                         # slab rows, sublane aligned
    off = wp + 1                                     # max backward tap reach
    ext = -(-(rows + 2 * off) // 8) * 8              # extended buffer rows

    # ---- host-side layout prep (tiny; one transpose/pad per call) ----
    x_nhwc = jnp.transpose(x_nchw, (0, 2, 3, 1))
    xpad = jnp.pad(x_nhwc, ((0, 0), (1, 1), (1, 1), (0, 0)))
    xflat = xpad.reshape(n, core, c0)
    x_ext = jnp.pad(xflat, ((0, 0), (off, ext - core - off), (0, 0)))

    # Interior mask: 1 for real output pixels, 0 on the padding ring / tail rows.
    q = np.arange(rows)
    r, c = q // wp, q % wp
    valid = (q < core) & (r >= 1) & (r <= hp - 2) & (c >= 1) & (c <= wp - 2)
    mask = jnp.asarray(valid.astype(np.float32).reshape(rows, 1))

    def flat(p):
        ci, co = p["w"].shape[2], p["w"].shape[3]
        return (p["w"].reshape(9, ci, co),
                p["scale"].reshape(1, co), p["bias"].reshape(1, co))

    w1, s1, b1 = flat(params[0])
    w2, s2, b2 = flat(params[1])
    w3, s3, b3 = flat(params[2])

    def full(*shape):
        return pl.BlockSpec(shape, lambda i, _s=shape: (0,) * len(_s))

    out = pl.pallas_call(
        _make_translator_kernel(wp, rows),
        out_shape=jax.ShapeDtypeStruct((n, rows, c1), jnp.float32),
        grid_spec=pltpu.PrefetchScalarGridSpec(
            num_scalar_prefetch=0,
            grid=(n,),                                # one image per grid step
            in_specs=[
                pl.BlockSpec((None, ext, c0), lambda i: (i, 0, 0)),
                full(9, c0, c0), full(1, c0), full(1, c0),
                full(9, c0, c1), full(1, c1), full(1, c1),
                full(9, c1, c1), full(1, c1), full(1, c1),
                full(rows, 1),
            ],
            out_specs=pl.BlockSpec((None, rows, c1), lambda i: (i, 0, 0)),
            scratch_shapes=[pltpu.VMEM((ext, c0), jnp.float32),
                            pltpu.VMEM((ext, c1), jnp.float32)],
        ),
        compiler_params=pltpu.CompilerParams(
            dimension_semantics=("parallel",)),
    )(x_ext, w1, s1, b1, w2, s2, b2, w3, s3, b3, mask)

    y = out[:, :core, :].reshape(n, hp, wp, c1)[:, 1:-1, 1:-1, :]
    return jnp.transpose(y, (0, 3, 1, 2))


def init_translator_params(key, num_input_channels, num_output_channels):
    """Deterministic Conv+BN parameters for the 3-layer translator, with
    eval-mode BatchNorm and the conv bias folded into per-channel scale/bias."""
    plan = [(num_input_channels, num_input_channels),
            (num_input_channels, num_output_channels),
            (num_output_channels, num_output_channels)]
    params = []
    for cin, cout in plan:
        key, kw, kb, kg, kbe, km, kv = jax.random.split(key, 7)
        w = jax.random.normal(kw, (3, 3, cin, cout), jnp.float32) / np.sqrt(9 * cin)
        conv_b = 0.1 * jax.random.normal(kb, (cout,), jnp.float32)
        gamma = 1.0 + 0.1 * jax.random.normal(kg, (cout,), jnp.float32)
        beta = 0.1 * jax.random.normal(kbe, (cout,), jnp.float32)
        run_mean = 0.1 * jax.random.normal(km, (cout,), jnp.float32)
        run_var = jax.random.uniform(kv, (cout,), jnp.float32, 0.5, 1.5)
        scale = gamma * jax.lax.rsqrt(run_var + 1e-5)
        bias = beta + (conv_b - run_mean) * scale
        params.append(dict(w=w, scale=scale, bias=bias))
    return params


def translator_reference(x_nchw, params):
    """Pure-JAX reference (lax.conv) used to validate the Pallas kernel."""
    x = jnp.transpose(x_nchw, (0, 2, 3, 1))
    for p in params:
        x = jax.lax.conv_general_dilated(
            x, p["w"], window_strides=(1, 1), padding=((1, 1), (1, 1)),
            dimension_numbers=("NHWC", "HWIO", "NHWC"))
        x = x * p["scale"].reshape(1, 1, 1, -1) + p["bias"].reshape(1, 1, 1, -1)
        x = jnp.where(x >= 0, x, 0.1 * x)
    return jnp.transpose(x, (0, 3, 1, 2))


class Student4FactorTransfer:
    """JAX/Pallas port of torchdistill's Student4FactorTransfer.

    forward(*args) delegates to the wrapped student model; post_forward(io_dict)
    routes the hint-layer activation through the Pallas translator kernel.
    """

    def __init__(self, student_model_fn, input_module_path, translator_params):
        # TODO(synk): student_model is an arbitrary external nn.Module (wrapped by
        # wrap_if_distributed in torch); here it must be supplied as a JAX callable.
        self.student_model_fn = student_model_fn
        self.input_module_path = input_module_path
        self.translator_params = translator_params

    def forward(self, *args):
        # Pure delegation — no compute owned by this module, so no Pallas kernel
        # (and no identity-copy HBM round-trip) is emitted here.
        return self.student_model_fn(*args)

    def post_forward(self, io_dict):
        hint = io_dict[self.input_module_path]["output"]
        return translator_forward(hint, self.translator_params)


if __name__ == "__main__":
    key = jax.random.PRNGKey(0)
    k_in, k_hint, k_p = jax.random.split(key, 3)

    N, C_IN, H, W = 2, 4, 16, 16   # NCHW activation-like shapes
    C_OUT = 2                      # factor channels (translator num_output_channels)

    params = init_translator_params(k_p, C_IN, C_OUT)
    student = Student4FactorTransfer(
        student_model_fn=lambda *a: a[0] if len(a) == 1 else a,  # placeholder student
        input_module_path="layer3",
        translator_params=params)

    x = jax.random.normal(k_in, (N, C_IN, H, W), jnp.float32)        # student input
    hint = jax.random.normal(k_hint, (N, C_IN, H, W), jnp.float32)   # hint activation

    # forward(): student-model delegation (pass-through placeholder here).
    y = student.forward(x)
    assert y.shape == x.shape and y.dtype == x.dtype

    # post_forward(): translator (the Pallas kernel) on the hint activation.
    factor = jax.block_until_ready(student.post_forward({"layer3": {"output": hint}}))
    assert factor.shape == (N, C_OUT, H, W) and factor.dtype == jnp.float32

    # Validate against the pure-JAX reference.
    ref = jax.block_until_ready(translator_reference(hint, params))
    max_err = float(jnp.max(jnp.abs(factor - ref)))
    assert max_err < 1e-3, f"translator mismatch: max abs err {max_err}"

    print("KERNEL_OK")
</pallas_src>

<mosaic_0001>
module attributes {stable_mosaic.version = 11 : i64} {
  func.func @kernel(%arg0: i32, %arg1: memref<1x368x4xf32, #tpu.memory_space<vmem>>, %arg2: memref<9x4x4xf32, #tpu.memory_space<vmem>>, %arg3: memref<1x4xf32, #tpu.memory_space<vmem>>, %arg4: memref<1x4xf32, #tpu.memory_space<vmem>>, %arg5: memref<9x4x2xf32, #tpu.memory_space<vmem>>, %arg6: memref<1x2xf32, #tpu.memory_space<vmem>>, %arg7: memref<1x2xf32, #tpu.memory_space<vmem>>, %arg8: memref<9x2x2xf32, #tpu.memory_space<vmem>>, %arg9: memref<1x2xf32, #tpu.memory_space<vmem>>, %arg10: memref<1x2xf32, #tpu.memory_space<vmem>>, %arg11: memref<328x1xf32, #tpu.memory_space<vmem>>, %arg12: memref<1x328x2xf32, #tpu.memory_space<vmem>>, %arg13: memref<368x4xf32, #tpu.memory_space<vmem>>, %arg14: memref<368x2xf32, #tpu.memory_space<vmem>>) attributes {dimension_semantics = [#tpu.dimension_semantics<parallel>], iteration_bounds = array<i64: 2>, scalar_prefetch = 0 : i64, scratch_operands = 2 : i64, tpu.core_type = #tpu.core_type<tc>, window_params = [{transform_indices = @transform_0, window_bounds = array<i64: 1, 368, 4>}, {pipeline_mode = #tpu.pipeline_mode<synchronous>, transform_indices = @transform_1, window_bounds = array<i64: 9, 4, 4>}, {pipeline_mode = #tpu.pipeline_mode<synchronous>, transform_indices = @transform_2, window_bounds = array<i64: 1, 4>}, {pipeline_mode = #tpu.pipeline_mode<synchronous>, transform_indices = @transform_3, window_bounds = array<i64: 1, 4>}, {pipeline_mode = #tpu.pipeline_mode<synchronous>, transform_indices = @transform_4, window_bounds = array<i64: 9, 4, 2>}, {pipeline_mode = #tpu.pipeline_mode<synchronous>, transform_indices = @transform_5, window_bounds = array<i64: 1, 2>}, {pipeline_mode = #tpu.pipeline_mode<synchronous>, transform_indices = @transform_6, window_bounds = array<i64: 1, 2>}, {pipeline_mode = #tpu.pipeline_mode<synchronous>, transform_indices = @transform_7, window_bounds = array<i64: 9, 2, 2>}, {pipeline_mode = #tpu.pipeline_mode<synchronous>, transform_indices = @transform_8, window_bounds = array<i64: 1, 2>}, {pipeline_mode = #tpu.pipeline_mode<synchronous>, transform_indices = @transform_9, window_bounds = array<i64: 1, 2>}, {pipeline_mode = #tpu.pipeline_mode<synchronous>, transform_indices = @transform_10, window_bounds = array<i64: 328, 1>}, {transform_indices = @transform_11, window_bounds = array<i64: 1, 328, 2>}]} {
    %cst = arith.constant 0.000000e+00 : f32
    %0 = vector.broadcast %cst : f32 to vector<368x4xf32>
    %c0 = arith.constant 0 : index
    %c0_0 = arith.constant 0 : index
    %1 = vector.load %arg13[%c0, %c0_0] : memref<368x4xf32, #tpu.memory_space<vmem>>, vector<368x4xf32>
    tpu.vector_store %arg13[%c0, %c0_0], %0 {strides = array<i32>} : memref<368x4xf32, #tpu.memory_space<vmem>>, vector<368x4xf32>,
    %cst_1 = arith.constant 0.000000e+00 : f32
    %2 = vector.broadcast %cst_1 : f32 to vector<368x2xf32>
    %c0_2 = arith.constant 0 : index
    %c0_3 = arith.constant 0 : index
    %3 = vector.load %arg14[%c0_2, %c0_3] : memref<368x2xf32, #tpu.memory_space<vmem>>, vector<368x2xf32>
    tpu.vector_store %arg14[%c0_2, %c0_3], %2 {strides = array<i32>} : memref<368x2xf32, #tpu.memory_space<vmem>>, vector<368x2xf32>,
    %cst_4 = arith.constant 0.000000e+00 : f32
    %4 = vector.broadcast %cst_4 : f32 to vector<328x4xf32>
    %c0_5 = arith.constant 0 : index
    %c0_6 = arith.constant 0 : index
    %c0_7 = arith.constant 0 : index
    %5 = vector.load %arg1[%c0_5, %c0_6, %c0_7] : memref<1x368x4xf32, #tpu.memory_space<vmem>>, vector<1x328x4xf32>
    %6 = vector.shape_cast %5 : vector<1x328x4xf32> to vector<328x4xf32>
    %c0_8 = arith.constant 0 : index
    %c0_9 = arith.constant 0 : index
    %c0_10 = arith.constant 0 : index
    %7 = vector.load %arg2[%c0_8, %c0_9, %c0_10] : memref<9x4x4xf32, #tpu.memory_space<vmem>>, vector<1x4x4xf32>
    %8 = vector.shape_cast %7 : vector<1x4x4xf32> to vector<4x4xf32>
    %cst_11 = arith.constant dense<0.000000e+00> : vector<328x4xf32>
    %9 = tpu.matmul %6, %8, %cst_11 {dimension_numbers = #tpu.dot_dimension_numbers<[1], [0], [0], [1], [0, 0, 1, 1], [], []>} : vector<328x4xf32>, vector<4x4xf32>, vector<328x4xf32> -> vector<328x4xf32>
    %10 = arith.addf %4, %9 : vector<328x4xf32>
    %c0_12 = arith.constant 0 : index
    %c1 = arith.constant 1 : index
    %c0_13 = arith.constant 0 : index
    %11 = vector.load %arg1[%c0_12, %c1, %c0_13] : memref<1x368x4xf32, #tpu.memory_space<vmem>>, vector<1x328x4xf32>
    %12 = vector.shape_cast %11 : vector<1x328x4xf32> to vector<328x4xf32>
    %c1_14 = arith.constant 1 : index
    %c0_15 = arith.constant 0 : index
    %c0_16 = arith.constant 0 : index
    %13 = vector.load %arg2[%c1_14, %c0_15, %c0_16] : memref<9x4x4xf32, #tpu.memory_space<vmem>>, vector<1x4x4xf32>
    %14 = vector.shape_cast %13 : vector<1x4x4xf32> to vector<4x4xf32>
    %cst_17 = arith.constant dense<0.000000e+00> : vector<328x4xf32>
    %15 = tpu.matmul %12, %14, %cst_17 {dimension_numbers = #tpu.dot_dimension_numbers<[1], [0], [0], [1], [0, 0, 1, 1], [], []>} : vector<328x4xf32>, vector<4x4xf32>, vector<328x4xf32> -> vector<328x4xf32>
    %16 = arith.addf %10, %15 : vector<328x4xf32>
    %c0_18 = arith.constant 0 : index
    %c2 = arith.constant 2 : index
    %c0_19 = arith.constant 0 : index
    %17 = vector.load %arg1[%c0_18, %c2, %c0_19] : memref<1x368x4xf32, #tpu.memory_space<vmem>>, vector<1x328x4xf32>
    %18 = vector.shape_cast %17 : vector<1x328x4xf32> to vector<328x4xf32>
    %c2_20 = arith.constant 2 : index
    %c0_21 = arith.constant 0 : index
    %c0_22 = arith.constant 0 : index
    %19 = vector.load %arg2[%c2_20, %c0_21, %c0_22] : memref<9x4x4xf32, #tpu.memory_space<vmem>>, vector<1x4x4xf32>
    %20 = vector.shape_cast %19 : vector<1x4x4xf32> to vector<4x4xf32>
    %cst_23 = arith.constant dense<0.000000e+00> : vector<328x4xf32>
    %21 = tpu.matmul %18, %20, %cst_23 {dimension_numbers = #tpu.dot_dimension_numbers<[1], [0], [0], [1], [0, 0, 1, 1], [], []>} : vector<328x4xf32>, vector<4x4xf32>, vector<328x4xf32> -> vector<328x4xf32>
    %22 = arith.addf %16, %21 : vector<328x4xf32>
    %c0_24 = arith.constant 0 : index
    %c18 = arith.constant 18 : index
    %c0_25 = arith.constant 0 : index
    %23 = vector.load %arg1[%c0_24, %c18, %c0_25] : memref<1x368x4xf32, #tpu.memory_space<vmem>>, vector<1x328x4xf32>
    %24 = vector.shape_cast %23 : vector<1x328x4xf32> to vector<328x4xf32>
    %c3 = arith.constant 3 : index
    %c0_26 = arith.constant 0 : index
    %c0_27 = arith.constant 0 : index
    %25 = vector.load %arg2[%c3, %c0_26, %c0_27] : memref<9x4x4xf32, #tpu.memory_space<vmem>>, vector<1x4x4xf32>
    %26 = vector.shape_cast %25 : vector<1x4x4xf32> to vector<4x4xf32>
    %cst_28 = arith.constant dense<0.000000e+00> : vector<328x4xf32>
    %27 = tpu.matmul %24, %26, %cst_28 {dimension_numbers = #tpu.dot_dimension_numbers<[1], [0], [0], [1], [0, 0, 1, 1], [], []>} : vector<328x4xf32>, vector<4x4xf32>, vector<328x4xf32> -> vector<328x4xf32>
    %28 = arith.addf %22, %27 : vector<328x4xf32>
    %c0_29 = arith.constant 0 : index
    %c19 = arith.constant 19 : index
    %c0_30 = arith.constant 0 : index
    %29 = vector.load %arg1[%c0_29, %c19, %c0_30] : memref<1x368x4xf32, #tpu.memory_space<vmem>>, vector<1x328x4xf32>
    %30 = vector.shape_cast %29 : vector<1x328x4xf32> to vector<328x4xf32>
    %c4 = arith.constant 4 : index
    %c0_31 = arith.constant 0 : index
    %c0_32 = arith.constant 0 : index
    %31 = vector.load %arg2[%c4, %c0_31, %c0_32] : memref<9x4x4xf32, #tpu.memory_space<vmem>>, vector<1x4x4xf32>
    %32 = vector.shape_cast %31 : vector<1x4x4xf32> to vector<4x4xf32>
    %cst_33 = arith.constant dense<0.000000e+00> : vector<328x4xf32>
    %33 = tpu.matmul %30, %32, %cst_33 {dimension_numbers = #tpu.dot_dimension_numbers<[1], [0], [0], [1], [0, 0, 1, 1], [], []>} : vector<328x4xf32>, vector<4x4xf32>, vector<328x4xf32> -> vector<328x4xf32>
    %34 = arith.addf %28, %33 : vector<328x4xf32>
    %c0_34 = arith.constant 0 : index
    %c20 = arith.constant 20 : index
    %c0_35 = arith.constant 0 : index
    %35 = vector.load %arg1[%c0_34, %c20, %c0_35] : memref<1x368x4xf32, #tpu.memory_space<vmem>>, vector<1x328x4xf32>
    %36 = vector.shape_cast %35 : vector<1x328x4xf32> to vector<328x4xf32>
    %c5 = arith.constant 5 : index
    %c0_36 = arith.constant 0 : index
    %c0_37 = arith.constant 0 : index
    %37 = vector.load %arg2[%c5, %c0_36, %c0_37] : memref<9x4x4xf32, #tpu.memory_space<vmem>>, vector<1x4x4xf32>
    %38 = vector.shape_cast %37 : vector<1x4x4xf32> to vector<4x4xf32>
    %cst_38 = arith.constant dense<0.000000e+00> : vector<328x4xf32>
    %39 = tpu.matmul %36, %38, %cst_38 {dimension_numbers = #tpu.dot_dimension_numbers<[1], [0], [0], [1], [0, 0, 1, 1], [], []>} : vector<328x4xf32>, vector<4x4xf32>, vector<328x4xf32> -> vector<328x4xf32>
    %40 = arith.addf %34, %39 : vector<328x4xf32>
    %c0_39 = arith.constant 0 : index
    %c36 = arith.constant 36 : index
    %c0_40 = arith.constant 0 : index
    %41 = vector.load %arg1[%c0_39, %c36, %c0_40] : memref<1x368x4xf32, #tpu.memory_space<vmem>>, vector<1x328x4xf32>
    %42 = vector.shape_cast %41 : vector<1x328x4xf32> to vector<328x4xf32>
    %c6 = arith.constant 6 : index
    %c0_41 = arith.constant 0 : index
    %c0_42 = arith.constant 0 : index
    %43 = vector.load %arg2[%c6, %c0_41, %c0_42] : memref<9x4x4xf32, #tpu.memory_space<vmem>>, vector<1x4x4xf32>
    %44 = vector.shape_cast %43 : vector<1x4x4xf32> to vector<4x4xf32>
    %cst_43 = arith.constant dense<0.000000e+00> : vector<328x4xf32>
    %45 = tpu.matmul %42, %44, %cst_43 {dimension_numbers = #tpu.dot_dimension_numbers<[1], [0], [0], [1], [0, 0, 1, 1], [], []>} : vector<328x4xf32>, vector<4x4xf32>, vector<328x4xf32> -> vector<328x4xf32>
    %46 = arith.addf %40, %45 : vector<328x4xf32>
    %c0_44 = arith.constant 0 : index
    %c37 = arith.constant 37 : index
    %c0_45 = arith.constant 0 : index
    %47 = vector.load %arg1[%c0_44, %c37, %c0_45] : memref<1x368x4xf32, #tpu.memory_space<vmem>>, vector<1x328x4xf32>
    %48 = vector.shape_cast %47 : vector<1x328x4xf32> to vector<328x4xf32>
    %c7 = arith.constant 7 : index
    %c0_46 = arith.constant 0 : index
    %c0_47 = arith.constant 0 : index
    %49 = vector.load %arg2[%c7, %c0_46, %c0_47] : memref<9x4x4xf32, #tpu.memory_space<vmem>>, vector<1x4x4xf32>
    %50 = vector.shape_cast %49 : vector<1x4x4xf32> to vector<4x4xf32>
    %cst_48 = arith.constant dense<0.000000e+00> : vector<328x4xf32>
    %51 = tpu.matmul %48, %50, %cst_48 {dimension_numbers = #tpu.dot_dimension_numbers<[1], [0], [0], [1], [0, 0, 1, 1], [], []>} : vector<328x4xf32>, vector<4x4xf32>, vector<328x4xf32> -> vector<328x4xf32>
    %52 = arith.addf %46, %51 : vector<328x4xf32>
    %c0_49 = arith.constant 0 : index
    %c38 = arith.constant 38 : index
    %c0_50 = arith.constant 0 : index
    %53 = vector.load %arg1[%c0_49, %c38, %c0_50] : memref<1x368x4xf32, #tpu.memory_space<vmem>>, vector<1x328x4xf32>
    %54 = vector.shape_cast %53 : vector<1x328x4xf32> to vector<328x4xf32>
    %c8 = arith.constant 8 : index
    %c0_51 = arith.constant 0 : index
    %c0_52 = arith.constant 0 : index
    %55 = vector.load %arg2[%c8, %c0_51, %c0_52] : memref<9x4x4xf32, #tpu.memory_space<vmem>>, vector<1x4x4xf32>
    %56 = vector.shape_cast %55 : vector<1x4x4xf32> to vector<4x4xf32>
    %cst_53 = arith.constant dense<0.000000e+00> : vector<328x4xf32>
    %57 = tpu.matmul %54, %56, %cst_53 {dimension_numbers = #tpu.dot_dimension_numbers<[1], [0], [0], [1], [0, 0, 1, 1], [], []>} : vector<328x4xf32>, vector<4x4xf32>, vector<328x4xf32> -> vector<328x4xf32>
    %58 = arith.addf %52, %57 : vector<328x4xf32>
    %c0_54 = arith.constant 0 : index
    %c0_55 = arith.constant 0 : index
    %59 = vector.load %arg3[%c0_54, %c0_55] : memref<1x4xf32, #tpu.memory_space<vmem>>, vector<1x4xf32>
    %60 = vector.broadcast %59 : vector<1x4xf32> to vector<328x4xf32>
    %61 = arith.mulf %58, %60 : vector<328x4xf32>
    %c0_56 = arith.constant 0 : index
    %c0_57 = arith.constant 0 : index
    %62 = vector.load %arg4[%c0_56, %c0_57] : memref<1x4xf32, #tpu.memory_space<vmem>>, vector<1x4xf32>
    %63 = vector.broadcast %62 : vector<1x4xf32> to vector<328x4xf32>
    %64 = arith.addf %61, %63 : vector<328x4xf32>
    %cst_58 = arith.constant 0.000000e+00 : f32
    %65 = vector.broadcast %cst_58 : f32 to vector<328x4xf32>
    %66 = arith.cmpf oge, %64, %65 : vector<328x4xf32>
    %cst_59 = arith.constant 1.000000e-01 : f32
    %67 = vector.broadcast %cst_59 : f32 to vector<328x4xf32>
    %68 = arith.mulf %67, %64 : vector<328x4xf32>
    %69 = arith.select %66, %64, %68 : vector<328x4xi1>, vector<328x4xf32>
    %c0_60 = arith.constant 0 : index
    %c0_61 = arith.constant 0 : index
    %70 = vector.load %arg11[%c0_60, %c0_61] : memref<328x1xf32, #tpu.memory_space<vmem>>, vector<328x1xf32>
    %71 = vector.broadcast %70 : vector<328x1xf32> to vector<328x4xf32>
    %72 = arith.mulf %69, %71 : vector<328x4xf32>
    %c19_62 = arith.constant 19 : index
    %c0_63 = arith.constant 0 : index
    %73 = vector.load %arg13[%c19_62, %c0_63] : memref<368x4xf32, #tpu.memory_space<vmem>>, vector<328x4xf32>
    tpu.vector_store %arg13[%c19_62, %c0_63], %72 {strides = array<i32>} : memref<368x4xf32, #tpu.memory_space<vmem>>, vector<328x4xf32>,
    %cst_64 = arith.constant 0.000000e+00 : f32
    %74 = vector.broadcast %cst_64 : f32 to vector<328x2xf32>
    %c0_65 = arith.constant 0 : index
    %c0_66 = arith.constant 0 : index
    %75 = vector.load %arg13[%c0_65, %c0_66] : memref<368x4xf32, #tpu.memory_space<vmem>>, vector<328x4xf32>
    %c0_67 = arith.constant 0 : index
    %c0_68 = arith.constant 0 : index
    %c0_69 = arith.constant 0 : index
    %76 = vector.load %arg5[%c0_67, %c0_68, %c0_69] : memref<9x4x2xf32, #tpu.memory_space<vmem>>, vector<1x4x2xf32>
    %77 = vector.shape_cast %76 : vector<1x4x2xf32> to vector<4x2xf32>
    %cst_70 = arith.constant dense<0.000000e+00> : vector<328x2xf32>
    %78 = tpu.matmul %75, %77, %cst_70 {dimension_numbers = #tpu.dot_dimension_numbers<[1], [0], [0], [1], [0, 0, 1, 1], [], []>} : vector<328x4xf32>, vector<4x2xf32>, vector<328x2xf32> -> vector<328x2xf32>
    %79 = arith.addf %74, %78 : vector<328x2xf32>
    %c1_71 = arith.constant 1 : index
    %c0_72 = arith.constant 0 : index
    %80 = vector.load %arg13[%c1_71, %c0_72] : memref<368x4xf32, #tpu.memory_space<vmem>>, vector<328x4xf32>
    %c1_73 = arith.constant 1 : index
    %c0_74 = arith.constant 0 : index
    %c0_75 = arith.constant 0 : index
    %81 = vector.load %arg5[%c1_73, %c0_74, %c0_75] : memref<9x4x2xf32, #tpu.memory_space<vmem>>, vector<1x4x2xf32>
    %82 = vector.shape_cast %81 : vector<1x4x2xf32> to vector<4x2xf32>
    %cst_76 = arith.constant dense<0.000000e+00> : vector<328x2xf32>
    %83 = tpu.matmul %80, %82, %cst_76 {dimension_numbers = #tpu.dot_dimension_numbers<[1], [0], [0], [1], [0, 0, 1, 1], [], []>} : vector<328x4xf32>, vector<4x2xf32>, vector<328x2xf32> -> vector<328x2xf32>
    %84 = arith.addf %79, %83 : vector<328x2xf32>
    %c2_77 = arith.constant 2 : index
    %c0_78 = arith.constant 0 : index
    %85 = vector.load %arg13[%c2_77, %c0_78] : memref<368x4xf32, #tpu.memory_space<vmem>>, vector<328x4xf32>
    %c2_79 = arith.constant 2 : index
    %c0_80 = arith.constant 0 : index
    %c0_81 = arith.constant 0 : index
    %86 = vector.load %arg5[%c2_79, %c0_80, %c0_81] : memref<9x4x2xf32, #tpu.memory_space<vmem>>, vector<1x4x2xf32>
    %87 = vector.shape_cast %86 : vector<1x4x2xf32> to vector<4x2xf32>
    %cst_82 = arith.constant dense<0.000000e+00> : vector<328x2xf32>
    %88 = tpu.matmul %85, %87, %cst_82 {dimension_numbers = #tpu.dot_dimension_numbers<[1], [0], [0], [1], [0, 0, 1, 1], [], []>} : vector<328x4xf32>, vector<4x2xf32>, vector<328x2xf32> -> vector<328x2xf32>
    %89 = arith.addf %84, %88 : vector<328x2xf32>
    %c18_83 = arith.constant 18 : index
    %c0_84 = arith.constant 0 : index
    %90 = vector.load %arg13[%c18_83, %c0_84] : memref<368x4xf32, #tpu.memory_space<vmem>>, vector<328x4xf32>
    %c3_85 = arith.constant 3 : index
    %c0_86 = arith.constant 0 : index
    %c0_87 = arith.constant 0 : index
    %91 = vector.load %arg5[%c3_85, %c0_86, %c0_87] : memref<9x4x2xf32, #tpu.memory_space<vmem>>, vector<1x4x2xf32>
    %92 = vector.shape_cast %91 : vector<1x4x2xf32> to vector<4x2xf32>
    %cst_88 = arith.constant dense<0.000000e+00> : vector<328x2xf32>
    %93 = tpu.matmul %90, %92, %cst_88 {dimension_numbers = #tpu.dot_dimension_numbers<[1], [0], [0], [1], [0, 0, 1, 1], [], []>} : vector<328x4xf32>, vector<4x2xf32>, vector<328x2xf32> -> vector<328x2xf32>
    %94 = arith.addf %89, %93 : vector<328x2xf32>
    %c19_89 = arith.constant 19 : index
    %c0_90 = arith.constant 0 : index
    %95 = vector.load %arg13[%c19_89, %c0_90] : memref<368x4xf32, #tpu.memory_space<vmem>>, vector<328x4xf32>
    %c4_91 = arith.constant 4 : index
    %c0_92 = arith.constant 0 : index
    %c0_93 = arith.constant 0 : index
    %96 = vector.load %arg5[%c4_91, %c0_92, %c0_93] : memref<9x4x2xf32, #tpu.memory_space<vmem>>, vector<1x4x2xf32>
    %97 = vector.shape_cast %96 : vector<1x4x2xf32> to vector<4x2xf32>
    %cst_94 = arith.constant dense<0.000000e+00> : vector<328x2xf32>
    %98 = tpu.matmul %95, %97, %cst_94 {dimension_numbers = #tpu.dot_dimension_numbers<[1], [0], [0], [1], [0, 0, 1, 1], [], []>} : vector<328x4xf32>, vector<4x2xf32>, vector<328x2xf32> -> vector<328x2xf32>
    %99 = arith.addf %94, %98 : vector<328x2xf32>
    %c20_95 = arith.constant 20 : index
    %c0_96 = arith.constant 0 : index
    %100 = vector.load %arg13[%c20_95, %c0_96] : memref<368x4xf32, #tpu.memory_space<vmem>>, vector<328x4xf32>
    %c5_97 = arith.constant 5 : index
    %c0_98 = arith.constant 0 : index
    %c0_99 = arith.constant 0 : index
    %101 = vector.load %arg5[%c5_97, %c0_98, %c0_99] : memref<9x4x2xf32, #tpu.memory_space<vmem>>, vector<1x4x2xf32>
    %102 = vector.shape_cast %101 : vector<1x4x2xf32> to vector<4x2xf32>
    %cst_100 = arith.constant dense<0.000000e+00> : vector<328x2xf32>
    %103 = tpu.matmul %100, %102, %cst_100 {dimension_numbers = #tpu.dot_dimension_numbers<[1], [0], [0], [1], [0, 0, 1, 1], [], []>} : vector<328x4xf32>, vector<4x2xf32>, vector<328x2xf32> -> vector<328x2xf32>
    %104 = arith.addf %99, %103 : vector<328x2xf32>
    %c36_101 = arith.constant 36 : index
    %c0_102 = arith.constant 0 : index
    %105 = vector.load %arg13[%c36_101, %c0_102] : memref<368x4xf32, #tpu.memory_space<vmem>>, vector<328x4xf32>
    %c6_103 = arith.constant 6 : index
    %c0_104 = arith.constant 0 : index
    %c0_105 = arith.constant 0 : index
    %106 = vector.load %arg5[%c6_103, %c0_104, %c0_105] : memref<9x4x2xf32, #tpu.memory_space<vmem>>, vector<1x4x2xf32>
    %107 = vector.shape_cast %106 : vector<1x4x2xf32> to vector<4x2xf32>
    %cst_106 = arith.constant dense<0.000000e+00> : vector<328x2xf32>
    %108 = tpu.matmul %105, %107, %cst_106 {dimension_numbers = #tpu.dot_dimension_numbers<[1], [0], [0], [1], [0, 0, 1, 1], [], []>} : vector<328x4xf32>, vector<4x2xf32>, vector<328x2xf32> -> vector<328x2xf32>
    %109 = arith.addf %104, %108 : vector<328x2xf32>
    %c37_107 = arith.constant 37 : index
    %c0_108 = arith.constant 0 : index
    %110 = vector.load %arg13[%c37_107, %c0_108] : memref<368x4xf32, #tpu.memory_space<vmem>>, vector<328x4xf32>
    %c7_109 = arith.constant 7 : index
    %c0_110 = arith.constant 0 : index
    %c0_111 = arith.constant 0 : index
    %111 = vector.load %arg5[%c7_109, %c0_110, %c0_111] : memref<9x4x2xf32, #tpu.memory_space<vmem>>, vector<1x4x2xf32>
    %112 = vector.shape_cast %111 : vector<1x4x2xf32> to vector<4x2xf32>
    %cst_112 = arith.constant dense<0.000000e+00> : vector<328x2xf32>
    %113 = tpu.matmul %110, %112, %cst_112 {dimension_numbers = #tpu.dot_dimension_numbers<[1], [0], [0], [1], [0, 0, 1, 1], [], []>} : vector<328x4xf32>, vector<4x2xf32>, vector<328x2xf32> -> vector<328x2xf32>
    %114 = arith.addf %109, %113 : vector<328x2xf32>
    %c38_113 = arith.constant 38 : index
    %c0_114 = arith.constant 0 : index
    %115 = vector.load %arg13[%c38_113, %c0_114] : memref<368x4xf32, #tpu.memory_space<vmem>>, vector<328x4xf32>
    %c8_115 = arith.constant 8 : index
    %c0_116 = arith.constant 0 : index
    %c0_117 = arith.constant 0 : index
    %116 = vector.load %arg5[%c8_115, %c0_116, %c0_117] : memref<9x4x2xf32, #tpu.memory_space<vmem>>, vector<1x4x2xf32>
    %117 = vector.shape_cast %116 : vector<1x4x2xf32> to vector<4x2xf32>
    %cst_118 = arith.constant dense<0.000000e+00> : vector<328x2xf32>
    %118 = tpu.matmul %115, %117, %cst_118 {dimension_numbers = #tpu.dot_dimension_numbers<[1], [0], [0], [1], [0, 0, 1, 1], [], []>} : vector<328x4xf32>, vector<4x2xf32>, vector<328x2xf32> -> vector<328x2xf32>
    %119 = arith.addf %114, %118 : vector<328x2xf32>
    %c0_119 = arith.constant 0 : index
    %c0_120 = arith.constant 0 : index
    %120 = vector.load %arg6[%c0_119, %c0_120] : memref<1x2xf32, #tpu.memory_space<vmem>>, vector<1x2xf32>
    %121 = vector.broadcast %120 : vector<1x2xf32> to vector<328x2xf32>
    %122 = arith.mulf %119, %121 : vector<328x2xf32>
    %c0_121 = arith.constant 0 : index
    %c0_122 = arith.constant 0 : index
    %123 = vector.load %arg7[%c0_121, %c0_122] : memref<1x2xf32, #tpu.memory_space<vmem>>, vector<1x2xf32>
    %124 = vector.broadcast %123 : vector<1x2xf32> to vector<328x2xf32>
    %125 = arith.addf %122, %124 : vector<328x2xf32>
    %cst_123 = arith.constant 0.000000e+00 : f32
    %126 = vector.broadcast %cst_123 : f32 to vector<328x2xf32>
    %127 = arith.cmpf oge, %125, %126 : vector<328x2xf32>
    %cst_124 = arith.constant 1.000000e-01 : f32
    %128 = vector.broadcast %cst_124 : f32 to vector<328x2xf32>
    %129 = arith.mulf %128, %125 : vector<328x2xf32>
    %130 = arith.select %127, %125, %129 : vector<328x2xi1>, vector<328x2xf32>
    %c0_125 = arith.constant 0 : index
    %c0_126 = arith.constant 0 : index
    %131 = vector.load %arg11[%c0_125, %c0_126] : memref<328x1xf32, #tpu.memory_space<vmem>>, vector<328x1xf32>
    %132 = vector.broadcast %131 : vector<328x1xf32> to vector<328x2xf32>
    %133 = arith.mulf %130, %132 : vector<328x2xf32>
    %c19_127 = arith.constant 19 : index
    %c0_128 = arith.constant 0 : index
    %134 = vector.load %arg14[%c19_127, %c0_128] : memref<368x2xf32, #tpu.memory_space<vmem>>, vector<328x2xf32>
    tpu.vector_store %arg14[%c19_127, %c0_128], %133 {strides = array<i32>} : memref<368x2xf32, #tpu.memory_space<vmem>>, vector<328x2xf32>,
    %cst_129 = arith.constant 0.000000e+00 : f32
    %135 = vector.broadcast %cst_129 : f32 to vector<328x2xf32>
    %c0_130 = arith.constant 0 : index
    %c0_131 = arith.constant 0 : index
    %136 = vector.load %arg14[%c0_130, %c0_131] : memref<368x2xf32, #tpu.memory_space<vmem>>, vector<328x2xf32>
    %c0_132 = arith.constant 0 : index
    %c0_133 = arith.constant 0 : index
    %c0_134 = arith.constant 0 : index
    %137 = vector.load %arg8[%c0_132, %c0_133, %c0_134] : memref<9x2x2xf32, #tpu.memory_space<vmem>>, vector<1x2x2xf32>
    %138 = vector.shape_cast %137 : vector<1x2x2xf32> to vector<2x2xf32>
    %cst_135 = arith.constant dense<0.000000e+00> : vector<328x2xf32>
    %139 = tpu.matmul %136, %138, %cst_135 {dimension_numbers = #tpu.dot_dimension_numbers<[1], [0], [0], [1], [0, 0, 1, 1], [], []>} : vector<328x2xf32>, vector<2x2xf32>, vector<328x2xf32> -> vector<328x2xf32>
    %140 = arith.addf %135, %139 : vector<328x2xf32>
    %c1_136 = arith.constant 1 : index
    %c0_137 = arith.constant 0 : index
    %141 = vector.load %arg14[%c1_136, %c0_137] : memref<368x2xf32, #tpu.memory_space<vmem>>, vector<328x2xf32>
    %c1_138 = arith.constant 1 : index
    %c0_139 = arith.constant 0 : index
    %c0_140 = arith.constant 0 : index
    %142 = vector.load %arg8[%c1_138, %c0_139, %c0_140] : memref<9x2x2xf32, #tpu.memory_space<vmem>>, vector<1x2x2xf32>
    %143 = vector.shape_cast %142 : vector<1x2x2xf32> to vector<2x2xf32>
    %cst_141 = arith.constant dense<0.000000e+00> : vector<328x2xf32>
    %144 = tpu.matmul %141, %143, %cst_141 {dimension_numbers = #tpu.dot_dimension_numbers<[1], [0], [0], [1], [0, 0, 1, 1], [], []>} : vector<328x2xf32>, vector<2x2xf32>, vector<328x2xf32> -> vector<328x2xf32>
    %145 = arith.addf %140, %144 : vector<328x2xf32>
    %c2_142 = arith.constant 2 : index
    %c0_143 = arith.constant 0 : index
    %146 = vector.load %arg14[%c2_142, %c0_143] : memref<368x2xf32, #tpu.memory_space<vmem>>, vector<328x2xf32>
    %c2_144 = arith.constant 2 : index
    %c0_145 = arith.constant 0 : index
    %c0_146 = arith.constant 0 : index
    %147 = vector.load %arg8[%c2_144, %c0_145, %c0_146] : memref<9x2x2xf32, #tpu.memory_space<vmem>>, vector<1x2x2xf32>
    %148 = vector.shape_cast %147 : vector<1x2x2xf32> to vector<2x2xf32>
    %cst_147 = arith.constant dense<0.000000e+00> : vector<328x2xf32>
    %149 = tpu.matmul %146, %148, %cst_147 {dimension_numbers = #tpu.dot_dimension_numbers<[1], [0], [0], [1], [0, 0, 1, 1], [], []>} : vector<328x2xf32>, vector<2x2xf32>, vector<328x2xf32> -> vector<328x2xf32>
    %150 = arith.addf %145, %149 : vector<328x2xf32>
    %c18_148 = arith.constant 18 : index
    %c0_149 = arith.constant 0 : index
    %151 = vector.load %arg14[%c18_148, %c0_149] : memref<368x2xf32, #tpu.memory_space<vmem>>, vector<328x2xf32>
    %c3_150 = arith.constant 3 : index
    %c0_151 = arith.constant 0 : index
    %c0_152 = arith.constant 0 : index
    %152 = vector.load %arg8[%c3_150, %c0_151, %c0_152] : memref<9x2x2xf32, #tpu.memory_space<vmem>>, vector<1x2x2xf32>
    %153 = vector.shape_cast %152 : vector<1x2x2xf32> to vector<2x2xf32>
    %cst_153 = arith.constant dense<0.000000e+00> : vector<328x2xf32>
    %154 = tpu.matmul %151, %153, %cst_153 {dimension_numbers = #tpu.dot_dimension_numbers<[1], [0], [0], [1], [0, 0, 1, 1], [], []>} : vector<328x2xf32>, vector<2x2xf32>, vector<328x2xf32> -> vector<328x2xf32>
    %155 = arith.addf %150, %154 : vector<328x2xf32>
    %c19_154 = arith.constant 19 : index
    %c0_155 = arith.constant 0 : index
    %156 = vector.load %arg14[%c19_154, %c0_155] : memref<368x2xf32, #tpu.memory_space<vmem>>, vector<328x2xf32>
    %c4_156 = arith.constant 4 : index
    %c0_157 = arith.constant 0 : index
    %c0_158 = arith.constant 0 : index
    %157 = vector.load %arg8[%c4_156, %c0_157, %c0_158] : memref<9x2x2xf32, #tpu.memory_space<vmem>>, vector<1x2x2xf32>
    %158 = vector.shape_cast %157 : vector<1x2x2xf32> to vector<2x2xf32>
    %cst_159 = arith.constant dense<0.000000e+00> : vector<328x2xf32>
    %159 = tpu.matmul %156, %158, %cst_159 {dimension_numbers = #tpu.dot_dimension_numbers<[1], [0], [0], [1], [0, 0, 1, 1], [], []>} : vector<328x2xf32>, vector<2x2xf32>, vector<328x2xf32> -> vector<328x2xf32>
    %160 = arith.addf %155, %159 : vector<328x2xf32>
    %c20_160 = arith.constant 20 : index
    %c0_161 = arith.constant 0 : index
    %161 = vector.load %arg14[%c20_160, %c0_161] : memref<368x2xf32, #tpu.memory_space<vmem>>, vector<328x2xf32>
    %c5_162 = arith.constant 5 : index
    %c0_163 = arith.constant 0 : index
    %c0_164 = arith.constant 0 : index
    %162 = vector.load %arg8[%c5_162, %c0_163, %c0_164] : memref<9x2x2xf32, #tpu.memory_space<vmem>>, vector<1x2x2xf32>
    %163 = vector.shape_cast %162 : vector<1x2x2xf32> to vector<2x2xf32>
    %cst_165 = arith.constant dense<0.000000e+00> : vector<328x2xf32>
    %164 = tpu.matmul %161, %163, %cst_165 {dimension_numbers = #tpu.dot_dimension_numbers<[1], [0], [0], [1], [0, 0, 1, 1], [], []>} : vector<328x2xf32>, vector<2x2xf32>, vector<328x2xf32> -> vector<328x2xf32>
    %165 = arith.addf %160, %164 : vector<328x2xf32>
    %c36_166 = arith.constant 36 : index
    %c0_167 = arith.constant 0 : index
    %166 = vector.load %arg14[%c36_166, %c0_167] : memref<368x2xf32, #tpu.memory_space<vmem>>, vector<328x2xf32>
    %c6_168 = arith.constant 6 : index
    %c0_169 = arith.constant 0 : index
    %c0_170 = arith.constant 0 : index
    %167 = vector.load %arg8[%c6_168, %c0_169, %c0_170] : memref<9x2x2xf32, #tpu.memory_space<vmem>>, vector<1x2x2xf32>
    %168 = vector.shape_cast %167 : vector<1x2x2xf32> to vector<2x2xf32>
    %cst_171 = arith.constant dense<0.000000e+00> : vector<328x2xf32>
    %169 = tpu.matmul %166, %168, %cst_171 {dimension_numbers = #tpu.dot_dimension_numbers<[1], [0], [0], [1], [0, 0, 1, 1], [], []>} : vector<328x2xf32>, vector<2x2xf32>, vector<328x2xf32> -> vector<328x2xf32>
    %170 = arith.addf %165, %169 : vector<328x2xf32>
    %c37_172 = arith.constant 37 : index
    %c0_173 = arith.constant 0 : index
    %171 = vector.load %arg14[%c37_172, %c0_173] : memref<368x2xf32, #tpu.memory_space<vmem>>, vector<328x2xf32>
    %c7_174 = arith.constant 7 : index
    %c0_175 = arith.constant 0 : index
    %c0_176 = arith.constant 0 : index
    %172 = vector.load %arg8[%c7_174, %c0_175, %c0_176] : memref<9x2x2xf32, #tpu.memory_space<vmem>>, vector<1x2x2xf32>
    %173 = vector.shape_cast %172 : vector<1x2x2xf32> to vector<2x2xf32>
    %cst_177 = arith.constant dense<0.000000e+00> : vector<328x2xf32>
    %174 = tpu.matmul %171, %173, %cst_177 {dimension_numbers = #tpu.dot_dimension_numbers<[1], [0], [0], [1], [0, 0, 1, 1], [], []>} : vector<328x2xf32>, vector<2x2xf32>, vector<328x2xf32> -> vector<328x2xf32>
    %175 = arith.addf %170, %174 : vector<328x2xf32>
    %c38_178 = arith.constant 38 : index
    %c0_179 = arith.constant 0 : index
    %176 = vector.load %arg14[%c38_178, %c0_179] : memref<368x2xf32, #tpu.memory_space<vmem>>, vector<328x2xf32>
    %c8_180 = arith.constant 8 : index
    %c0_181 = arith.constant 0 : index
    %c0_182 = arith.constant 0 : index
    %177 = vector.load %arg8[%c8_180, %c0_181, %c0_182] : memref<9x2x2xf32, #tpu.memory_space<vmem>>, vector<1x2x2xf32>
    %178 = vector.shape_cast %177 : vector<1x2x2xf32> to vector<2x2xf32>
    %cst_183 = arith.constant dense<0.000000e+00> : vector<328x2xf32>
    %179 = tpu.matmul %176, %178, %cst_183 {dimension_numbers = #tpu.dot_dimension_numbers<[1], [0], [0], [1], [0, 0, 1, 1], [], []>} : vector<328x2xf32>, vector<2x2xf32>, vector<328x2xf32> -> vector<328x2xf32>
    %180 = arith.addf %175, %179 : vector<328x2xf32>
    %c0_184 = arith.constant 0 : index
    %c0_185 = arith.constant 0 : index
    %181 = vector.load %arg9[%c0_184, %c0_185] : memref<1x2xf32, #tpu.memory_space<vmem>>, vector<1x2xf32>
    %182 = vector.broadcast %181 : vector<1x2xf32> to vector<328x2xf32>
    %183 = arith.mulf %180, %182 : vector<328x2xf32>
    %c0_186 = arith.constant 0 : index
    %c0_187 = arith.constant 0 : index
    %184 = vector.load %arg10[%c0_186, %c0_187] : memref<1x2xf32, #tpu.memory_space<vmem>>, vector<1x2xf32>
    %185 = vector.broadcast %184 : vector<1x2xf32> to vector<328x2xf32>
    %186 = arith.addf %183, %185 : vector<328x2xf32>
    %cst_188 = arith.constant 0.000000e+00 : f32
    %187 = vector.broadcast %cst_188 : f32 to vector<328x2xf32>
    %188 = arith.cmpf oge, %186, %187 : vector<328x2xf32>
    %cst_189 = arith.constant 1.000000e-01 : f32
    %189 = vector.broadcast %cst_189 : f32 to vector<328x2xf32>
    %190 = arith.mulf %189, %186 : vector<328x2xf32>
    %191 = arith.select %188, %186, %190 : vector<328x2xi1>, vector<328x2xf32>
    %c0_190 = arith.constant 0 : index
    %c0_191 = arith.constant 0 : index
    %192 = vector.load %arg11[%c0_190, %c0_191] : memref<328x1xf32, #tpu.memory_space<vmem>>, vector<328x1xf32>
    %193 = vector.broadcast %192 : vector<328x1xf32> to vector<328x2xf32>
    %194 = arith.mulf %191, %193 : vector<328x2xf32>
    %c0_192 = arith.constant 0 : index
    %c0_193 = arith.constant 0 : index
    %c0_194 = arith.constant 0 : index
    %195 = vector.load %arg12[%c0_192, %c0_193, %c0_194] : memref<1x328x2xf32, #tpu.memory_space<vmem>>, vector<1x328x2xf32>
    %196 = vector.shape_cast %195 : vector<1x328x2xf32> to vector<328x2xf32>
    %197 = vector.shape_cast %194 : vector<328x2xf32> to vector<1x328x2xf32>
    tpu.vector_store %arg12[%c0_192, %c0_193, %c0_194], %197 {strides = array<i32>} : memref<1x328x2xf32, #tpu.memory_space<vmem>>, vector<1x328x2xf32>,
    return
  }
  func.func @transform_0(%arg0: i32) -> (i32, i32, i32) {
    %c0_i32 = arith.constant 0 : i32
    %c0_i32_0 = arith.constant 0 : i32
    %c0_i32_1 = arith.constant 0 : i32
    return %arg0, %c0_i32, %c0_i32_0 : i32, i32, i32
  }
  func.func @transform_1(%arg0: i32) -> (i32, i32, i32) {
    %c0_i32 = arith.constant 0 : i32
    %c0_i32_0 = arith.constant 0 : i32
    %c0_i32_1 = arith.constant 0 : i32
    %c0_i32_2 = arith.constant 0 : i32
    return %c0_i32, %c0_i32_0, %c0_i32_1 : i32, i32, i32
  }
  func.func @transform_2(%arg0: i32) -> (i32, i32) {
    %c0_i32 = arith.constant 0 : i32
    %c0_i32_0 = arith.constant 0 : i32
    %c0_i32_1 = arith.constant 0 : i32
    return %c0_i32, %c0_i32_0 : i32, i32
  }
  func.func @transform_3(%arg0: i32) -> (i32, i32) {
    %c0_i32 = arith.constant 0 : i32
    %c0_i32_0 = arith.constant 0 : i32
    %c0_i32_1 = arith.constant 0 : i32
    return %c0_i32, %c0_i32_0 : i32, i32
  }
  func.func @transform_4(%arg0: i32) -> (i32, i32, i32) {
    %c0_i32 = arith.constant 0 : i32
    %c0_i32_0 = arith.constant 0 : i32
    %c0_i32_1 = arith.constant 0 : i32
    %c0_i32_2 = arith.constant 0 : i32
    return %c0_i32, %c0_i32_0, %c0_i32_1 : i32, i32, i32
  }
  func.func @transform_5(%arg0: i32) -> (i32, i32) {
    %c0_i32 = arith.constant 0 : i32
    %c0_i32_0 = arith.constant 0 : i32
    %c0_i32_1 = arith.constant 0 : i32
    return %c0_i32, %c0_i32_0 : i32, i32
  }
  func.func @transform_6(%arg0: i32) -> (i32, i32) {
    %c0_i32 = arith.constant 0 : i32
    %c0_i32_0 = arith.constant 0 : i32
    %c0_i32_1 = arith.constant 0 : i32
    return %c0_i32, %c0_i32_0 : i32, i32
  }
  func.func @transform_7(%arg0: i32) -> (i32, i32, i32) {
    %c0_i32 = arith.constant 0 : i32
    %c0_i32_0 = arith.constant 0 : i32
    %c0_i32_1 = arith.constant 0 : i32
    %c0_i32_2 = arith.constant 0 : i32
    return %c0_i32, %c0_i32_0, %c0_i32_1 : i32, i32, i32
  }
  func.func @transform_8(%arg0: i32) -> (i32, i32) {
    %c0_i32 = arith.constant 0 : i32
    %c0_i32_0 = arith.constant 0 : i32
    %c0_i32_1 = arith.constant 0 : i32
    return %c0_i32, %c0_i32_0 : i32, i32
  }
  func.func @transform_9(%arg0: i32) -> (i32, i32) {
    %c0_i32 = arith.constant 0 : i32
    %c0_i32_0 = arith.constant 0 : i32
    %c0_i32_1 = arith.constant 0 : i32
    return %c0_i32, %c0_i32_0 : i32, i32
  }
  func.func @transform_10(%arg0: i32) -> (i32, i32) {
    %c0_i32 = arith.constant 0 : i32
    %c0_i32_0 = arith.constant 0 : i32
    %c0_i32_1 = arith.constant 0 : i32
    return %c0_i32, %c0_i32_0 : i32, i32
  }
  func.func @transform_11(%arg0: i32) -> (i32, i32, i32) {
    %c0_i32 = arith.constant 0 : i32
    %c0_i32_0 = arith.constant 0 : i32
    %c0_i32_1 = arith.constant 0 : i32
    return %arg0, %c0_i32, %c0_i32_0 : i32, i32, i32
  }
}

</mosaic_0001>

<bundles_post_ra>
// kernel: tpu_custom_call.1
= control target key start
LH: loop header
LB: loop body
LE: loop exit
PB: predicated region body
PF: predicated region fallthrough
CT: control target
= control target key end

     0   :  { %s12629_s17 = smov 0   ;;  %s18019_s0 = inlined_call_operand.vmem [shape: f32[2,368,4], index: 0, kind: input, shape index: {}]   ;;  %s18020_s1 = inlined_call_operand.vmem [shape: f32[9,4,4], index: 1, kind: input, shape index: {}]   ;;  %s18021_s2 = inlined_call_operand.vmem [shape: f32[1,4], index: 2, kind: input, shape index: {}]   ;;  %s18022_s3 = inlined_call_operand.vmem [shape: f32[1,4], index: 3, kind: input, shape index: {}]   ;;  %s18023_s4 = inlined_call_operand.vmem [shape: f32[9,4,2], index: 4, kind: input, shape index: {}]   ;;  %s18024_s5 = inlined_call_operand.vmem [shape: f32[1,2], index: 5, kind: input, shape index: {}]   ;;  %s18025_s6 = inlined_call_operand.vmem [shape: f32[1,2], index: 6, kind: input, shape index: {}]   ;;  %s18026_s7 = inlined_call_operand.vmem [shape: f32[9,2,2], index: 7, kind: input, shape index: {}]   ;;  %s18027_s8 = inlined_call_operand.vmem [shape: f32[1,2], index: 8, kind: input, shape index: {}]   ;;  %s18028_s9 = inlined_call_operand.vmem [shape: f32[1,2], index: 9, kind: input, shape index: {}]   ;;  %s18029_s10 = inlined_call_operand.vmem [shape: f32[328,1], index: 10, kind: input, shape index: {}]   ;;  %s18030_s11 = inlined_call_operand.vmem [shape: f32[2,328,2], index: 11, kind: output, shape index: {}]  }
   0x1 LB: > { %s11362_s18 = sadd.s32 4294967295, %s12565_s17   ;;  %p11366_p0 = scmp.ge.s32.totalorder %s12565_s17, 1  ;;  %s12565_s17 = sphi %s12629_s17, %s21_s17  }
   0x2   : > { %p337_p1 = scmp.lt.s32.totalorder %s12565_s17, 3 }
   0x4   : > { %p338_p2 = pnand %p11366_p0, %p337_p1 }
   0x6   : > { %341 = sbr.rel (%p338_p2) target bundleno = 2631 (0xa47), region = 64 }
   0xb   : > { %v11369_v0 = vld [vmem:[%s18020_s1 + $0x4] sm:$0xf]  ;;  %vm689_vm0 = vcmask 1043456   ;;  %v522_v1 = vld [vmem:[%s18020_s1] sm:$0xf]  ;;  %p377_p3 = scmp.lt.s32.totalorder %s11362_s18, 1 }
   0xc   : > { %11370 = vmatpush.msk.msra.mxu0 %vm689_vm0, %v11369_v0  ;;  %12529 = vmatpush.msk.msra.mxu3 %vm689_vm0, %v11369_v0  ;;  %v11454_v2 = vld [vmem:[%s18020_s1 + $0x8] sm:$0xf]  ;;  %v11540_v3 = vld [vmem:[%s18020_s1 + $0x10] sm:$0xf]  ;;  %vm387_vm1 = vcmask 31744  }
   0xd   : > { %11412 = vmatpush.msk.msra.mxu1 %vm689_vm0, %v522_v1  ;;  %11455 = vmatpush.msk.msra.mxu2 %vm689_vm0, %v11454_v2  ;;  %s18656_s18 = smov (!%p377_p3, %s11362_s18), 1  ;;  %v11583_v56 = vld [vmem:[%s18020_s1 + $0x14] sm:$0xf] }
   0xe   : > { %12530 = vmatpush.msk.msrb.mxu3 %vm689_vm0, %v522_v1  ;;  %11541 = vmatpush.msk.msrb.mxu0 %vm689_vm0, %v11540_v3  ;;  %s12532_s27 = smul.u32 368, %s18656_s18 }
   0xf   : > { %11584 = vmatpush.msk.msrb.mxu1 %vm689_vm0, %v11583_v56  ;;  %s12533_s29 = smul.u32 328, %s18656_s18 }
  0x10   : > { %s12661_s30 = scalar_lea.vmem %s18019_s0, %s12532_s27 }
  0x11   : > { %v523_v4 = vld [vmem:[%s12661_s30 + $0x1] sm:$0xff]  ;;  %v554_v5 = vld [vmem:[%s12661_s30 + $0xf9] sm:$0xff]  ;;  %v524_v8 = vld [vmem:[%s12661_s30 + $0x9] sm:$0xff]  ;;  %s17641_s14 = scalar_lea.vmem %s18030_s11, %s12533_s29 }
  0x12   : > { %v481_v6 = vld [vmem:[%s12661_s30] sm:$0xff]  ;;  %11371 = vmatmul.msk.f32.vlgmr.msra.gmra.mxu0 %vm387_vm1, %v523_v4  ;;  %11402 = vmatmul.msk.f32.vlgmr.msra.gmra.mxu3 %vm387_vm1, %v554_v5  ;;  %v482_v10 = vld [vmem:[%s12661_s30 + $0x8] sm:$0xff]  ;;  %v525_v12 = vld [vmem:[%s12661_s30 + $0x11] sm:$0xff] }
  0x13   : > { %v1099_v7 = vld [vmem:[%s12661_s30 + $0x2] sm:$0xff]  ;;  %11413 = vmatmul.msk.f32.vlgmr.msra.gmra.mxu1 %vm387_vm1, %v481_v6  ;;  %12531 = vmatpush.msk.msra.mxu3 %vm689_vm0, %v11454_v2  ;;  %v1100_v11 = vld [vmem:[%s12661_s30 + $0xa] sm:$0xff]  ;;  %v12684_v15 = vld [vmem:[%s12661_s30 + $0x12] sm:$0xff] }
  0x14   : > { %11456 = vmatmul.msk.f32.vlgmr.msra.gmra.mxu2 %vm387_vm1, %v1099_v7  ;;  %v555_v9 = vld [vmem:[%s12661_s30 + $0x101] sm:$0xff]  ;;  %v556_v13 = vld [vmem:[%s12661_s30 + $0x109] sm:$0xff]  ;;  %v526_v16 = vld [vmem:[%s12661_s30 + $0x19] sm:$0xff] }
  0x15   : > { %v483_v14 = vld [vmem:[%s12661_s30 + $0x10] sm:$0xff]  ;;  %v484_v18 = vld [vmem:[%s12661_s30 + $0x18] sm:$0xff]  ;;  %v527_v20 = vld [vmem:[%s12661_s30 + $0x21] sm:$0xff] }
  0x16   : > { %v557_v17 = vld [vmem:[%s12661_s30 + $0x111] sm:$0xff]  ;;  %v12695_v19 = vld [vmem:[%s12661_s30 + $0x1a] sm:$0xff]  ;;  %v12706_v23 = vld [vmem:[%s12661_s30 + $0x22] sm:$0xff] }
  0x17   : > { %v558_v21 = vld [vmem:[%s12661_s30 + $0x119] sm:$0xff]  ;;  %v528_v24 = vld [vmem:[%s12661_s30 + $0x29] sm:$0xff]  ;;  %v559_v25 = vld [vmem:[%s12661_s30 + $0x121] sm:$0xff] }
  0x18   : > { %v485_v22 = vld [vmem:[%s12661_s30 + $0x20] sm:$0xff]  ;;  %v486_v26 = vld [vmem:[%s12661_s30 + $0x28] sm:$0xff]  ;;  %v529_v28 = vld [vmem:[%s12661_s30 + $0x31] sm:$0xff] }
  0x19   : > { %v12717_v27 = vld [vmem:[%s12661_s30 + $0x2a] sm:$0xff]  ;;  %v12728_v31 = vld [vmem:[%s12661_s30 + $0x32] sm:$0xff]  ;;  %v12739_v35 = vld [vmem:[%s12661_s30 + $0x3a] sm:$0xff] }
  0x1a   : > { %11372 = vmatmul.msk.f32.gmra.mxu0 %vm387_vm1, %v524_v8  ;;  %11403 = vmatmul.msk.f32.gmra.mxu3 %vm387_vm1, %v555_v9  ;;  %v560_v29 = vld [vmem:[%s12661_s30 + $0x129] sm:$0xff]  ;;  %v530_v32 = vld [vmem:[%s12661_s30 + $0x39] sm:$0xff]  ;;  %v561_v33 = vld [vmem:[%s12661_s30 + $0x131] sm:$0xff] }
  0x1b   : > { %11414 = vmatmul.msk.f32.gmra.mxu1 %vm387_vm1, %v482_v10  ;;  %v487_v30 = vld [vmem:[%s12661_s30 + $0x30] sm:$0xff]  ;;  %v488_v34 = vld [vmem:[%s12661_s30 + $0x38] sm:$0xff]  ;;  %v531_v36 = vld [vmem:[%s12661_s30 + $0x41] sm:$0xff] }
  0x1c   : > { %11457 = vmatmul.msk.f32.gmra.mxu2 %vm387_vm1, %v1100_v11  ;;  %v562_v37 = vld [vmem:[%s12661_s30 + $0x139] sm:$0xff]  ;;  %v12750_v39 = vld [vmem:[%s12661_s30 + $0x42] sm:$0xff]  ;;  %v12761_v43 = vld [vmem:[%s12661_s30 + $0x4a] sm:$0xff] }
  0x1d   : > { %v489_v38 = vld [vmem:[%s12661_s30 + $0x40] sm:$0xff]  ;;  %v532_v40 = vld [vmem:[%s12661_s30 + $0x49] sm:$0xff]  ;;  %v533_v44 = vld [vmem:[%s12661_s30 + $0x51] sm:$0xff] }
  0x1e   : > { %v563_v41 = vld [vmem:[%s12661_s30 + $0x141] sm:$0xff]  ;;  %v512_v45 = vld [vmem:[%s12661_s30 + $0xf8] sm:$0xff]  ;;  %v491_v46 = vld [vmem:[%s12661_s30 + $0x50] sm:$0xff] }
  0x1f   : > { %v490_v42 = vld [vmem:[%s12661_s30 + $0x48] sm:$0xff]  ;;  %v12772_v47 = vld [vmem:[%s12661_s30 + $0x52] sm:$0xff]  ;;  %v513_v49 = vld [vmem:[%s12661_s30 + $0x100] sm:$0xff] }
  0x20   : > { %v534_v48 = vld [vmem:[%s12661_s30 + $0x59] sm:$0xff]  ;;  %v535_v52 = vld [vmem:[%s12661_s30 + $0x61] sm:$0xff]  ;;  %v536_v57 = vld [vmem:[%s12661_s30 + $0x69] sm:$0xff] }
  0x21   : > { %v492_v50 = vld [vmem:[%s12661_s30 + $0x58] sm:$0xff]  ;;  %v514_v53 = vld [vmem:[%s12661_s30 + $0x108] sm:$0xff]  ;;  %v493_v54 = vld [vmem:[%s12661_s30 + $0x60] sm:$0xff] }
  0x22   : > { %11373 = vmatmul.msk.f32.gmra.mxu0 %vm387_vm1, %v525_v12  ;;  %11404 = vmatmul.msk.f32.gmra.mxu3 %vm387_vm1, %v556_v13  ;;  %v12783_v51 = vld [vmem:[%s12661_s30 + $0x5a] sm:$0xff]  ;;  %v12794_v55 = vld [vmem:[%s12661_s30 + $0x62] sm:$0xff]  ;;  %v515_v58 = vld [vmem:[%s12661_s30 + $0x110] sm:$0xff] }
  0x23   : > { %11415 = vmatmul.msk.f32.gmra.mxu1 %vm387_vm1, %v483_v14  ;;  %v494_v59 = vld [vmem:[%s12661_s30 + $0x68] sm:$0xff]  ;;  %v537_v61 = vld [vmem:[%s12661_s30 + $0x71] sm:$0xff]  ;;  %v538_v1 = vld [vmem:[%s12661_s30 + $0x79] sm:$0xff] }
  0x24   : > { %11458 = vmatmul.msk.f32.gmra.mxu2 %vm387_vm1, %v12684_v15  ;;  %v12809_v60 = vld [vmem:[%s12661_s30 + $0x6a] sm:$0xff]  ;;  %v516_v62 = vld [vmem:[%s12661_s30 + $0x118] sm:$0xff]  ;;  %v517_v2 = vld [vmem:[%s12661_s30 + $0x120] sm:$0xff] }
  0x25   : > { %v495_v63 = vld [vmem:[%s12661_s30 + $0x70] sm:$0xff]  ;;  %v496_v3 = vld [vmem:[%s12661_s30 + $0x78] sm:$0xff]  ;;  %v539_v6 = vld [vmem:[%s12661_s30 + $0x81] sm:$0xff] }
  0x26   : > { %v12820_v0 = vld [vmem:[%s12661_s30 + $0x72] sm:$0xff]  ;;  %v12831_v4 = vld [vmem:[%s12661_s30 + $0x7a] sm:$0xff]  ;;  %v518_v7 = vld [vmem:[%s12661_s30 + $0x128] sm:$0xff] }
  0x27   : > { %v497_v9 = vld [vmem:[%s12661_s30 + $0x80] sm:$0xff]  ;;  %v11497_v11 = vld [vmem:[%s18020_s1 + $0xc] sm:$0xf] }
  0x28   : > { %v12846_v10 = vld [vmem:[%s12661_s30 + $0x82] sm:$0xff] }
  0x2a   : > { %11374 = vmatmul.msk.f32.gmra.mxu0 %vm387_vm1, %v526_v16  ;;  %11405 = vmatmul.msk.f32.gmra.mxu3 %vm387_vm1, %v557_v17  ;;  %v540_v16 = vld [vmem:[%s12661_s30 + $0x89] sm:$0xff] }
  0x2b   : > { %11416 = vmatmul.msk.f32.gmra.mxu1 %vm387_vm1, %v484_v18  ;;  %v519_v17 = vld [vmem:[%s12661_s30 + $0x130] sm:$0xff] }
  0x2c   : > { %11459 = vmatmul.msk.f32.gmra.mxu2 %vm387_vm1, %v12695_v19 }
  0x32   : > { %11375 = vmatmul.msk.f32.gmra.mxu0 %vm387_vm1, %v527_v20  ;;  %11406 = vmatmul.msk.f32.gmra.mxu3 %vm387_vm1, %v558_v21  ;;  %v498_v20 = vld [vmem:[%s12661_s30 + $0x88] sm:$0xff] }
  0x33   : > { %11417 = vmatmul.msk.f32.gmra.mxu1 %vm387_vm1, %v485_v22  ;;  %v12869_v21 = vld [vmem:[%s12661_s30 + $0x8a] sm:$0xff] }
  0x34   : > { %11460 = vmatmul.msk.f32.gmra.mxu2 %vm387_vm1, %v12706_v23 }
  0x3a   : > { %11376 = vmatmul.msk.f32.gmra.mxu0 %vm387_vm1, %v528_v24  ;;  %11407 = vmatmul.msk.f32.gmra.mxu3 %vm387_vm1, %v559_v25 }
  0x3b   : > { %11418 = vmatmul.msk.f32.gmra.mxu1 %vm387_vm1, %v486_v26  ;;  %v541_v26 = vld [vmem:[%s12661_s30 + $0x91] sm:$0xff] }
  0x3c   : > { %11461 = vmatmul.msk.f32.gmra.mxu2 %vm387_vm1, %v12717_v27 }
  0x42   : > { %11377 = vmatmul.msk.f32.gmra.mxu0 %vm387_vm1, %v529_v28  ;;  %11408 = vmatmul.msk.f32.gmra.mxu3 %vm387_vm1, %v560_v29  ;;  %v520_v28 = vld [vmem:[%s12661_s30 + $0x138] sm:$0xff] }
  0x43   : > { %11419 = vmatmul.msk.f32.gmra.mxu1 %vm387_vm1, %v487_v30  ;;  %v499_v30 = vld [vmem:[%s12661_s30 + $0x90] sm:$0xff] }
  0x44   : > { %11462 = vmatmul.msk.f32.gmra.mxu2 %vm387_vm1, %v12728_v31 }
  0x4a   : > { %11378 = vmatmul.msk.f32.gmra.mxu0 %vm387_vm1, %v530_v32  ;;  %11409 = vmatmul.msk.f32.gmra.mxu3 %vm387_vm1, %v561_v33  ;;  %v12888_v32 = vld [vmem:[%s12661_s30 + $0x92] sm:$0xff] }
  0x4b   : > { %11420 = vmatmul.msk.f32.gmra.mxu1 %vm387_vm1, %v488_v34 }
  0x4c   : > { %11463 = vmatmul.msk.f32.gmra.mxu2 %vm387_vm1, %v12739_v35 }
  0x52   : > { %11379 = vmatmul.msk.f32.gmra.mxu0 %vm387_vm1, %v531_v36  ;;  %11410 = vmatmul.msk.f32.gmra.mxu3 %vm387_vm1, %v562_v37  ;;  %v542_v37 = vld [vmem:[%s12661_s30 + $0x99] sm:$0xff] }
  0x53   : > { %11421 = vmatmul.msk.f32.gmra.mxu1 %vm387_vm1, %v489_v38  ;;  %v521_v38 = vld [vmem:[%s12661_s30 + $0x140] sm:$0xff] }
  0x54   : > { %11464 = vmatmul.msk.f32.gmra.mxu2 %vm387_vm1, %v12750_v39 }
  0x5a   : > { %11380 = vmatmul.msk.f32.gmra.mxu0 %vm387_vm1, %v532_v40  ;;  %11411 = vmatmul.msk.f32.gmra.mxu3 %vm387_vm1, %v563_v41  ;;  %v500_v41 = vld [vmem:[%s12661_s30 + $0x98] sm:$0xff] }
  0x5b   : > { %11422 = vmatmul.msk.f32.gmra.mxu1 %vm387_vm1, %v490_v42  ;;  %v12907_v42 = vld [vmem:[%s12661_s30 + $0x9a] sm:$0xff] }
  0x5c   : > { %11465 = vmatmul.msk.f32.gmra.mxu2 %vm387_vm1, %v12761_v43 }
  0x62   : > { %11381 = vmatmul.msk.f32.gmra.mxu0 %vm387_vm1, %v533_v44  ;;  %11444 = vmatmul.msk.f32.vlgmr.msrb.gmra.mxu3 %vm387_vm1, %v512_v45 }
  0x63   : > { %11423 = vmatmul.msk.f32.gmra.mxu1 %vm387_vm1, %v491_v46  ;;  %11498 = vmatpush.msk.msrb.mxu3 %vm689_vm0, %v11497_v11  ;;  %v503_v11 = vld [vmem:[%s12661_s30 + $0xb0] sm:$0xff] }
  0x64   : > { %11466 = vmatmul.msk.f32.gmra.mxu2 %vm387_vm1, %v12772_v47 }
  0x6a   : > { %11382 = vmatmul.msk.f32.gmra.mxu0 %vm387_vm1, %v534_v48  ;;  %11445 = vmatmul.msk.f32.gmra.mxu3 %vm387_vm1, %v513_v49  ;;  %v543_v48 = vld [vmem:[%s12661_s30 + $0xa1] sm:$0xff] }
  0x6b   : > { %11424 = vmatmul.msk.f32.gmra.mxu1 %vm387_vm1, %v492_v50  ;;  %v1130_v49 = vld [vmem:[%s12661_s30 + $0xfa] sm:$0xff] }
  0x6c   : > { %11467 = vmatmul.msk.f32.gmra.mxu2 %vm387_vm1, %v12783_v51 }
  0x72   : > { %11383 = vmatmul.msk.f32.gmra.mxu0 %vm387_vm1, %v535_v52  ;;  %11446 = vmatmul.msk.f32.gmra.mxu3 %vm387_vm1, %v514_v53  ;;  %v501_v52 = vld [vmem:[%s12661_s30 + $0xa0] sm:$0xff] }
  0x73   : > { %11425 = vmatmul.msk.f32.gmra.mxu1 %vm387_vm1, %v493_v54  ;;  %v12926_v53 = vld [vmem:[%s12661_s30 + $0xa2] sm:$0xff] }
  0x74   : > { %11468 = vmatmul.msk.f32.gmra.mxu2 %vm387_vm1, %v12794_v55 }
  0x7a   : > { %11384 = vmatmul.msk.f32.gmra.mxu0 %vm387_vm1, %v536_v57  ;;  %11447 = vmatmul.msk.f32.gmra.mxu3 %vm387_vm1, %v515_v58  ;;  %v544_v58 = vld [vmem:[%s12661_s30 + $0xa9] sm:$0xff] }
  0x7b   : > { %11426 = vmatmul.msk.f32.gmra.mxu1 %vm387_vm1, %v494_v59  ;;  %v1131_v59 = vld [vmem:[%s12661_s30 + $0x102] sm:$0xff] }
  0x7c   : > { %11469 = vmatmul.msk.f32.gmra.mxu2 %vm387_vm1, %v12809_v60 }
  0x82   : > { %11385 = vmatmul.msk.f32.gmra.mxu0 %vm387_vm1, %v537_v61  ;;  %11448 = vmatmul.msk.f32.gmra.mxu3 %vm387_vm1, %v516_v62  ;;  %v502_v62 = vld [vmem:[%s12661_s30 + $0xa8] sm:$0xff] }
  0x83   : > { %11427 = vmatmul.msk.f32.gmra.mxu1 %vm387_vm1, %v495_v63  ;;  %v12945_v63 = vld [vmem:[%s12661_s30 + $0xaa] sm:$0xff] }
  0x84   : > { %11470 = vmatmul.msk.f32.gmra.mxu2 %vm387_vm1, %v12820_v0 }
  0x8a   : > { %11386 = vmatmul.msk.f32.gmra.mxu0 %vm387_vm1, %v538_v1  ;;  %11449 = vmatmul.msk.f32.gmra.mxu3 %vm387_vm1, %v517_v2 }
  0x8b   : > { %11428 = vmatmul.msk.f32.gmra.mxu1 %vm387_vm1, %v496_v3 }
  0x8c   : > { %11471 = vmatmul.msk.f32.gmra.mxu2 %vm387_vm1, %v12831_v4 }
  0x8f   : > { %v12838_v5 = vpop.f32.mrf.mxu0 }
  0x90   : > { %v12842_v8 = vpop.f32.mrf.mxu1 }
  0x92   : > { %11387 = vmatmul.msk.f32.gmra.mxu0 %vm387_vm1, %v539_v6  ;;  %11450 = vmatmul.msk.f32.gmra.mxu3 %vm387_vm1, %v518_v7  ;;  %v545_v6 = vld [vmem:[%s12661_s30 + $0xb1] sm:$0xff] }
  0x93   : > { %11429 = vmatmul.msk.f32.gmra.mxu1 %vm387_vm1, %v497_v9  ;;  %v1132_v7 = vld [vmem:[%s12661_s30 + $0x10a] sm:$0xff] }
  0x94   : > { %11472 = vmatmul.msk.f32.gmra.mxu2 %vm387_vm1, %v12846_v10 }
  0x95   : > { %v12857_v12 = vpop.f32.mrf.mxu3 }
  0x97   : > { %v12859_v13 = vpop.f32.mrf.mxu2  ;;  %v12861_v14 = vpop.f32.mrf.mxu0 }
  0x98   : > { %v12865_v18 = vpop.f32.mrf.mxu1 }
  0x9a   : > { %11388 = vmatmul.msk.f32.gmra.mxu0 %vm387_vm1, %v540_v16  ;;  %11451 = vmatmul.msk.f32.gmra.mxu3 %vm387_vm1, %v519_v17  ;;  %v12964_v16 = vld [vmem:[%s12661_s30 + $0xb2] sm:$0xff] }
  0x9b   : > { %11430 = vmatmul.msk.f32.gmra.mxu1 %vm387_vm1, %v498_v20 }
  0x9c   : > { %11473 = vmatmul.msk.f32.gmra.mxu2 %vm387_vm1, %v12869_v21 }
  0x9d   : > { %v12876_v22 = vpop.f32.mrf.mxu3 }
  0x9f   : > { %v12878_v24 = vpop.f32.mrf.mxu2  ;;  %v12880_v25 = vpop.f32.mrf.mxu0 }
  0xa0   : > { %v12884_v29 = vpop.f32.mrf.mxu1 }
  0xa2   : > { %11389 = vmatmul.msk.f32.gmra.mxu0 %vm387_vm1, %v541_v26  ;;  %11452 = vmatmul.msk.f32.gmra.mxu3 %vm387_vm1, %v520_v28  ;;  %v546_v28 = vld [vmem:[%s12661_s30 + $0xb9] sm:$0xff] }
  0xa3   : > { %11431 = vmatmul.msk.f32.gmra.mxu1 %vm387_vm1, %v499_v30  ;;  %v1133_v30 = vld [vmem:[%s12661_s30 + $0x112] sm:$0xff] }
  0xa4   : > { %11474 = vmatmul.msk.f32.gmra.mxu2 %vm387_vm1, %v12888_v32 }
  0xa5   : > { %v12895_v33 = vpop.f32.mrf.mxu3 }
  0xa7   : > { %v12897_v34 = vpop.f32.mrf.mxu2  ;;  %v12899_v36 = vpop.f32.mrf.mxu0 }
  0xa8   : > { %v12903_v40 = vpop.f32.mrf.mxu1 }
  0xaa   : > { %11390 = vmatmul.msk.f32.gmra.mxu0 %vm387_vm1, %v542_v37  ;;  %11453 = vmatmul.msk.f32.gmra.mxu3 %vm387_vm1, %v521_v38  ;;  %v504_v38 = vld [vmem:[%s12661_s30 + $0xb8] sm:$0xff] }
  0xab   : > { %11432 = vmatmul.msk.f32.gmra.mxu1 %vm387_vm1, %v500_v41  ;;  %v1122_v41 = vld [vmem:[%s12661_s30 + $0xba] sm:$0xff] }
  0xac   : > { %11475 = vmatmul.msk.f32.gmra.mxu2 %vm387_vm1, %v12907_v42 }
  0xad   : > { %v12914_v44 = vpop.f32.mrf.mxu3 }
  0xaf   : > { %v12916_v45 = vpop.f32.mrf.mxu2  ;;  %v12918_v46 = vpop.f32.mrf.mxu0 }
  0xb0   : > { %v12922_v50 = vpop.f32.mrf.mxu1 }
  0xb2   : > { %11391 = vmatmul.msk.f32.gmra.mxu0 %vm387_vm1, %v543_v48  ;;  %11487 = vmatmul.msk.f32.vlgmr.msra.gmra.mxu3 %vm387_vm1, %v1130_v49 }
  0xb3   : > { %11433 = vmatmul.msk.f32.gmra.mxu1 %vm387_vm1, %v501_v52 }
  0xb4   : > { %11476 = vmatmul.msk.f32.gmra.mxu2 %vm387_vm1, %v12926_v53 }
  0xb5   : > { %v12933_v54 = vpop.f32.mrf.mxu3 }
  0xb7   : > { %v12935_v56 = vpop.f32.mrf.mxu2  ;;  %v12937_v57 = vpop.f32.mrf.mxu0 }
  0xb8   : > { %18048 = vst [vmem:[#allocation4_spill] sm:$0xff] %v12937_v57  ;;  %v12941_v61 = vpop.f32.mrf.mxu1 }
  0xb9   : > { %18049 = vst [vmem:[#allocation5_spill] sm:$0xff] %v12941_v61 }
  0xba   : > { %11392 = vmatmul.msk.f32.gmra.mxu0 %vm387_vm1, %v544_v58  ;;  %11488 = vmatmul.msk.f32.gmra.mxu3 %vm387_vm1, %v1131_v59  ;;  %v547_v58 = vld [vmem:[%s12661_s30 + $0xc1] sm:$0xff] }
  0xbb   : > { %11434 = vmatmul.msk.f32.gmra.mxu1 %vm387_vm1, %v502_v62  ;;  %v1134_v59 = vld [vmem:[%s12661_s30 + $0x11a] sm:$0xff] }
  0xbc   : > { %11477 = vmatmul.msk.f32.gmra.mxu2 %vm387_vm1, %v12945_v63 }
  0xbd   : > { %v12952_v1 = vpop.f32.mrf.mxu3 }
  0xbf   : > { %v12954_v2 = vpop.f32.mrf.mxu2  ;;  %v12956_v3 = vpop.f32.mrf.mxu0 }
  0xc0   : > { %18050 = vst [vmem:[#allocation6_spill] sm:$0xff] %v12954_v2  ;;  %v12960_v9 = vpop.f32.mrf.mxu1 }
  0xc1   : > { %18051 = vst [vmem:[#allocation7_spill] sm:$0xff] %v12956_v3 }
  0xc2   : > { %18052 = vst [vmem:[#allocation8_spill] sm:$0xff] %v12960_v9  ;;  %11393 = vmatmul.msk.f32.gmra.mxu0 %vm387_vm1, %v545_v6  ;;  %11489 = vmatmul.msk.f32.gmra.mxu3 %vm387_vm1, %v1132_v7  ;;  %v505_v6 = vld [vmem:[%s12661_s30 + $0xc0] sm:$0xff]  ;;  %v1129_v9 = vld [vmem:[%s12661_s30 + $0xf2] sm:$0xff] }
  0xc3   : > { %11435 = vmatmul.msk.f32.gmra.mxu1 %vm387_vm1, %v503_v11  ;;  %v1123_v7 = vld [vmem:[%s12661_s30 + $0xc2] sm:$0xff] }
  0xc4   : > { %11478 = vmatmul.msk.f32.gmra.mxu2 %vm387_vm1, %v12964_v16 }
  0xc5   : > { %v12971_v17 = vpop.f32.mrf.mxu3 }
  0xc7   : > { %v12973_v20 = vpop.f32.mrf.mxu2  ;;  %v12975_v26 = vpop.f32.mrf.mxu0 }
  0xc8   : > { %18053 = vst [vmem:[#allocation9_spill] sm:$0xff] %v12973_v20  ;;  %v12979_v37 = vpop.f32.mrf.mxu1  ;;  %v1128_v20 = vld [vmem:[%s12661_s30 + $0xea] sm:$0xff] }
  0xc9   : > { %18054 = vst [vmem:[#allocation10_spill] sm:$0xff] %v12975_v26 }
  0xca   : > { %18055 = vst [vmem:[#allocation11_spill] sm:$0xff] %v12979_v37  ;;  %11394 = vmatmul.msk.f32.gmra.mxu0 %vm387_vm1, %v546_v28  ;;  %11490 = vmatmul.msk.f32.gmra.mxu3 %vm387_vm1, %v1133_v30  ;;  %v1127_v37 = vld [vmem:[%s12661_s30 + $0xe2] sm:$0xff] }
  0xcb   : > { %11436 = vmatmul.msk.f32.gmra.mxu1 %vm387_vm1, %v504_v38  ;;  %v548_v38 = vld [vmem:[%s12661_s30 + $0xc9] sm:$0xff] }
  0xcc   : > { %11479 = vmatmul.msk.f32.gmra.mxu2 %vm387_vm1, %v1122_v41  ;;  %v1135_v41 = vld [vmem:[%s12661_s30 + $0x122] sm:$0xff] }
  0xcd   : > { %v12987_v48 = vpop.f32.mrf.mxu3 }
  0xcf   : > { %v12989_v49 = vpop.f32.mrf.mxu2  ;;  %v12991_v52 = vpop.f32.mrf.mxu0 }
  0xd0   : > { %18056 = vst [vmem:[#allocation12_spill] sm:$0xff] %v12989_v49  ;;  %v12995_v62 = vpop.f32.mrf.mxu1  ;;  %v509_v49 = vld [vmem:[%s12661_s30 + $0xe0] sm:$0xff] }
  0xd1   : > { %18057 = vst [vmem:[#allocation13_spill] sm:$0xff] %v12991_v52 }
  0xd2   : > { %18058 = vst [vmem:[#allocation14_spill] sm:$0xff] %v12995_v62  ;;  %11395 = vmatmul.msk.f32.gmra.mxu0 %vm387_vm1, %v547_v58  ;;  %11491 = vmatmul.msk.f32.gmra.mxu3 %vm387_vm1, %v1134_v59  ;;  %v506_v58 = vld [vmem:[%s12661_s30 + $0xc8] sm:$0xff] }
  0xd3   : > { %11437 = vmatmul.msk.f32.gmra.mxu1 %vm387_vm1, %v505_v6  ;;  %v1124_v59 = vld [vmem:[%s12661_s30 + $0xca] sm:$0xff] }
  0xd4   : > { %11480 = vmatmul.msk.f32.gmra.mxu2 %vm387_vm1, %v1123_v7 }
  0xd5   : > { %v13003_v11 = vpop.f32.mrf.mxu3 }
  0xd7   : > { %v13005_v28 = vpop.f32.mrf.mxu2  ;;  %v13007_v30 = vpop.f32.mrf.mxu0 }
  0xd8   : > { %18059 = vst [vmem:[#allocation15_spill] sm:$0xff] %v13005_v28  ;;  %v13011_v62 = vpop.f32.mrf.mxu1  ;;  %v549_v28 = vld [vmem:[%s12661_s30 + $0xd1] sm:$0xff] }
  0xd9   : > { %18060 = vst [vmem:[#allocation16_spill] sm:$0xff] %v13007_v30 }
  0xda   : > { %18061 = vst [vmem:[#allocation17_spill] sm:$0xff] %v13011_v62  ;;  %11396 = vmatmul.msk.f32.gmra.mxu0 %vm387_vm1, %v548_v38  ;;  %11492 = vmatmul.msk.f32.gmra.mxu3 %vm387_vm1, %v1135_v41  ;;  %v1136_v62 = vld [vmem:[%s12661_s30 + $0x12a] sm:$0xff]  ;;  %v1125_v41 = vld [vmem:[%s12661_s30 + $0xd2] sm:$0xff] }
  0xdb   : > { %11438 = vmatmul.msk.f32.gmra.mxu1 %vm387_vm1, %v506_v58  ;;  %v507_v38 = vld [vmem:[%s12661_s30 + $0xd0] sm:$0xff]  ;;  %v11669_v58 = vld [vmem:[%s18020_s1 + $0x1c] sm:$0xf] }
  0xdc   : > { %11481 = vmatmul.msk.f32.gmra.mxu2 %vm387_vm1, %v1124_v59  ;;  %11670 = vmatpush.msk.msra.mxu3 %vm689_vm0, %v11669_v58  ;;  %v11626_v58 = vld [vmem:[%s18020_s1 + $0x18] sm:$0xf] }
  0xdd   : > { %v13019_v6 = vpop.f32.mrf.mxu3  ;;  %11627 = vmatpush.msk.msrb.mxu2 %vm689_vm0, %v11626_v58 }
  0xdf   : > { %v13021_v7 = vpop.f32.mrf.mxu2  ;;  %v13023_v30 = vpop.f32.mrf.mxu0 }
  0xe0   : > { %18062 = vst [vmem:[#allocation18_spill] sm:$0xff] %v13021_v7  ;;  %v13027_v52 = vpop.f32.mrf.mxu1  ;;  %v550_v7 = vld [vmem:[%s12661_s30 + $0xd9] sm:$0xff] }
  0xe1   : > { %18063 = vst [vmem:[#allocation19_spill] sm:$0xff] %v13023_v30 }
  0xe2   : > { %18064 = vst [vmem:[#allocation20_spill] sm:$0xff] %v13027_v52  ;;  %11397 = vmatmul.msk.f32.gmra.mxu0 %vm387_vm1, %v549_v28  ;;  %11493 = vmatmul.msk.f32.gmra.mxu3 %vm387_vm1, %v1136_v62  ;;  %v1137_v28 = vld [vmem:[%s12661_s30 + $0x132] sm:$0xff] }
  0xe3   : > { %11439 = vmatmul.msk.f32.gmra.mxu1 %vm387_vm1, %v507_v38  ;;  %v508_v38 = vld [vmem:[%s12661_s30 + $0xd8] sm:$0xff] }
  0xe4   : > { %11482 = vmatmul.msk.f32.gmra.mxu2 %vm387_vm1, %v1125_v41  ;;  %v1126_v41 = vld [vmem:[%s12661_s30 + $0xda] sm:$0xff] }
  0xe5   : > { %v13039_v59 = vpop.f32.mrf.mxu3 }
  0xe7   : > { %v13041_v52 = vpop.f32.mrf.mxu2  ;;  %v13043_v30 = vpop.f32.mrf.mxu0 }
  0xe8   : > { %18065 = vst [vmem:[#allocation21_spill] sm:$0xff] %v13041_v52  ;;  %v13047_v62 = vpop.f32.mrf.mxu1 }
  0xe9   : > { %18066 = vst [vmem:[#allocation22_spill] sm:$0xff] %v13043_v30 }
  0xea   : > { %18067 = vst [vmem:[#allocation23_spill] sm:$0xff] %v13047_v62  ;;  %11398 = vmatmul.msk.f32.gmra.mxu0 %vm387_vm1, %v550_v7  ;;  %11494 = vmatmul.msk.f32.gmra.mxu3 %vm387_vm1, %v1137_v28  ;;  %v11712_v62 = vld [vmem:[%s18020_s1 + $0x20] sm:$0xf] }
  0xeb   : > { %11440 = vmatmul.msk.f32.gmra.mxu1 %vm387_vm1, %v508_v38  ;;  %11713 = vmatpush.msk.msra.mxu0 %vm689_vm0, %v11712_v62  ;;  %v551_v28 = vld [vmem:[%s12661_s30 + $0xe1] sm:$0xff] }
  0xec   : > { %11483 = vmatmul.msk.f32.gmra.mxu2 %vm387_vm1, %v1126_v41  ;;  %v1138_v38 = vld [vmem:[%s12661_s30 + $0x13a] sm:$0xff] }
  0xed   : > { %v13063_v30 = vpop.f32.mrf.mxu3 }
  0xef   : > { %v13065_v52 = vpop.f32.mrf.mxu2  ;;  %v13067_v7 = vpop.f32.mrf.mxu0 }
  0xf0   : > { %18068 = vst [vmem:[#allocation24_spill] sm:$0xff] %v13065_v52  ;;  %v13071_v41 = vpop.f32.mrf.mxu1  ;;  %v1139_v52 = vld [vmem:[%s12661_s30 + $0x142] sm:$0xff] }
  0xf1   : > { %18069 = vst [vmem:[#allocation25_spill] sm:$0xff] %v13067_v7 }
  0xf2   : > { %18070 = vst [vmem:[#allocation26_spill] sm:$0xff] %v13071_v41  ;;  %11399 = vmatmul.msk.f32.gmra.mxu0 %vm387_vm1, %v551_v28  ;;  %11495 = vmatmul.msk.f32.gmra.mxu3 %vm387_vm1, %v1138_v38  ;;  %v552_v41 = vld [vmem:[%s12661_s30 + $0xe9] sm:$0xff] }
  0xf3   : > { %11441 = vmatmul.msk.f32.gmra.mxu1 %vm387_vm1, %v509_v49  ;;  %v510_v28 = vld [vmem:[%s12661_s30 + $0xe8] sm:$0xff] }
  0xf4   : > { %11484 = vmatmul.msk.f32.gmra.mxu2 %vm387_vm1, %v1127_v37 }
  0xf5   : > { %v13079_v62 = vpop.f32.mrf.mxu3 }
  0xf7   : > { %v13081_v58 = vpop.f32.mrf.mxu2  ;;  %v13083_v7 = vpop.f32.mrf.mxu0 }
  0xf8   : > { %18071 = vst [vmem:[#allocation27_spill] sm:$0xff] %v13081_v58  ;;  %v13087_v26 = vpop.f32.mrf.mxu1 }
  0xf9   : > { %18072 = vst [vmem:[#allocation28_spill] sm:$0xff] %v13083_v7  ;;  %v553_v7 = vld [vmem:[%s12661_s30 + $0xf1] sm:$0xff] }
  0xfa   : > { %18073 = vst [vmem:[#allocation29_spill] sm:$0xff] %v13087_v26  ;;  %11400 = vmatmul.msk.f32.gmra.mxu0 %vm387_vm1, %v552_v41  ;;  %11496 = vmatmul.msk.f32.gmra.mxu3 %vm387_vm1, %v1139_v52  ;;  %v511_v26 = vld [vmem:[%s12661_s30 + $0xf0] sm:$0xff] }
  0xfb   : > { %11442 = vmatmul.msk.f32.gmra.mxu1 %vm387_vm1, %v510_v28 }
  0xfc   : > { %11485 = vmatmul.msk.f32.gmra.mxu2 %vm387_vm1, %v1128_v20  ;;  %v12567_v20 = vmov 0  }
  0xfd   : > { %v13095_v37 = vpop.f32.mrf.mxu3  ;;  %12544 = vset.pattern.permute.xlu0 %v12567_v20  ;;  %12545 = vset.pattern.permute.xlu1 %v12567_v20 }
  0xfe   : > { %12546 = vset.pattern.permute.xlu2 %v12567_v20 }
  0xff   : > { %v13097_v49 = vpop.f32.mrf.mxu2  ;;  %v13099_v38 = vpop.f32.mrf.mxu0 }
 0x100   : > { %18074 = vst [vmem:[#allocation30_spill] sm:$0xff] %v13097_v49  ;;  %v13102_v58 = vpop.f32.mrf.mxu1  ;;  %v13167_v49 = vld [vmem:[%s18029_s10 + $0x30] sm:$0xff] }
 0x101   : > { %18075 = vst [vmem:[#allocation31_spill] sm:$0xff] %v13099_v38  ;;  %v1800_v38 = vld [vmem:[%s12661_s30 + $0x1b] sm:$0xff] }
 0x102   : > { %18076 = vst [vmem:[#allocation32_spill] sm:$0xff] %v13102_v58  ;;  %11401 = vmatmul.msk.f32.gmra.mxu0 %vm387_vm1, %v553_v7  ;;  %11499 = vmatmul.msk.f32.vlgmr.msrb.gmra.mxu3 %vm387_vm1, %v12684_v15  ;;  %v13118_v7 = vld [vmem:[%s18029_s10] sm:$0xff]  ;;  %v1799_v15 = vld [vmem:[%s12661_s30 + $0x13] sm:$0xff] }
 0x103   : > { %11443 = vmatmul.msk.f32.gmra.mxu1 %vm387_vm1, %v511_v26  ;;  %3805 = vperm.xlu0 %12544, %v13118_v7   ;;  %v2499_v26 = vld [vmem:[%s12661_s30 + $0x24] sm:$0xff]  ;;  %v2149_v58 = vld [vmem:[%s12661_s30 + $0x14] sm:$0xff]  ;;  %18084 = vst [vmem:[#allocation40_spill] sm:$0xff] %v13167_v49 }
 0x104   : > { %11486 = vmatmul.msk.f32.gmra.mxu2 %vm387_vm1, %v1129_v9 }
 0x105   : > { %v13111_v52 = vpop.f32.mrf.mxu3 }
 0x107   : > { %v13113_v41 = vpop.f32.mrf.mxu2  ;;  %v13120_v28 = vpop.f32.mrf.mxu0 }
 0x108   : > { %18077 = vst [vmem:[#allocation33_spill] sm:$0xff] %v13113_v41  ;;  %v13124_v9 = vpop.f32.mrf.mxu1  ;;  %v13140_v41 = vld [vmem:[%s18029_s10 + $0x8] sm:$0xff] }
 0x109   : > { %18078 = vst [vmem:[#allocation34_spill] sm:$0xff] %v13120_v28 }
 0x10a   : > { %18079 = vst [vmem:[#allocation35_spill] sm:$0xff] %v13124_v9  ;;  %11500 = vmatmul.msk.f32.gmra.mxu3 %vm387_vm1, %v12695_v19  ;;  %11542 = vmatmul.msk.f32.vlgmr.msrb.gmra.mxu0 %vm387_vm1, %v1799_v15  ;;  %v2500_v15 = vld [vmem:[%s12661_s30 + $0x2c] sm:$0xff] }
 0x10b   : > { %11585 = vmatmul.msk.f32.vlgmr.msrb.gmra.mxu1 %vm387_vm1, %v2149_v58  ;;  %3810 = vperm.xlu0 %12544, %v13140_v41   ;;  %v2150_v58 = vld [vmem:[%s12661_s30 + $0x1c] sm:$0xff] }
 0x10c   : > { %11628 = vmatmul.msk.f32.vlgmr.msrb.gmra.mxu2 %vm387_vm1, %v2499_v26 }
 0x10d   : > { %v13133_v20 = vpop.f32.mrf.mxu3 }
 0x10f   : > { %v13135_v28 = vpop.f32.mrf.mxu2  ;;  %v13142_v9 = vpop.f32.mrf.mxu0 }
 0x110   : > { %18080 = vst [vmem:[#allocation36_spill] sm:$0xff] %v13135_v28  ;;  %v13146_v19 = vpop.f32.mrf.mxu1 }
 0x111   : > { %18081 = vst [vmem:[#allocation37_spill] sm:$0xff] %v13142_v9 }
 0x112   : > { %18082 = vst [vmem:[#allocation38_spill] sm:$0xff] %v13146_v19  ;;  %11501 = vmatmul.msk.f32.gmra.mxu3 %vm387_vm1, %v12706_v23  ;;  %11543 = vmatmul.msk.f32.gmra.mxu0 %vm387_vm1, %v1800_v38  ;;  %v13162_v19 = vld [vmem:[%s18029_s10 + $0x10] sm:$0xff]  ;;  %v1801_v38 = vld [vmem:[%s12661_s30 + $0x23] sm:$0xff] }
 0x113   : > { %11586 = vmatmul.msk.f32.gmra.mxu1 %vm387_vm1, %v2150_v58  ;;  %3815 = vperm.xlu1 %12545, %v13162_v19  }
 0x114   : > { %11629 = vmatmul.msk.f32.gmra.mxu2 %vm387_vm1, %v2500_v15  ;;  %3835 = vperm.xlu0 %12544, %v13167_v49   ;;  %v13189_v49 = vld [vmem:[%s18029_s10 + $0x18] sm:$0xff] }
 0x115   : > { %v13155_v28 = vpop.f32.mrf.mxu3  ;;  %18088 = vst [vmem:[#allocation44_spill] sm:$0xff] %v13189_v49 }
 0x117   : > { %v13157_v9 = vpop.f32.mrf.mxu2  ;;  %v13169_v23 = vpop.f32.mrf.mxu0 }
 0x118   : > { %18083 = vst [vmem:[#allocation39_spill] sm:$0xff] %v13157_v9  ;;  %v13174_v58 = vpop.f32.mrf.mxu1  ;;  %v2501_v9 = vld [vmem:[%s12661_s30 + $0x34] sm:$0xff] }
 0x119   : > { %18085 = vst [vmem:[#allocation41_spill] sm:$0xff] %v13169_v23 }
 0x11a   : > { %18086 = vst [vmem:[#allocation42_spill] sm:$0xff] %v13174_v58  ;;  %11502 = vmatmul.msk.f32.gmra.mxu3 %vm387_vm1, %v12717_v27  ;;  %11544 = vmatmul.msk.f32.gmra.mxu0 %vm387_vm1, %v1801_v38  ;;  %v13194_v58 = vld [vmem:[%s18029_s10 + $0x48] sm:$0xff] }
 0x11b   : > { %11587 = vmatmul.msk.f32.gmra.mxu1 %vm387_vm1, %v2499_v26  ;;  %18089 = vst [vmem:[#allocation45_spill] sm:$0xff] %v13194_v58  ;;  %v1802_v38 = vld [vmem:[%s12661_s30 + $0x2b] sm:$0xff]  ;;  %3820 = vperm.xlu1 %12545, %v13189_v49  }
 0x11c   : > { %11630 = vmatmul.msk.f32.gmra.mxu2 %vm387_vm1, %v2501_v9  ;;  %3850 = vperm.xlu0 %12544, %v13194_v58   ;;  %v13216_v58 = vld [vmem:[%s18029_s10 + $0x38] sm:$0xff] }
 0x11d   : > { %v13182_v3 = vpop.f32.mrf.mxu3 }
 0x11f   : > { %v13184_v23 = vpop.f32.mrf.mxu2  ;;  %v13196_v27 = vpop.f32.mrf.mxu0 }
 0x120   : > { %18087 = vst [vmem:[#allocation43_spill] sm:$0xff] %v13184_v23  ;;  %v13201_v26 = vpop.f32.mrf.mxu1  ;;  %v2502_v23 = vld [vmem:[%s12661_s30 + $0x3c] sm:$0xff] }
 0x121   : > { %18090 = vst [vmem:[#allocation46_spill] sm:$0xff] %v13196_v27 }
 0x122   : > { %18091 = vst [vmem:[#allocation47_spill] sm:$0xff] %v13201_v26  ;;  %11503 = vmatmul.msk.f32.gmra.mxu3 %vm387_vm1, %v12728_v31  ;;  %11545 = vmatmul.msk.f32.gmra.mxu0 %vm387_vm1, %v1802_v38  ;;  %v13221_v26 = vld [vmem:[%s18029_s10 + $0x60] sm:$0xff]  ;;  %v1803_v38 = vld [vmem:[%s12661_s30 + $0x33] sm:$0xff] }
 0x123   : > { %11588 = vmatmul.msk.f32.gmra.mxu1 %vm387_vm1, %v2500_v15  ;;  %18093 = vst [vmem:[#allocation49_spill] sm:$0xff] %v13221_v26  ;;  %3840 = vperm.xlu1 %12545, %v13216_v58  }
 0x124   : > { %11631 = vmatmul.msk.f32.gmra.mxu2 %vm387_vm1, %v2502_v23  ;;  %3865 = vperm.xlu0 %12544, %v13221_v26   ;;  %v13243_v26 = vld [vmem:[%s18029_s10 + $0x50] sm:$0xff] }
 0x125   : > { %v13209_v2 = vpop.f32.mrf.mxu3 }
 0x127   : > { %v13211_v27 = vpop.f32.mrf.mxu2  ;;  %v13223_v31 = vpop.f32.mrf.mxu0 }
 0x128   : > { %18092 = vst [vmem:[#allocation48_spill] sm:$0xff] %v13211_v27  ;;  %v13228_v15 = vpop.f32.mrf.mxu1  ;;  %v2503_v27 = vld [vmem:[%s12661_s30 + $0x44] sm:$0xff] }
 0x129   : > { %18094 = vst [vmem:[#allocation50_spill] sm:$0xff] %v13223_v31 }
 0x12a   : > { %18095 = vst [vmem:[#allocation51_spill] sm:$0xff] %v13228_v15  ;;  %11504 = vmatmul.msk.f32.gmra.mxu3 %vm387_vm1, %v12739_v35  ;;  %11546 = vmatmul.msk.f32.gmra.mxu0 %vm387_vm1, %v1803_v38  ;;  %v13248_v15 = vld [vmem:[%s18029_s10 + $0x78] sm:$0xff] }
 0x12b   : > { %11589 = vmatmul.msk.f32.gmra.mxu1 %vm387_vm1, %v2501_v9  ;;  %18097 = vst [vmem:[#allocation53_spill] sm:$0xff] %v13248_v15  ;;  %v1804_v38 = vld [vmem:[%s12661_s30 + $0x3b] sm:$0xff]  ;;  %3855 = vperm.xlu1 %12545, %v13243_v26  }
 0x12c   : > { %11632 = vmatmul.msk.f32.gmra.mxu2 %vm387_vm1, %v2503_v27  ;;  %3880 = vperm.xlu0 %12544, %v13248_v15  }
 0x12d   : > { %v13236_v49 = vpop.f32.mrf.mxu3 }
 0x12f   : > { %v13238_v31 = vpop.f32.mrf.mxu2  ;;  %v13250_v35 = vpop.f32.mrf.mxu0 }
 0x130   : > { %18096 = vst [vmem:[#allocation52_spill] sm:$0xff] %v13238_v31  ;;  %v13255_v9 = vpop.f32.mrf.mxu1  ;;  %v2504_v31 = vld [vmem:[%s12661_s30 + $0x4c] sm:$0xff] }
 0x131   : > { %18098 = vst [vmem:[#allocation54_spill] sm:$0xff] %v13250_v35  ;;  %v1070_v35 = vadd.f32 %v13039_v59, %v12857_v12  ;;  %v1073_v59 = vadd.f32 %v13063_v30, %v12876_v22  ;;  %v1806_v30 = vld [vmem:[%s12661_s30 + $0x4b] sm:$0xff] }
 0x132   : > { %18099 = vst [vmem:[#allocation55_spill] sm:$0xff] %v13255_v9  ;;  %11505 = vmatmul.msk.f32.gmra.mxu3 %vm387_vm1, %v12750_v39  ;;  %11547 = vmatmul.msk.f32.gmra.mxu0 %vm387_vm1, %v1804_v38  ;;  %v13272_v9 = vld [vmem:[%s18029_s10 + $0x68] sm:$0xff]  ;;  %v13277_v39 = vld [vmem:[%s18029_s10 + $0x90] sm:$0xff] }
 0x133   : > { %11590 = vmatmul.msk.f32.gmra.mxu1 %vm387_vm1, %v2502_v23  ;;  %v1805_v23 = vld [vmem:[%s12661_s30 + $0x43] sm:$0xff]  ;;  %3870 = vperm.xlu1 %12545, %v13272_v9  }
 0x134   : > { %11633 = vmatmul.msk.f32.gmra.mxu2 %vm387_vm1, %v2504_v31  ;;  %3895 = vperm.xlu0 %12544, %v13277_v39  }
 0x135   : > { %v1378_v61 = vpop.f32.mrf.mxu3 }
 0x136   : > { %v13267_v15 = vadd.f32 %v1378_v61, %v1070_v35  ;;  %v2505_v61 = vld [vmem:[%s12661_s30 + $0x54] sm:$0xff] }
 0x137   : > { %v13265_v57 = vpop.f32.mrf.mxu2  ;;  %v13279_v38 = vpop.f32.mrf.mxu0 }
 0x138   : > { %18100 = vst [vmem:[#allocation56_spill] sm:$0xff] %v13267_v15  ;;  %v13284_v12 = vpop.f32.mrf.mxu1 }
 0x139   : > { %18101 = vst [vmem:[#allocation57_spill] sm:$0xff] %v13279_v38 }
 0x13a   : > { %18102 = vst [vmem:[#allocation58_spill] sm:$0xff] %v13284_v12  ;;  %11506 = vmatmul.msk.f32.gmra.mxu3 %vm387_vm1, %v12761_v43  ;;  %11548 = vmatmul.msk.f32.gmra.mxu0 %vm387_vm1, %v1805_v23  ;;  %v13301_v12 = vld [vmem:[%s18029_s10 + $0x20] sm:$0xff] }
 0x13b   : > { %11591 = vmatmul.msk.f32.gmra.mxu1 %vm387_vm1, %v2503_v27  ;;  %v13306_v43 = vld [vmem:[%s18029_s10 + $0x80] sm:$0xff]  ;;  %v13311_v27 = vld [vmem:[%s18029_s10 + $0xa8] sm:$0xff]  ;;  %3825 = vperm.xlu2 %12546, %v13301_v12  }
 0x13c   : > { %11634 = vmatmul.msk.f32.gmra.mxu2 %vm387_vm1, %v2505_v61  ;;  %3885 = vperm.xlu1 %12545, %v13306_v43  }
 0x13d   : > { %v1381_v35 = vpop.f32.mrf.mxu3  ;;  %3910 = vperm.xlu0 %12544, %v13311_v27  }
 0x13e   : > { %v13296_v38 = vadd.f32 %v1381_v35, %v1073_v59  ;;  %v2506_v59 = vld [vmem:[%s12661_s30 + $0x5c] sm:$0xff]  ;;  %v1076_v35 = vadd.f32 %v13079_v62, %v12895_v33  ;;  %v1807_v62 = vld [vmem:[%s12661_s30 + $0x53] sm:$0xff] }
 0x13f   : > { %v13294_v15 = vpop.f32.mrf.mxu2  ;;  %v13313_v22 = vpop.f32.mrf.mxu0 }
 0x140   : > { %18103 = vst [vmem:[#allocation59_spill] sm:$0xff] %v13294_v15  ;;  %v13318_v23 = vpop.f32.mrf.mxu1  ;;  %v13336_v15 = vld [vmem:[%s18029_s10 + $0x28] sm:$0xff] }
 0x141   : > { %18104 = vst [vmem:[#allocation60_spill] sm:$0xff] %v13296_v38 }
 0x142   : > { %18105 = vst [vmem:[#allocation61_spill] sm:$0xff] %v13313_v22  ;;  %11507 = vmatmul.msk.f32.gmra.mxu3 %vm387_vm1, %v12772_v47  ;;  %11549 = vmatmul.msk.f32.gmra.mxu0 %vm387_vm1, %v1806_v30  ;;  %v13341_v47 = vld [vmem:[%s18029_s10 + $0x98] sm:$0xff]  ;;  %v2507_v30 = vld [vmem:[%s12661_s30 + $0x64] sm:$0xff] }
 0x143   : > { %18106 = vst [vmem:[#allocation62_spill] sm:$0xff] %v13318_v23  ;;  %11592 = vmatmul.msk.f32.gmra.mxu1 %vm387_vm1, %v2504_v31  ;;  %v13346_v31 = vld [vmem:[%s18029_s10 + $0xc0] sm:$0xff]  ;;  %3830 = vperm.xlu2 %12546, %v13336_v15  }
 0x144   : > { %11635 = vmatmul.msk.f32.gmra.mxu2 %vm387_vm1, %v2506_v59  ;;  %3900 = vperm.xlu1 %12545, %v13341_v47  }
 0x145   : > { %v1384_v38 = vpop.f32.mrf.mxu3  ;;  %3925 = vperm.xlu0 %12544, %v13346_v31  }
 0x146   : > { %v13331_v23 = vadd.f32 %v1384_v38, %v1076_v35  ;;  %v1079_v35 = vadd.f32 %v13095_v37, %v12914_v44  ;;  %v1808_v37 = vld [vmem:[%s12661_s30 + $0x5b] sm:$0xff] }
 0x147   : > { %v13329_v22 = vpop.f32.mrf.mxu2  ;;  %v13348_v33 = vpop.f32.mrf.mxu0 }
 0x148   : > { %18107 = vst [vmem:[#allocation63_spill] sm:$0xff] %v13329_v22  ;;  %v13353_v38 = vpop.f32.mrf.mxu1  ;;  %v13371_v22 = vld [vmem:[%s18029_s10 + $0x40] sm:$0xff] }
 0x149   : > { %18108 = vst [vmem:[#allocation64_spill] sm:$0xff] %v13331_v23 }
 0x14a   : > { %18109 = vst [vmem:[#allocation65_spill] sm:$0xff] %v13348_v33  ;;  %11508 = vmatmul.msk.f32.gmra.mxu3 %vm387_vm1, %v12783_v51  ;;  %11550 = vmatmul.msk.f32.gmra.mxu0 %vm387_vm1, %v1807_v62  ;;  %v13376_v51 = vld [vmem:[%s18029_s10 + $0xb0] sm:$0xff] }
 0x14b   : > { %18110 = vst [vmem:[#allocation66_spill] sm:$0xff] %v13353_v38  ;;  %11593 = vmatmul.msk.f32.gmra.mxu1 %vm387_vm1, %v2505_v61  ;;  %v13381_v61 = vld [vmem:[%s18029_s10 + $0xd8] sm:$0xff]  ;;  %3845 = vperm.xlu2 %12546, %v13371_v22   ;;  %v2508_v62 = vld [vmem:[%s12661_s30 + $0x6c] sm:$0xff] }
 0x14c   : > { %11636 = vmatmul.msk.f32.gmra.mxu2 %vm387_vm1, %v2507_v30  ;;  %3915 = vperm.xlu1 %12545, %v13376_v51  }
 0x14d   : > { %v1387_v23 = vpop.f32.mrf.mxu3  ;;  %3940 = vperm.xlu0 %12544, %v13381_v61  }
 0x14e   : > { %v13366_v38 = vadd.f32 %v1387_v23, %v1079_v35  ;;  %v1082_v35 = vadd.f32 %v13111_v52, %v12933_v54  ;;  %v1809_v52 = vld [vmem:[%s12661_s30 + $0x63] sm:$0xff] }
 0x14f   : > { %v13364_v33 = vpop.f32.mrf.mxu2  ;;  %v13383_v44 = vpop.f32.mrf.mxu0 }
 0x150   : > { %18111 = vst [vmem:[#allocation67_spill] sm:$0xff] %v13364_v33  ;;  %v13388_v23 = vpop.f32.mrf.mxu1  ;;  %v13406_v33 = vld [vmem:[%s18029_s10 + $0x58] sm:$0xff] }
 0x151   : > { %18112 = vst [vmem:[#allocation68_spill] sm:$0xff] %v13366_v38 }
 0x152   : > { %18113 = vst [vmem:[#allocation69_spill] sm:$0xff] %v13383_v44  ;;  %11509 = vmatmul.msk.f32.gmra.mxu3 %vm387_vm1, %v12794_v55  ;;  %11551 = vmatmul.msk.f32.gmra.mxu0 %vm387_vm1, %v1808_v37  ;;  %v13411_v55 = vld [vmem:[%s18029_s10 + $0xc8] sm:$0xff]  ;;  %v2509_v37 = vld [vmem:[%s12661_s30 + $0x74] sm:$0xff] }
 0x153   : > { %18114 = vst [vmem:[#allocation70_spill] sm:$0xff] %v13388_v23  ;;  %11594 = vmatmul.msk.f32.gmra.mxu1 %vm387_vm1, %v2506_v59  ;;  %v13416_v59 = vld [vmem:[%s18029_s10 + $0xf0] sm:$0xff]  ;;  %3860 = vperm.xlu2 %12546, %v13406_v33  }
 0x154   : > { %11637 = vmatmul.msk.f32.gmra.mxu2 %vm387_vm1, %v2508_v62  ;;  %3930 = vperm.xlu1 %12545, %v13411_v55  }
 0x155   : > { %v1390_v38 = vpop.f32.mrf.mxu3  ;;  %3955 = vperm.xlu0 %12544, %v13416_v59  }
 0x156   : > { %v13401_v23 = vadd.f32 %v1390_v38, %v1082_v35  ;;  %v1085_v35 = vadd.f32 %v13133_v20, %v12952_v1  ;;  %v1810_v20 = vld [vmem:[%s12661_s30 + $0x6b] sm:$0xff] }
 0x157   : > { %v13399_v44 = vpop.f32.mrf.mxu2  ;;  %v13418_v54 = vpop.f32.mrf.mxu0 }
 0x158   : > { %18115 = vst [vmem:[#allocation71_spill] sm:$0xff] %v13399_v44  ;;  %v13423_v38 = vpop.f32.mrf.mxu1  ;;  %v13441_v44 = vld [vmem:[%s18029_s10 + $0x70] sm:$0xff] }
 0x159   : > { %18116 = vst [vmem:[#allocation72_spill] sm:$0xff] %v13401_v23 }
 0x15a   : > { %18117 = vst [vmem:[#allocation73_spill] sm:$0xff] %v13418_v54  ;;  %11510 = vmatmul.msk.f32.gmra.mxu3 %vm387_vm1, %v12809_v60  ;;  %11552 = vmatmul.msk.f32.gmra.mxu0 %vm387_vm1, %v1809_v52  ;;  %v13446_v60 = vld [vmem:[%s18029_s10 + $0xe0] sm:$0xff] }
 0x15b   : > { %18118 = vst [vmem:[#allocation74_spill] sm:$0xff] %v13423_v38  ;;  %11595 = vmatmul.msk.f32.gmra.mxu1 %vm387_vm1, %v2507_v30  ;;  %v13451_v30 = vld [vmem:[%s18029_s10 + $0x108] sm:$0xff]  ;;  %3875 = vperm.xlu2 %12546, %v13441_v44   ;;  %v2510_v52 = vld [vmem:[%s12661_s30 + $0x7c] sm:$0xff] }
 0x15c   : > { %11638 = vmatmul.msk.f32.gmra.mxu2 %vm387_vm1, %v2509_v37  ;;  %3945 = vperm.xlu1 %12545, %v13446_v60  }
 0x15d   : > { %v1393_v23 = vpop.f32.mrf.mxu3  ;;  %3970 = vperm.xlu0 %12544, %v13451_v30  }
 0x15e   : > { %v13436_v38 = vadd.f32 %v1393_v23, %v1085_v35  ;;  %v1088_v35 = vadd.f32 %v13155_v28, %v12971_v17  ;;  %v1811_v28 = vld [vmem:[%s12661_s30 + $0x73] sm:$0xff] }
 0x15f   : > { %v13434_v54 = vpop.f32.mrf.mxu2  ;;  %v13453_v1 = vpop.f32.mrf.mxu0 }
 0x160   : > { %18119 = vst [vmem:[#allocation75_spill] sm:$0xff] %v13434_v54  ;;  %v13458_v23 = vpop.f32.mrf.mxu1  ;;  %v13476_v54 = vld [vmem:[%s18029_s10 + $0x88] sm:$0xff] }
 0x161   : > { %18120 = vst [vmem:[#allocation76_spill] sm:$0xff] %v13436_v38 }
 0x162   : > { %18121 = vst [vmem:[#allocation77_spill] sm:$0xff] %v13453_v1  ;;  %11511 = vmatmul.msk.f32.gmra.mxu3 %vm387_vm1, %v12820_v0  ;;  %11553 = vmatmul.msk.f32.gmra.mxu0 %vm387_vm1, %v1810_v20  ;;  %v13481_v0 = vld [vmem:[%s18029_s10 + $0xf8] sm:$0xff]  ;;  %v2511_v20 = vld [vmem:[%s12661_s30 + $0x84] sm:$0xff] }
 0x163   : > { %18122 = vst [vmem:[#allocation78_spill] sm:$0xff] %v13458_v23  ;;  %11596 = vmatmul.msk.f32.gmra.mxu1 %vm387_vm1, %v2508_v62  ;;  %v13486_v62 = vld [vmem:[%s18029_s10 + $0x120] sm:$0xff]  ;;  %3890 = vperm.xlu2 %12546, %v13476_v54  }
 0x164   : > { %11639 = vmatmul.msk.f32.gmra.mxu2 %vm387_vm1, %v2510_v52  ;;  %3960 = vperm.xlu1 %12545, %v13481_v0  }
 0x165   : > { %v1396_v38 = vpop.f32.mrf.mxu3  ;;  %3985 = vperm.xlu0 %12544, %v13486_v62  }
 0x166   : > { %v13471_v23 = vadd.f32 %v1396_v38, %v1088_v35  ;;  %v11755_v35 = vld [vmem:[%s18023_s4 + $0x4] sm:$0xf] }
 0x167   : > { %v13469_v1 = vpop.f32.mrf.mxu2  ;;  %v13488_v17 = vpop.f32.mrf.mxu0  ;;  %11756 = vmatpush.msk.msra.mxu1 %vm689_vm0, %v11755_v35  ;;  %v1812_v35 = vld [vmem:[%s12661_s30 + $0x7b] sm:$0xff] }
 0x168   : > { %18123 = vst [vmem:[#allocation79_spill] sm:$0xff] %v13469_v1  ;;  %v13493_v38 = vpop.f32.mrf.mxu1  ;;  %v13550_v1 = vld [vmem:[%s18029_s10 + $0xb8] sm:$0xff] }
 0x169   : > { %18124 = vst [vmem:[#allocation80_spill] sm:$0xff] %v13471_v23  ;;  %v1091_v23 = vadd.f32 %v13182_v3, %v12987_v48  ;;  %v13525_v3 = vld [vmem:[%s18029_s10 + $0x138] sm:$0xff] }
 0x16a   : > { %18125 = vst [vmem:[#allocation81_spill] sm:$0xff] %v13488_v17  ;;  %11512 = vmatmul.msk.f32.gmra.mxu3 %vm387_vm1, %v12831_v4  ;;  %11554 = vmatmul.msk.f32.gmra.mxu0 %vm387_vm1, %v1811_v28  ;;  %v13515_v28 = vld [vmem:[%s18029_s10 + $0xa0] sm:$0xff] }
 0x16b   : > { %18126 = vst [vmem:[#allocation82_spill] sm:$0xff] %v13493_v38  ;;  %11597 = vmatmul.msk.f32.gmra.mxu1 %vm387_vm1, %v2509_v37  ;;  %v13520_v37 = vld [vmem:[%s18029_s10 + $0x110] sm:$0xff]  ;;  %3905 = vperm.xlu2 %12546, %v13515_v28  }
 0x16c   : > { %11640 = vmatmul.msk.f32.gmra.mxu2 %vm387_vm1, %v2511_v20  ;;  %3975 = vperm.xlu1 %12545, %v13520_v37  }
 0x16d   : > { %v1399_v38 = vpop.f32.mrf.mxu3  ;;  %4000 = vperm.xlu0 %12544, %v13525_v3  }
 0x16e   : > { %v13510_v4 = vadd.f32 %v1399_v38, %v1091_v23  ;;  %v2512_v38 = vld [vmem:[%s12661_s30 + $0x8c] sm:$0xff] }
 0x16f   : > { %v13508_v17 = vpop.f32.mrf.mxu2  ;;  %v13527_v48 = vpop.f32.mrf.mxu0 }
 0x170   : > { %18127 = vst [vmem:[#allocation83_spill] sm:$0xff] %v13508_v17  ;;  %v13532_v23 = vpop.f32.mrf.mxu1 }
 0x171   : > { %18128 = vst [vmem:[#allocation84_spill] sm:$0xff] %v13510_v4  ;;  %v1094_v4 = vadd.f32 %v13209_v2, %v13003_v11  ;;  %v2513_v11 = vld [vmem:[%s12661_s30 + $0x94] sm:$0xff] }
 0x172   : > { %18129 = vst [vmem:[#allocation85_spill] sm:$0xff] %v13527_v48  ;;  %11513 = vmatmul.msk.f32.gmra.mxu3 %vm387_vm1, %v12846_v10  ;;  %11555 = vmatmul.msk.f32.gmra.mxu0 %vm387_vm1, %v1812_v35  ;;  %v13555_v10 = vld [vmem:[%s18029_s10 + $0x128] sm:$0xff] }
 0x173   : > { %18130 = vst [vmem:[#allocation86_spill] sm:$0xff] %v13532_v23  ;;  %11598 = vmatmul.msk.f32.gmra.mxu1 %vm387_vm1, %v2510_v52  ;;  %v1813_v52 = vld [vmem:[%s12661_s30 + $0x83] sm:$0xff]  ;;  %3920 = vperm.xlu2 %12546, %v13550_v1  }
 0x174   : > { %11641 = vmatmul.msk.f32.gmra.mxu2 %vm387_vm1, %v2512_v38  ;;  %3990 = vperm.xlu1 %12545, %v13555_v10  }
 0x175   : > { %v1402_v48 = vpop.f32.mrf.mxu3  ;;  %7418 = vperm.xlu0 %12544, %v13140_v41   ;;  %v13580_v41 = vld [vmem:[%s18029_s10 + $0xd0] sm:$0xff] }
 0x176   : > { %v13545_v23 = vadd.f32 %v1402_v48, %v1094_v4  ;;  %v1097_v4 = vadd.f32 %v13236_v49, %v13019_v6  ;;  %v2514_v49 = vld [vmem:[%s12661_s30 + $0x9c] sm:$0xff] }
 0x177   : > { %v13543_v17 = vpop.f32.mrf.mxu2  ;;  %v13557_v35 = vpop.f32.mrf.mxu0 }
 0x178   : > { %18131 = vst [vmem:[#allocation87_spill] sm:$0xff] %v13545_v23  ;;  %v13562_v2 = vpop.f32.mrf.mxu1 }
 0x179   : > { %18132 = vst [vmem:[#allocation88_spill] sm:$0xff] %v13562_v2 }
 0x17a   : > { %11514 = vmatmul.msk.f32.gmra.mxu3 %vm387_vm1, %v12869_v21  ;;  %11556 = vmatmul.msk.f32.gmra.mxu0 %vm387_vm1, %v1813_v52  ;;  %v13585_v21 = vld [vmem:[%s18029_s10 + $0x140] sm:$0xff] }
 0x17b   : > { %11599 = vmatmul.msk.f32.gmra.mxu1 %vm387_vm1, %v2511_v20  ;;  %v1814_v20 = vld [vmem:[%s12661_s30 + $0x8b] sm:$0xff]  ;;  %3935 = vperm.xlu2 %12546, %v13580_v41  }
 0x17c   : > { %11642 = vmatmul.msk.f32.gmra.mxu2 %vm387_vm1, %v2513_v11  ;;  %4005 = vperm.xlu1 %12545, %v13585_v21  }
 0x17d   : > { %v1405_v48 = vpop.f32.mrf.mxu3  ;;  %7433 = vperm.xlu0 %12544, %v13301_v12   ;;  %v13609_v12 = vld [vmem:[%s18029_s10 + $0xe8] sm:$0xff] }
 0x17e   : > { %v13575_v2 = vadd.f32 %v1405_v48, %v1097_v4  ;;  %v977_v4 = vadd.f32 %v12842_v8, %v12838_v5  ;;  %v1815_v8 = vld [vmem:[%s12661_s30 + $0x93] sm:$0xff] }
 0x17f   : > { %v13573_v23 = vpop.f32.mrf.mxu2  ;;  %v13587_v52 = vpop.f32.mrf.mxu0 }
 0x180   : > { %18133 = vst [vmem:[#allocation89_spill] sm:$0xff] %v13575_v2  ;;  %v13592_v6 = vpop.f32.mrf.mxu1  ;;  %v1408_v48 = vadd.f32 %v12859_v13, %v977_v4 }
 0x181   : > { %18134 = vst [vmem:[#allocation90_spill] sm:$0xff] %v13587_v52 }
 0x182   : > { %18135 = vst [vmem:[#allocation91_spill] sm:$0xff] %v13592_v6  ;;  %11515 = vmatmul.msk.f32.gmra.mxu3 %vm387_vm1, %v12888_v32  ;;  %11557 = vmatmul.msk.f32.gmra.mxu0 %vm387_vm1, %v1814_v20  ;;  %v2515_v20 = vld [vmem:[%s12661_s30 + $0xa4] sm:$0xff] }
 0x183   : > { %11600 = vmatmul.msk.f32.gmra.mxu1 %vm387_vm1, %v2512_v38  ;;  %3950 = vperm.xlu2 %12546, %v13609_v12   ;;  %v980_v38 = vadd.f32 %v12865_v18, %v12861_v14  ;;  %v13627_v14 = vld [vmem:[%s18029_s10 + $0x100] sm:$0xff] }
 0x184   : > { %11643 = vmatmul.msk.f32.gmra.mxu2 %vm387_vm1, %v2514_v49  ;;  %7423 = vperm.xlu1 %12545, %v13162_v19  }
 0x185   : > { %v1635_v2 = vpop.f32.mrf.mxu3  ;;  %7448 = vperm.xlu0 %12544, %v13216_v58   ;;  %v1409_v19 = vadd.f32 %v12878_v24, %v980_v38 }
 0x186   : > { %v1758_v52 = vadd.f32 %v1635_v2, %v1408_v48 }
 0x187   : > { %v13604_v6 = vpop.f32.mrf.mxu2  ;;  %v1985_v5 = vpop.f32.mrf.mxu0 }
 0x188   : > { %v2335_v32 = vpop.f32.mrf.mxu1  ;;  %v2108_v13 = vadd.f32 %v1985_v5, %v1758_v52  ;;  %v1816_v52 = vld [vmem:[%s12661_s30 + $0x9b] sm:$0xff]  ;;  %v2516_v5 = vld [vmem:[%s12661_s30 + $0xac] sm:$0xff] }
 0x18a   : > { %11516 = vmatmul.msk.f32.gmra.mxu3 %vm387_vm1, %v12907_v42  ;;  %11558 = vmatmul.msk.f32.gmra.mxu0 %vm387_vm1, %v1815_v8  ;;  %v2458_v2 = vadd.f32 %v2335_v32, %v2108_v13  ;;  %v983_v8 = vadd.f32 %v12884_v29, %v12880_v25  ;;  %v13647_v25 = vld [vmem:[%s18029_s10 + $0x118] sm:$0xff] }
 0x18b   : > { %11601 = vmatmul.msk.f32.gmra.mxu1 %vm387_vm1, %v2513_v11  ;;  %3965 = vperm.xlu2 %12546, %v13627_v14  }
 0x18c   : > { %11644 = vmatmul.msk.f32.gmra.mxu2 %vm387_vm1, %v2515_v20  ;;  %7438 = vperm.xlu1 %12545, %v13336_v15   ;;  %v1410_v32 = vadd.f32 %v12897_v34, %v983_v8 }
 0x18d   : > { %v1638_v4 = vpop.f32.mrf.mxu3  ;;  %7463 = vperm.xlu0 %12544, %v13243_v26  }
 0x18e   : > { %v1759_v48 = vadd.f32 %v1638_v4, %v1409_v19  ;;  %v2517_v4 = vld [vmem:[%s12661_s30 + $0xb4] sm:$0xff] }
 0x18f   : > { %v2685_v58 = vpop.f32.mrf.mxu2  ;;  %v1988_v42 = vpop.f32.mrf.mxu0 }
 0x190   : > { %v13629_v18 = vadd.f32 %v2685_v58, %v2458_v2  ;;  %v2338_v11 = vpop.f32.mrf.mxu1  ;;  %v2109_v24 = vadd.f32 %v1988_v42, %v1759_v48  ;;  %v1817_v2 = vld [vmem:[%s12661_s30 + $0xa3] sm:$0xff]  ;;  %v986_v48 = vadd.f32 %v12903_v40, %v12899_v36  ;;  %v13667_v36 = vld [vmem:[%s18029_s10 + $0x130] sm:$0xff] }
 0x192   : > { %11517 = vmatmul.msk.f32.gmra.mxu3 %vm387_vm1, %v12926_v53  ;;  %11559 = vmatmul.msk.f32.gmra.mxu0 %vm387_vm1, %v1816_v52  ;;  %v2459_v13 = vadd.f32 %v2338_v11, %v2109_v24  ;;  %v1411_v58 = vadd.f32 %v12916_v45, %v986_v48  ;;  %v1818_v24 = vld [vmem:[%s12661_s30 + $0xab] sm:$0xff]  ;;  %v2518_v45 = vld [vmem:[%s12661_s30 + $0xbc] sm:$0xff] }
 0x193   : > { %11602 = vmatmul.msk.f32.gmra.mxu1 %vm387_vm1, %v2514_v49  ;;  %3980 = vperm.xlu2 %12546, %v13647_v25  }
 0x194   : > { %11645 = vmatmul.msk.f32.gmra.mxu2 %vm387_vm1, %v2516_v5  ;;  %7453 = vperm.xlu1 %12545, %v13371_v22  }
 0x195   : > { %v1641_v38 = vpop.f32.mrf.mxu3  ;;  %7478 = vperm.xlu0 %12544, %v13272_v9  }
 0x196   : > { %v1760_v19 = vadd.f32 %v1641_v38, %v1410_v32  ;;  %v989_v32 = vadd.f32 %v12922_v50, %v12918_v46  ;;  %v1470_v46 = vld [vmem:[%s12661_s30 + $0xba] sm:$0xff] }
 0x197   : > { %v2688_v26 = vpop.f32.mrf.mxu2  ;;  %v1991_v53 = vpop.f32.mrf.mxu0  ;;  %v1819_v50 = vld [vmem:[%s12661_s30 + $0xb3] sm:$0xff] }
 0x198   : > { %v13649_v29 = vadd.f32 %v2688_v26, %v2459_v13  ;;  %v2341_v49 = vpop.f32.mrf.mxu1  ;;  %v2110_v34 = vadd.f32 %v1991_v53, %v1760_v19 }
 0x19a   : > { %11518 = vmatmul.msk.f32.gmra.mxu3 %vm387_vm1, %v12945_v63  ;;  %11560 = vmatmul.msk.f32.gmra.mxu0 %vm387_vm1, %v1817_v2  ;;  %v2460_v42 = vadd.f32 %v2341_v49, %v2110_v34  ;;  %v2519_v2 = vld [vmem:[%s12661_s30 + $0xc4] sm:$0xff] }
 0x19b   : > { %11603 = vmatmul.msk.f32.gmra.mxu1 %vm387_vm1, %v2515_v20  ;;  %3995 = vperm.xlu2 %12546, %v13667_v36   ;;  %v18137_v49 = vld [vmem:[#allocation5_spill] sm:$0xff] }
 0x19c   : > { %11646 = vmatmul.msk.f32.gmra.mxu2 %vm387_vm1, %v2517_v4  ;;  %7468 = vperm.xlu1 %12545, %v13406_v33   ;;  %v1412_v33 = vadd.f32 %v12935_v56, %v989_v32  ;;  %v18140_v32 = vld [vmem:[#allocation7_spill] sm:$0xff] }
 0x19d   : > { %v1644_v52 = vpop.f32.mrf.mxu3  ;;  %7493 = vperm.xlu0 %12544, %v13306_v43  }
 0x19e   : > { %v1761_v11 = vadd.f32 %v1644_v52, %v1411_v58 }
 0x19f   : > { %v2691_v9 = vpop.f32.mrf.mxu2  ;;  %v1994_v63 = vpop.f32.mrf.mxu0 }
 0x1a0   : > { %v13669_v40 = vadd.f32 %v2691_v9, %v2460_v42  ;;  %v2344_v20 = vpop.f32.mrf.mxu1  ;;  %v2111_v8 = vadd.f32 %v1994_v63, %v1761_v11  ;;  %v1471_v9 = vld [vmem:[%s12661_s30 + $0xc2] sm:$0xff] }
 0x1a1   : > { %v1820_v63 = vld [vmem:[%s12661_s30 + $0xbb] sm:$0xff] }
 0x1a2   : > { %11519 = vmatmul.msk.f32.gmra.mxu3 %vm387_vm1, %v12964_v16  ;;  %11561 = vmatmul.msk.f32.gmra.mxu0 %vm387_vm1, %v1818_v24  ;;  %v2461_v13 = vadd.f32 %v2344_v20, %v2111_v8  ;;  %v18139_v24 = vld [vmem:[#allocation44_spill] sm:$0xff]  ;;  %v2520_v8 = vld [vmem:[%s12661_s30 + $0xcc] sm:$0xff] }
 0x1a3   : > { %11604 = vmatmul.msk.f32.gmra.mxu1 %vm387_vm1, %v2516_v5  ;;  %7413 = vperm.xlu2 %12546, %v13118_v7   ;;  %v18136_v5 = vld [vmem:[#allocation4_spill] sm:$0xff]  ;;  %v18138_v7 = vld [vmem:[#allocation6_spill] sm:$0xff] }
 0x1a4   : > { %11647 = vmatmul.msk.f32.gmra.mxu2 %vm387_vm1, %v2518_v45  ;;  %7483 = vperm.xlu1 %12545, %v13441_v44   ;;  %v992_v34 = vadd.f32 %v18137_v49, %v18136_v5  ;;  %v18143_v5 = vld [vmem:[#allocation40_spill] sm:$0xff] }
 0x1a5   : > { %v1647_v38 = vpop.f32.mrf.mxu3  ;;  %7508 = vperm.xlu0 %12544, %v13341_v47  }
 0x1a6   : > { %v1762_v19 = vadd.f32 %v1647_v38, %v1412_v33  ;;  %v1413_v44 = vadd.f32 %v18138_v7, %v992_v34  ;;  %v18141_v33 = vld [vmem:[#allocation8_spill] sm:$0xff]  ;;  %v2521_v34 = vld [vmem:[%s12661_s30 + $0xd4] sm:$0xff] }
 0x1a7   : > { %v2694_v43 = vpop.f32.mrf.mxu2  ;;  %v1997_v53 = vpop.f32.mrf.mxu0  ;;  %v18144_v7 = vld [vmem:[#allocation10_spill] sm:$0xff] }
 0x1a8   : > { %v13684_v26 = vadd.f32 %v2694_v43, %v2461_v13  ;;  %v2347_v16 = vpop.f32.mrf.mxu1  ;;  %v2112_v56 = vadd.f32 %v1997_v53, %v1762_v19  ;;  %v995_v13 = vadd.f32 %v18141_v33, %v18140_v32  ;;  %v2522_v33 = vld [vmem:[%s12661_s30 + $0xdc] sm:$0xff] }
 0x1aa   : > { %11520 = vmatmul.msk.f32.gmra.mxu3 %vm387_vm1, %v1470_v46  ;;  %11562 = vmatmul.msk.f32.gmra.mxu0 %vm387_vm1, %v1819_v50  ;;  %v2462_v48 = vadd.f32 %v2347_v16, %v2112_v56  ;;  %v1472_v16 = vld [vmem:[%s12661_s30 + $0xca] sm:$0xff] }
 0x1ab   : > { %11605 = vmatmul.msk.f32.gmra.mxu1 %vm387_vm1, %v2517_v4  ;;  %7428 = vperm.xlu2 %12546, %v18139_v24   ;;  %v1821_v56 = vld [vmem:[%s12661_s30 + $0xc3] sm:$0xff]  ;;  %v1473_v24 = vld [vmem:[%s12661_s30 + $0xd2] sm:$0xff] }
 0x1ac   : > { %11648 = vmatmul.msk.f32.gmra.mxu2 %vm387_vm1, %v2519_v2  ;;  %7498 = vperm.xlu1 %12545, %v13476_v54   ;;  %v18142_v54 = vld [vmem:[#allocation9_spill] sm:$0xff] }
 0x1ad   : > { %v1650_v58 = vpop.f32.mrf.mxu3  ;;  %7523 = vperm.xlu0 %12544, %v13376_v51   ;;  %v1414_v38 = vadd.f32 %v18142_v54, %v995_v13  ;;  %v18148_v13 = vld [vmem:[#allocation13_spill] sm:$0xff]  ;;  %v18149_v54 = vld [vmem:[#allocation14_spill] sm:$0xff] }
 0x1ae   : > { %v1763_v42 = vadd.f32 %v1650_v58, %v1413_v44  ;;  %v18145_v44 = vld [vmem:[#allocation11_spill] sm:$0xff] }
 0x1af   : > { %v2697_v52 = vpop.f32.mrf.mxu2  ;;  %v2000_v11 = vpop.f32.mrf.mxu0 }
 0x1b0   : > { %v13699_v47 = vadd.f32 %v2697_v52, %v2462_v48  ;;  %v2350_v20 = vpop.f32.mrf.mxu1  ;;  %v2113_v4 = vadd.f32 %v2000_v11, %v1763_v42  ;;  %v998_v48 = vadd.f32 %v18145_v44, %v18144_v7  ;;  %v2523_v7 = vld [vmem:[%s12661_s30 + $0xe4] sm:$0xff] }
 0x1b1   : > { %v18152_v44 = vld [vmem:[#allocation16_spill] sm:$0xff] }
 0x1b2   : > { %11521 = vmatmul.msk.f32.gmra.mxu3 %vm387_vm1, %v1471_v9  ;;  %11563 = vmatmul.msk.f32.gmra.mxu0 %vm387_vm1, %v1820_v63  ;;  %v2463_v19 = vadd.f32 %v2350_v20, %v2113_v4  ;;  %v1822_v20 = vld [vmem:[%s12661_s30 + $0xcb] sm:$0xff] }
 0x1b3   : > { %11606 = vmatmul.msk.f32.gmra.mxu1 %vm387_vm1, %v2518_v45  ;;  %7443 = vperm.xlu2 %12546, %v18143_v5   ;;  %v18147_v4 = vld [vmem:[#allocation45_spill] sm:$0xff]  ;;  %v1823_v5 = vld [vmem:[%s12661_s30 + $0xd3] sm:$0xff] }
 0x1b4   : > { %11649 = vmatmul.msk.f32.gmra.mxu2 %vm387_vm1, %v2520_v8  ;;  %7513 = vperm.xlu1 %12545, %v13515_v28   ;;  %v18146_v28 = vld [vmem:[#allocation12_spill] sm:$0xff] }
 0x1b5   : > { %v1653_v43 = vpop.f32.mrf.mxu3  ;;  %7538 = vperm.xlu0 %12544, %v13411_v55   ;;  %v1415_v58 = vadd.f32 %v18146_v28, %v998_v48  ;;  %v18153_v48 = vld [vmem:[#allocation17_spill] sm:$0xff] }
 0x1b6   : > { %v1764_v53 = vadd.f32 %v1653_v43, %v1414_v38  ;;  %v1001_v38 = vadd.f32 %v18149_v54, %v18148_v13  ;;  %v1004_v28 = vadd.f32 %v18153_v48, %v18152_v44  ;;  %v18156_v13 = vld [vmem:[#allocation19_spill] sm:$0xff]  ;;  %v18157_v54 = vld [vmem:[#allocation20_spill] sm:$0xff] }
 0x1b7   : > { %v2700_v46 = vpop.f32.mrf.mxu2  ;;  %v2003_v50 = vpop.f32.mrf.mxu0 }
 0x1b8   : > { %v13714_v51 = vadd.f32 %v2700_v46, %v2463_v19  ;;  %v2353_v49 = vpop.f32.mrf.mxu1  ;;  %v2114_v45 = vadd.f32 %v2003_v50, %v1764_v53 }
 0x1ba   : > { %11522 = vmatmul.msk.f32.gmra.mxu3 %vm387_vm1, %v1472_v16  ;;  %11564 = vmatmul.msk.f32.gmra.mxu0 %vm387_vm1, %v1821_v56  ;;  %v2464_v42 = vadd.f32 %v2353_v49, %v2114_v45  ;;  %v1474_v56 = vld [vmem:[%s12661_s30 + $0xda] sm:$0xff]  ;;  %v18151_v49 = vld [vmem:[#allocation49_spill] sm:$0xff] }
 0x1bb   : > { %11607 = vmatmul.msk.f32.gmra.mxu1 %vm387_vm1, %v2519_v2  ;;  %7458 = vperm.xlu2 %12546, %v18147_v4   ;;  %v18155_v4 = vld [vmem:[#allocation53_spill] sm:$0xff] }
 0x1bc   : > { %11650 = vmatmul.msk.f32.gmra.mxu2 %vm387_vm1, %v2521_v34  ;;  %7528 = vperm.xlu1 %12545, %v13550_v1   ;;  %v18150_v1 = vld [vmem:[#allocation15_spill] sm:$0xff] }
 0x1bd   : > { %v1656_v52 = vpop.f32.mrf.mxu3  ;;  %7553 = vperm.xlu0 %12544, %v13446_v60   ;;  %v1416_v19 = vadd.f32 %v18150_v1, %v1001_v38  ;;  %v1007_v38 = vadd.f32 %v18157_v54, %v18156_v13  ;;  %v10981_v54 = vld [vmem:[%s18029_s10 + $0x10] sm:$0xff] }
 0x1be   : > { %v1765_v11 = vadd.f32 %v1656_v52, %v1415_v58 }
 0x1bf   : > { %v2703_v9 = vpop.f32.mrf.mxu2  ;;  %v2006_v63 = vpop.f32.mrf.mxu0 }
 0x1c0   : > { %v13729_v55 = vadd.f32 %v2703_v9, %v2464_v42  ;;  %v2356_v32 = vpop.f32.mrf.mxu1  ;;  %v2115_v2 = vadd.f32 %v2006_v63, %v1765_v11 }
 0x1c2   : > { %11523 = vmatmul.msk.f32.gmra.mxu3 %vm387_vm1, %v1473_v24  ;;  %11565 = vmatmul.msk.f32.gmra.mxu0 %vm387_vm1, %v1822_v20  ;;  %v2465_v43 = vadd.f32 %v2356_v32, %v2115_v2  ;;  %v1475_v24 = vld [vmem:[%s12661_s30 + $0xe2] sm:$0xff]  ;;  %v2524_v2 = vld [vmem:[%s12661_s30 + $0xec] sm:$0xff] }
 0x1c3   : > { %11608 = vmatmul.msk.f32.gmra.mxu1 %vm387_vm1, %v2520_v8  ;;  %7473 = vperm.xlu2 %12546, %v18151_v49   ;;  %v1824_v20 = vld [vmem:[%s12661_s30 + $0xdb] sm:$0xff] }
 0x1c4   : > { %11651 = vmatmul.msk.f32.gmra.mxu2 %vm387_vm1, %v2522_v33  ;;  %7543 = vperm.xlu1 %12545, %v13580_v41   ;;  %v18154_v41 = vld [vmem:[#allocation18_spill] sm:$0xff] }
 0x1c5   : > { %v1659_v53 = vpop.f32.mrf.mxu3  ;;  %7568 = vperm.xlu0 %12544, %v13481_v0   ;;  %v1417_v58 = vadd.f32 %v18154_v41, %v1004_v28  ;;  %v2525_v49 = vld [vmem:[%s12661_s30 + $0xf4] sm:$0xff] }
 0x1c6   : > { %v1766_v46 = vadd.f32 %v1659_v53, %v1416_v19 }
 0x1c7   : > { %v2706_v50 = vpop.f32.mrf.mxu2  ;;  %v2009_v16 = vpop.f32.mrf.mxu0 }
 0x1c8   : > { %v13744_v60 = vadd.f32 %v2706_v50, %v2465_v43  ;;  %v2359_v45 = vpop.f32.mrf.mxu1  ;;  %v2116_v8 = vadd.f32 %v2009_v16, %v1766_v46  ;;  %v1476_v16 = vld [vmem:[%s12661_s30 + $0xea] sm:$0xff] }
 0x1ca   : > { %11524 = vmatmul.msk.f32.gmra.mxu3 %vm387_vm1, %v1474_v56  ;;  %11566 = vmatmul.msk.f32.gmra.mxu0 %vm387_vm1, %v1823_v5  ;;  %v2466_v42 = vadd.f32 %v2359_v45, %v2116_v8  ;;  %v1825_v56 = vld [vmem:[%s12661_s30 + $0xe3] sm:$0xff]  ;;  %v18159_v45 = vld [vmem:[#allocation22_spill] sm:$0xff]  ;;  %v18160_v8 = vld [vmem:[#allocation23_spill] sm:$0xff] }
 0x1cb   : > { %11609 = vmatmul.msk.f32.gmra.mxu1 %vm387_vm1, %v2521_v34  ;;  %7488 = vperm.xlu2 %12546, %v18155_v4   ;;  %v1010_v44 = vadd.f32 %v18160_v8, %v18159_v45 }
 0x1cc   : > { %11652 = vmatmul.msk.f32.gmra.mxu2 %vm387_vm1, %v2523_v7  ;;  %7558 = vperm.xlu1 %12545, %v13609_v12   ;;  %v18158_v12 = vld [vmem:[#allocation21_spill] sm:$0xff] }
 0x1cd   : > { %v1662_v52 = vpop.f32.mrf.mxu3  ;;  %7583 = vperm.xlu0 %12544, %v13520_v37   ;;  %v1418_v1 = vadd.f32 %v18158_v12, %v1007_v38 }
 0x1ce   : > { %v1767_v11 = vadd.f32 %v1662_v52, %v1417_v58  ;;  %v1477_v52 = vld [vmem:[%s12661_s30 + $0xf2] sm:$0xff] }
 0x1cf   : > { %v2709_v9 = vpop.f32.mrf.mxu2  ;;  %v2012_v63 = vpop.f32.mrf.mxu0 }
 0x1d0   : > { %v13759_v0 = vadd.f32 %v2709_v9, %v2466_v42  ;;  %v2362_v32 = vpop.f32.mrf.mxu1  ;;  %v2117_v34 = vadd.f32 %v2012_v63, %v1767_v11  ;;  %v1826_v11 = vld [vmem:[%s12661_s30 + $0xeb] sm:$0xff]  ;;  %v2526_v63 = vld [vmem:[%s12661_s30 + $0xfc] sm:$0xff] }
 0x1d2   : > { %11525 = vmatmul.msk.f32.gmra.mxu3 %vm387_vm1, %v1475_v24  ;;  %11567 = vmatmul.msk.f32.gmra.mxu0 %vm387_vm1, %v1824_v20  ;;  %v2467_v19 = vadd.f32 %v2362_v32, %v2117_v34  ;;  %v18162_v24 = vld [vmem:[#allocation25_spill] sm:$0xff]  ;;  %v18163_v20 = vld [vmem:[#allocation26_spill] sm:$0xff] }
 0x1d3   : > { %11610 = vmatmul.msk.f32.gmra.mxu1 %vm387_vm1, %v2522_v33  ;;  %7503 = vperm.xlu2 %12546, %v13277_v39   ;;  %v18161_v39 = vld [vmem:[#allocation24_spill] sm:$0xff]  ;;  %v1013_v4 = vadd.f32 %v18163_v20, %v18162_v24 }
 0x1d4   : > { %11653 = vmatmul.msk.f32.gmra.mxu2 %vm387_vm1, %v2524_v2  ;;  %7573 = vperm.xlu1 %12545, %v13627_v14   ;;  %v1419_v14 = vadd.f32 %v18161_v39, %v1010_v44  ;;  %v10979_v44 = vld [vmem:[%s18029_s10] sm:$0xff] }
 0x1d5   : > { %v1665_v43 = vpop.f32.mrf.mxu3  ;;  %7598 = vperm.xlu0 %12544, %v13555_v10  }
 0x1d6   : > { %v1768_v53 = vadd.f32 %v1665_v43, %v1418_v1  ;;  %v1478_v1 = vld [vmem:[%s12661_s30 + $0xfa] sm:$0xff]  ;;  %v2527_v43 = vld [vmem:[%s12661_s30 + $0x104] sm:$0xff] }
 0x1d7   : > { %v2712_v46 = vpop.f32.mrf.mxu2  ;;  %v2015_v50 = vpop.f32.mrf.mxu0 }
 0x1d8   : > { %v13774_v37 = vadd.f32 %v2712_v46, %v2467_v19  ;;  %v2365_v5 = vpop.f32.mrf.mxu1  ;;  %v2118_v33 = vadd.f32 %v2015_v50, %v1768_v53  ;;  %v1827_v19 = vld [vmem:[%s12661_s30 + $0xf3] sm:$0xff]  ;;  %v18165_v46 = vld [vmem:[#allocation28_spill] sm:$0xff]  ;;  %v18166_v50 = vld [vmem:[#allocation29_spill] sm:$0xff] }
 0x1da   : > { %11526 = vmatmul.msk.f32.gmra.mxu3 %vm387_vm1, %v1476_v16  ;;  %11568 = vmatmul.msk.f32.gmra.mxu0 %vm387_vm1, %v1825_v56  ;;  %v2468_v48 = vadd.f32 %v2365_v5, %v2118_v33  ;;  %v1016_v16 = vadd.f32 %v18166_v50, %v18165_v46  ;;  %v10985_v50 = vld [vmem:[%s18029_s10 + $0x30] sm:$0xff] }
 0x1db   : > { %11611 = vmatmul.msk.f32.gmra.mxu1 %vm387_vm1, %v2523_v7  ;;  %7518 = vperm.xlu2 %12546, %v13311_v27   ;;  %v18164_v27 = vld [vmem:[#allocation27_spill] sm:$0xff] }
 0x1dc   : > { %11654 = vmatmul.msk.f32.gmra.mxu2 %vm387_vm1, %v2525_v49  ;;  %7588 = vperm.xlu1 %12545, %v13647_v25   ;;  %v1420_v25 = vadd.f32 %v18164_v27, %v1013_v4  ;;  %v10982_v4 = vld [vmem:[%s18029_s10 + $0x18] sm:$0xff] }
 0x1dd   : > { %v1668_v28 = vpop.f32.mrf.mxu3  ;;  %7613 = vperm.xlu0 %12544, %v13585_v21  }
 0x1de   : > { %v1769_v41 = vadd.f32 %v1668_v28, %v1419_v14  ;;  %v1479_v14 = vld [vmem:[%s12661_s30 + $0x102] sm:$0xff] }
 0x1df   : > { %v2715_v58 = vpop.f32.mrf.mxu2  ;;  %v2018_v42 = vpop.f32.mrf.mxu0 }
 0x1e0   : > { %v13789_v10 = vadd.f32 %v2715_v58, %v2468_v48  ;;  %v2368_v9 = vpop.f32.mrf.mxu1  ;;  %v2119_v7 = vadd.f32 %v2018_v42, %v1769_v41  ;;  %v1828_v48 = vld [vmem:[%s12661_s30 + $0xfb] sm:$0xff]  ;;  %v2528_v41 = vld [vmem:[%s12661_s30 + $0x10c] sm:$0xff] }
 0x1e1   : > { %v18168_v42 = vld [vmem:[#allocation31_spill] sm:$0xff] }
 0x1e2   : > { %11527 = vmatmul.msk.f32.gmra.mxu3 %vm387_vm1, %v1477_v52  ;;  %11569 = vmatmul.msk.f32.gmra.mxu0 %vm387_vm1, %v1826_v11  ;;  %v2469_v32 = vadd.f32 %v2368_v9, %v2119_v7  ;;  %v18169_v52 = vld [vmem:[#allocation32_spill] sm:$0xff] }
 0x1e3   : > { %11612 = vmatmul.msk.f32.gmra.mxu1 %vm387_vm1, %v2524_v2  ;;  %7533 = vperm.xlu2 %12546, %v13346_v31   ;;  %v4131_v31 = vld [vmem:[%s18023_s4] sm:$0xf]  ;;  %v1019_v11 = vadd.f32 %v18169_v52, %v18168_v42  ;;  %v10988_v52 = vld [vmem:[%s18029_s10 + $0x48] sm:$0xff] }
 0x1e4   : > { %11655 = vmatmul.msk.f32.gmra.mxu2 %vm387_vm1, %v2526_v63  ;;  %7603 = vperm.xlu1 %12545, %v13667_v36   ;;  %v18167_v36 = vld [vmem:[#allocation30_spill] sm:$0xff] }
 0x1e5   : > { %v1671_v34 = vpop.f32.mrf.mxu3  ;;  %11032 = vperm.xlu0 %12544, %v10981_v54   ;;  %v1421_v56 = vadd.f32 %v18167_v36, %v1016_v16  ;;  %11798 = vmatpush.msk.msra.mxu2 %vm689_vm0, %v4131_v31  ;;  %v18171_v54 = vld [vmem:[#allocation34_spill] sm:$0xff]  ;;  %v10990_v16 = vld [vmem:[%s18029_s10 + $0x58] sm:$0xff] }
 0x1e6   : > { %v1770_v13 = vadd.f32 %v1671_v34, %v1420_v25  ;;  %v1829_v34 = vld [vmem:[%s12661_s30 + $0x103] sm:$0xff] }
 0x1e7   : > { %v2718_v21 = vpop.f32.mrf.mxu2  ;;  %v2021_v12 = vpop.f32.mrf.mxu0 }
 0x1e8   : > { %v13807_v38 = vadd.f32 %v2718_v21, %v2469_v32  ;;  %v2371_v2 = vpop.f32.mrf.mxu1  ;;  %v2120_v53 = vadd.f32 %v2021_v12, %v1770_v13  ;;  %v1480_v32 = vld [vmem:[%s12661_s30 + $0x10a] sm:$0xff]  ;;  %v18172_v12 = vld [vmem:[#allocation35_spill] sm:$0xff] }
 0x1ea   : > { %11528 = vmatmul.msk.f32.gmra.mxu3 %vm387_vm1, %v1478_v1  ;;  %11570 = vmatmul.msk.f32.gmra.mxu0 %vm387_vm1, %v1827_v19  ;;  %v2470_v5 = vadd.f32 %v2371_v2, %v2120_v53  ;;  %v1022_v1 = vadd.f32 %v18172_v12, %v18171_v54 }
 0x1eb   : > { %11613 = vmatmul.msk.f32.gmra.mxu1 %vm387_vm1, %v2525_v49  ;;  %7548 = vperm.xlu2 %12546, %v13381_v61   ;;  %v18170_v61 = vld [vmem:[#allocation33_spill] sm:$0xff] }
 0x1ec   : > { %11656 = vmatmul.msk.f32.gmra.mxu2 %vm387_vm1, %v2527_v43  ;;  %11022 = vperm.xlu1 %12545, %v10979_v44   ;;  %v1422_v9 = vadd.f32 %v18170_v61, %v1019_v11  ;;  %v18175_v44 = vld [vmem:[#allocation38_spill] sm:$0xff] }
 0x1ed   : > { %v1674_v33 = vpop.f32.mrf.mxu3  ;;  %11047 = vperm.xlu0 %12544, %v13336_v15   ;;  %v10993_v11 = vld [vmem:[%s18029_s10 + $0x70] sm:$0xff] }
 0x1ee   : > { %v1771_v45 = vadd.f32 %v1674_v33, %v1421_v56  ;;  %v1481_v56 = vld [vmem:[%s12661_s30 + $0x112] sm:$0xff]  ;;  %v2530_v33 = vld [vmem:[%s12661_s30 + $0x11c] sm:$0xff] }
 0x1ef   : > { %v2721_v8 = vpop.f32.mrf.mxu2  ;;  %v2024_v49 = vpop.f32.mrf.mxu0 }
 0x1f0   : > { %v13828_v39 = vadd.f32 %v2721_v8, %v2470_v5  ;;  %v2374_v28 = vpop.f32.mrf.mxu1  ;;  %v2121_v58 = vadd.f32 %v2024_v49, %v1771_v45  ;;  %v1830_v5 = vld [vmem:[%s12661_s30 + $0x10b] sm:$0xff] }
 0x1f1   : > { %v18174_v8 = vld [vmem:[#allocation37_spill] sm:$0xff] }
 0x1f2   : > { %11529 = vmatmul.msk.f32.gmra.mxu3 %vm387_vm1, %v1479_v14  ;;  %11571 = vmatmul.msk.f32.gmra.mxu0 %vm387_vm1, %v1828_v48  ;;  %v2471_v7 = vadd.f32 %v2374_v28, %v2121_v58  ;;  %v1025_v49 = vadd.f32 %v18175_v44, %v18174_v8  ;;  %v10999_v8 = vld [vmem:[%s18029_s10 + $0xa0] sm:$0xff] }
 0x1f3   : > { %11614 = vmatmul.msk.f32.gmra.mxu1 %vm387_vm1, %v2526_v63  ;;  %7563 = vperm.xlu2 %12546, %v13416_v59   ;;  %v2529_v63 = vld [vmem:[%s12661_s30 + $0x114] sm:$0xff]  ;;  %v18173_v59 = vld [vmem:[#allocation36_spill] sm:$0xff] }
 0x1f4   : > { %11657 = vmatmul.msk.f32.gmra.mxu2 %vm387_vm1, %v2528_v41  ;;  %11037 = vperm.xlu1 %12545, %v10982_v4   ;;  %v1423_v19 = vadd.f32 %v18173_v59, %v1022_v1  ;;  %v18178_v4 = vld [vmem:[#allocation42_spill] sm:$0xff]  ;;  %v10991_v1 = vld [vmem:[%s18029_s10 + $0x60] sm:$0xff]  ;;  %v10996_v59 = vld [vmem:[%s18029_s10 + $0x88] sm:$0xff] }
 0x1f5   : > { %v1677_v24 = vpop.f32.mrf.mxu3  ;;  %11062 = vperm.xlu0 %12544, %v13371_v22  }
 0x1f6   : > { %v1772_v20 = vadd.f32 %v1677_v24, %v1422_v9  ;;  %v1831_v24 = vld [vmem:[%s12661_s30 + $0x113] sm:$0xff] }
 0x1f7   : > { %v2724_v15 = vpop.f32.mrf.mxu2  ;;  %v2027_v25 = vpop.f32.mrf.mxu0 }
 0x1f8   : > { %v13845_v27 = vadd.f32 %v2724_v15, %v2471_v7  ;;  %v2377_v13 = vpop.f32.mrf.mxu1  ;;  %v2122_v21 = vadd.f32 %v2027_v25, %v1772_v20  ;;  %v1482_v7 = vld [vmem:[%s12661_s30 + $0x11a] sm:$0xff]  ;;  %v18177_v15 = vld [vmem:[#allocation41_spill] sm:$0xff] }
 0x1f9   : > { %v1028_v25 = vadd.f32 %v18178_v4, %v18177_v15  ;;  %v1834_v15 = vld [vmem:[%s12661_s30 + $0x12b] sm:$0xff]  ;;  %v2534_v4 = vld [vmem:[%s12661_s30 + $0x13c] sm:$0xff] }
 0x1fa   : > { %11530 = vmatmul.msk.f32.gmra.mxu3 %vm387_vm1, %v1480_v32  ;;  %11572 = vmatmul.msk.f32.gmra.mxu0 %vm387_vm1, %v1829_v34  ;;  %v2472_v2 = vadd.f32 %v2377_v13, %v2122_v21 }
 0x1fb   : > { %11615 = vmatmul.msk.f32.gmra.mxu1 %vm387_vm1, %v2527_v43  ;;  %7578 = vperm.xlu2 %12546, %v13451_v30   ;;  %v18176_v30 = vld [vmem:[#allocation39_spill] sm:$0xff] }
 0x1fc   : > { %11658 = vmatmul.msk.f32.gmra.mxu2 %vm387_vm1, %v2529_v63  ;;  %11052 = vperm.xlu1 %12545, %v10985_v50   ;;  %v1424_v14 = vadd.f32 %v18176_v30, %v1025_v49  ;;  %v18181_v50 = vld [vmem:[#allocation47_spill] sm:$0xff]  ;;  %v1833_v49 = vld [vmem:[%s12661_s30 + $0x123] sm:$0xff] }
 0x1fd   : > { %v1680_v53 = vpop.f32.mrf.mxu3  ;;  %11077 = vperm.xlu0 %12544, %v10990_v16   ;;  %v2533_v30 = vld [vmem:[%s12661_s30 + $0x134] sm:$0xff] }
 0x1fe   : > { %v1773_v22 = vadd.f32 %v1680_v53, %v1423_v19  ;;  %v1832_v53 = vld [vmem:[%s12661_s30 + $0x11b] sm:$0xff] }
 0x1ff   : > { %v2727_v46 = vpop.f32.mrf.mxu2  ;;  %v2030_v36 = vpop.f32.mrf.mxu0 }
 0x200   : > { %v13865_v31 = vadd.f32 %v2727_v46, %v2472_v2  ;;  %v2380_v43 = vpop.f32.mrf.mxu1  ;;  %v2123_v45 = vadd.f32 %v2030_v36, %v1773_v22  ;;  %v2532_v22 = vld [vmem:[%s12661_s30 + $0x12c] sm:$0xff]  ;;  %v18182_v36 = vld [vmem:[#allocation48_spill] sm:$0xff] }
 0x201   : > { %v18180_v46 = vld [vmem:[#allocation46_spill] sm:$0xff] }
 0x202   : > { %11531 = vmatmul.msk.f32.gmra.mxu3 %vm387_vm1, %v1481_v56  ;;  %11573 = vmatmul.msk.f32.gmra.mxu0 %vm387_vm1, %v1830_v5  ;;  %v2473_v48 = vadd.f32 %v2380_v43, %v2123_v45  ;;  %v1031_v16 = vadd.f32 %v18181_v50, %v18180_v46  ;;  %v10980_v43 = vld [vmem:[%s18029_s10 + $0x8] sm:$0xff]  ;;  %v10994_v45 = vld [vmem:[%s18029_s10 + $0x78] sm:$0xff]  ;;  %v18189_v50 = vld [vmem:[#allocation58_spill] sm:$0xff] }
 0x203   : > { %11616 = vmatmul.msk.f32.gmra.mxu1 %vm387_vm1, %v2528_v41  ;;  %7593 = vperm.xlu2 %12546, %v13486_v62   ;;  %v2531_v41 = vld [vmem:[%s12661_s30 + $0x124] sm:$0xff]  ;;  %v18179_v62 = vld [vmem:[#allocation43_spill] sm:$0xff] }
 0x204   : > { %11659 = vmatmul.msk.f32.gmra.mxu2 %vm387_vm1, %v2530_v33  ;;  %11067 = vperm.xlu1 %12545, %v10988_v52   ;;  %v1425_v34 = vadd.f32 %v18179_v62, %v1028_v25  ;;  %v1426_v56 = vadd.f32 %v18182_v36, %v1031_v16  ;;  %v18186_v25 = vld [vmem:[#allocation54_spill] sm:$0xff]  ;;  %v18188_v46 = vld [vmem:[#allocation57_spill] sm:$0xff]  ;;  %v18190_v36 = vld [vmem:[#allocation59_spill] sm:$0xff] }
 0x205   : > { %v1683_v28 = vpop.f32.mrf.mxu3  ;;  %11092 = vperm.xlu0 %12544, %v10993_v11   ;;  %v1040_v16 = vadd.f32 %v18189_v50, %v18188_v46  ;;  %v10995_v50 = vld [vmem:[%s18029_s10 + $0x80] sm:$0xff] }
 0x206   : > { %v1774_v58 = vadd.f32 %v1683_v28, %v1424_v14  ;;  %v18183_v14 = vld [vmem:[#allocation50_spill] sm:$0xff] }
 0x207   : > { %v2730_v42 = vpop.f32.mrf.mxu2  ;;  %v2033_v9 = vpop.f32.mrf.mxu0 }
 0x208   : > { %v13884_v61 = vadd.f32 %v2730_v42, %v2473_v48  ;;  %v2124_v20 = vadd.f32 %v2033_v9, %v1774_v58  ;;  %v2383_v32 = vpop.f32.mrf.mxu1  ;;  %v18184_v48 = vld [vmem:[#allocation51_spill] sm:$0xff]  ;;  %v18185_v58 = vld [vmem:[#allocation52_spill] sm:$0xff] }
 0x209   : > { %v1034_v28 = vadd.f32 %v18184_v48, %v18183_v14  ;;  %v10983_v9 = vld [vmem:[%s18029_s10 + $0x20] sm:$0xff]  ;;  %v2536_v48 = vld [vmem:[%s12661_s30 + $0x14c] sm:$0xff] }
 0x20a   : > { %11532 = vmatmul.msk.f32.gmra.mxu3 %vm387_vm1, %v1482_v7  ;;  %11574 = vmatmul.msk.f32.gmra.mxu0 %vm387_vm1, %v1831_v24  ;;  %v2474_v13 = vadd.f32 %v2383_v32, %v2124_v20  ;;  %v10997_v7 = vld [vmem:[%s18029_s10 + $0x90] sm:$0xff]  ;;  %v11002_v24 = vld [vmem:[%s18029_s10 + $0xb8] sm:$0xff] }
 0x20b   : > { %11617 = vmatmul.msk.f32.gmra.mxu1 %vm387_vm1, %v2529_v63  ;;  %v1483_v63 = vld [vmem:[%s12661_s30 + $0x122] sm:$0xff]  ;;  %7608 = vperm.xlu2 %12546, %v13525_v3   ;;  %v1427_v42 = vadd.f32 %v18185_v58, %v1034_v28  ;;  %v18187_v32 = vld [vmem:[#allocation55_spill] sm:$0xff]  ;;  %v18192_v58 = vld [vmem:[#allocation62_spill] sm:$0xff] }
 0x20c   : > { %11660 = vmatmul.msk.f32.gmra.mxu2 %vm387_vm1, %v2531_v41  ;;  %11082 = vperm.xlu1 %12545, %v10991_v1   ;;  %v1037_v62 = vadd.f32 %v18187_v32, %v18186_v25  ;;  %v11000_v1 = vld [vmem:[%s18029_s10 + $0xa8] sm:$0xff]  ;;  %v1836_v14 = vld [vmem:[%s12661_s30 + $0x13b] sm:$0xff] }
 0x20d   : > { %v1686_v21 = vpop.f32.mrf.mxu3  ;;  %11107 = vperm.xlu0 %12544, %v10996_v59   ;;  %v11005_v59 = vld [vmem:[%s18029_s10 + $0xd0] sm:$0xff]  ;;  %v18191_v28 = vld [vmem:[#allocation61_spill] sm:$0xff]  ;;  %v11011_v25 = vld [vmem:[%s18029_s10 + $0x100] sm:$0xff] }
 0x20e   : > { %v13897_v54 = vadd.f32 %v1686_v21, %v1425_v34  ;;  %v1428_v34 = vadd.f32 %v13265_v57, %v1037_v62  ;;  %v2535_v57 = vld [vmem:[%s12661_s30 + $0x144] sm:$0xff] }
 0x20f   : > { %v2733_v12 = vpop.f32.mrf.mxu2  ;;  %v13907_v2 = vpop.f32.mrf.mxu0  ;;  %v1837_v62 = vld [vmem:[%s12661_s30 + $0x143] sm:$0xff] }
 0x210   : > { %v13905_v19 = vadd.f32 %v2733_v12, %v2474_v13  ;;  %v10986_v12 = vld [vmem:[%s18029_s10 + $0x38] sm:$0xff] }
 0x212   : > { %11533 = vmatmul.msk.f32.gmra.mxu3 %vm387_vm1, %v1483_v63  ;;  %11575 = vmatmul.msk.f32.gmra.mxu0 %vm387_vm1, %v1832_v53  ;;  %v1486_v53 = vld [vmem:[%s12661_s30 + $0x13a] sm:$0xff] }
 0x213   : > { %11618 = vmatmul.msk.f32.gmra.mxu1 %vm387_vm1, %v2530_v33  ;;  %v1484_v33 = vld [vmem:[%s12661_s30 + $0x12a] sm:$0xff]  ;;  %11027 = vperm.xlu2 %12546, %v10980_v43  }
 0x214   : > { %11661 = vmatmul.msk.f32.gmra.mxu2 %vm387_vm1, %v2532_v22  ;;  %11097 = vperm.xlu1 %12545, %v10994_v45   ;;  %v10989_v45 = vld [vmem:[%s18029_s10 + $0x50] sm:$0xff] }
 0x215   : > { %v1689_v3 = vpop.f32.mrf.mxu3  ;;  %11122 = vperm.xlu0 %12544, %v10999_v8   ;;  %v11003_v8 = vld [vmem:[%s18029_s10 + $0xc0] sm:$0xff] }
 0x216   : > { %v13920_v5 = vadd.f32 %v1689_v3, %v1426_v56  ;;  %v1429_v56 = vadd.f32 %v18190_v36, %v1040_v16  ;;  %v11009_v16 = vld [vmem:[%s18029_s10 + $0xf0] sm:$0xff]  ;;  %v11014_v36 = vld [vmem:[%s18029_s10 + $0x118] sm:$0xff] }
 0x217   : > { %v13931_v44 = vpop.f32.mrf.mxu0 }
 0x21a   : > { %11534 = vmatmul.msk.f32.gmra.mxu3 %vm387_vm1, %v1484_v33  ;;  %11576 = vmatmul.msk.f32.gmra.mxu0 %vm387_vm1, %v1833_v49  ;;  %v11008_v33 = vld [vmem:[%s18029_s10 + $0xe8] sm:$0xff] }
 0x21b   : > { %11619 = vmatmul.msk.f32.gmra.mxu1 %vm387_vm1, %v2531_v41  ;;  %v1485_v41 = vld [vmem:[%s12661_s30 + $0x132] sm:$0xff]  ;;  %11042 = vperm.xlu2 %12546, %v10983_v9  }
 0x21c   : > { %11662 = vmatmul.msk.f32.gmra.mxu2 %vm387_vm1, %v2533_v30  ;;  %11112 = vperm.xlu1 %12545, %v10997_v7  }
 0x21d   : > { %v1692_v52 = vpop.f32.mrf.mxu3  ;;  %11137 = vperm.xlu0 %12544, %v11002_v24  }
 0x21e   : > { %v13943_v11 = vadd.f32 %v1692_v52, %v1427_v42  ;;  %v1043_v42 = vadd.f32 %v18192_v58, %v18191_v28  ;;  %v18193_v52 = vld [vmem:[#allocation63_spill] sm:$0xff] }
 0x21f   : > { %v13954_v20 = vpop.f32.mrf.mxu0 }
 0x220   : > { %v1430_v9 = vadd.f32 %v18193_v52, %v1043_v42  ;;  %v10998_v52 = vld [vmem:[%s18029_s10 + $0x98] sm:$0xff] }
 0x222   : > { %11535 = vmatmul.msk.f32.gmra.mxu3 %vm387_vm1, %v1485_v41  ;;  %11577 = vmatmul.msk.f32.gmra.mxu0 %vm387_vm1, %v1834_v15  ;;  %v10992_v41 = vld [vmem:[%s18029_s10 + $0x68] sm:$0xff]  ;;  %v11006_v15 = vld [vmem:[%s18029_s10 + $0xd8] sm:$0xff] }
 0x223   : > { %11620 = vmatmul.msk.f32.gmra.mxu1 %vm387_vm1, %v2532_v22  ;;  %v1835_v22 = vld [vmem:[%s12661_s30 + $0x133] sm:$0xff]  ;;  %11057 = vperm.xlu2 %12546, %v10986_v12  }
 0x224   : > { %11663 = vmatmul.msk.f32.gmra.mxu2 %vm387_vm1, %v2534_v4  ;;  %11127 = vperm.xlu1 %12545, %v11000_v1   ;;  %v18195_v12 = vld [vmem:[#allocation66_spill] sm:$0xff] }
 0x225   : > { %v1695_v13 = vpop.f32.mrf.mxu3  ;;  %11152 = vperm.xlu0 %12544, %v11005_v59   ;;  %v18196_v59 = vld [vmem:[#allocation67_spill] sm:$0xff] }
 0x226   : > { %v13966_v21 = vadd.f32 %v1695_v13, %v1428_v34  ;;  %v2537_v34 = vld [vmem:[%s12661_s30 + $0x154] sm:$0xff]  ;;  %v18194_v13 = vld [vmem:[#allocation65_spill] sm:$0xff] }
 0x227   : > { %v13977_v63 = vpop.f32.mrf.mxu0  ;;  %v1046_v1 = vadd.f32 %v18195_v12, %v18194_v13  ;;  %v18202_v12 = vld [vmem:[#allocation75_spill] sm:$0xff] }
 0x22a   : > { %11536 = vmatmul.msk.f32.gmra.mxu3 %vm387_vm1, %v1486_v53  ;;  %11578 = vmatmul.msk.f32.gmra.mxu0 %vm387_vm1, %v1835_v22  ;;  %v1431_v53 = vadd.f32 %v18196_v59, %v1046_v1 }
 0x22b   : > { %11621 = vmatmul.msk.f32.gmra.mxu1 %vm387_vm1, %v2533_v30  ;;  %v1487_v30 = vld [vmem:[%s12661_s30 + $0x142] sm:$0xff]  ;;  %11072 = vperm.xlu2 %12546, %v10989_v45  }
 0x22c   : > { %11664 = vmatmul.msk.f32.gmra.mxu2 %vm387_vm1, %v2535_v57  ;;  %11142 = vperm.xlu1 %12545, %v11003_v8   ;;  %v2538_v45 = vld [vmem:[%s12661_s30 + $0x15c] sm:$0xff]  ;;  %v18197_v8 = vld [vmem:[#allocation69_spill] sm:$0xff] }
 0x22d   : > { %v1698_v3 = vpop.f32.mrf.mxu3  ;;  %11167 = vperm.xlu0 %12544, %v11008_v33   ;;  %v18198_v33 = vld [vmem:[#allocation70_spill] sm:$0xff] }
 0x22e   : > { %v13989_v43 = vadd.f32 %v1698_v3, %v1429_v56  ;;  %v1838_v3 = vld [vmem:[%s12661_s30 + $0x14b] sm:$0xff] }
 0x22f   : > { %v14000_v49 = vpop.f32.mrf.mxu0 }
 0x232   : > { %11537 = vmatmul.msk.f32.gmra.mxu3 %vm387_vm1, %v1487_v30  ;;  %11579 = vmatmul.msk.f32.gmra.mxu0 %vm387_vm1, %v1836_v14  ;;  %v1049_v30 = vadd.f32 %v18198_v33, %v18197_v8  ;;  %v18199_v14 = vld [vmem:[#allocation71_spill] sm:$0xff] }
 0x233   : > { %11622 = vmatmul.msk.f32.gmra.mxu1 %vm387_vm1, %v2534_v4  ;;  %v1488_v4 = vld [vmem:[%s12661_s30 + $0x14a] sm:$0xff]  ;;  %11087 = vperm.xlu2 %12546, %v10992_v41   ;;  %v18207_v8 = vld [vmem:[#allocation79_spill] sm:$0xff] }
 0x234   : > { %11665 = vmatmul.msk.f32.gmra.mxu2 %vm387_vm1, %v2536_v48  ;;  %11157 = vperm.xlu1 %12545, %v11006_v15   ;;  %v1432_v28 = vadd.f32 %v18199_v14, %v1049_v30  ;;  %v2849_v15 = vld [vmem:[%s12661_s30 + $0x25] sm:$0xff] }
 0x235   : > { %v1701_v7 = vpop.f32.mrf.mxu3  ;;  %11182 = vperm.xlu0 %12544, %v11011_v25   ;;  %v2539_v25 = vld [vmem:[%s12661_s30 + $0x164] sm:$0xff] }
 0x236   : > { %v14012_v24 = vadd.f32 %v1701_v7, %v1430_v9  ;;  %v11012_v9 = vld [vmem:[%s18029_s10 + $0x108] sm:$0xff]  ;;  %v11017_v7 = vld [vmem:[%s18029_s10 + $0x130] sm:$0xff] }
 0x237   : > { %v14023_v32 = vpop.f32.mrf.mxu0 }
 0x23a   : > { %11538 = vmatmul.msk.f32.gmra.mxu3 %vm387_vm1, %v1488_v4  ;;  %11580 = vmatmul.msk.f32.gmra.mxu0 %vm387_vm1, %v1837_v62  ;;  %v18200_v4 = vld [vmem:[#allocation73_spill] sm:$0xff]  ;;  %v18201_v62 = vld [vmem:[#allocation74_spill] sm:$0xff] }
 0x23b   : > { %11623 = vmatmul.msk.f32.gmra.mxu1 %vm387_vm1, %v2535_v57  ;;  %v1489_v57 = vld [vmem:[%s12661_s30 + $0x152] sm:$0xff]  ;;  %11102 = vperm.xlu2 %12546, %v10995_v50   ;;  %v1052_v13 = vadd.f32 %v18201_v62, %v18200_v4  ;;  %v11015_v50 = vld [vmem:[%s18029_s10 + $0x120] sm:$0xff] }
 0x23c   : > { %11666 = vmatmul.msk.f32.gmra.mxu2 %vm387_vm1, %v2537_v34  ;;  %11172 = vperm.xlu1 %12545, %v11009_v16   ;;  %v18212_v4 = vld [vmem:[#allocation83_spill] sm:$0xff] }
 0x23d   : > { %v1704_v22 = vpop.f32.mrf.mxu3  ;;  %11197 = vperm.xlu0 %12544, %v11014_v36   ;;  %v1433_v1 = vadd.f32 %v18202_v12, %v1052_v13  ;;  %v2850_v36 = vld [vmem:[%s12661_s30 + $0x2d] sm:$0xff]  ;;  %v14115_v12 = vpop.f32.mrf.mxu1 }
 0x23e   : > { %v14035_v46 = vadd.f32 %v1704_v22, %v1431_v53  ;;  %v11001_v22 = vld [vmem:[%s18029_s10 + $0xb0] sm:$0xff] }
 0x23f   : > { %v14046_v56 = vpop.f32.mrf.mxu0 }
 0x242   : > { %11539 = vmatmul.msk.f32.gmra.mxu3 %vm387_vm1, %v1489_v57  ;;  %11581 = vmatmul.msk.f32.gmra.mxu0 %vm387_vm1, %v1838_v3  ;;  %v3199_v57 = vld [vmem:[%s12661_s30 + $0x26] sm:$0xff]  ;;  %v18206_v3 = vld [vmem:[#allocation78_spill] sm:$0xff] }
 0x243   : > { %11624 = vmatmul.msk.f32.gmra.mxu1 %vm387_vm1, %v2536_v48  ;;  %v1839_v48 = vld [vmem:[%s12661_s30 + $0x153] sm:$0xff]  ;;  %11117 = vperm.xlu2 %12546, %v10998_v52  }
 0x244   : > { %11667 = vmatmul.msk.f32.gmra.mxu2 %vm387_vm1, %v2538_v45  ;;  %11187 = vperm.xlu1 %12545, %v11012_v9   ;;  %v2851_v9 = vld [vmem:[%s12661_s30 + $0x35] sm:$0xff] }
 0x245   : > { %v1707_v58 = vpop.f32.mrf.mxu3  ;;  %11212 = vperm.xlu0 %12544, %v11017_v7   ;;  %v3200_v7 = vld [vmem:[%s12661_s30 + $0x2e] sm:$0xff] }
 0x246   : > { %v14058_v42 = vadd.f32 %v1707_v58, %v1432_v28  ;;  %v11004_v28 = vld [vmem:[%s18029_s10 + $0xc8] sm:$0xff]  ;;  %v11018_v58 = vld [vmem:[%s18029_s10 + $0x138] sm:$0xff] }
 0x247   : > { %v14069_v41 = vpop.f32.mrf.mxu0 }
 0x24a   : > { %11582 = vmatmul.msk.f32.gmra.mxu0 %vm387_vm1, %v1839_v48  ;;  %11671 = vmatmul.msk.f32.vlgmr.msra.gmra.mxu3 %vm387_vm1, %v2849_v15  ;;  %v18210_v48 = vld [vmem:[#allocation81_spill] sm:$0xff]  ;;  %v18211_v15 = vld [vmem:[#allocation82_spill] sm:$0xff] }
 0x24b   : > { %11625 = vmatmul.msk.f32.gmra.mxu1 %vm387_vm1, %v2537_v34  ;;  %11132 = vperm.xlu2 %12546, %v11001_v22   ;;  %v18205_v34 = vld [vmem:[#allocation77_spill] sm:$0xff] }
 0x24c   : > { %11668 = vmatmul.msk.f32.gmra.mxu2 %vm387_vm1, %v2539_v25  ;;  %11202 = vperm.xlu1 %12545, %v11015_v50   ;;  %v1055_v45 = vadd.f32 %v18206_v3, %v18205_v34  ;;  %v1058_v25 = vadd.f32 %v18211_v15, %v18210_v48  ;;  %v2852_v50 = vld [vmem:[%s12661_s30 + $0x3d] sm:$0xff]  ;;  %v18216_v34 = vld [vmem:[#allocation86_spill] sm:$0xff]  ;;  %v14142_v48 = vpop.f32.mrf.mxu1 }
 0x24d   : > { %v1710_v59 = vpop.f32.mrf.mxu3 }
 0x24e   : > { %v14081_v53 = vadd.f32 %v1710_v59, %v1433_v1  ;;  %v1434_v33 = vadd.f32 %v18207_v8, %v1055_v45  ;;  %v1435_v62 = vadd.f32 %v18212_v4, %v1058_v25  ;;  %v11007_v59 = vld [vmem:[%s18029_s10 + $0xe0] sm:$0xff] }
 0x24f   : > { %v14089_v16 = vpop.f32.mrf.mxu0 }
 0x250   : > { %18203 = vst [vmem:[#allocation4_spill] sm:$0xff] %v14081_v53 }
 0x251   : > { %18204 = vst [vmem:[#allocation5_spill] sm:$0xff] %v14089_v16  ;;  %v2867_v16 = vld [vmem:[%s12661_s30 + $0xb5] sm:$0xff] }
 0x252   : > { %11672 = vmatmul.msk.f32.gmra.mxu3 %vm387_vm1, %v2850_v36  ;;  %11714 = vmatmul.msk.f32.vlgmr.msra.gmra.mxu0 %vm387_vm1, %v3199_v57  ;;  %v3201_v36 = vld [vmem:[%s12661_s30 + $0x36] sm:$0xff]  ;;  %v18215_v57 = vld [vmem:[#allocation85_spill] sm:$0xff] }
 0x253   : > { %11147 = vperm.xlu2 %12546, %v11004_v28   ;;  %v1061_v3 = vadd.f32 %v18216_v34, %v18215_v57  ;;  %v11010_v28 = vld [vmem:[%s18029_s10 + $0xf8] sm:$0xff]  ;;  %v18222_v57 = vld [vmem:[#allocation90_spill] sm:$0xff] }
 0x254   : > { %11217 = vperm.xlu1 %12545, %v11018_v58   ;;  %v18223_v34 = vld [vmem:[#allocation91_spill] sm:$0xff] }
 0x255   : > { %v1713_v30 = vpop.f32.mrf.mxu3  ;;  %v1436_v45 = vadd.f32 %v13543_v17, %v1061_v3  ;;  %v18219_v17 = vld [vmem:[#allocation88_spill] sm:$0xff]  ;;  %v1067_v3 = vadd.f32 %v18223_v34, %v18222_v57 }
 0x256   : > { %v14098_v14 = vadd.f32 %v1713_v30, %v1434_v33  ;;  %v14131_v33 = vpop.f32.mrf.mxu2  ;;  %v1064_v15 = vadd.f32 %v18219_v17, %v13557_v35  ;;  %v2855_v17 = vld [vmem:[%s12661_s30 + $0x55] sm:$0xff]  ;;  %v2856_v34 = vld [vmem:[%s12661_s30 + $0x5d] sm:$0xff] }
 0x257   : > { %v14106_v52 = vpop.f32.mrf.mxu0 }
 0x258   : > { %18208 = vst [vmem:[#allocation6_spill] sm:$0xff] %v14098_v14  ;;  %v1437_v25 = vadd.f32 %v13573_v23, %v1064_v15  ;;  %v14162_v23 = vpop.f32.mrf.mxu1  ;;  %v3204_v15 = vld [vmem:[%s12661_s30 + $0x4e] sm:$0xff] }
 0x259   : > { %18209 = vst [vmem:[#allocation44_spill] sm:$0xff] %v14106_v52  ;;  %v3213_v52 = vld [vmem:[%s12661_s30 + $0x96] sm:$0xff] }
 0x25a   : > { %11673 = vmatmul.msk.f32.gmra.mxu3 %vm387_vm1, %v2851_v9  ;;  %11715 = vmatmul.msk.f32.gmra.mxu0 %vm387_vm1, %v3200_v7  ;;  %v2853_v9 = vld [vmem:[%s12661_s30 + $0x45] sm:$0xff] }
 0x25b   : > { %11162 = vperm.xlu2 %12546, %v11007_v59   ;;  %v3202_v7 = vld [vmem:[%s12661_s30 + $0x3e] sm:$0xff] }
 0x25d   : > { %v1716_v13 = vpop.f32.mrf.mxu3 }
 0x25e   : > { %v14117_v1 = vadd.f32 %v1716_v13, %v1435_v62  ;;  %v11013_v13 = vld [vmem:[%s18029_s10 + $0x110] sm:$0xff]  ;;  %v14158_v35 = vpop.f32.mrf.mxu2 }
 0x25f   : > { %v14122_v22 = vpop.f32.mrf.mxu0 }
 0x260   : > { %18213 = vst [vmem:[#allocation7_spill] sm:$0xff] %v14117_v1  ;;  %v3212_v1 = vld [vmem:[%s12661_s30 + $0x8e] sm:$0xff] }
 0x261   : > { %18214 = vst [vmem:[#allocation8_spill] sm:$0xff] %v14122_v22  ;;  %v2863_v22 = vld [vmem:[%s12661_s30 + $0x95] sm:$0xff] }
 0x262   : > { %11674 = vmatmul.msk.f32.gmra.mxu3 %vm387_vm1, %v2852_v50  ;;  %11716 = vmatmul.msk.f32.gmra.mxu0 %vm387_vm1, %v3201_v36  ;;  %v2854_v50 = vld [vmem:[%s12661_s30 + $0x4d] sm:$0xff] }
 0x263   : > { %11177 = vperm.xlu2 %12546, %v11010_v28   ;;  %v3203_v36 = vld [vmem:[%s12661_s30 + $0x46] sm:$0xff] }
 0x265   : > { %v1719_v8 = vpop.f32.mrf.mxu3 }
 0x266   : > { %v14133_v30 = vadd.f32 %v1719_v8, %v1436_v45  ;;  %v1438_v45 = vadd.f32 %v13604_v6, %v1067_v3  ;;  %v14180_v6 = vpop.f32.mrf.mxu1  ;;  %v3205_v3 = vld [vmem:[%s12661_s30 + $0x56] sm:$0xff] }
 0x267   : > { %v14138_v58 = vpop.f32.mrf.mxu0 }
 0x268   : > { %18217 = vst [vmem:[#allocation9_spill] sm:$0xff] %v14133_v30  ;;  %v18036_v30 = vmov 0.0  }
 0x269   : > { %18218 = vst [vmem:[#allocation40_spill] sm:$0xff] %v14138_v58  ;;  %v18241_v58 = vld [vmem:[#allocation76_spill] sm:$0xff] }
 0x26a   : > { %11675 = vmatmul.msk.f32.gmra.mxu3 %vm387_vm1, %v2853_v9  ;;  %11717 = vmatmul.msk.f32.gmra.mxu0 %vm387_vm1, %v3202_v7  ;;  %v11016_v9 = vld [vmem:[%s18029_s10 + $0x128] sm:$0xff]  ;;  %388 = vst.msk [vmem:[#allocation2] sm:$0xff] %vm387_vm1, %v18036_v30 }
 0x26b   : > { %11192 = vperm.xlu2 %12546, %v11013_v13   ;;  %v18226_v13 = vld [vmem:[#allocation56_spill] sm:$0xff]  ;;  %389 = vst.msk [vmem:[#allocation2 + $0x8] sm:$0xff] %vm387_vm1, %v18036_v30 }
 0x26c   : > { %390 = vst.msk [vmem:[#allocation2 + $0x10] sm:$0xff] %vm387_vm1, %v18036_v30 }
 0x26d   : > { %v1722_v4 = vpop.f32.mrf.mxu3  ;;  %391 = vst.msk [vmem:[#allocation2 + $0x18] sm:$0xff] %vm387_vm1, %v18036_v30 }
 0x26e   : > { %v14149_v62 = vadd.f32 %v1722_v4, %v1437_v25  ;;  %v14176_v25 = vpop.f32.mrf.mxu2  ;;  %392 = vst.msk [vmem:[#allocation2 + $0x20] sm:$0xff] %vm387_vm1, %v18036_v30 }
 0x26f   : > { %v14154_v59 = vpop.f32.mrf.mxu0  ;;  %393 = vst.msk [vmem:[#allocation2 + $0x28] sm:$0xff] %vm387_vm1, %v18036_v30 }
 0x270   : > { %18220 = vst [vmem:[#allocation10_spill] sm:$0xff] %v14149_v62 }
 0x271   : > { %18221 = vst [vmem:[#allocation11_spill] sm:$0xff] %v14154_v59 }
 0x272   : > { %11676 = vmatmul.msk.f32.gmra.mxu3 %vm387_vm1, %v2854_v50  ;;  %11718 = vmatmul.msk.f32.gmra.mxu0 %vm387_vm1, %v3203_v36  ;;  %v11019_v36 = vld [vmem:[%s18029_s10 + $0x140] sm:$0xff]  ;;  %394 = vst.msk [vmem:[#allocation2 + $0x30] sm:$0xff] %vm387_vm1, %v18036_v30 }
 0x273   : > { %11207 = vperm.xlu2 %12546, %v11016_v9   ;;  %v14196_v9 = vpop.f32.mrf.mxu1  ;;  %395 = vst.msk [vmem:[#allocation2 + $0x38] sm:$0xff] %vm387_vm1, %v18036_v30 }
 0x274   : > { %396 = vst.msk [vmem:[#allocation2 + $0x40] sm:$0xff] %vm387_vm1, %v18036_v30 }
 0x275   : > { %v1725_v8 = vpop.f32.mrf.mxu3  ;;  %397 = vst.msk [vmem:[#allocation2 + $0x48] sm:$0xff] %vm387_vm1, %v18036_v30 }
 0x276   : > { %v14167_v28 = vadd.f32 %v1725_v8, %v1438_v45  ;;  %v14194_v45 = vpop.f32.mrf.mxu2  ;;  %398 = vst.msk [vmem:[#allocation2 + $0x50] sm:$0xff] %vm387_vm1, %v18036_v30 }
 0x277   : > { %v14172_v7 = vpop.f32.mrf.mxu0  ;;  %399 = vst.msk [vmem:[#allocation2 + $0x58] sm:$0xff] %vm387_vm1, %v18036_v30 }
 0x278   : > { %18224 = vst [vmem:[#allocation12_spill] sm:$0xff] %v14167_v28 }
 0x279   : > { %18225 = vst [vmem:[#allocation45_spill] sm:$0xff] %v14172_v7 }
 0x27a   : > { %11677 = vmatmul.msk.f32.gmra.mxu3 %vm387_vm1, %v2855_v17  ;;  %11719 = vmatmul.msk.f32.gmra.mxu0 %vm387_vm1, %v3204_v15  ;;  %v18229_v17 = vld [vmem:[#allocation60_spill] sm:$0xff]  ;;  %400 = vst.msk [vmem:[#allocation2 + $0x60] sm:$0xff] %vm387_vm1, %v18036_v30 }
 0x27b   : > { %11222 = vperm.xlu2 %12546, %v11019_v36   ;;  %401 = vst.msk [vmem:[#allocation2 + $0x68] sm:$0xff] %vm387_vm1, %v18036_v30 }
 0x27c   : > { %402 = vst.msk [vmem:[#allocation2 + $0x70] sm:$0xff] %vm387_vm1, %v18036_v30 }
 0x27d   : > { %v1728_v4 = vpop.f32.mrf.mxu3  ;;  %403 = vst.msk [vmem:[#allocation2 + $0x78] sm:$0xff] %vm387_vm1, %v18036_v30 }
 0x27e   : > { %v14183_v50 = vadd.f32 %v1728_v4, %v18226_v13  ;;  %v2857_v13 = vld [vmem:[%s12661_s30 + $0x65] sm:$0xff]  ;;  %404 = vst.msk [vmem:[#allocation2 + $0x80] sm:$0xff] %vm387_vm1, %v18036_v30 }
 0x27f   : > { %v14188_v57 = vpop.f32.mrf.mxu0  ;;  %405 = vst.msk [vmem:[#allocation2 + $0x88] sm:$0xff] %vm387_vm1, %v18036_v30 }
 0x280   : > { %18227 = vst [vmem:[#allocation13_spill] sm:$0xff] %v14183_v50 }
 0x281   : > { %18228 = vst [vmem:[#allocation14_spill] sm:$0xff] %v14188_v57  ;;  %v3206_v57 = vld [vmem:[%s12661_s30 + $0x5e] sm:$0xff] }
 0x282   : > { %11678 = vmatmul.msk.f32.gmra.mxu3 %vm387_vm1, %v2856_v34  ;;  %11720 = vmatmul.msk.f32.gmra.mxu0 %vm387_vm1, %v3205_v3  ;;  %v14207_v34 = vpop.f32.mrf.mxu2  ;;  %v18232_v3 = vld [vmem:[#allocation64_spill] sm:$0xff]  ;;  %406 = vst.msk [vmem:[#allocation2 + $0x90] sm:$0xff] %vm387_vm1, %v18036_v30 }
 0x283   : > { %407 = vst.msk [vmem:[#allocation2 + $0x98] sm:$0xff] %vm387_vm1, %v18036_v30 }
 0x284   : > { %408 = vst.msk [vmem:[#allocation2 + $0xa0] sm:$0xff] %vm387_vm1, %v18036_v30 }
 0x285   : > { %v1731_v8 = vpop.f32.mrf.mxu3  ;;  %409 = vst.msk [vmem:[#allocation2 + $0xa8] sm:$0xff] %vm387_vm1, %v18036_v30 }
 0x286   : > { %v14199_v15 = vadd.f32 %v1731_v8, %v18229_v17  ;;  %v2858_v8 = vld [vmem:[%s12661_s30 + $0x6d] sm:$0xff]  ;;  %410 = vst.msk [vmem:[#allocation2 + $0xb0] sm:$0xff] %vm387_vm1, %v18036_v30 }
 0x287   : > { %v14201_v4 = vpop.f32.mrf.mxu0  ;;  %v3207_v17 = vld [vmem:[%s12661_s30 + $0x66] sm:$0xff]  ;;  %411 = vst.msk [vmem:[#allocation2 + $0xb8] sm:$0xff] %vm387_vm1, %v18036_v30 }
 0x288   : > { %18230 = vst [vmem:[#allocation15_spill] sm:$0xff] %v14199_v15 }
 0x289   : > { %18231 = vst [vmem:[#allocation49_spill] sm:$0xff] %v14201_v4  ;;  %v14216_v4 = vpop.f32.mrf.mxu1 }
 0x28a   : > { %11679 = vmatmul.msk.f32.gmra.mxu3 %vm387_vm1, %v2857_v13  ;;  %11721 = vmatmul.msk.f32.gmra.mxu0 %vm387_vm1, %v3206_v57  ;;  %v18235_v57 = vld [vmem:[#allocation68_spill] sm:$0xff]  ;;  %412 = vst.msk [vmem:[#allocation2 + $0xc0] sm:$0xff] %vm387_vm1, %v18036_v30 }
 0x28b   : > { %413 = vst.msk [vmem:[#allocation2 + $0xc8] sm:$0xff] %vm387_vm1, %v18036_v30 }
 0x28c   : > { %414 = vst.msk [vmem:[#allocation2 + $0xd0] sm:$0xff] %vm387_vm1, %v18036_v30 }
 0x28d   : > { %v1734_v36 = vpop.f32.mrf.mxu3  ;;  %415 = vst.msk [vmem:[#allocation2 + $0xd8] sm:$0xff] %vm387_vm1, %v18036_v30 }
 0x28e   : > { %v14210_v50 = vadd.f32 %v1734_v36, %v18232_v3  ;;  %v2859_v36 = vld [vmem:[%s12661_s30 + $0x75] sm:$0xff]  ;;  %416 = vst.msk [vmem:[#allocation2 + $0xe0] sm:$0xff] %vm387_vm1, %v18036_v30 }
 0x28f   : > { %v14212_v7 = vpop.f32.mrf.mxu0  ;;  %v3208_v3 = vld [vmem:[%s12661_s30 + $0x6e] sm:$0xff]  ;;  %417 = vst.msk [vmem:[#allocation2 + $0xe8] sm:$0xff] %vm387_vm1, %v18036_v30 }
 0x290   : > { %18233 = vst [vmem:[#allocation16_spill] sm:$0xff] %v14210_v50  ;;  %v14227_v50 = vpop.f32.mrf.mxu2 }
 0x291   : > { %18234 = vst [vmem:[#allocation17_spill] sm:$0xff] %v14212_v7  ;;  %v14229_v7 = vpop.f32.mrf.mxu1 }
 0x292   : > { %11680 = vmatmul.msk.f32.gmra.mxu3 %vm387_vm1, %v2858_v8  ;;  %11722 = vmatmul.msk.f32.gmra.mxu0 %vm387_vm1, %v3207_v17  ;;  %v18238_v17 = vld [vmem:[#allocation72_spill] sm:$0xff]  ;;  %418 = vst.msk [vmem:[#allocation2 + $0xf0] sm:$0xff] %vm387_vm1, %v18036_v30 }
 0x293   : > { %419 = vst.msk [vmem:[#allocation2 + $0xf8] sm:$0xff] %vm387_vm1, %v18036_v30 }
 0x294   : > { %420 = vst.msk [vmem:[#allocation2 + $0x100] sm:$0xff] %vm387_vm1, %v18036_v30 }
 0x295   : > { %v1737_v13 = vpop.f32.mrf.mxu3  ;;  %421 = vst.msk [vmem:[#allocation2 + $0x108] sm:$0xff] %vm387_vm1, %v18036_v30 }
 0x296   : > { %v14221_v15 = vadd.f32 %v1737_v13, %v18235_v57  ;;  %v2860_v57 = vld [vmem:[%s12661_s30 + $0x7d] sm:$0xff]  ;;  %422 = vst.msk [vmem:[#allocation2 + $0x110] sm:$0xff] %vm387_vm1, %v18036_v30 }
 0x297   : > { %v14223_v28 = vpop.f32.mrf.mxu0  ;;  %423 = vst.msk [vmem:[#allocation2 + $0x118] sm:$0xff] %vm387_vm1, %v18036_v30 }
 0x298   : > { %18236 = vst [vmem:[#allocation18_spill] sm:$0xff] %v14221_v15  ;;  %v14240_v15 = vpop.f32.mrf.mxu2 }
 0x299   : > { %18237 = vst [vmem:[#allocation53_spill] sm:$0xff] %v14223_v28  ;;  %v3209_v28 = vld [vmem:[%s12661_s30 + $0x76] sm:$0xff]  ;;  %v14244_v62 = vpop.f32.mrf.mxu1 }
 0x29a   : > { %11681 = vmatmul.msk.f32.gmra.mxu3 %vm387_vm1, %v2859_v36  ;;  %11723 = vmatmul.msk.f32.gmra.mxu0 %vm387_vm1, %v3208_v3  ;;  %424 = vst.msk [vmem:[#allocation2 + $0x120] sm:$0xff] %vm387_vm1, %v18036_v30 }
 0x29b   : > { %425 = vst.msk [vmem:[#allocation2 + $0x128] sm:$0xff] %vm387_vm1, %v18036_v30 }
 0x29c   : > { %426 = vst.msk [vmem:[#allocation2 + $0x130] sm:$0xff] %vm387_vm1, %v18036_v30 }
 0x29d   : > { %v1740_v8 = vpop.f32.mrf.mxu3  ;;  %427 = vst.msk [vmem:[#allocation2 + $0x138] sm:$0xff] %vm387_vm1, %v18036_v30 }
 0x29e   : > { %v14234_v59 = vadd.f32 %v1740_v8, %v18238_v17  ;;  %v2861_v17 = vld [vmem:[%s12661_s30 + $0x85] sm:$0xff]  ;;  %428 = vst.msk [vmem:[#allocation2 + $0x140] sm:$0xff] %vm387_vm1, %v18036_v30 }
 0x29f   : > { %v14236_v13 = vpop.f32.mrf.mxu0  ;;  %429 = vst.msk [vmem:[#allocation2 + $0x148] sm:$0xff] %vm387_vm1, %v18036_v30 }
 0x2a0   : > { %18239 = vst [vmem:[#allocation19_spill] sm:$0xff] %v14234_v59  ;;  %v3211_v59 = vld [vmem:[%s12661_s30 + $0x86] sm:$0xff] }
 0x2a1   : > { %18240 = vst [vmem:[#allocation20_spill] sm:$0xff] %v14236_v13  ;;  %v3210_v13 = vld [vmem:[%s12661_s30 + $0x7e] sm:$0xff] }
 0x2a2   : > { %11682 = vmatmul.msk.f32.gmra.mxu3 %vm387_vm1, %v2860_v57  ;;  %11724 = vmatmul.msk.f32.gmra.mxu0 %vm387_vm1, %v3209_v28  ;;  %v14271_v28 = vpop.f32.mrf.mxu2  ;;  %430 = vst.msk [vmem:[#allocation2 + $0x150] sm:$0xff] %vm387_vm1, %v18036_v30 }
 0x2a3   : > { %18244 = vst [vmem:[#allocation23_spill] sm:$0xff] %v14271_v28 }
 0x2a4   : > { %431 = vst.msk [vmem:[#allocation2 + $0x158] sm:$0xff] %vm387_vm1, %v18036_v30 }
 0x2a5   : > { %v1743_v36 = vpop.f32.mrf.mxu3  ;;  %432 = vst.msk [vmem:[#allocation2 + $0x160] sm:$0xff] %vm387_vm1, %v18036_v30 }
 0x2a6   : > { %v14247_v3 = vadd.f32 %v1743_v36, %v18241_v58  ;;  %v11840_v58 = vld [vmem:[%s18023_s4 + $0x8] sm:$0xf]  ;;  %v14277_v36 = vpop.f32.mrf.mxu1  ;;  %433 = vst.msk [vmem:[#allocation2 + $0x168] sm:$0xff] %vm387_vm1, %v18036_v30 }
 0x2a7   : > { %v14251_v8 = vpop.f32.mrf.mxu0  ;;  %11841 = vmatpush.msk.msrb.mxu3 %vm689_vm0, %v11840_v58  ;;  %18245 = vst [vmem:[#allocation24_spill] sm:$0xff] %v14277_v36 }
 0x2a8   : > { %18242 = vst [vmem:[#allocation21_spill] sm:$0xff] %v14247_v3  ;;  %v2862_v3 = vld [vmem:[%s12661_s30 + $0x8d] sm:$0xff] }
 0x2a9   : > { %18243 = vst [vmem:[#allocation22_spill] sm:$0xff] %v14251_v8 }
 0x2aa   : > { %11683 = vmatmul.msk.f32.gmra.mxu3 %vm387_vm1, %v2861_v17  ;;  %11725 = vmatmul.msk.f32.gmra.mxu0 %vm387_vm1, %v3210_v13  ;;  %v4090_v13 = vld [vmem:[#allocation2] sm:$0xff] }
 0x2ab   : > { %v18246_v17 = vld [vmem:[#allocation80_spill] sm:$0xff]  ;;  %11799 = vmatmul.msk.f32.vlgmr.msra.gmra.mxu2 %vm387_vm1, %v4090_v13 }
 0x2ad   : > { %v1746_v57 = vpop.f32.mrf.mxu3 }
 0x2ae   : > { %v14280_v8 = vadd.f32 %v1746_v57, %v18246_v17  ;;  %v4132_v57 = vld [vmem:[#allocation2 + $0x1] sm:$0xff]  ;;  %v14306_v17 = vpop.f32.mrf.mxu2 }
 0x2af   : > { %v14285_v58 = vpop.f32.mrf.mxu0  ;;  %11757 = vmatmul.msk.f32.vlgmr.msra.gmra.mxu1 %vm387_vm1, %v4132_v57  ;;  %18249 = vst [vmem:[#allocation27_spill] sm:$0xff] %v14306_v17  ;;  %v14320_v57 = vpop.f32.mrf.mxu1 }
 0x2b0   : > { %18247 = vst [vmem:[#allocation25_spill] sm:$0xff] %v14280_v8 }
 0x2b1   : > { %18248 = vst [vmem:[#allocation26_spill] sm:$0xff] %v14285_v58 }
 0x2b2   : > { %11684 = vmatmul.msk.f32.gmra.mxu3 %vm387_vm1, %v2862_v3  ;;  %11726 = vmatmul.msk.f32.gmra.mxu0 %vm387_vm1, %v3211_v59  ;;  %v4091_v3 = vld [vmem:[#allocation2 + $0x8] sm:$0xff]  ;;  %v18250_v59 = vld [vmem:[#allocation84_spill] sm:$0xff]  ;;  %18253 = vst [vmem:[#allocation30_spill] sm:$0xff] %v14320_v57 }
 0x2b3   : > { %11800 = vmatmul.msk.f32.gmra.mxu2 %vm387_vm1, %v4091_v3  ;;  %v11926_v3 = vld [vmem:[%s18023_s4 + $0x10] sm:$0xf]  ;;  %v2864_v57 = vld [vmem:[%s12661_s30 + $0x9d] sm:$0xff] }
 0x2b4   : > { %11927 = vmatpush.msk.msrb.mxu1 %vm689_vm0, %v11926_v3 }
 0x2b5   : > { %v1749_v13 = vpop.f32.mrf.mxu3 }
 0x2b6   : > { %v14309_v58 = vadd.f32 %v1749_v13, %v18250_v59  ;;  %v11883_v13 = vld [vmem:[%s18023_s4 + $0xc] sm:$0xf] }
 0x2b7   : > { %v14314_v8 = vpop.f32.mrf.mxu0  ;;  %v4133_v59 = vld [vmem:[#allocation2 + $0x9] sm:$0xff]  ;;  %11884 = vmatpush.msk.msrb.mxu0 %vm689_vm0, %v11883_v13  ;;  %v14356_v13 = vpop.f32.mrf.mxu2 }
 0x2b8   : > { %18251 = vst [vmem:[#allocation28_spill] sm:$0xff] %v14309_v58  ;;  %11758 = vmatmul.msk.f32.gmra.mxu1 %vm387_vm1, %v4133_v59  ;;  %v14362_v3 = vpop.f32.mrf.mxu1 }
 0x2b9   : > { %18252 = vst [vmem:[#allocation29_spill] sm:$0xff] %v14314_v8 }
 0x2ba   : > { %11685 = vmatmul.msk.f32.gmra.mxu3 %vm387_vm1, %v2863_v22  ;;  %11727 = vmatmul.msk.f32.gmra.mxu0 %vm387_vm1, %v3212_v1  ;;  %v18254_v22 = vld [vmem:[#allocation87_spill] sm:$0xff]  ;;  %18257 = vst [vmem:[#allocation33_spill] sm:$0xff] %v14356_v13  ;;  %v3806_v13 = vpop.permute.xlu0 %3805 }
 0x2bb   : > { %18258 = vst [vmem:[#allocation34_spill] sm:$0xff] %v14362_v3 }
 0x2bd   : > { %v1752_v1 = vpop.f32.mrf.mxu3 }
 0x2be   : > { %v14346_v8 = vadd.f32 %v1752_v1, %v18254_v22  ;;  %v18259_v1 = vld [vmem:[#allocation89_spill] sm:$0xff] }
 0x2bf   : > { %v14350_v58 = vpop.f32.mrf.mxu0 }
 0x2c0   : > { %18255 = vst [vmem:[#allocation31_spill] sm:$0xff] %v14346_v8  ;;  %v2866_v8 = vld [vmem:[%s12661_s30 + $0xad] sm:$0xff] }
 0x2c1   : > { %18256 = vst [vmem:[#allocation32_spill] sm:$0xff] %v14350_v58  ;;  %v3214_v58 = vld [vmem:[%s12661_s30 + $0x9e] sm:$0xff] }
 0x2c2   : > { %11686 = vmatmul.msk.f32.gmra.mxu3 %vm387_vm1, %v2864_v57  ;;  %11728 = vmatmul.msk.f32.gmra.mxu0 %vm387_vm1, %v3213_v52  ;;  %v2865_v57 = vld [vmem:[%s12661_s30 + $0xa5] sm:$0xff] }
 0x2c5   : > { %v1755_v59 = vpop.f32.mrf.mxu3 }
 0x2c6   : > { %v14375_v22 = vadd.f32 %v1755_v59, %v18259_v1  ;;  %v14389_v59 = vpop.f32.mrf.mxu2  ;;  %v14397_v1 = vpop.f32.mrf.mxu1 }
 0x2c7   : > { %v14379_v52 = vpop.f32.mrf.mxu0  ;;  %18262 = vst [vmem:[#allocation37_spill] sm:$0xff] %v14389_v59 }
 0x2c8   : > { %18260 = vst [vmem:[#allocation35_spill] sm:$0xff] %v14375_v22 }
 0x2c9   : > { %18261 = vst [vmem:[#allocation36_spill] sm:$0xff] %v14379_v52 }
 0x2ca   : > { %11687 = vmatmul.msk.f32.gmra.mxu3 %vm387_vm1, %v2865_v57  ;;  %11729 = vmatmul.msk.f32.gmra.mxu0 %vm387_vm1, %v3214_v58  ;;  %18263 = vst [vmem:[#allocation38_spill] sm:$0xff] %v14397_v1  ;;  %v14409_v58 = vld [vmem:[%s18021_s2] ss:$0 sm:$0xff]  ;;  %v3215_v1 = vld [vmem:[%s12661_s30 + $0xa6] sm:$0xff] }
 0x2cd   : > { %v3035_v52 = vpop.f32.mrf.mxu3 }
 0x2ce   : > { %v3158_v22 = vadd.f32 %v3035_v52, %v13629_v18  ;;  %v14420_v18 = vld [vmem:[%s18022_s3] ss:$0 sm:$0xff]  ;;  %v14434_v14 = vpop.f32.mrf.mxu1 }
 0x2cf   : > { %v3385_v57 = vpop.f32.mrf.mxu0  ;;  %18265 = vst [vmem:[#allocation41_spill] sm:$0xff] %v14434_v14 }
 0x2d0   : > { %v3508_v59 = vadd.f32 %v3385_v57, %v3158_v22  ;;  %v14431_v22 = vpop.f32.mrf.mxu2 }
 0x2d1   : > { %18264 = vst [vmem:[#allocation39_spill] sm:$0xff] %v14431_v22 }
 0x2d2   : > { %v3553_v52 = vmul.f32 %v14409_v58, %v3508_v59  ;;  %11688 = vmatmul.msk.f32.gmra.mxu3 %vm387_vm1, %v2866_v8  ;;  %11730 = vmatmul.msk.f32.gmra.mxu0 %vm387_vm1, %v3215_v1  ;;  %v3216_v8 = vld [vmem:[%s12661_s30 + $0xae] sm:$0xff] }
 0x2d4   : > { %v3598_v57 = vadd.f32 %v14420_v18, %v3553_v52 }
 0x2d5   : > { %v3038_v3 = vpop.f32.mrf.mxu3 }
 0x2d6   : > { %vm3639_vm2 = vcmp.ge.f32.partialorder %v3598_v57, 0.0  ;;  %v3680_v17 = vmul.f32 0.1, %v3598_v57  ;;  %v3159_v36 = vadd.f32 %v3038_v3, %v13649_v29 }
 0x2d7   : > { %v3388_v59 = vpop.f32.mrf.mxu0 }
 0x2d8   : > { %v3721_v1 = vsel %vm3639_vm2, %v3598_v57, %v3680_v17  ;;  %v3509_v53 = vadd.f32 %v3388_v59, %v3159_v36  ;;  %v14444_v29 = vpop.f32.mrf.mxu2  ;;  %v2868_v36 = vld [vmem:[%s12661_s30 + $0xbd] sm:$0xff]  ;;  %v3811_v57 = vpop.permute.xlu0 %3810 }
 0x2d9   : > { %v4008_v30 = vmul.f32 %v3806_v13, %v3721_v1  ;;  %v3217_v13 = vld [vmem:[%s12661_s30 + $0xb6] sm:$0xff] }
 0x2da   : > { %v3554_v22 = vmul.f32 %v14409_v58, %v3509_v53  ;;  %11689 = vmatmul.msk.f32.gmra.mxu3 %vm387_vm1, %v2867_v16  ;;  %11731 = vmatmul.msk.f32.gmra.mxu0 %vm387_vm1, %v3216_v8  ;;  %v14449_v53 = vpop.f32.mrf.mxu1 }
 0x2db   : > { %4049 = vst.msk [vmem:[#allocation2 + $0x13] sm:$0xff] %vm387_vm1, %v4008_v30 }
 0x2dc   : > { %v3599_v52 = vadd.f32 %v14420_v18, %v3554_v22 }
 0x2dd   : > { %v3041_v14 = vpop.f32.mrf.mxu3 }
 0x2de   : > { %vm3640_vm3 = vcmp.ge.f32.partialorder %v3599_v52, 0.0  ;;  %v3681_v3 = vmul.f32 0.1, %v3599_v52  ;;  %v3160_v28 = vadd.f32 %v3041_v14, %v13669_v40 }
 0x2df   : > { %v3391_v17 = vpop.f32.mrf.mxu0 }
 0x2e0   : > { %v3722_v16 = vsel %vm3640_vm3, %v3599_v52, %v3681_v3  ;;  %v3510_v59 = vadd.f32 %v3391_v17, %v3160_v28  ;;  %v3816_v28 = vpop.permute.xlu1 %3815 }
 0x2e1   : > { %v4009_v8 = vmul.f32 %v3811_v57, %v3722_v16  ;;  %v3218_v57 = vld [vmem:[%s12661_s30 + $0xbe] sm:$0xff] }
 0x2e2   : > { %v3555_v30 = vmul.f32 %v14409_v58, %v3510_v59  ;;  %11690 = vmatmul.msk.f32.gmra.mxu3 %vm387_vm1, %v2868_v36  ;;  %11732 = vmatmul.msk.f32.gmra.mxu0 %vm387_vm1, %v3217_v13  ;;  %v4134_v22 = vld [vmem:[#allocation2 + $0x11] sm:$0xff]  ;;  %v2869_v36 = vld [vmem:[%s12661_s30 + $0xc5] sm:$0xff]  ;;  %v14461_v13 = vpop.f32.mrf.mxu2 }
 0x2e3   : > { %v4092_v1 = vld [vmem:[#allocation2 + $0x10] sm:$0xff]  ;;  %4050 = vst.msk [vmem:[#allocation2 + $0x1b] sm:$0xff] %vm387_vm1, %v4009_v8  ;;  %11759 = vmatmul.msk.f32.gmra.mxu1 %vm387_vm1, %v4134_v22  ;;  %v14463_v22 = vpop.f32.mrf.mxu1 }
 0x2e4   : > { %11801 = vmatmul.msk.f32.gmra.mxu2 %vm387_vm1, %v4092_v1  ;;  %v3600_v40 = vadd.f32 %v14420_v18, %v3555_v30  ;;  %18266 = vst [vmem:[#allocation42_spill] sm:$0xff] %v14461_v13 }
 0x2e5   : > { %v3044_v14 = vpop.f32.mrf.mxu3  ;;  %18267 = vst [vmem:[#allocation43_spill] sm:$0xff] %v14463_v22 }
 0x2e6   : > { %vm3641_vm4 = vcmp.ge.f32.partialorder %v3600_v40, 0.0  ;;  %v3682_v52 = vmul.f32 0.1, %v3600_v40  ;;  %v3161_v3 = vadd.f32 %v3044_v14, %v13684_v26 }
 0x2e7   : > { %v3394_v17 = vpop.f32.mrf.mxu0 }
 0x2e8   : > { %v3723_v16 = vsel %vm3641_vm4, %v3600_v40, %v3682_v52  ;;  %v3511_v59 = vadd.f32 %v3394_v17, %v3161_v3  ;;  %v2870_v17 = vld [vmem:[%s12661_s30 + $0xcd] sm:$0xff] }
 0x2e9   : > { %v4010_v8 = vmul.f32 %v3816_v28, %v3723_v16  ;;  %v3821_v16 = vpop.permute.xlu1 %3820 }
 0x2ea   : > { %v3556_v30 = vmul.f32 %v14409_v58, %v3511_v59  ;;  %11691 = vmatmul.msk.f32.gmra.mxu3 %vm387_vm1, %v2869_v36  ;;  %11733 = vmatmul.msk.f32.gmra.mxu0 %vm387_vm1, %v3218_v57  ;;  %v4135_v1 = vld [vmem:[#allocation2 + $0x19] sm:$0xff]  ;;  %v3219_v36 = vld [vmem:[%s12661_s30 + $0xc6] sm:$0xff]  ;;  %v14475_v13 = vpop.f32.mrf.mxu2 }
 0x2eb   : > { %v4093_v26 = vld [vmem:[#allocation2 + $0x18] sm:$0xff]  ;;  %4051 = vst.msk [vmem:[#allocation2 + $0x23] sm:$0xff] %vm387_vm1, %v4010_v8  ;;  %11760 = vmatmul.msk.f32.gmra.mxu1 %vm387_vm1, %v4135_v1 }
 0x2ec   : > { %11802 = vmatmul.msk.f32.gmra.mxu2 %vm387_vm1, %v4093_v26  ;;  %v3601_v40 = vadd.f32 %v14420_v18, %v3556_v30 }
 0x2ed   : > { %v3047_v14 = vpop.f32.mrf.mxu3 }
 0x2ee   : > { %vm3642_vm5 = vcmp.ge.f32.partialorder %v3601_v40, 0.0  ;;  %v3683_v28 = vmul.f32 0.1, %v3601_v40  ;;  %v3162_v52 = vadd.f32 %v3047_v14, %v13699_v47  ;;  %v14483_v47 = vpop.f32.mrf.mxu1  ;;  %v3826_v14 = vpop.permute.xlu2 %3825 }
 0x2ef   : > { %v3397_v3 = vpop.f32.mrf.mxu0 }
 0x2f0   : > { %v3724_v57 = vsel %vm3642_vm5, %v3601_v40, %v3683_v28  ;;  %v3512_v59 = vadd.f32 %v3397_v3, %v3162_v52 }
 0x2f1   : > { %v4011_v22 = vmul.f32 %v3821_v16, %v3724_v57 }
 0x2f2   : > { %v3557_v8 = vmul.f32 %v14409_v58, %v3512_v59  ;;  %11692 = vmatmul.msk.f32.gmra.mxu3 %vm387_vm1, %v2870_v17  ;;  %11734 = vmatmul.msk.f32.gmra.mxu0 %vm387_vm1, %v3219_v36  ;;  %v4136_v30 = vld [vmem:[#allocation2 + $0x21] sm:$0xff]  ;;  %v2871_v17 = vld [vmem:[%s12661_s30 + $0xd5] sm:$0xff] }
 0x2f3   : > { %v4094_v1 = vld [vmem:[#allocation2 + $0x20] sm:$0xff]  ;;  %4052 = vst.msk [vmem:[#allocation2 + $0x2b] sm:$0xff] %vm387_vm1, %v4011_v22  ;;  %11761 = vmatmul.msk.f32.gmra.mxu1 %vm387_vm1, %v4136_v30  ;;  %v3220_v36 = vld [vmem:[%s12661_s30 + $0xce] sm:$0xff] }
 0x2f4   : > { %11803 = vmatmul.msk.f32.gmra.mxu2 %vm387_vm1, %v4094_v1  ;;  %v3602_v26 = vadd.f32 %v14420_v18, %v3557_v8 }
 0x2f5   : > { %v3050_v40 = vpop.f32.mrf.mxu3 }
 0x2f6   : > { %vm3643_vm6 = vcmp.ge.f32.partialorder %v3602_v26, 0.0  ;;  %v3684_v28 = vmul.f32 0.1, %v3602_v26  ;;  %v3163_v52 = vadd.f32 %v3050_v40, %v13714_v51  ;;  %v14495_v51 = vpop.f32.mrf.mxu2  ;;  %v14498_v40 = vpop.f32.mrf.mxu1 }
 0x2f7   : > { %v3400_v3 = vpop.f32.mrf.mxu0 }
 0x2f8   : > { %v3725_v16 = vsel %vm3643_vm6, %v3602_v26, %v3684_v28  ;;  %v3513_v57 = vadd.f32 %v3400_v3, %v3163_v52  ;;  %v2872_v3 = vld [vmem:[%s12661_s30 + $0xdd] sm:$0xff] }
 0x2f9   : > { %v4012_v22 = vmul.f32 %v3826_v14, %v3725_v16 }
 0x2fa   : > { %v3558_v59 = vmul.f32 %v14409_v58, %v3513_v57  ;;  %11693 = vmatmul.msk.f32.gmra.mxu3 %vm387_vm1, %v2871_v17  ;;  %11735 = vmatmul.msk.f32.gmra.mxu0 %vm387_vm1, %v3220_v36  ;;  %v4137_v8 = vld [vmem:[#allocation2 + $0x29] sm:$0xff]  ;;  %v3221_v17 = vld [vmem:[%s12661_s30 + $0xd6] sm:$0xff]  ;;  %v3831_v36 = vpop.permute.xlu2 %3830 }
 0x2fb   : > { %v4095_v30 = vld [vmem:[#allocation2 + $0x28] sm:$0xff]  ;;  %4053 = vst.msk [vmem:[#allocation2 + $0x33] sm:$0xff] %vm387_vm1, %v4012_v22  ;;  %11762 = vmatmul.msk.f32.gmra.mxu1 %vm387_vm1, %v4137_v8 }
 0x2fc   : > { %11804 = vmatmul.msk.f32.gmra.mxu2 %vm387_vm1, %v4095_v30  ;;  %v3603_v1 = vadd.f32 %v14420_v18, %v3558_v59 }
 0x2fd   : > { %v3053_v26 = vpop.f32.mrf.mxu3 }
 0x2fe   : > { %vm3644_vm7 = vcmp.ge.f32.partialorder %v3603_v1, 0.0  ;;  %v3685_v14 = vmul.f32 0.1, %v3603_v1  ;;  %v3164_v28 = vadd.f32 %v3053_v26, %v13729_v55  ;;  %v14510_v26 = vpop.f32.mrf.mxu2 }
 0x2ff   : > { %v3403_v52 = vpop.f32.mrf.mxu0  ;;  %18268 = vst [vmem:[#allocation46_spill] sm:$0xff] %v14510_v26 }
 0x300   : > { %v3726_v16 = vsel %vm3644_vm7, %v3603_v1, %v3685_v14  ;;  %v3514_v57 = vadd.f32 %v3403_v52, %v3164_v28 }
 0x301   : > { %v4013_v22 = vmul.f32 %v3831_v36, %v3726_v16  ;;  %v3836_v36 = vpop.permute.xlu0 %3835  ;;  %v14515_v16 = vpop.f32.mrf.mxu1 }
 0x302   : > { %v3559_v8 = vmul.f32 %v14409_v58, %v3514_v57  ;;  %11694 = vmatmul.msk.f32.gmra.mxu3 %vm387_vm1, %v2872_v3  ;;  %11736 = vmatmul.msk.f32.gmra.mxu0 %vm387_vm1, %v3221_v17  ;;  %v4138_v59 = vld [vmem:[#allocation2 + $0x31] sm:$0xff]  ;;  %v2873_v3 = vld [vmem:[%s12661_s30 + $0xe5] sm:$0xff] }
 0x303   : > { %v4096_v30 = vld [vmem:[#allocation2 + $0x30] sm:$0xff]  ;;  %4054 = vst.msk [vmem:[#allocation2 + $0x3b] sm:$0xff] %vm387_vm1, %v4013_v22  ;;  %11763 = vmatmul.msk.f32.gmra.mxu1 %vm387_vm1, %v4138_v59  ;;  %v3222_v17 = vld [vmem:[%s12661_s30 + $0xde] sm:$0xff] }
 0x304   : > { %11805 = vmatmul.msk.f32.gmra.mxu2 %vm387_vm1, %v4096_v30  ;;  %v3604_v55 = vadd.f32 %v14420_v18, %v3559_v8 }
 0x305   : > { %v3056_v1 = vpop.f32.mrf.mxu3 }
 0x306   : > { %vm3645_vm8 = vcmp.ge.f32.partialorder %v3604_v55, 0.0  ;;  %v3686_v14 = vmul.f32 0.1, %v3604_v55  ;;  %v3165_v28 = vadd.f32 %v3056_v1, %v13744_v60 }
 0x307   : > { %v3406_v52 = vpop.f32.mrf.mxu0 }
 0x308   : > { %v3727_v57 = vsel %vm3645_vm8, %v3604_v55, %v3686_v14  ;;  %v3515_v22 = vadd.f32 %v3406_v52, %v3165_v28  ;;  %v2874_v52 = vld [vmem:[%s12661_s30 + $0xed] sm:$0xff] }
 0x309   : > { %v4014_v59 = vmul.f32 %v3836_v36, %v3727_v57  ;;  %v3841_v36 = vpop.permute.xlu1 %3840 }
 0x30a   : > { %v3560_v8 = vmul.f32 %v14409_v58, %v3515_v22  ;;  %11695 = vmatmul.msk.f32.gmra.mxu3 %vm387_vm1, %v2873_v3  ;;  %11737 = vmatmul.msk.f32.gmra.mxu0 %vm387_vm1, %v3222_v17  ;;  %v4139_v30 = vld [vmem:[#allocation2 + $0x39] sm:$0xff]  ;;  %v3223_v3 = vld [vmem:[%s12661_s30 + $0xe6] sm:$0xff]  ;;  %v14527_v17 = vpop.f32.mrf.mxu2 }
 0x30b   : > { %v4097_v26 = vld [vmem:[#allocation2 + $0x38] sm:$0xff]  ;;  %4055 = vst.msk [vmem:[#allocation2 + $0x43] sm:$0xff] %vm387_vm1, %v4014_v59  ;;  %11764 = vmatmul.msk.f32.gmra.mxu1 %vm387_vm1, %v4139_v30  ;;  %v14529_v30 = vpop.f32.mrf.mxu1 }
 0x30c   : > { %11806 = vmatmul.msk.f32.gmra.mxu2 %vm387_vm1, %v4097_v26  ;;  %v3605_v60 = vadd.f32 %v14420_v18, %v3560_v8  ;;  %18269 = vst [vmem:[#allocation47_spill] sm:$0xff] %v14527_v17 }
 0x30d   : > { %v3059_v55 = vpop.f32.mrf.mxu3  ;;  %18270 = vst [vmem:[#allocation48_spill] sm:$0xff] %v14529_v30 }
 0x30e   : > { %vm3646_vm9 = vcmp.ge.f32.partialorder %v3605_v60, 0.0  ;;  %v3687_v1 = vmul.f32 0.1, %v3605_v60  ;;  %v3166_v14 = vadd.f32 %v3059_v55, %v13759_v0 }
 0x30f   : > { %v3409_v28 = vpop.f32.mrf.mxu0 }
 0x310   : > { %v3728_v57 = vsel %vm3646_vm9, %v3605_v60, %v3687_v1  ;;  %v3516_v22 = vadd.f32 %v3409_v28, %v3166_v14 }
 0x311   : > { %v4015_v59 = vmul.f32 %v3841_v36, %v3728_v57  ;;  %v2875_v36 = vld [vmem:[%s12661_s30 + $0xf5] sm:$0xff]  ;;  %v3846_v57 = vpop.permute.xlu2 %3845 }
 0x312   : > { %v3561_v26 = vmul.f32 %v14409_v58, %v3516_v22  ;;  %11696 = vmatmul.msk.f32.gmra.mxu3 %vm387_vm1, %v2874_v52  ;;  %11738 = vmatmul.msk.f32.gmra.mxu0 %vm387_vm1, %v3223_v3  ;;  %v4140_v0 = vld [vmem:[#allocation2 + $0x41] sm:$0xff]  ;;  %v3224_v52 = vld [vmem:[%s12661_s30 + $0xee] sm:$0xff]  ;;  %v14541_v17 = vpop.f32.mrf.mxu2 }
 0x313   : > { %v4098_v8 = vld [vmem:[#allocation2 + $0x40] sm:$0xff]  ;;  %4056 = vst.msk [vmem:[#allocation2 + $0x4b] sm:$0xff] %vm387_vm1, %v4015_v59  ;;  %11765 = vmatmul.msk.f32.gmra.mxu1 %vm387_vm1, %v4140_v0 }
 0x314   : > { %11807 = vmatmul.msk.f32.gmra.mxu2 %vm387_vm1, %v4098_v8  ;;  %v3606_v60 = vadd.f32 %v14420_v18, %v3561_v26 }
 0x315   : > { %v3062_v55 = vpop.f32.mrf.mxu3 }
 0x316   : > { %vm3647_vm10 = vcmp.ge.f32.partialorder %v3606_v60, 0.0  ;;  %v3688_v1 = vmul.f32 0.1, %v3606_v60  ;;  %v3167_v14 = vadd.f32 %v3062_v55, %v13774_v37  ;;  %v14549_v37 = vpop.f32.mrf.mxu1 }
 0x317   : > { %v3412_v28 = vpop.f32.mrf.mxu0 }
 0x318   : > { %v3729_v3 = vsel %vm3647_vm10, %v3606_v60, %v3688_v1  ;;  %v3517_v22 = vadd.f32 %v3412_v28, %v3167_v14  ;;  %v2876_v28 = vld [vmem:[%s12661_s30 + $0xfd] sm:$0xff] }
 0x319   : > { %v4016_v30 = vmul.f32 %v3846_v57, %v3729_v3 }
 0x31a   : > { %v3562_v59 = vmul.f32 %v14409_v58, %v3517_v22  ;;  %11697 = vmatmul.msk.f32.gmra.mxu3 %vm387_vm1, %v2875_v36  ;;  %11739 = vmatmul.msk.f32.gmra.mxu0 %vm387_vm1, %v3224_v52  ;;  %v4141_v26 = vld [vmem:[#allocation2 + $0x49] sm:$0xff]  ;;  %v3225_v36 = vld [vmem:[%s12661_s30 + $0xf6] sm:$0xff]  ;;  %v3851_v52 = vpop.permute.xlu0 %3850 }
 0x31b   : > { %v4099_v0 = vld [vmem:[#allocation2 + $0x48] sm:$0xff]  ;;  %4057 = vst.msk [vmem:[#allocation2 + $0x53] sm:$0xff] %vm387_vm1, %v4016_v30  ;;  %11766 = vmatmul.msk.f32.gmra.mxu1 %vm387_vm1, %v4141_v26 }
 0x31c   : > { %11808 = vmatmul.msk.f32.gmra.mxu2 %vm387_vm1, %v4099_v0  ;;  %v3607_v8 = vadd.f32 %v14420_v18, %v3562_v59 }
 0x31d   : > { %v3065_v60 = vpop.f32.mrf.mxu3 }
 0x31e   : > { %vm3648_vm11 = vcmp.ge.f32.partialorder %v3607_v8, 0.0  ;;  %v3689_v55 = vmul.f32 0.1, %v3607_v8  ;;  %v3168_v1 = vadd.f32 %v3065_v60, %v13789_v10  ;;  %v14561_v10 = vpop.f32.mrf.mxu2  ;;  %v14564_v60 = vpop.f32.mrf.mxu1 }
 0x31f   : > { %v3415_v14 = vpop.f32.mrf.mxu0 }
 0x320   : > { %v3730_v57 = vsel %vm3648_vm11, %v3607_v8, %v3689_v55  ;;  %v3518_v3 = vadd.f32 %v3415_v14, %v3168_v1 }
 0x321   : > { %v4017_v30 = vmul.f32 %v3851_v52, %v3730_v57  ;;  %v3856_v52 = vpop.permute.xlu1 %3855 }
 0x322   : > { %v3563_v22 = vmul.f32 %v14409_v58, %v3518_v3  ;;  %11698 = vmatmul.msk.f32.gmra.mxu3 %vm387_vm1, %v2876_v28  ;;  %11740 = vmatmul.msk.f32.gmra.mxu0 %vm387_vm1, %v3225_v36  ;;  %v4142_v59 = vld [vmem:[#allocation2 + $0x51] sm:$0xff]  ;;  %v2877_v28 = vld [vmem:[%s12661_s30 + $0x105] sm:$0xff] }
 0x323   : > { %v4100_v26 = vld [vmem:[#allocation2 + $0x50] sm:$0xff]  ;;  %4058 = vst.msk [vmem:[#allocation2 + $0x5b] sm:$0xff] %vm387_vm1, %v4017_v30  ;;  %11767 = vmatmul.msk.f32.gmra.mxu1 %vm387_vm1, %v4142_v59  ;;  %v3226_v36 = vld [vmem:[%s12661_s30 + $0xfe] sm:$0xff] }
 0x324   : > { %11809 = vmatmul.msk.f32.gmra.mxu2 %vm387_vm1, %v4100_v26  ;;  %v3608_v0 = vadd.f32 %v14420_v18, %v3563_v22 }
 0x325   : > { %v3068_v8 = vpop.f32.mrf.mxu3 }
 0x326   : > { %vm3649_vm12 = vcmp.ge.f32.partialorder %v3608_v0, 0.0  ;;  %v3690_v55 = vmul.f32 0.1, %v3608_v0  ;;  %v3169_v1 = vadd.f32 %v3068_v8, %v13807_v38  ;;  %v14576_v8 = vpop.f32.mrf.mxu2 }
 0x327   : > { %v3418_v14 = vpop.f32.mrf.mxu0  ;;  %18271 = vst [vmem:[#allocation50_spill] sm:$0xff] %v14576_v8 }
 0x328   : > { %v3731_v57 = vsel %vm3649_vm12, %v3608_v0, %v3690_v55  ;;  %v3519_v3 = vadd.f32 %v3418_v14, %v3169_v1 }
 0x329   : > { %v4018_v30 = vmul.f32 %v3856_v52, %v3731_v57  ;;  %v3861_v52 = vpop.permute.xlu2 %3860  ;;  %v14581_v57 = vpop.f32.mrf.mxu1 }
 0x32a   : > { %v3564_v59 = vmul.f32 %v14409_v58, %v3519_v3  ;;  %11699 = vmatmul.msk.f32.gmra.mxu3 %vm387_vm1, %v2877_v28  ;;  %11741 = vmatmul.msk.f32.gmra.mxu0 %vm387_vm1, %v3226_v36  ;;  %v4143_v22 = vld [vmem:[#allocation2 + $0x59] sm:$0xff]  ;;  %v2878_v28 = vld [vmem:[%s12661_s30 + $0x10d] sm:$0xff]  ;;  %18272 = vst [vmem:[#allocation51_spill] sm:$0xff] %v14581_v57 }
 0x32b   : > { %v4101_v26 = vld [vmem:[#allocation2 + $0x58] sm:$0xff]  ;;  %4059 = vst.msk [vmem:[#allocation2 + $0x63] sm:$0xff] %vm387_vm1, %v4018_v30  ;;  %11768 = vmatmul.msk.f32.gmra.mxu1 %vm387_vm1, %v4143_v22  ;;  %v3227_v36 = vld [vmem:[%s12661_s30 + $0x106] sm:$0xff] }
 0x32c   : > { %11810 = vmatmul.msk.f32.gmra.mxu2 %vm387_vm1, %v4101_v26  ;;  %v3609_v38 = vadd.f32 %v14420_v18, %v3564_v59 }
 0x32d   : > { %v3071_v0 = vpop.f32.mrf.mxu3 }
 0x32e   : > { %vm3650_vm13 = vcmp.ge.f32.partialorder %v3609_v38, 0.0  ;;  %v3691_v55 = vmul.f32 0.1, %v3609_v38  ;;  %v3170_v1 = vadd.f32 %v3071_v0, %v13828_v39 }
 0x32f   : > { %v3421_v14 = vpop.f32.mrf.mxu0 }
 0x330   : > { %v3732_v3 = vsel %vm3650_vm13, %v3609_v38, %v3691_v55  ;;  %v3520_v30 = vadd.f32 %v3421_v14, %v3170_v1  ;;  %v2879_v14 = vld [vmem:[%s12661_s30 + $0x115] sm:$0xff] }
 0x331   : > { %v4019_v22 = vmul.f32 %v3861_v52, %v3732_v3  ;;  %v3866_v52 = vpop.permute.xlu0 %3865  ;;  %v14595_v57 = vpop.f32.mrf.mxu1 }
 0x332   : > { %v3565_v59 = vmul.f32 %v14409_v58, %v3520_v30  ;;  %11700 = vmatmul.msk.f32.gmra.mxu3 %vm387_vm1, %v2878_v28  ;;  %11742 = vmatmul.msk.f32.gmra.mxu0 %vm387_vm1, %v3227_v36  ;;  %v4144_v26 = vld [vmem:[#allocation2 + $0x61] sm:$0xff]  ;;  %v3228_v28 = vld [vmem:[%s12661_s30 + $0x10e] sm:$0xff]  ;;  %v14593_v36 = vpop.f32.mrf.mxu2 }
 0x333   : > { %v4102_v8 = vld [vmem:[#allocation2 + $0x60] sm:$0xff]  ;;  %4060 = vst.msk [vmem:[#allocation2 + $0x6b] sm:$0xff] %vm387_vm1, %v4019_v22  ;;  %11769 = vmatmul.msk.f32.gmra.mxu1 %vm387_vm1, %v4144_v26  ;;  %v11969_v26 = vld [vmem:[%s18023_s4 + $0x14] sm:$0xf] }
 0x334   : > { %11811 = vmatmul.msk.f32.gmra.mxu2 %vm387_vm1, %v4102_v8  ;;  %v3610_v39 = vadd.f32 %v14420_v18, %v3565_v59 }
 0x335   : > { %v3074_v38 = vpop.f32.mrf.mxu3  ;;  %11970 = vmatpush.msk.msrb.mxu2 %vm689_vm0, %v11969_v26 }
 0x336   : > { %vm3651_vm14 = vcmp.ge.f32.partialorder %v3610_v39, 0.0  ;;  %v3692_v0 = vmul.f32 0.1, %v3610_v39  ;;  %v3171_v55 = vadd.f32 %v3074_v38, %v13845_v27 }
 0x337   : > { %v3424_v1 = vpop.f32.mrf.mxu0 }
 0x338   : > { %v3733_v3 = vsel %vm3651_vm14, %v3610_v39, %v3692_v0  ;;  %v3521_v30 = vadd.f32 %v3424_v1, %v3171_v55 }
 0x339   : > { %v4020_v22 = vmul.f32 %v3866_v52, %v3733_v3  ;;  %v3871_v52 = vpop.permute.xlu1 %3870 }
 0x33a   : > { %v3566_v8 = vmul.f32 %v14409_v58, %v3521_v30  ;;  %11701 = vmatmul.msk.f32.gmra.mxu3 %vm387_vm1, %v2879_v14  ;;  %11743 = vmatmul.msk.f32.gmra.mxu0 %vm387_vm1, %v3228_v28  ;;  %v4145_v27 = vld [vmem:[#allocation2 + $0x69] sm:$0xff]  ;;  %v2880_v14 = vld [vmem:[%s12661_s30 + $0x11d] sm:$0xff] }
 0x33b   : > { %v4103_v59 = vld [vmem:[#allocation2 + $0x68] sm:$0xff]  ;;  %4061 = vst.msk [vmem:[#allocation2 + $0x73] sm:$0xff] %vm387_vm1, %v4020_v22  ;;  %11770 = vmatmul.msk.f32.gmra.mxu1 %vm387_vm1, %v4145_v27  ;;  %v3229_v28 = vld [vmem:[%s12661_s30 + $0x116] sm:$0xff]  ;;  %v14611_v27 = vpop.f32.mrf.mxu2 }
 0x33c   : > { %11812 = vmatmul.msk.f32.gmra.mxu2 %vm387_vm1, %v4103_v59  ;;  %v3611_v39 = vadd.f32 %v14420_v18, %v3566_v8 }
 0x33d   : > { %v3077_v38 = vpop.f32.mrf.mxu3 }
 0x33e   : > { %vm3652_vm15 = vcmp.ge.f32.partialorder %v3611_v39, 0.0  ;;  %v3693_v0 = vmul.f32 0.1, %v3611_v39  ;;  %v3172_v55 = vadd.f32 %v3077_v38, %v13865_v31  ;;  %v14619_v31 = vpop.f32.mrf.mxu1 }
 0x33f   : > { %v3427_v1 = vpop.f32.mrf.mxu0 }
 0x340   : > { %v3734_v3 = vsel %vm3652_vm15, %v3611_v39, %v3693_v0  ;;  %v3522_v30 = vadd.f32 %v3427_v1, %v3172_v55 }
 0x341   : > { %v4021_v22 = vmul.f32 %v3871_v52, %v3734_v3  ;;  %v3876_v52 = vpop.permute.xlu2 %3875 }
 0x342   : > { %v3567_v59 = vmul.f32 %v14409_v58, %v3522_v30  ;;  %11702 = vmatmul.msk.f32.gmra.mxu3 %vm387_vm1, %v2880_v14  ;;  %11744 = vmatmul.msk.f32.gmra.mxu0 %vm387_vm1, %v3229_v28  ;;  %v4146_v8 = vld [vmem:[#allocation2 + $0x71] sm:$0xff]  ;;  %v2881_v14 = vld [vmem:[%s12661_s30 + $0x125] sm:$0xff] }
 0x343   : > { %v4104_v26 = vld [vmem:[#allocation2 + $0x70] sm:$0xff]  ;;  %4062 = vst.msk [vmem:[#allocation2 + $0x7b] sm:$0xff] %vm387_vm1, %v4021_v22  ;;  %11771 = vmatmul.msk.f32.gmra.mxu1 %vm387_vm1, %v4146_v8  ;;  %v3230_v28 = vld [vmem:[%s12661_s30 + $0x11e] sm:$0xff] }
 0x344   : > { %11813 = vmatmul.msk.f32.gmra.mxu2 %vm387_vm1, %v4104_v26  ;;  %v3612_v39 = vadd.f32 %v14420_v18, %v3567_v59 }
 0x345   : > { %v3080_v38 = vpop.f32.mrf.mxu3 }
 0x346   : > { %vm3653_vm2 = vcmp.ge.f32.partialorder %v3612_v39, 0.0  ;;  %v3694_v0 = vmul.f32 0.1, %v3612_v39  ;;  %v3173_v55 = vadd.f32 %v3080_v38, %v13884_v61  ;;  %v14631_v61 = vpop.f32.mrf.mxu2  ;;  %v14634_v38 = vpop.f32.mrf.mxu1 }
 0x347   : > { %v3430_v1 = vpop.f32.mrf.mxu0  ;;  %18273 = vst [vmem:[#allocation52_spill] sm:$0xff] %v14631_v61 }
 0x348   : > { %v3735_v3 = vsel %vm3653_vm2, %v3612_v39, %v3694_v0  ;;  %v3523_v30 = vadd.f32 %v3430_v1, %v3173_v55  ;;  %v2125_v55 = vadd.f32 %v13907_v2, %v13897_v54 }
 0x349   : > { %v4022_v22 = vmul.f32 %v3876_v52, %v3735_v3  ;;  %v2882_v52 = vld [vmem:[%s12661_s30 + $0x12d] sm:$0xff] }
 0x34a   : > { %v3568_v8 = vmul.f32 %v14409_v58, %v3523_v30  ;;  %11703 = vmatmul.msk.f32.gmra.mxu3 %vm387_vm1, %v2881_v14  ;;  %11745 = vmatmul.msk.f32.gmra.mxu0 %vm387_vm1, %v3230_v28  ;;  %v4147_v59 = vld [vmem:[#allocation2 + $0x79] sm:$0xff]  ;;  %v3231_v3 = vld [vmem:[%s12661_s30 + $0x126] sm:$0xff]  ;;  %v3881_v30 = vpop.permute.xlu0 %3880  ;;  %v2475_v61 = vadd.f32 %v14115_v12, %v2125_v55  ;;  %v2126_v55 = vadd.f32 %v13931_v44, %v13920_v5 }
 0x34b   : > { %v4105_v26 = vld [vmem:[#allocation2 + $0x78] sm:$0xff]  ;;  %4063 = vst.msk [vmem:[#allocation2 + $0x83] sm:$0xff] %vm387_vm1, %v4022_v22  ;;  %11772 = vmatmul.msk.f32.gmra.mxu1 %vm387_vm1, %v4147_v59 }
 0x34c   : > { %11814 = vmatmul.msk.f32.gmra.mxu2 %vm387_vm1, %v4105_v26  ;;  %v3613_v39 = vadd.f32 %v14420_v18, %v3568_v8 }
 0x34d   : > { %v3083_v0 = vpop.f32.mrf.mxu3 }
 0x34e   : > { %vm3654_vm3 = vcmp.ge.f32.partialorder %v3613_v39, 0.0  ;;  %v3695_v1 = vmul.f32 0.1, %v3613_v39  ;;  %v3174_v14 = vadd.f32 %v3083_v0, %v13905_v19  ;;  %v2825_v19 = vadd.f32 %v14131_v33, %v2475_v61 }
 0x34f   : > { %v3433_v28 = vpop.f32.mrf.mxu0  ;;  %v2476_v61 = vadd.f32 %v14142_v48, %v2126_v55 }
 0x350   : > { %v3736_v22 = vsel %vm3654_vm3, %v3613_v39, %v3695_v1  ;;  %v3524_v59 = vadd.f32 %v3433_v28, %v3174_v14  ;;  %v14650_v39 = vpop.f32.mrf.mxu2  ;;  %v14654_v28 = vpop.f32.mrf.mxu1 }
 0x351   : > { %v4023_v26 = vmul.f32 %v3881_v30, %v3736_v22  ;;  %v3232_v30 = vld [vmem:[%s12661_s30 + $0x12e] sm:$0xff]  ;;  %v3886_v22 = vpop.permute.xlu1 %3885 }
 0x352   : > { %v3569_v8 = vmul.f32 %v14409_v58, %v3524_v59  ;;  %11704 = vmatmul.msk.f32.gmra.mxu3 %vm387_vm1, %v2882_v52  ;;  %11746 = vmatmul.msk.f32.gmra.mxu0 %vm387_vm1, %v3231_v3  ;;  %v4148_v54 = vld [vmem:[#allocation2 + $0x81] sm:$0xff]  ;;  %v2883_v3 = vld [vmem:[%s12661_s30 + $0x135] sm:$0xff] }
 0x353   : > { %v4106_v2 = vld [vmem:[#allocation2 + $0x80] sm:$0xff]  ;;  %4064 = vst.msk [vmem:[#allocation2 + $0x8b] sm:$0xff] %vm387_vm1, %v4023_v26  ;;  %11773 = vmatmul.msk.f32.gmra.mxu1 %vm387_vm1, %v4148_v54  ;;  %v2826_v54 = vadd.f32 %v14158_v35, %v2476_v61 }
 0x354   : > { %11815 = vmatmul.msk.f32.gmra.mxu2 %vm387_vm1, %v4106_v2  ;;  %v3614_v12 = vadd.f32 %v14420_v18, %v3569_v8 }
 0x355   : > { %v3086_v0 = vpop.f32.mrf.mxu3 }
 0x356   : > { %vm3655_vm4 = vcmp.ge.f32.partialorder %v3614_v12, 0.0  ;;  %v3696_v1 = vmul.f32 0.1, %v3614_v12  ;;  %v3175_v14 = vadd.f32 %v3086_v0, %v2825_v19  ;;  %v2127_v19 = vadd.f32 %v13954_v20, %v13943_v11 }
 0x357   : > { %v3436_v52 = vpop.f32.mrf.mxu0 }
 0x358   : > { %v3737_v59 = vsel %vm3655_vm4, %v3614_v12, %v3696_v1  ;;  %v3525_v26 = vadd.f32 %v3436_v52, %v3175_v14  ;;  %v14669_v0 = vpop.f32.mrf.mxu2  ;;  %v2884_v14 = vld [vmem:[%s12661_s30 + $0x13d] sm:$0xff]  ;;  %v2477_v35 = vadd.f32 %v14162_v23, %v2127_v19 }
 0x359   : > { %v4024_v33 = vmul.f32 %v3886_v22, %v3737_v59  ;;  %v3233_v52 = vld [vmem:[%s12661_s30 + $0x136] sm:$0xff] }
 0x35a   : > { %v3570_v8 = vmul.f32 %v14409_v58, %v3525_v26  ;;  %11705 = vmatmul.msk.f32.gmra.mxu3 %vm387_vm1, %v2883_v3  ;;  %11747 = vmatmul.msk.f32.gmra.mxu0 %vm387_vm1, %v3232_v30  ;;  %v4149_v5 = vld [vmem:[#allocation2 + $0x89] sm:$0xff]  ;;  %v3891_v3 = vpop.permute.xlu2 %3890  ;;  %v2827_v61 = vadd.f32 %v14176_v25, %v2477_v35  ;;  %v2129_v35 = vadd.f32 %v14000_v49, %v13989_v43 }
 0x35b   : > { %v4107_v44 = vld [vmem:[#allocation2 + $0x88] sm:$0xff]  ;;  %4065 = vst.msk [vmem:[#allocation2 + $0x93] sm:$0xff] %vm387_vm1, %v4024_v33  ;;  %11774 = vmatmul.msk.f32.gmra.mxu1 %vm387_vm1, %v4149_v5  ;;  %v2128_v5 = vadd.f32 %v13977_v63, %v13966_v21 }
 0x35c   : > { %11816 = vmatmul.msk.f32.gmra.mxu2 %vm387_vm1, %v4107_v44  ;;  %v3615_v48 = vadd.f32 %v14420_v18, %v3570_v8 }
 0x35d   : > { %v3089_v2 = vpop.f32.mrf.mxu3 }
 0x35e   : > { %vm3656_vm5 = vcmp.ge.f32.partialorder %v3615_v48, 0.0  ;;  %v3697_v12 = vmul.f32 0.1, %v3615_v48  ;;  %v3176_v55 = vadd.f32 %v3089_v2, %v2826_v54 }
 0x35f   : > { %v3439_v1 = vpop.f32.mrf.mxu0 }
 0x360   : > { %v3738_v30 = vsel %vm3656_vm5, %v3615_v48, %v3697_v12  ;;  %v3526_v22 = vadd.f32 %v3439_v1, %v3176_v55  ;;  %v4324_v59 = vpop.f32.mrf.mxu1  ;;  %v2885_v12 = vld [vmem:[%s12661_s30 + $0x145] sm:$0xff]  ;;  %v3896_v1 = vpop.permute.xlu0 %3895 }
 0x361   : > { %v4025_v26 = vmul.f32 %v3891_v3, %v3738_v30  ;;  %v3234_v55 = vld [vmem:[%s12661_s30 + $0x13e] sm:$0xff]  ;;  %v2478_v30 = vadd.f32 %v14180_v6, %v2128_v5  ;;  %v3235_v5 = vld [vmem:[%s12661_s30 + $0x146] sm:$0xff] }
 0x362   : > { %v3571_v33 = vmul.f32 %v14409_v58, %v3526_v22  ;;  %11706 = vmatmul.msk.f32.gmra.mxu3 %vm387_vm1, %v2884_v14  ;;  %11748 = vmatmul.msk.f32.gmra.mxu0 %vm387_vm1, %v3233_v52  ;;  %v4150_v11 = vld [vmem:[#allocation2 + $0x91] sm:$0xff] }
 0x363   : > { %v4108_v20 = vld [vmem:[#allocation2 + $0x90] sm:$0xff]  ;;  %4066 = vst.msk [vmem:[#allocation2 + $0x9b] sm:$0xff] %vm387_vm1, %v4025_v26  ;;  %11775 = vmatmul.msk.f32.gmra.mxu1 %vm387_vm1, %v4150_v11 }
 0x364   : > { %11817 = vmatmul.msk.f32.gmra.mxu2 %vm387_vm1, %v4108_v20  ;;  %v3616_v23 = vadd.f32 %v14420_v18, %v3571_v33 }
 0x365   : > { %v3092_v8 = vpop.f32.mrf.mxu3 }
 0x366   : > { %vm3657_vm6 = vcmp.ge.f32.partialorder %v3616_v23, 0.0  ;;  %v3698_v44 = vmul.f32 0.1, %v3616_v23  ;;  %v3177_v54 = vadd.f32 %v3092_v8, %v2827_v61  ;;  %v2886_v8 = vld [vmem:[%s12661_s30 + $0x14d] sm:$0xff] }
 0x367   : > { %v4590_v48 = vpop.f32.mrf.mxu2  ;;  %v3442_v19 = vpop.f32.mrf.mxu0 }
 0x368   : > { %v14684_v2 = vadd.f32 %v4590_v48, %v4324_v59  ;;  %v3739_v14 = vsel %vm3657_vm6, %v3616_v23, %v3698_v44  ;;  %v3527_v52 = vadd.f32 %v3442_v19, %v3177_v54  ;;  %v4327_v3 = vpop.f32.mrf.mxu1  ;;  %v2828_v59 = vadd.f32 %v14194_v45, %v2478_v30  ;;  %v3901_v44 = vpop.permute.xlu1 %3900 }
 0x369   : > { %v4026_v25 = vmul.f32 %v3896_v1, %v3739_v14 }
 0x36a   : > { %v3572_v22 = vmul.f32 %v14409_v58, %v3527_v52  ;;  %11707 = vmatmul.msk.f32.gmra.mxu3 %vm387_vm1, %v2885_v12  ;;  %11749 = vmatmul.msk.f32.gmra.mxu0 %vm387_vm1, %v3234_v55  ;;  %v4151_v21 = vld [vmem:[#allocation2 + $0x99] sm:$0xff]  ;;  %v2479_v12 = vadd.f32 %v14196_v9, %v2129_v35  ;;  %v2130_v52 = vadd.f32 %v14023_v32, %v14012_v24 }
 0x36b   : > { %v4109_v63 = vld [vmem:[#allocation2 + $0x98] sm:$0xff]  ;;  %4067 = vst.msk [vmem:[#allocation2 + $0xa3] sm:$0xff] %vm387_vm1, %v4026_v25  ;;  %11776 = vmatmul.msk.f32.gmra.mxu1 %vm387_vm1, %v4151_v21 }
 0x36c   : > { %11818 = vmatmul.msk.f32.gmra.mxu2 %vm387_vm1, %v4109_v63  ;;  %v3617_v6 = vadd.f32 %v14420_v18, %v3572_v22  ;;  %v2829_v1 = vadd.f32 %v14207_v34, %v2479_v12  ;;  %v2887_v63 = vld [vmem:[%s12661_s30 + $0x155] sm:$0xff]  ;;  %v2888_v12 = vld [vmem:[%s12661_s30 + $0x15d] sm:$0xff] }
 0x36d   : > { %v3095_v26 = vpop.f32.mrf.mxu3 }
 0x36e   : > { %vm3658_vm7 = vcmp.ge.f32.partialorder %v3617_v6, 0.0  ;;  %v3699_v33 = vmul.f32 0.1, %v3617_v6  ;;  %v3178_v11 = vadd.f32 %v3095_v26, %v2828_v59  ;;  %v3236_v59 = vld [vmem:[%s12661_s30 + $0x14e] sm:$0xff] }
 0x36f   : > { %v4593_v20 = vpop.f32.mrf.mxu2  ;;  %v3445_v23 = vpop.f32.mrf.mxu0 }
 0x370   : > { %v14699_v61 = vadd.f32 %v4593_v20, %v4327_v3  ;;  %v3740_v54 = vsel %vm3658_vm7, %v3617_v6, %v3699_v33  ;;  %v3528_v48 = vadd.f32 %v3445_v23, %v3178_v11  ;;  %v4330_v19 = vpop.f32.mrf.mxu1  ;;  %v3906_v6 = vpop.permute.xlu2 %3905  ;;  %v2480_v11 = vadd.f32 %v14216_v4, %v2130_v52 }
 0x371   : > { %v4027_v45 = vmul.f32 %v3901_v44, %v3740_v54 }
 0x372   : > { %v3573_v55 = vmul.f32 %v14409_v58, %v3528_v48  ;;  %11708 = vmatmul.msk.f32.gmra.mxu3 %vm387_vm1, %v2886_v8  ;;  %11750 = vmatmul.msk.f32.gmra.mxu0 %vm387_vm1, %v3235_v5  ;;  %v4152_v43 = vld [vmem:[#allocation2 + $0xa1] sm:$0xff]  ;;  %v2830_v23 = vadd.f32 %v14227_v50, %v2480_v11  ;;  %v2131_v5 = vadd.f32 %v14046_v56, %v14035_v46 }
 0x373   : > { %v4110_v49 = vld [vmem:[#allocation2 + $0xa0] sm:$0xff]  ;;  %4068 = vst.msk [vmem:[#allocation2 + $0xab] sm:$0xff] %vm387_vm1, %v4027_v45  ;;  %11777 = vmatmul.msk.f32.gmra.mxu1 %vm387_vm1, %v4152_v43  ;;  %v3911_v43 = vpop.permute.xlu0 %3910 }
 0x374   : > { %11819 = vmatmul.msk.f32.gmra.mxu2 %vm387_vm1, %v4110_v49  ;;  %v3618_v9 = vadd.f32 %v14420_v18, %v3573_v55  ;;  %v3237_v55 = vld [vmem:[%s12661_s30 + $0x156] sm:$0xff] }
 0x375   : > { %v3098_v14 = vpop.f32.mrf.mxu3 }
 0x376   : > { %vm3659_vm8 = vcmp.ge.f32.partialorder %v3618_v9, 0.0  ;;  %v3700_v3 = vmul.f32 0.1, %v3618_v9  ;;  %v3179_v25 = vadd.f32 %v3098_v14, %v2829_v1  ;;  %v2481_v14 = vadd.f32 %v14229_v7, %v2131_v5 }
 0x377   : > { %v4596_v30 = vpop.f32.mrf.mxu2  ;;  %v3448_v21 = vpop.f32.mrf.mxu0 }
 0x378   : > { %v14714_v22 = vadd.f32 %v4596_v30, %v4330_v19  ;;  %v3741_v26 = vsel %vm3659_vm8, %v3618_v9, %v3700_v3  ;;  %v3529_v35 = vadd.f32 %v3448_v21, %v3179_v25  ;;  %v4333_v33 = vpop.f32.mrf.mxu1  ;;  %v2831_v3 = vadd.f32 %v14240_v15, %v2481_v14 }
 0x379   : > { %v4028_v34 = vmul.f32 %v3906_v6, %v3741_v26  ;;  %v2889_v26 = vld [vmem:[%s12661_s30 + $0x165] sm:$0xff] }
 0x37a   : > { %v3574_v20 = vmul.f32 %v14409_v58, %v3529_v35  ;;  %11709 = vmatmul.msk.f32.gmra.mxu3 %vm387_vm1, %v2887_v63  ;;  %11751 = vmatmul.msk.f32.gmra.mxu0 %vm387_vm1, %v3236_v59  ;;  %v4153_v24 = vld [vmem:[#allocation2 + $0xa9] sm:$0xff]  ;;  %v3238_v35 = vld [vmem:[%s12661_s30 + $0x15e] sm:$0xff] }
 0x37b   : > { %v4111_v32 = vld [vmem:[#allocation2 + $0xa8] sm:$0xff]  ;;  %4069 = vst.msk [vmem:[#allocation2 + $0xb3] sm:$0xff] %vm387_vm1, %v4028_v34  ;;  %11778 = vmatmul.msk.f32.gmra.mxu1 %vm387_vm1, %v4153_v24 }
 0x37c   : > { %11820 = vmatmul.msk.f32.gmra.mxu2 %vm387_vm1, %v4111_v32  ;;  %v3619_v4 = vadd.f32 %v14420_v18, %v3574_v20 }
 0x37d   : > { %v3101_v8 = vpop.f32.mrf.mxu3 }
 0x37e   : > { %vm3660_vm9 = vcmp.ge.f32.partialorder %v3619_v4, 0.0  ;;  %v3701_v44 = vmul.f32 0.1, %v3619_v4  ;;  %v3180_v54 = vadd.f32 %v3101_v8, %v2830_v23 }
 0x37f   : > { %v4599_v48 = vpop.f32.mrf.mxu2  ;;  %v3451_v45 = vpop.f32.mrf.mxu0 }
 0x380   : > { %v14729_v19 = vadd.f32 %v4599_v48, %v4333_v33  ;;  %v3742_v49 = vsel %vm3660_vm9, %v3619_v4, %v3701_v44  ;;  %v3530_v1 = vadd.f32 %v3451_v45, %v3180_v54  ;;  %v4336_v9 = vpop.f32.mrf.mxu1  ;;  %v3916_v33 = vpop.permute.xlu1 %3915  ;;  %v14764_v4 = vld [vmem:[%s18022_s3] ss:$0 sm:$0xff]  ;;  %v18276_v54 = vld [vmem:[#allocation5_spill] sm:$0xff] }
 0x381   : > { %v4029_v50 = vmul.f32 %v3911_v43, %v3742_v49  ;;  %v18275_v44 = vld [vmem:[#allocation4_spill] sm:$0xff] }
 0x382   : > { %v3575_v52 = vmul.f32 %v14409_v58, %v3530_v1  ;;  %11710 = vmatmul.msk.f32.gmra.mxu3 %vm387_vm1, %v2888_v12  ;;  %11752 = vmatmul.msk.f32.gmra.mxu0 %vm387_vm1, %v3237_v55  ;;  %v4154_v46 = vld [vmem:[#allocation2 + $0xb1] sm:$0xff]  ;;  %v2132_v58 = vadd.f32 %v14069_v41, %v14058_v42  ;;  %v14752_v42 = vld [vmem:[%s18021_s2] ss:$0 sm:$0xff]  ;;  %v2133_v48 = vadd.f32 %v18276_v54, %v18275_v44  ;;  %v3239_v1 = vld [vmem:[%s12661_s30 + $0x166] sm:$0xff] }
 0x383   : > { %v4112_v56 = vld [vmem:[#allocation2 + $0xb0] sm:$0xff]  ;;  %4070 = vst.msk [vmem:[#allocation2 + $0xbb] sm:$0xff] %vm387_vm1, %v4029_v50  ;;  %11779 = vmatmul.msk.f32.gmra.mxu1 %vm387_vm1, %v4154_v46  ;;  %v3921_v50 = vpop.permute.xlu2 %3920 }
 0x384   : > { %11821 = vmatmul.msk.f32.gmra.mxu2 %vm387_vm1, %v4112_v56  ;;  %v3620_v7 = vadd.f32 %v14420_v18, %v3575_v52  ;;  %v2482_v18 = vadd.f32 %v14244_v62, %v2132_v58  ;;  %v18274_v62 = vld [vmem:[#allocation23_spill] sm:$0xff]  ;;  %v18281_v54 = vld [vmem:[#allocation30_spill] sm:$0xff] }
 0x385   : > { %v3104_v25 = vpop.f32.mrf.mxu3  ;;  %v5057_v44 = vld [vmem:[#allocation2 + $0x12] sm:$0xff] }
 0x386   : > { %vm3661_vm10 = vcmp.ge.f32.partialorder %v3620_v7, 0.0  ;;  %v3702_v30 = vmul.f32 0.1, %v3620_v7  ;;  %v3181_v21 = vadd.f32 %v3104_v25, %v2831_v3  ;;  %v2832_v23 = vadd.f32 %v18274_v62, %v2482_v18  ;;  %v18277_v3 = vld [vmem:[#allocation24_spill] sm:$0xff] }
 0x387   : > { %v4602_v63 = vpop.f32.mrf.mxu2  ;;  %v3454_v6 = vpop.f32.mrf.mxu0 }
 0x388   : > { %v14744_v59 = vadd.f32 %v4602_v63, %v4336_v9  ;;  %v3743_v34 = vsel %vm3661_vm10, %v3620_v7, %v3702_v30  ;;  %v3531_v11 = vadd.f32 %v3454_v6, %v3181_v21  ;;  %v4339_v20 = vpop.f32.mrf.mxu1  ;;  %v4707_v9 = vld [vmem:[#allocation2 + $0x2] sm:$0xff]  ;;  %v2483_v7 = vadd.f32 %v18277_v3, %v2133_v48  ;;  %v18278_v21 = vld [vmem:[#allocation27_spill] sm:$0xff] }
 0x389   : > { %v4030_v15 = vmul.f32 %v3916_v33, %v3743_v34  ;;  %v18280_v33 = vld [vmem:[#allocation44_spill] sm:$0xff] }
 0x38a   : > { %v3576_v41 = vmul.f32 %v14752_v42, %v3531_v11  ;;  %11711 = vmatmul.msk.f32.gmra.mxu3 %vm387_vm1, %v2889_v26  ;;  %11753 = vmatmul.msk.f32.gmra.mxu0 %vm387_vm1, %v3238_v35  ;;  %v4155_v24 = vld [vmem:[#allocation2 + $0xb9] sm:$0xff]  ;;  %v2833_v63 = vadd.f32 %v18278_v21, %v2483_v7  ;;  %v18279_v35 = vld [vmem:[#allocation6_spill] sm:$0xff] }
 0x38b   : > { %v4113_v32 = vld [vmem:[#allocation2 + $0xb8] sm:$0xff]  ;;  %4071 = vst.msk [vmem:[#allocation2 + $0xc3] sm:$0xff] %vm387_vm1, %v4030_v15  ;;  %11780 = vmatmul.msk.f32.gmra.mxu1 %vm387_vm1, %v4155_v24  ;;  %v2134_v34 = vadd.f32 %v18280_v33, %v18279_v35  ;;  %v4708_v24 = vld [vmem:[#allocation2 + $0xa] sm:$0xff] }
 0x38c   : > { %11822 = vmatmul.msk.f32.gmra.mxu2 %vm387_vm1, %v4113_v32  ;;  %v3621_v8 = vadd.f32 %v14764_v4, %v3576_v41  ;;  %v3926_v32 = vpop.permute.xlu0 %3925  ;;  %v5058_v35 = vld [vmem:[#allocation2 + $0x1a] sm:$0xff]  ;;  %v18285_v33 = vld [vmem:[#allocation34_spill] sm:$0xff] }
 0x38d   : > { %v3107_v5 = vpop.f32.mrf.mxu3  ;;  %v2484_v48 = vadd.f32 %v18281_v54, %v2134_v34 }
 0x38e   : > { %vm3662_vm11 = vcmp.ge.f32.partialorder %v3621_v8, 0.0  ;;  %v3703_v45 = vmul.f32 0.1, %v3621_v8  ;;  %v3182_v12 = vadd.f32 %v3107_v5, %v2832_v23 }
 0x38f   : > { %v4605_v55 = vpop.f32.mrf.mxu2  ;;  %v3457_v49 = vpop.f32.mrf.mxu0 }
 0x390   : > { %v14769_v43 = vadd.f32 %v4605_v55, %v4339_v20  ;;  %v3744_v14 = vsel %vm3662_vm11, %v3621_v8, %v3703_v45  ;;  %v3532_v52 = vadd.f32 %v3457_v49, %v3182_v12  ;;  %v4342_v46 = vpop.f32.mrf.mxu1  ;;  %v18282_v49 = vld [vmem:[#allocation33_spill] sm:$0xff] }
 0x391   : > { %v4031_v56 = vmul.f32 %v3921_v50, %v3744_v14  ;;  %v18283_v14 = vld [vmem:[#allocation7_spill] sm:$0xff] }
 0x392   : > { %v3577_v25 = vmul.f32 %v14752_v42, %v3532_v52  ;;  %11754 = vmatmul.msk.f32.gmra.mxu0 %vm387_vm1, %v3239_v1  ;;  %11842 = vmatmul.msk.f32.vlgmr.msrb.gmra.mxu3 %vm387_vm1, %v4707_v9  ;;  %v4156_v58 = vld [vmem:[#allocation2 + $0xc1] sm:$0xff]  ;;  %v2834_v1 = vadd.f32 %v18282_v49, %v2484_v48 }
 0x393   : > { %v4114_v30 = vld [vmem:[#allocation2 + $0xc0] sm:$0xff]  ;;  %4072 = vst.msk [vmem:[#allocation2 + $0xcb] sm:$0xff] %vm387_vm1, %v4031_v56  ;;  %11781 = vmatmul.msk.f32.gmra.mxu1 %vm387_vm1, %v4156_v58 }
 0x394   : > { %11823 = vmatmul.msk.f32.gmra.mxu2 %vm387_vm1, %v4114_v30  ;;  %v3622_v6 = vadd.f32 %v14764_v4, %v3577_v25  ;;  %v18284_v52 = vld [vmem:[#allocation8_spill] sm:$0xff]  ;;  %v3931_v30 = vpop.permute.xlu1 %3930 }
 0x395   : > { %v3110_v26 = vpop.f32.mrf.mxu3 }
 0x396   : > { %vm3663_vm12 = vcmp.ge.f32.partialorder %v3622_v6, 0.0  ;;  %v3704_v11 = vmul.f32 0.1, %v3622_v6  ;;  %v3183_v20 = vadd.f32 %v3110_v26, %v2833_v63 }
 0x397   : > { %v4608_v15 = vpop.f32.mrf.mxu2  ;;  %v3460_v41 = vpop.f32.mrf.mxu0 }
 0x398   : > { %v14783_v18 = vadd.f32 %v4608_v15, %v4342_v46  ;;  %v3745_v62 = vsel %vm3663_vm12, %v3622_v6, %v3704_v11  ;;  %v3533_v23 = vadd.f32 %v3460_v41, %v3183_v20  ;;  %v4345_v8 = vpop.f32.mrf.mxu1  ;;  %v2135_v46 = vadd.f32 %v18284_v52, %v18283_v14  ;;  %v18286_v41 = vld [vmem:[#allocation37_spill] sm:$0xff]  ;;  %v18289_v52 = vld [vmem:[#allocation38_spill] sm:$0xff] }
 0x399   : > { %v4032_v5 = vmul.f32 %v3926_v32, %v3745_v62  ;;  %v5059_v14 = vld [vmem:[#allocation2 + $0x22] sm:$0xff] }
 0x39a   : > { %v3578_v45 = vmul.f32 %v14752_v42, %v3533_v23  ;;  %11843 = vmatmul.msk.f32.gmra.mxu3 %vm387_vm1, %v4708_v24  ;;  %11885 = vmatmul.msk.f32.vlgmr.msrb.gmra.mxu0 %vm387_vm1, %v5057_v44  ;;  %v4157_v12 = vld [vmem:[#allocation2 + $0xc9] sm:$0xff]  ;;  %v2485_v34 = vadd.f32 %v18285_v33, %v2135_v46 }
 0x39b   : > { %v4115_v55 = vld [vmem:[#allocation2 + $0xc8] sm:$0xff]  ;;  %4073 = vst.msk [vmem:[#allocation2 + $0xd3] sm:$0xff] %vm387_vm1, %v4032_v5  ;;  %11782 = vmatmul.msk.f32.gmra.mxu1 %vm387_vm1, %v4157_v12 }
 0x39c   : > { %11824 = vmatmul.msk.f32.gmra.mxu2 %vm387_vm1, %v4115_v55  ;;  %v3623_v9 = vadd.f32 %v14764_v4, %v3578_v45  ;;  %v2835_v24 = vadd.f32 %v18286_v41, %v2485_v34  ;;  %v18287_v23 = vld [vmem:[#allocation9_spill] sm:$0xff]  ;;  %v3936_v55 = vpop.permute.xlu2 %3935  ;;  %v3941_v41 = vpop.permute.xlu0 %3940 }
 0x39d   : > { %v3113_v50 = vpop.f32.mrf.mxu3 }
 0x39e   : > { %vm3664_vm13 = vcmp.ge.f32.partialorder %v3623_v9, 0.0  ;;  %v3705_v56 = vmul.f32 0.1, %v3623_v9  ;;  %v3184_v3 = vadd.f32 %v3113_v50, %v2834_v1 }
 0x39f   : > { %v4611_v7 = vpop.f32.mrf.mxu2  ;;  %v3463_v58 = vpop.f32.mrf.mxu0 }
 0x3a0   : > { %v14796_v25 = vadd.f32 %v4611_v7, %v4345_v8  ;;  %v3746_v21 = vsel %vm3664_vm13, %v3623_v9, %v3705_v56  ;;  %v3534_v63 = vadd.f32 %v3463_v58, %v3184_v3  ;;  %v4348_v6 = vpop.f32.mrf.mxu1  ;;  %v18288_v8 = vld [vmem:[#allocation40_spill] sm:$0xff]  ;;  %v18290_v58 = vld [vmem:[#allocation39_spill] sm:$0xff] }
 0x3a1   : > { %v4033_v26 = vmul.f32 %v3931_v30, %v3746_v21  ;;  %v2136_v5 = vadd.f32 %v18288_v8, %v18287_v23  ;;  %v5060_v8 = vld [vmem:[#allocation2 + $0x2a] sm:$0xff] }
 0x3a2   : > { %v3579_v11 = vmul.f32 %v14752_v42, %v3534_v63  ;;  %11844 = vmatmul.msk.f32.gmra.mxu3 %vm387_vm1, %v5057_v44  ;;  %11886 = vmatmul.msk.f32.gmra.mxu0 %vm387_vm1, %v5058_v35  ;;  %v4158_v20 = vld [vmem:[#allocation2 + $0xd1] sm:$0xff] }
 0x3a3   : > { %v4116_v15 = vld [vmem:[#allocation2 + $0xd0] sm:$0xff]  ;;  %4074 = vst.msk [vmem:[#allocation2 + $0xdb] sm:$0xff] %vm387_vm1, %v4033_v26  ;;  %11783 = vmatmul.msk.f32.gmra.mxu1 %vm387_vm1, %v4158_v20  ;;  %v2486_v46 = vadd.f32 %v18289_v52, %v2136_v5  ;;  %v18292_v26 = vld [vmem:[#allocation11_spill] sm:$0xff]  ;;  %v18293_v5 = vld [vmem:[#allocation41_spill] sm:$0xff] }
 0x3a4   : > { %11825 = vmatmul.msk.f32.gmra.mxu2 %vm387_vm1, %v4116_v15  ;;  %v3624_v32 = vadd.f32 %v14764_v4, %v3579_v11 }
 0x3a5   : > { %v3116_v62 = vpop.f32.mrf.mxu3  ;;  %v2836_v30 = vadd.f32 %v18290_v58, %v2486_v46  ;;  %v3946_v58 = vpop.permute.xlu1 %3945 }
 0x3a6   : > { %vm3665_vm14 = vcmp.ge.f32.partialorder %v3624_v32, 0.0  ;;  %v3706_v44 = vmul.f32 0.1, %v3624_v32  ;;  %v3185_v54 = vadd.f32 %v3116_v62, %v2835_v24 }
 0x3a7   : > { %v4614_v48 = vpop.f32.mrf.mxu2  ;;  %v3466_v12 = vpop.f32.mrf.mxu0 }
 0x3a8   : > { %v14809_v45 = vadd.f32 %v4614_v48, %v4348_v6  ;;  %v3747_v49 = vsel %vm3665_vm14, %v3624_v32, %v3706_v44  ;;  %v3535_v1 = vadd.f32 %v3466_v12, %v3185_v54  ;;  %v4351_v9 = vpop.f32.mrf.mxu1  ;;  %v18291_v6 = vld [vmem:[#allocation10_spill] sm:$0xff]  ;;  %vm7906_vm14 = vcmask 1041408  }
 0x3a9   : > { %v4034_v50 = vmul.f32 %v3936_v55, %v3747_v49  ;;  %v2137_v33 = vadd.f32 %v18292_v26, %v18291_v6  ;;  %v5061_v26 = vld [vmem:[#allocation2 + $0x32] sm:$0xff] }
 0x3aa   : > { %v3580_v56 = vmul.f32 %v14752_v42, %v3535_v1  ;;  %11845 = vmatmul.msk.f32.gmra.mxu3 %vm387_vm1, %v5058_v35  ;;  %11887 = vmatmul.msk.f32.gmra.mxu0 %vm387_vm1, %v5059_v14  ;;  %v4159_v3 = vld [vmem:[#allocation2 + $0xd9] sm:$0xff] }
 0x3ab   : > { %v4117_v7 = vld [vmem:[#allocation2 + $0xd8] sm:$0xff]  ;;  %4075 = vst.msk [vmem:[#allocation2 + $0xe3] sm:$0xff] %vm387_vm1, %v4034_v50  ;;  %11784 = vmatmul.msk.f32.gmra.mxu1 %vm387_vm1, %v4159_v3  ;;  %v2487_v44 = vadd.f32 %v18293_v5, %v2137_v33  ;;  %v18295_v50 = vld [vmem:[#allocation45_spill] sm:$0xff] }
 0x3ac   : > { %11826 = vmatmul.msk.f32.gmra.mxu2 %vm387_vm1, %v4117_v7  ;;  %v3625_v21 = vadd.f32 %v14764_v4, %v3580_v56 }
 0x3ad   : > { %v3119_v63 = vpop.f32.mrf.mxu3  ;;  %v2837_v55 = vadd.f32 %v14444_v29, %v2487_v44 }
 0x3ae   : > { %vm3666_vm15 = vcmp.ge.f32.partialorder %v3625_v21, 0.0  ;;  %v3707_v35 = vmul.f32 0.1, %v3625_v21  ;;  %v3186_v34 = vadd.f32 %v3119_v63, %v2836_v30 }
 0x3af   : > { %v4617_v11 = vpop.f32.mrf.mxu2  ;;  %v3469_v15 = vpop.f32.mrf.mxu0 }
 0x3b0   : > { %v14822_v20 = vadd.f32 %v4617_v11, %v4351_v9  ;;  %v3748_v24 = vsel %vm3666_vm15, %v3625_v21, %v3707_v35  ;;  %v3536_v32 = vadd.f32 %v3469_v15, %v3186_v34  ;;  %v4354_v62 = vpop.f32.mrf.mxu1  ;;  %v18294_v9 = vld [vmem:[#allocation12_spill] sm:$0xff]  ;;  %v18296_v11 = vld [vmem:[#allocation42_spill] sm:$0xff]  ;;  %vm434_vm15 = vcmask 15360  }
 0x3b1   : > { %v4035_v23 = vmul.f32 %v3941_v41, %v3748_v24  ;;  %v2138_v52 = vadd.f32 %v18295_v50, %v18294_v9  ;;  %v5062_v9 = vld [vmem:[#allocation2 + $0x3a] sm:$0xff] }
 0x3b2   : > { %v3581_v54 = vmul.f32 %v14752_v42, %v3536_v32  ;;  %11846 = vmatmul.msk.f32.gmra.mxu3 %vm387_vm1, %v5059_v14  ;;  %11888 = vmatmul.msk.f32.gmra.mxu0 %vm387_vm1, %v5060_v8  ;;  %v4160_v48 = vld [vmem:[#allocation2 + $0xe1] sm:$0xff]  ;;  %v18298_v32 = vld [vmem:[#allocation14_spill] sm:$0xff]  ;;  %v18299_v50 = vld [vmem:[#allocation43_spill] sm:$0xff] }
 0x3b3   : > { %v4118_v12 = vld [vmem:[#allocation2 + $0xe0] sm:$0xff]  ;;  %4076 = vst.msk [vmem:[#allocation2 + $0xeb] sm:$0xff] %vm387_vm1, %v4035_v23  ;;  %11785 = vmatmul.msk.f32.gmra.mxu1 %vm387_vm1, %v4160_v48  ;;  %v2488_v29 = vadd.f32 %v14449_v53, %v2138_v52  ;;  %v18297_v53 = vld [vmem:[#allocation13_spill] sm:$0xff]  ;;  %v3951_v48 = vpop.permute.xlu2 %3950 }
 0x3b4   : > { %11827 = vmatmul.msk.f32.gmra.mxu2 %vm387_vm1, %v4118_v12  ;;  %v3626_v49 = vadd.f32 %v14764_v4, %v3581_v54 }
 0x3b5   : > { %v3122_v1 = vpop.f32.mrf.mxu3  ;;  %v2838_v15 = vadd.f32 %v18296_v11, %v2488_v29  ;;  %v3956_v11 = vpop.permute.xlu0 %3955 }
 0x3b6   : > { %vm3667_vm2 = vcmp.ge.f32.partialorder %v3626_v49, 0.0  ;;  %v3708_v14 = vmul.f32 0.1, %v3626_v49  ;;  %v3187_v46 = vadd.f32 %v3122_v1, %v2837_v55 }
 0x3b7   : > { %v4620_v56 = vpop.f32.mrf.mxu2  ;;  %v3472_v7 = vpop.f32.mrf.mxu0 }
 0x3b8   : > { %v14835_v3 = vadd.f32 %v4620_v56, %v4354_v62  ;;  %v3749_v30 = vsel %vm3667_vm2, %v3626_v49, %v3708_v14  ;;  %v3537_v21 = vadd.f32 %v3472_v7, %v3187_v46  ;;  %v4357_v63 = vpop.f32.mrf.mxu1  ;;  %v2139_v62 = vadd.f32 %v18298_v32, %v18297_v53  ;;  %v5063_v32 = vld [vmem:[#allocation2 + $0x42] sm:$0xff] }
 0x3b9   : > { %v4036_v6 = vmul.f32 %v3946_v58, %v3749_v30 }
 0x3ba   : > { %v3582_v33 = vmul.f32 %v14752_v42, %v3537_v21  ;;  %11847 = vmatmul.msk.f32.gmra.mxu3 %vm387_vm1, %v5060_v8  ;;  %11889 = vmatmul.msk.f32.gmra.mxu0 %vm387_vm1, %v5061_v26  ;;  %v4161_v35 = vld [vmem:[#allocation2 + $0xe9] sm:$0xff]  ;;  %v2489_v52 = vadd.f32 %v18299_v50, %v2139_v62  ;;  %v18300_v21 = vld [vmem:[#allocation15_spill] sm:$0xff] }
 0x3bb   : > { %v4119_v34 = vld [vmem:[#allocation2 + $0xe8] sm:$0xff]  ;;  %4077 = vst.msk [vmem:[#allocation2 + $0xf3] sm:$0xff] %vm387_vm1, %v4036_v6  ;;  %11786 = vmatmul.msk.f32.gmra.mxu1 %vm387_vm1, %v4161_v35 }
 0x3bc   : > { %11828 = vmatmul.msk.f32.gmra.mxu2 %vm387_vm1, %v4119_v34  ;;  %v3627_v41 = vadd.f32 %v14764_v4, %v3582_v33  ;;  %v2839_v7 = vadd.f32 %v14475_v13, %v2489_v52 }
 0x3bd   : > { %v3125_v24 = vpop.f32.mrf.mxu3 }
 0x3be   : > { %vm3668_vm3 = vcmp.ge.f32.partialorder %v3627_v41, 0.0  ;;  %v3709_v23 = vmul.f32 0.1, %v3627_v41  ;;  %v3188_v8 = vadd.f32 %v3125_v24, %v2838_v15 }
 0x3bf   : > { %v4623_v5 = vpop.f32.mrf.mxu2  ;;  %v3475_v54 = vpop.f32.mrf.mxu0 }
 0x3c0   : > { %v14848_v44 = vadd.f32 %v4623_v5, %v4357_v63  ;;  %v3750_v12 = vsel %vm3668_vm3, %v3627_v41, %v3709_v23  ;;  %v3538_v55 = vadd.f32 %v3475_v54, %v3188_v8  ;;  %v4360_v49 = vpop.f32.mrf.mxu1  ;;  %v18301_v63 = vld [vmem:[#allocation49_spill] sm:$0xff] }
 0x3c1   : > { %v4037_v1 = vmul.f32 %v3951_v48, %v3750_v12  ;;  %v2140_v6 = vadd.f32 %v18301_v63, %v18300_v21  ;;  %v18303_v12 = vld [vmem:[#allocation17_spill] sm:$0xff] }
 0x3c2   : > { %v3583_v14 = vmul.f32 %v14752_v42, %v3538_v55  ;;  %11848 = vmatmul.msk.f32.gmra.mxu3 %vm387_vm1, %v5061_v26  ;;  %11890 = vmatmul.msk.f32.gmra.mxu0 %vm387_vm1, %v5062_v9  ;;  %v4162_v46 = vld [vmem:[#allocation2 + $0xf1] sm:$0xff] }
 0x3c3   : > { %v4120_v56 = vld [vmem:[#allocation2 + $0xf0] sm:$0xff]  ;;  %4078 = vst.msk [vmem:[#allocation2 + $0xfb] sm:$0xff] %vm387_vm1, %v4037_v1  ;;  %11787 = vmatmul.msk.f32.gmra.mxu1 %vm387_vm1, %v4162_v46  ;;  %v2490_v13 = vadd.f32 %v14483_v47, %v2140_v6  ;;  %v18302_v47 = vld [vmem:[#allocation16_spill] sm:$0xff] }
 0x3c4   : > { %11829 = vmatmul.msk.f32.gmra.mxu2 %vm387_vm1, %v4120_v56  ;;  %v3628_v58 = vadd.f32 %v14764_v4, %v3583_v14  ;;  %v2141_v55 = vadd.f32 %v18303_v12, %v18302_v47  ;;  %v3961_v14 = vpop.permute.xlu1 %3960 }
 0x3c5   : > { %v3128_v30 = vpop.f32.mrf.mxu3  ;;  %v2840_v5 = vadd.f32 %v14495_v51, %v2490_v13 }
 0x3c6   : > { %vm3669_vm4 = vcmp.ge.f32.partialorder %v3628_v58, 0.0  ;;  %v3710_v26 = vmul.f32 0.1, %v3628_v58  ;;  %v3189_v29 = vadd.f32 %v3128_v30, %v2839_v7  ;;  %v5064_v30 = vld [vmem:[#allocation2 + $0x4a] sm:$0xff]  ;;  %v2491_v51 = vadd.f32 %v14498_v40, %v2141_v55 }
 0x3c7   : > { %v4626_v33 = vpop.f32.mrf.mxu2  ;;  %v3478_v34 = vpop.f32.mrf.mxu0  ;;  %v18305_v40 = vld [vmem:[#allocation18_spill] sm:$0xff] }
 0x3c8   : > { %v14861_v35 = vadd.f32 %v4626_v33, %v4360_v49  ;;  %v3751_v15 = vsel %vm3669_vm4, %v3628_v58, %v3710_v26  ;;  %v3539_v41 = vadd.f32 %v3478_v34, %v3189_v29  ;;  %v4363_v24 = vpop.f32.mrf.mxu1  ;;  %v18304_v26 = vld [vmem:[#allocation46_spill] sm:$0xff] }
 0x3c9   : > { %v4038_v53 = vmul.f32 %v3956_v11, %v3751_v15  ;;  %v2841_v29 = vadd.f32 %v18304_v26, %v2491_v51  ;;  %v18306_v11 = vld [vmem:[#allocation53_spill] sm:$0xff] }
 0x3ca   : > { %v3584_v62 = vmul.f32 %v14752_v42, %v3539_v41  ;;  %11849 = vmatmul.msk.f32.gmra.mxu3 %vm387_vm1, %v5062_v9  ;;  %11891 = vmatmul.msk.f32.gmra.mxu0 %vm387_vm1, %v5063_v32  ;;  %v4163_v23 = vld [vmem:[#allocation2 + $0xf9] sm:$0xff]  ;;  %v2142_v15 = vadd.f32 %v18306_v11, %v18305_v40 }
 0x3cb   : > { %v4121_v8 = vld [vmem:[#allocation2 + $0xf8] sm:$0xff]  ;;  %4079 = vst.msk [vmem:[#allocation2 + $0x103] sm:$0xff] %vm387_vm1, %v4038_v53  ;;  %11788 = vmatmul.msk.f32.gmra.mxu1 %vm387_vm1, %v4163_v23  ;;  %v18310_v40 = vld [vmem:[#allocation48_spill] sm:$0xff] }
 0x3cc   : > { %11830 = vmatmul.msk.f32.gmra.mxu2 %vm387_vm1, %v4121_v8  ;;  %v3629_v54 = vadd.f32 %v14764_v4, %v3584_v62  ;;  %v3966_v62 = vpop.permute.xlu2 %3965  ;;  %v2492_v47 = vadd.f32 %v14515_v16, %v2142_v15  ;;  %v18308_v16 = vld [vmem:[#allocation19_spill] sm:$0xff] }
 0x3cd   : > { %v3131_v48 = vpop.f32.mrf.mxu3 }
 0x3ce   : > { %vm3670_vm5 = vcmp.ge.f32.partialorder %v3629_v54, 0.0  ;;  %v3711_v49 = vmul.f32 0.1, %v3629_v54  ;;  %v3190_v1 = vadd.f32 %v3131_v48, %v2840_v5  ;;  %v5065_v48 = vld [vmem:[#allocation2 + $0x52] sm:$0xff] }
 0x3cf   : > { %v4629_v9 = vpop.f32.mrf.mxu2  ;;  %v3481_v52 = vpop.f32.mrf.mxu0 }
 0x3d0   : > { %v14874_v50 = vadd.f32 %v4629_v9, %v4363_v24  ;;  %v3752_v46 = vsel %vm3670_vm5, %v3629_v54, %v3711_v49  ;;  %v3540_v56 = vadd.f32 %v3481_v52, %v3190_v1  ;;  %v4366_v7 = vpop.f32.mrf.mxu1  ;;  %v18307_v1 = vld [vmem:[#allocation47_spill] sm:$0xff] }
 0x3d1   : > { %v4039_v58 = vmul.f32 %v3961_v14, %v3752_v46  ;;  %v2842_v9 = vadd.f32 %v18307_v1, %v2492_v47  ;;  %v18309_v46 = vld [vmem:[#allocation20_spill] sm:$0xff] }
 0x3d2   : > { %v3585_v21 = vmul.f32 %v14752_v42, %v3540_v56  ;;  %11850 = vmatmul.msk.f32.gmra.mxu3 %vm387_vm1, %v5063_v32  ;;  %11892 = vmatmul.msk.f32.gmra.mxu0 %vm387_vm1, %v5064_v30  ;;  %v4164_v63 = vld [vmem:[#allocation2 + $0x101] sm:$0xff]  ;;  %v2143_v56 = vadd.f32 %v18309_v46, %v18308_v16 }
 0x3d3   : > { %v4122_v6 = vld [vmem:[#allocation2 + $0x100] sm:$0xff]  ;;  %4080 = vst.msk [vmem:[#allocation2 + $0x10b] sm:$0xff] %vm387_vm1, %v4039_v58  ;;  %11789 = vmatmul.msk.f32.gmra.mxu1 %vm387_vm1, %v4164_v63  ;;  %v3971_v63 = vpop.permute.xlu0 %3970 }
 0x3d4   : > { %11831 = vmatmul.msk.f32.gmra.mxu2 %vm387_vm1, %v4122_v6  ;;  %v3630_v33 = vadd.f32 %v14764_v4, %v3585_v21  ;;  %v2493_v11 = vadd.f32 %v18310_v40, %v2143_v56  ;;  %v5067_v16 = vld [vmem:[#allocation2 + $0x62] sm:$0xff] }
 0x3d5   : > { %v3134_v34 = vpop.f32.mrf.mxu3 }
 0x3d6   : > { %vm3671_vm6 = vcmp.ge.f32.partialorder %v3630_v33, 0.0  ;;  %v3712_v41 = vmul.f32 0.1, %v3630_v33  ;;  %v3191_v24 = vadd.f32 %v3134_v34, %v2841_v29  ;;  %v5066_v34 = vld [vmem:[#allocation2 + $0x5a] sm:$0xff] }
 0x3d7   : > { %v4632_v53 = vpop.f32.mrf.mxu2  ;;  %v3484_v13 = vpop.f32.mrf.mxu0 }
 0x3d8   : > { %v14887_v32 = vadd.f32 %v4632_v53, %v4366_v7  ;;  %v3753_v23 = vsel %vm3671_vm6, %v3630_v33, %v3712_v41  ;;  %v3541_v8 = vadd.f32 %v3484_v13, %v3191_v24  ;;  %v4369_v5 = vpop.f32.mrf.mxu1  ;;  %v2843_v53 = vadd.f32 %v14541_v17, %v2493_v11  ;;  %v3981_v11 = vpop.permute.xlu2 %3980 }
 0x3d9   : > { %v4040_v54 = vmul.f32 %v3966_v62, %v3753_v23  ;;  %v18311_v23 = vld [vmem:[#allocation21_spill] sm:$0xff] }
 0x3da   : > { %v3586_v12 = vmul.f32 %v14752_v42, %v3541_v8  ;;  %11851 = vmatmul.msk.f32.gmra.mxu3 %vm387_vm1, %v5064_v30  ;;  %11893 = vmatmul.msk.f32.gmra.mxu0 %vm387_vm1, %v5065_v48  ;;  %v4165_v55 = vld [vmem:[#allocation2 + $0x109] sm:$0xff] }
 0x3db   : > { %v4123_v49 = vld [vmem:[#allocation2 + $0x108] sm:$0xff]  ;;  %4081 = vst.msk [vmem:[#allocation2 + $0x113] sm:$0xff] %vm387_vm1, %v4040_v54  ;;  %11790 = vmatmul.msk.f32.gmra.mxu1 %vm387_vm1, %v4165_v55  ;;  %v18312_v8 = vld [vmem:[#allocation22_spill] sm:$0xff] }
 0x3dc   : > { %11832 = vmatmul.msk.f32.gmra.mxu2 %vm387_vm1, %v4123_v49  ;;  %v3631_v52 = vadd.f32 %v14764_v4, %v3586_v12  ;;  %v3976_v49 = vpop.permute.xlu1 %3975 }
 0x3dd   : > { %v3137_v14 = vpop.f32.mrf.mxu3 }
 0x3de   : > { %vm3672_vm7 = vcmp.ge.f32.partialorder %v3631_v52, 0.0  ;;  %v3713_v7 = vmul.f32 0.1, %v3631_v52  ;;  %v3192_v58 = vadd.f32 %v3137_v14, %v2842_v9 }
 0x3df   : > { %v4635_v30 = vpop.f32.mrf.mxu2  ;;  %v3487_v21 = vpop.f32.mrf.mxu0 }
 0x3e0   : > { %v14900_v51 = vadd.f32 %v4635_v30, %v4369_v5  ;;  %v3754_v6 = vsel %vm3672_vm7, %v3631_v52, %v3713_v7  ;;  %v3542_v26 = vadd.f32 %v3487_v21, %v3192_v58  ;;  %v4372_v29 = vpop.f32.mrf.mxu1  ;;  %v2144_v5 = vadd.f32 %v18312_v8, %v18311_v23 }
 0x3e1   : > { %v4041_v33 = vmul.f32 %v3971_v63, %v3754_v6  ;;  %v18314_v63 = vld [vmem:[#allocation26_spill] sm:$0xff] }
 0x3e2   : > { %v3587_v15 = vmul.f32 %v14752_v42, %v3542_v26  ;;  %11852 = vmatmul.msk.f32.gmra.mxu3 %vm387_vm1, %v5065_v48  ;;  %11894 = vmatmul.msk.f32.gmra.mxu0 %vm387_vm1, %v5066_v34  ;;  %v4166_v41 = vld [vmem:[#allocation2 + $0x111] sm:$0xff]  ;;  %v2494_v17 = vadd.f32 %v14549_v37, %v2144_v5  ;;  %v18313_v37 = vld [vmem:[#allocation25_spill] sm:$0xff] }
 0x3e3   : > { %v4124_v24 = vld [vmem:[#allocation2 + $0x110] sm:$0xff]  ;;  %4082 = vst.msk [vmem:[#allocation2 + $0x11b] sm:$0xff] %vm387_vm1, %v4041_v33  ;;  %11791 = vmatmul.msk.f32.gmra.mxu1 %vm387_vm1, %v4166_v41  ;;  %v2145_v6 = vadd.f32 %v18314_v63, %v18313_v37 }
 0x3e4   : > { %11833 = vmatmul.msk.f32.gmra.mxu2 %vm387_vm1, %v4124_v24  ;;  %v3632_v13 = vadd.f32 %v14764_v4, %v3587_v15  ;;  %v2844_v58 = vadd.f32 %v14561_v10, %v2494_v17  ;;  %v18315_v5 = vld [vmem:[#allocation50_spill] sm:$0xff]  ;;  %v3986_v17 = vpop.permute.xlu0 %3985 }
 0x3e5   : > { %v3140_v62 = vpop.f32.mrf.mxu3  ;;  %v2495_v10 = vadd.f32 %v14564_v60, %v2145_v6  ;;  %v18316_v60 = vld [vmem:[#allocation28_spill] sm:$0xff] }
 0x3e6   : > { %vm3673_vm8 = vcmp.ge.f32.partialorder %v3632_v13, 0.0  ;;  %v3714_v54 = vmul.f32 0.1, %v3632_v13  ;;  %v3193_v48 = vadd.f32 %v3140_v62, %v2843_v53 }
 0x3e7   : > { %v4638_v47 = vpop.f32.mrf.mxu2  ;;  %v3490_v55 = vpop.f32.mrf.mxu0 }
 0x3e8   : > { %v14913_v12 = vadd.f32 %v4638_v47, %v4372_v29  ;;  %v3755_v1 = vsel %vm3673_vm8, %v3632_v13, %v3714_v54  ;;  %v3543_v9 = vadd.f32 %v3490_v55, %v3193_v48  ;;  %v4375_v52 = vpop.f32.mrf.mxu1  ;;  %v5068_v13 = vld [vmem:[#allocation2 + $0x6a] sm:$0xff]  ;;  %v2845_v54 = vadd.f32 %v18315_v5, %v2495_v10  ;;  %v3991_v5 = vpop.permute.xlu1 %3990 }
 0x3e9   : > { %v4042_v14 = vmul.f32 %v3976_v49, %v3755_v1  ;;  %v18317_v55 = vld [vmem:[#allocation29_spill] sm:$0xff] }
 0x3ea   : > { %v3588_v46 = vmul.f32 %v14752_v42, %v3543_v9  ;;  %11853 = vmatmul.msk.f32.gmra.mxu3 %vm387_vm1, %v5066_v34  ;;  %11895 = vmatmul.msk.f32.gmra.mxu0 %vm387_vm1, %v5067_v16  ;;  %v4167_v56 = vld [vmem:[#allocation2 + $0x119] sm:$0xff]  ;;  %v2146_v49 = vadd.f32 %v18317_v55, %v18316_v60 }
 0x3eb   : > { %v4125_v7 = vld [vmem:[#allocation2 + $0x118] sm:$0xff]  ;;  %4083 = vst.msk [vmem:[#allocation2 + $0x123] sm:$0xff] %vm387_vm1, %v4042_v14  ;;  %11792 = vmatmul.msk.f32.gmra.mxu1 %vm387_vm1, %v4167_v56 }
 0x3ec   : > { %11834 = vmatmul.msk.f32.gmra.mxu2 %vm387_vm1, %v4125_v7  ;;  %v3633_v30 = vadd.f32 %v14764_v4, %v3588_v46  ;;  %v5070_v55 = vld [vmem:[#allocation2 + $0x7a] sm:$0xff] }
 0x3ed   : > { %v3143_v21 = vpop.f32.mrf.mxu3 }
 0x3ee   : > { %vm3674_vm9 = vcmp.ge.f32.partialorder %v3633_v30, 0.0  ;;  %v3715_v26 = vmul.f32 0.1, %v3633_v30  ;;  %v3194_v29 = vadd.f32 %v3143_v21, %v2844_v58  ;;  %v18318_v21 = vld [vmem:[#allocation51_spill] sm:$0xff] }
 0x3ef   : > { %v4641_v33 = vpop.f32.mrf.mxu2  ;;  %v3493_v40 = vpop.f32.mrf.mxu0  ;;  %v2496_v37 = vadd.f32 %v18318_v21, %v2146_v49 }
 0x3f0   : > { %v14926_v34 = vadd.f32 %v4641_v33, %v4375_v52  ;;  %v3756_v15 = vsel %vm3674_vm9, %v3633_v30, %v3715_v26  ;;  %v3544_v41 = vadd.f32 %v3493_v40, %v3194_v29  ;;  %v4378_v24 = vpop.f32.mrf.mxu1  ;;  %v5069_v30 = vld [vmem:[#allocation2 + $0x72] sm:$0xff]  ;;  %v12055_v33 = vld [vmem:[%s18023_s4 + $0x1c] sm:$0xf] }
 0x3f1   : > { %v4043_v53 = vmul.f32 %v3981_v11, %v3756_v15  ;;  %v12012_v29 = vld [vmem:[%s18023_s4 + $0x18] sm:$0xf]  ;;  %v2846_v40 = vadd.f32 %v14593_v36, %v2496_v37  ;;  %12056 = vmatpush.msk.msra.mxu0 %vm689_vm0, %v12055_v33  ;;  %v12098_v15 = vld [vmem:[%s18023_s4 + $0x20] sm:$0xf] }
 0x3f2   : > { %v3589_v62 = vmul.f32 %v14752_v42, %v3544_v41  ;;  %11854 = vmatmul.msk.f32.gmra.mxu3 %vm387_vm1, %v5067_v16  ;;  %11896 = vmatmul.msk.f32.gmra.mxu0 %vm387_vm1, %v5068_v13  ;;  %v4168_v23 = vld [vmem:[#allocation2 + $0x121] sm:$0xff] }
 0x3f3   : > { %v4126_v8 = vld [vmem:[#allocation2 + $0x120] sm:$0xff]  ;;  %4084 = vst.msk [vmem:[#allocation2 + $0x12b] sm:$0xff] %vm387_vm1, %v4043_v53  ;;  %11793 = vmatmul.msk.f32.gmra.mxu1 %vm387_vm1, %v4168_v23  ;;  %12013 = vmatpush.msk.msra.mxu3 %vm689_vm0, %v12012_v29 }
 0x3f4   : > { %11835 = vmatmul.msk.f32.gmra.mxu2 %vm387_vm1, %v4126_v8  ;;  %v3634_v48 = vadd.f32 %v14764_v4, %v3589_v62  ;;  %12099 = vmatpush.msk.msra.mxu1 %vm689_vm0, %v12098_v15  ;;  %v18320_v53 = vld [vmem:[#allocation32_spill] sm:$0xff] }
 0x3f5   : > { %v3146_v47 = vpop.f32.mrf.mxu3 }
 0x3f6   : > { %vm3675_vm10 = vcmp.ge.f32.partialorder %v3634_v48, 0.0  ;;  %v3716_v1 = vmul.f32 0.1, %v3634_v48  ;;  %v3195_v9 = vadd.f32 %v3146_v47, %v2845_v54 }
 0x3f7   : > { %v4644_v52 = vpop.f32.mrf.mxu2  ;;  %v3496_v16 = vpop.f32.mrf.mxu0 }
 0x3f8   : > { %v14939_v14 = vadd.f32 %v4644_v52, %v4378_v24  ;;  %v3757_v46 = vsel %vm3675_vm10, %v3634_v48, %v3716_v1  ;;  %v3545_v56 = vadd.f32 %v3496_v16, %v3195_v9  ;;  %v4381_v7 = vpop.f32.mrf.mxu1  ;;  %v18319_v24 = vld [vmem:[#allocation31_spill] sm:$0xff] }
 0x3f9   : > { %v4044_v58 = vmul.f32 %v3986_v17, %v3757_v46 }
 0x3fa   : > { %v3590_v63 = vmul.f32 %v14752_v42, %v3545_v56  ;;  %11855 = vmatmul.msk.f32.gmra.mxu3 %vm387_vm1, %v5068_v13  ;;  %11897 = vmatmul.msk.f32.gmra.mxu0 %vm387_vm1, %v5069_v30  ;;  %v4169_v6 = vld [vmem:[#allocation2 + $0x129] sm:$0xff]  ;;  %v2147_v13 = vadd.f32 %v18320_v53, %v18319_v24  ;;  %v18322_v56 = vld [vmem:[#allocation36_spill] sm:$0xff] }
 0x3fb   : > { %v4127_v26 = vld [vmem:[#allocation2 + $0x128] sm:$0xff]  ;;  %4085 = vst.msk [vmem:[#allocation2 + $0x133] sm:$0xff] %vm387_vm1, %v4044_v58  ;;  %11794 = vmatmul.msk.f32.gmra.mxu1 %vm387_vm1, %v4169_v6  ;;  %v3996_v6 = vpop.permute.xlu2 %3995  ;;  %v18323_v53 = vld [vmem:[#allocation52_spill] sm:$0xff] }
 0x3fc   : > { %11836 = vmatmul.msk.f32.gmra.mxu2 %vm387_vm1, %v4127_v26  ;;  %v3635_v11 = vadd.f32 %v14764_v4, %v3590_v63  ;;  %v2497_v49 = vadd.f32 %v14595_v57, %v2147_v13  ;;  %v18321_v57 = vld [vmem:[#allocation35_spill] sm:$0xff] }
 0x3fd   : > { %v3149_v41 = vpop.f32.mrf.mxu3 }
 0x3fe   : > { %vm3676_vm11 = vcmp.ge.f32.partialorder %v3635_v11, 0.0  ;;  %v3717_v10 = vmul.f32 0.1, %v3635_v11  ;;  %v3196_v62 = vadd.f32 %v3149_v41, %v2846_v40  ;;  %v2847_v16 = vadd.f32 %v14611_v27, %v2497_v49 }
 0x3ff   : > { %v4647_v36 = vpop.f32.mrf.mxu2  ;;  %v3499_v8 = vpop.f32.mrf.mxu0 }
 0x400   : > { %v14964_v23 = vadd.f32 %v4647_v36, %v4381_v7  ;;  %v3758_v54 = vsel %vm3676_vm11, %v3635_v11, %v3717_v10  ;;  %v3546_v48 = vadd.f32 %v3499_v8, %v3196_v62  ;;  %v4384_v47 = vpop.f32.mrf.mxu1  ;;  %v2148_v7 = vadd.f32 %v18322_v56, %v18321_v57  ;;  %v5071_v11 = vld [vmem:[#allocation2 + $0x82] sm:$0xff] }
 0x401   : > { %v4045_v60 = vmul.f32 %v3991_v5, %v3758_v54 }
 0x402   : > { %v3591_v1 = vmul.f32 %v14752_v42, %v3546_v48  ;;  %11856 = vmatmul.msk.f32.gmra.mxu3 %vm387_vm1, %v5069_v30  ;;  %11898 = vmatmul.msk.f32.gmra.mxu0 %vm387_vm1, %v5070_v55  ;;  %v4170_v9 = vld [vmem:[#allocation2 + $0x131] sm:$0xff]  ;;  %v2498_v27 = vadd.f32 %v14619_v31, %v2148_v7  ;;  %v4001_v48 = vpop.permute.xlu0 %4000 }
 0x403   : > { %v4128_v52 = vld [vmem:[#allocation2 + $0x130] sm:$0xff]  ;;  %4086 = vst.msk [vmem:[#allocation2 + $0x13b] sm:$0xff] %vm387_vm1, %v4045_v60  ;;  %11795 = vmatmul.msk.f32.gmra.mxu1 %vm387_vm1, %v4170_v9 }
 0x404   : > { %11837 = vmatmul.msk.f32.gmra.mxu2 %vm387_vm1, %v4128_v52  ;;  %v3636_v17 = vadd.f32 %v14764_v4, %v3591_v1  ;;  %v2848_v13 = vadd.f32 %v18323_v53, %v2498_v27  ;;  %v5072_v1 = vld [vmem:[#allocation2 + $0x8a] sm:$0xff] }
 0x405   : > { %v3152_v46 = vpop.f32.mrf.mxu3 }
 0x406   : > { %vm3677_vm0 = vcmp.ge.f32.partialorder %v3636_v17, 0.0  ;;  %v3718_v58 = vmul.f32 0.1, %v3636_v17  ;;  %v3197_v30 = vadd.f32 %v3152_v46, %v2847_v16 }
 0x407   : > { %v4650_v21 = vpop.f32.mrf.mxu2  ;;  %v3502_v63 = vpop.f32.mrf.mxu0 }
 0x408   : > { %v14977_v37 = vadd.f32 %v4650_v21, %v4384_v47  ;;  %v3759_v26 = vsel %vm3677_vm0, %v3636_v17, %v3718_v58  ;;  %v3547_v29 = vadd.f32 %v3502_v63, %v3197_v30  ;;  %v4387_v33 = vpop.f32.mrf.mxu1  ;;  %v4006_v58 = vpop.permute.xlu1 %4005 }
 0x409   : > { %v4046_v40 = vmul.f32 %v3996_v6, %v3759_v26  ;;  %v5073_v6 = vld [vmem:[#allocation2 + $0x92] sm:$0xff] }
 0x40a   : > { %v3592_v15 = vmul.f32 %v14752_v42, %v3547_v29  ;;  %11857 = vmatmul.msk.f32.gmra.mxu3 %vm387_vm1, %v5070_v55  ;;  %11899 = vmatmul.msk.f32.gmra.mxu0 %vm387_vm1, %v5071_v11  ;;  %v4171_v41 = vld [vmem:[#allocation2 + $0x139] sm:$0xff] }
 0x40b   : > { %v4129_v24 = vld [vmem:[#allocation2 + $0x138] sm:$0xff]  ;;  %4087 = vst.msk [vmem:[#allocation2 + $0x143] sm:$0xff] %vm387_vm1, %v4046_v40  ;;  %11796 = vmatmul.msk.f32.gmra.mxu1 %vm387_vm1, %v4171_v41 }
 0x40c   : > { %11838 = vmatmul.msk.f32.gmra.mxu2 %vm387_vm1, %v4129_v24  ;;  %v3637_v10 = vadd.f32 %v14764_v4, %v3592_v15  ;;  %v5407_v26 = vld [vmem:[#allocation2 + $0x13] sm:$0xff]  ;;  %v5408_v41 = vld [vmem:[#allocation2 + $0x1b] sm:$0xff] }
 0x40d   : > { %v3155_v62 = vpop.f32.mrf.mxu3  ;;  %v5074_v15 = vld [vmem:[#allocation2 + $0x9a] sm:$0xff] }
 0x40e   : > { %vm3678_vm12 = vcmp.ge.f32.partialorder %v3637_v10, 0.0  ;;  %v3719_v31 = vmul.f32 0.1, %v3637_v10  ;;  %v3198_v36 = vadd.f32 %v3155_v62, %v2848_v13  ;;  %v5758_v24 = vld [vmem:[#allocation2 + $0x1c] sm:$0xff] }
 0x40f   : > { %v4653_v8 = vpop.f32.mrf.mxu2  ;;  %v3505_v54 = vpop.f32.mrf.mxu0 }
 0x410   : > { %v14988_v5 = vadd.f32 %v4653_v8, %v4387_v33  ;;  %v3760_v47 = vsel %vm3678_vm12, %v3637_v10, %v3719_v31  ;;  %v3548_v60 = vadd.f32 %v3505_v54, %v3198_v36  ;;  %v4390_v55 = vpop.f32.mrf.mxu1  ;;  %v5075_v8 = vld [vmem:[#allocation2 + $0xa2] sm:$0xff] }
 0x411   : > { %v4047_v49 = vmul.f32 %v4001_v48, %v3760_v47  ;;  %v5409_v54 = vld [vmem:[#allocation2 + $0x23] sm:$0xff] }
 0x412   : > { %v3593_v9 = vmul.f32 %v14752_v42, %v3548_v60  ;;  %11858 = vmatmul.msk.f32.gmra.mxu3 %vm387_vm1, %v5071_v11  ;;  %11900 = vmatmul.msk.f32.gmra.mxu0 %vm387_vm1, %v5072_v1  ;;  %v4172_v52 = vld [vmem:[#allocation2 + $0x141] sm:$0xff] }
 0x413   : > { %v4130_v16 = vld [vmem:[#allocation2 + $0x140] sm:$0xff]  ;;  %4088 = vst.msk [vmem:[#allocation2 + $0x14b] sm:$0xff] %vm387_vm1, %v4047_v49  ;;  %11797 = vmatmul.msk.f32.gmra.mxu1 %vm387_vm1, %v4172_v52  ;;  %v5410_v52 = vld [vmem:[#allocation2 + $0x2b] sm:$0xff] }
 0x414   : > { %11839 = vmatmul.msk.f32.gmra.mxu2 %vm387_vm1, %v4130_v16  ;;  %v3638_v17 = vadd.f32 %v14764_v4, %v3593_v9  ;;  %v5757_v4 = vld [vmem:[#allocation2 + $0x14] sm:$0xff]  ;;  %v15027_v48 = vld [vmem:[#allocation2 + $0x24] sm:$0xff]  ;;  %v15041_v16 = vld [vmem:[#allocation2 + $0x2c] sm:$0xff] }
 0x415   : > { %v14997_v46 = vpop.f32.mrf.mxu3  ;;  %v5076_v9 = vld [vmem:[#allocation2 + $0xaa] sm:$0xff] }
 0x416   : > { %vm3679_vm13 = vcmp.ge.f32.partialorder %v3638_v17, 0.0  ;;  %v3720_v57 = vmul.f32 0.1, %v3638_v17 }
 0x417   : > { %v4656_v56 = vpop.f32.mrf.mxu2  ;;  %v15001_v7 = vpop.f32.mrf.mxu0 }
 0x418   : > { %v14999_v42 = vadd.f32 %v4656_v56, %v4390_v55  ;;  %v3761_v30 = vsel %vm3679_vm13, %v3638_v17, %v3720_v57  ;;  %v4393_v21 = vpop.f32.mrf.mxu1 }
 0x419   : > { %v4048_v63 = vmul.f32 %v4006_v58, %v3761_v30 }
 0x41a   : > { %11859 = vmatmul.msk.f32.gmra.mxu3 %vm387_vm1, %v5072_v1  ;;  %11901 = vmatmul.msk.f32.gmra.mxu0 %vm387_vm1, %v5073_v6 }
 0x41b   : > { %4089 = vst.msk [vmem:[#allocation2 + $0x153] sm:$0xff] %vm387_vm1, %v4048_v63  ;;  %11928 = vmatmul.msk.f32.vlgmr.msrb.gmra.mxu1 %vm387_vm1, %v5407_v26  ;;  %v5411_v63 = vld [vmem:[#allocation2 + $0x33] sm:$0xff] }
 0x41c   : > { %11971 = vmatmul.msk.f32.vlgmr.msrb.gmra.mxu2 %vm387_vm1, %v5757_v4 }
 0x41d   : > { %v15008_v29 = vpop.f32.mrf.mxu3 }
 0x41f   : > { %v4659_v33 = vpop.f32.mrf.mxu2  ;;  %v15012_v11 = vpop.f32.mrf.mxu0 }
 0x420   : > { %v15010_v40 = vadd.f32 %v4659_v33, %v4393_v21  ;;  %v4396_v27 = vpop.f32.mrf.mxu1  ;;  %v5077_v21 = vld [vmem:[#allocation2 + $0xb2] sm:$0xff] }
 0x422   : > { %11860 = vmatmul.msk.f32.gmra.mxu3 %vm387_vm1, %v5073_v6  ;;  %11902 = vmatmul.msk.f32.gmra.mxu0 %vm387_vm1, %v5074_v15  ;;  %v15055_v6 = vld [vmem:[#allocation2 + $0x34] sm:$0xff] }
 0x423   : > { %11929 = vmatmul.msk.f32.gmra.mxu1 %vm387_vm1, %v5408_v41  ;;  %v5078_v41 = vld [vmem:[#allocation2 + $0xba] sm:$0xff] }
 0x424   : > { %11972 = vmatmul.msk.f32.gmra.mxu2 %vm387_vm1, %v5758_v24  ;;  %v5412_v24 = vld [vmem:[#allocation2 + $0x3b] sm:$0xff] }
 0x425   : > { %v4899_v53 = vpop.f32.mrf.mxu3 }
 0x426   : > { %v15019_v13 = vadd.f32 %v4899_v53, %v14684_v2  ;;  %v15069_v53 = vld [vmem:[#allocation2 + $0x3c] sm:$0xff] }
 0x427   : > { %v4662_v10 = vpop.f32.mrf.mxu2  ;;  %v15023_v31 = vpop.f32.mrf.mxu0 }
 0x428   : > { %v15021_v62 = vadd.f32 %v4662_v10, %v4396_v27  ;;  %v4399_v36 = vpop.f32.mrf.mxu1 }
 0x42a   : > { %11861 = vmatmul.msk.f32.gmra.mxu3 %vm387_vm1, %v5074_v15  ;;  %11903 = vmatmul.msk.f32.gmra.mxu0 %vm387_vm1, %v5075_v8 }
 0x42b   : > { %11930 = vmatmul.msk.f32.gmra.mxu1 %vm387_vm1, %v5409_v54 }
 0x42c   : > { %11973 = vmatmul.msk.f32.gmra.mxu2 %vm387_vm1, %v15027_v48 }
 0x42d   : > { %v4902_v2 = vpop.f32.mrf.mxu3 }
 0x42e   : > { %v15033_v47 = vadd.f32 %v4902_v2, %v14699_v61 }
 0x42f   : > { %v4665_v60 = vpop.f32.mrf.mxu2  ;;  %v15037_v49 = vpop.f32.mrf.mxu0 }
 0x430   : > { %v15035_v55 = vadd.f32 %v4665_v60, %v4399_v36  ;;  %v4402_v1 = vpop.f32.mrf.mxu1  ;;  %v5079_v60 = vld [vmem:[#allocation2 + $0xc2] sm:$0xff] }
 0x432   : > { %11862 = vmatmul.msk.f32.gmra.mxu3 %vm387_vm1, %v5075_v8  ;;  %11904 = vmatmul.msk.f32.gmra.mxu0 %vm387_vm1, %v5076_v9 }
 0x433   : > { %11931 = vmatmul.msk.f32.gmra.mxu1 %vm387_vm1, %v5410_v52 }
 0x434   : > { %11974 = vmatmul.msk.f32.gmra.mxu2 %vm387_vm1, %v15041_v16 }
 0x435   : > { %v4905_v61 = vpop.f32.mrf.mxu3 }
 0x436   : > { %v15047_v17 = vadd.f32 %v4905_v61, %v14714_v22 }
 0x437   : > { %v4668_v57 = vpop.f32.mrf.mxu2  ;;  %v15051_v58 = vpop.f32.mrf.mxu0 }
 0x438   : > { %v15049_v56 = vadd.f32 %v4668_v57, %v4402_v1  ;;  %v4405_v30 = vpop.f32.mrf.mxu1  ;;  %v5413_v1 = vld [vmem:[#allocation2 + $0x43] sm:$0xff] }
 0x43a   : > { %11863 = vmatmul.msk.f32.gmra.mxu3 %vm387_vm1, %v5076_v9  ;;  %11905 = vmatmul.msk.f32.gmra.mxu0 %vm387_vm1, %v5077_v21  ;;  %v15083_v9 = vld [vmem:[#allocation2 + $0x44] sm:$0xff] }
 0x43b   : > { %11932 = vmatmul.msk.f32.gmra.mxu1 %vm387_vm1, %v5411_v63  ;;  %v5080_v63 = vld [vmem:[#allocation2 + $0xca] sm:$0xff] }
 0x43c   : > { %11975 = vmatmul.msk.f32.gmra.mxu2 %vm387_vm1, %v15055_v6 }
 0x43d   : > { %v4908_v22 = vpop.f32.mrf.mxu3 }
 0x43e   : > { %v15061_v26 = vadd.f32 %v4908_v22, %v14729_v19  ;;  %v5414_v22 = vld [vmem:[#allocation2 + $0x4b] sm:$0xff] }
 0x43f   : > { %v4671_v4 = vpop.f32.mrf.mxu2  ;;  %v15065_v27 = vpop.f32.mrf.mxu0 }
 0x440   : > { %v15063_v33 = vadd.f32 %v4671_v4, %v4405_v30  ;;  %v4408_v15 = vpop.f32.mrf.mxu1  ;;  %v15097_v4 = vld [vmem:[#allocation2 + $0x4c] sm:$0xff] }
 0x441   : > { %18326 = vst [vmem:[#allocation57_spill] sm:$0xff] %v15097_v4 }
 0x442   : > { %11864 = vmatmul.msk.f32.gmra.mxu3 %vm387_vm1, %v5077_v21  ;;  %11906 = vmatmul.msk.f32.gmra.mxu0 %vm387_vm1, %v5078_v41 }
 0x443   : > { %11933 = vmatmul.msk.f32.gmra.mxu1 %vm387_vm1, %v5412_v24 }
 0x444   : > { %11976 = vmatmul.msk.f32.gmra.mxu2 %vm387_vm1, %v15069_v53 }
 0x445   : > { %v4911_v19 = vpop.f32.mrf.mxu3 }
 0x446   : > { %v15075_v10 = vadd.f32 %v4911_v19, %v14744_v59 }
 0x447   : > { %v4674_v36 = vpop.f32.mrf.mxu2  ;;  %v15079_v54 = vpop.f32.mrf.mxu0 }
 0x448   : > { %v15077_v8 = vadd.f32 %v4674_v36, %v4408_v15  ;;  %v4411_v2 = vpop.f32.mrf.mxu1 }
 0x44a   : > { %18324 = vst [vmem:[#allocation54_spill] sm:$0xff] %v15077_v8  ;;  %11865 = vmatmul.msk.f32.gmra.mxu3 %vm387_vm1, %v5078_v41  ;;  %11907 = vmatmul.msk.f32.gmra.mxu0 %vm387_vm1, %v5079_v60  ;;  %v5419_v8 = vld [vmem:[#allocation2 + $0x73] sm:$0xff] }
 0x44b   : > { %11934 = vmatmul.msk.f32.gmra.mxu1 %vm387_vm1, %v5413_v1  ;;  %v15111_v1 = vld [vmem:[#allocation2 + $0x54] sm:$0xff] }
 0x44c   : > { %11977 = vmatmul.msk.f32.gmra.mxu2 %vm387_vm1, %v15083_v9  ;;  %18328 = vst [vmem:[#allocation59_spill] sm:$0xff] %v15111_v1 }
 0x44d   : > { %v4914_v59 = vpop.f32.mrf.mxu3 }
 0x44e   : > { %v15089_v52 = vadd.f32 %v4914_v59, %v14769_v43 }
 0x44f   : > { %v4677_v61 = vpop.f32.mrf.mxu2  ;;  %v15093_v30 = vpop.f32.mrf.mxu0 }
 0x450   : > { %v15091_v57 = vadd.f32 %v4677_v61, %v4411_v2  ;;  %v4414_v21 = vpop.f32.mrf.mxu1  ;;  %v5081_v2 = vld [vmem:[#allocation2 + $0xd2] sm:$0xff] }
 0x452   : > { %18325 = vst [vmem:[#allocation55_spill] sm:$0xff] %v15091_v57  ;;  %11866 = vmatmul.msk.f32.gmra.mxu3 %vm387_vm1, %v5079_v60  ;;  %11908 = vmatmul.msk.f32.gmra.mxu0 %vm387_vm1, %v5080_v63  ;;  %v5415_v60 = vld [vmem:[#allocation2 + $0x53] sm:$0xff]  ;;  %v5417_v57 = vld [vmem:[#allocation2 + $0x63] sm:$0xff] }
 0x453   : > { %11935 = vmatmul.msk.f32.gmra.mxu1 %vm387_vm1, %v5414_v22 }
 0x454   : > { %11978 = vmatmul.msk.f32.gmra.mxu2 %vm387_vm1, %v15097_v4  ;;  %v15185_v4 = vld [vmem:[#allocation2 + $0x7c] sm:$0xff] }
 0x455   : > { %v4917_v43 = vpop.f32.mrf.mxu3  ;;  %18339 = vst [vmem:[#allocation74_spill] sm:$0xff] %v15185_v4 }
 0x456   : > { %v15103_v15 = vadd.f32 %v4917_v43, %v14783_v18  ;;  %v5082_v43 = vld [vmem:[#allocation2 + $0xda] sm:$0xff] }
 0x457   : > { %v4680_v41 = vpop.f32.mrf.mxu2  ;;  %v15107_v19 = vpop.f32.mrf.mxu0 }
 0x458   : > { %v15105_v24 = vadd.f32 %v4680_v41, %v4414_v21  ;;  %v4417_v36 = vpop.f32.mrf.mxu1  ;;  %v5416_v41 = vld [vmem:[#allocation2 + $0x5b] sm:$0xff] }
 0x45a   : > { %18327 = vst [vmem:[#allocation58_spill] sm:$0xff] %v15105_v24  ;;  %11867 = vmatmul.msk.f32.gmra.mxu3 %vm387_vm1, %v5080_v63  ;;  %11909 = vmatmul.msk.f32.gmra.mxu0 %vm387_vm1, %v5081_v2  ;;  %v5083_v24 = vld [vmem:[#allocation2 + $0xe2] sm:$0xff] }
 0x45b   : > { %11936 = vmatmul.msk.f32.gmra.mxu1 %vm387_vm1, %v5415_v60  ;;  %v15125_v60 = vld [vmem:[#allocation2 + $0x5c] sm:$0xff] }
 0x45c   : > { %11979 = vmatmul.msk.f32.gmra.mxu2 %vm387_vm1, %v15111_v1  ;;  %18330 = vst [vmem:[#allocation62_spill] sm:$0xff] %v15125_v60  ;;  %v5418_v1 = vld [vmem:[#allocation2 + $0x6b] sm:$0xff] }
 0x45d   : > { %v4920_v18 = vpop.f32.mrf.mxu3 }
 0x45e   : > { %v15117_v59 = vadd.f32 %v4920_v18, %v14796_v25 }
 0x45f   : > { %v4683_v61 = vpop.f32.mrf.mxu2  ;;  %v15121_v22 = vpop.f32.mrf.mxu0 }
 0x460   : > { %v15119_v21 = vadd.f32 %v4683_v61, %v4417_v36  ;;  %v4420_v63 = vpop.f32.mrf.mxu1 }
 0x462   : > { %18329 = vst [vmem:[#allocation61_spill] sm:$0xff] %v15119_v21  ;;  %11868 = vmatmul.msk.f32.gmra.mxu3 %vm387_vm1, %v5081_v2  ;;  %11910 = vmatmul.msk.f32.gmra.mxu0 %vm387_vm1, %v5082_v43 }
 0x463   : > { %11937 = vmatmul.msk.f32.gmra.mxu1 %vm387_vm1, %v5416_v41  ;;  %v15139_v41 = vld [vmem:[#allocation2 + $0x64] sm:$0xff] }
 0x464   : > { %11980 = vmatmul.msk.f32.gmra.mxu2 %vm387_vm1, %v15125_v60  ;;  %18332 = vst [vmem:[#allocation65_spill] sm:$0xff] %v15139_v41  ;;  %v5084_v60 = vld [vmem:[#allocation2 + $0xea] sm:$0xff] }
 0x465   : > { %v4923_v25 = vpop.f32.mrf.mxu3 }
 0x466   : > { %v15131_v36 = vadd.f32 %v4923_v25, %v14809_v45 }
 0x467   : > { %v4686_v18 = vpop.f32.mrf.mxu2  ;;  %v15135_v21 = vpop.f32.mrf.mxu0 }
 0x468   : > { %v15133_v61 = vadd.f32 %v4686_v18, %v4420_v63  ;;  %v4423_v2 = vpop.f32.mrf.mxu1 }
 0x46a   : > { %18331 = vst [vmem:[#allocation63_spill] sm:$0xff] %v15133_v61  ;;  %11869 = vmatmul.msk.f32.gmra.mxu3 %vm387_vm1, %v5082_v43  ;;  %11911 = vmatmul.msk.f32.gmra.mxu0 %vm387_vm1, %v5083_v24 }
 0x46b   : > { %11938 = vmatmul.msk.f32.gmra.mxu1 %vm387_vm1, %v5417_v57  ;;  %v15153_v57 = vld [vmem:[#allocation2 + $0x6c] sm:$0xff] }
 0x46c   : > { %11981 = vmatmul.msk.f32.gmra.mxu2 %vm387_vm1, %v15139_v41  ;;  %18334 = vst [vmem:[#allocation67_spill] sm:$0xff] %v15153_v57  ;;  %v5085_v41 = vld [vmem:[#allocation2 + $0xf2] sm:$0xff] }
 0x46d   : > { %v4926_v45 = vpop.f32.mrf.mxu3 }
 0x46e   : > { %v15145_v63 = vadd.f32 %v4926_v45, %v14822_v20 }
 0x46f   : > { %v4689_v25 = vpop.f32.mrf.mxu2  ;;  %v15149_v61 = vpop.f32.mrf.mxu0 }
 0x470   : > { %v15147_v18 = vadd.f32 %v4689_v25, %v4423_v2  ;;  %v4426_v43 = vpop.f32.mrf.mxu1 }
 0x472   : > { %18333 = vst [vmem:[#allocation66_spill] sm:$0xff] %v15147_v18  ;;  %11870 = vmatmul.msk.f32.gmra.mxu3 %vm387_vm1, %v5083_v24  ;;  %11912 = vmatmul.msk.f32.gmra.mxu0 %vm387_vm1, %v5084_v60 }
 0x473   : > { %11939 = vmatmul.msk.f32.gmra.mxu1 %vm387_vm1, %v5418_v1  ;;  %v15167_v1 = vld [vmem:[#allocation2 + $0x74] sm:$0xff] }
 0x474   : > { %11982 = vmatmul.msk.f32.gmra.mxu2 %vm387_vm1, %v15153_v57  ;;  %18336 = vst [vmem:[#allocation70_spill] sm:$0xff] %v15167_v1  ;;  %v5086_v57 = vld [vmem:[#allocation2 + $0xfa] sm:$0xff] }
 0x475   : > { %v4929_v20 = vpop.f32.mrf.mxu3 }
 0x476   : > { %v15159_v2 = vadd.f32 %v4929_v20, %v14835_v3  ;;  %v12141_v3 = vld [vmem:[%s18026_s7 + $0x2] sm:$0x3] }
 0x477   : > { %v4692_v45 = vpop.f32.mrf.mxu2  ;;  %v15163_v18 = vpop.f32.mrf.mxu0  ;;  %12142 = vmatpush.msk.msra.mxu2 %vm7906_vm14, %v12141_v3 }
 0x478   : > { %v15161_v25 = vadd.f32 %v4692_v45, %v4426_v43  ;;  %v4429_v24 = vpop.f32.mrf.mxu1 }
 0x47a   : > { %18335 = vst [vmem:[#allocation69_spill] sm:$0xff] %v15161_v25  ;;  %11871 = vmatmul.msk.f32.gmra.mxu3 %vm387_vm1, %v5084_v60  ;;  %11913 = vmatmul.msk.f32.gmra.mxu0 %vm387_vm1, %v5085_v41 }
 0x47b   : > { %11940 = vmatmul.msk.f32.gmra.mxu1 %vm387_vm1, %v5419_v8 }
 0x47c   : > { %11983 = vmatmul.msk.f32.gmra.mxu2 %vm387_vm1, %v15167_v1  ;;  %v5420_v1 = vld [vmem:[#allocation2 + $0x7b] sm:$0xff] }
 0x47d   : > { %v4932_v43 = vpop.f32.mrf.mxu3 }
 0x47e   : > { %v15177_v60 = vadd.f32 %v4932_v43, %v14848_v44 }
 0x47f   : > { %v4695_v20 = vpop.f32.mrf.mxu2  ;;  %v15181_v25 = vpop.f32.mrf.mxu0 }
 0x480   : > { %v15179_v45 = vadd.f32 %v4695_v20, %v4429_v24  ;;  %18338 = vst [vmem:[#allocation73_spill] sm:$0xff] %v15181_v25  ;;  %v4432_v8 = vpop.f32.mrf.mxu1  ;;  %v5421_v25 = vld [vmem:[#allocation2 + $0x83] sm:$0xff] }
 0x482   : > { %18337 = vst [vmem:[#allocation71_spill] sm:$0xff] %v15179_v45  ;;  %11872 = vmatmul.msk.f32.gmra.mxu3 %vm387_vm1, %v5085_v41  ;;  %11914 = vmatmul.msk.f32.gmra.mxu0 %vm387_vm1, %v5086_v57  ;;  %v5087_v45 = vld [vmem:[#allocation2 + $0x102] sm:$0xff] }
 0x483   : > { %11941 = vmatmul.msk.f32.gmra.mxu1 %vm387_vm1, %v5420_v1  ;;  %v15199_v1 = vld [vmem:[#allocation2 + $0x84] sm:$0xff] }
 0x484   : > { %11984 = vmatmul.msk.f32.gmra.mxu2 %vm387_vm1, %v15185_v4  ;;  %18342 = vst [vmem:[#allocation78_spill] sm:$0xff] %v15199_v1  ;;  %v5088_v4 = vld [vmem:[#allocation2 + $0x10a] sm:$0xff] }
 0x485   : > { %v4935_v44 = vpop.f32.mrf.mxu3 }
 0x486   : > { %v15191_v24 = vadd.f32 %v4935_v44, %v14861_v35 }
 0x487   : > { %v4698_v3 = vpop.f32.mrf.mxu2  ;;  %v15195_v20 = vpop.f32.mrf.mxu0 }
 0x488   : > { %v15193_v43 = vadd.f32 %v4698_v3, %v4432_v8  ;;  %18341 = vst [vmem:[#allocation77_spill] sm:$0xff] %v15195_v20  ;;  %v4435_v41 = vpop.f32.mrf.mxu1  ;;  %v5422_v20 = vld [vmem:[#allocation2 + $0x8b] sm:$0xff] }
 0x48a   : > { %18340 = vst [vmem:[#allocation75_spill] sm:$0xff] %v15193_v43  ;;  %11873 = vmatmul.msk.f32.gmra.mxu3 %vm387_vm1, %v5086_v57  ;;  %11915 = vmatmul.msk.f32.gmra.mxu0 %vm387_vm1, %v5087_v45 }
 0x48b   : > { %11942 = vmatmul.msk.f32.gmra.mxu1 %vm387_vm1, %v5421_v25  ;;  %v15213_v25 = vld [vmem:[#allocation2 + $0x8c] sm:$0xff] }
 0x48c   : > { %11985 = vmatmul.msk.f32.gmra.mxu2 %vm387_vm1, %v15199_v1  ;;  %18346 = vst [vmem:[#allocation83_spill] sm:$0xff] %v15213_v25 }
 0x48d   : > { %v4938_v35 = vpop.f32.mrf.mxu3 }
 0x48e   : > { %v15205_v8 = vadd.f32 %v4938_v35, %v14874_v50  ;;  %v4585_v50 = vadd.f32 %v14650_v39, %v14634_v38  ;;  %v4588_v39 = vadd.f32 %v14669_v0, %v14654_v28  ;;  %v15248_v28 = vld [vmem:[#allocation2 + $0x9c] sm:$0xff] }
 0x48f   : > { %v4701_v44 = vpop.f32.mrf.mxu2  ;;  %v15209_v43 = vpop.f32.mrf.mxu0 }
 0x490   : > { %18343 = vst [vmem:[#allocation79_spill] sm:$0xff] %v15205_v8  ;;  %v15207_v3 = vadd.f32 %v4701_v44, %v4435_v41  ;;  %v4438_v57 = vpop.f32.mrf.mxu1  ;;  %v5089_v8 = vld [vmem:[#allocation2 + $0x112] sm:$0xff] }
 0x491   : > { %18345 = vst [vmem:[#allocation82_spill] sm:$0xff] %v15209_v43 }
 0x492   : > { %18344 = vst [vmem:[#allocation81_spill] sm:$0xff] %v15207_v3  ;;  %11874 = vmatmul.msk.f32.gmra.mxu3 %vm387_vm1, %v5087_v45  ;;  %11916 = vmatmul.msk.f32.gmra.mxu0 %vm387_vm1, %v5088_v4  ;;  %v5016_v45 = vadd.f32 %v14997_v46, %v4585_v50  ;;  %v5017_v50 = vadd.f32 %v15008_v29, %v4588_v39 }
 0x493   : > { %11943 = vmatmul.msk.f32.gmra.mxu1 %vm387_vm1, %v5422_v20  ;;  %v5423_v20 = vld [vmem:[#allocation2 + $0x93] sm:$0xff] }
 0x494   : > { %11986 = vmatmul.msk.f32.gmra.mxu2 %vm387_vm1, %v15213_v25  ;;  %v15230_v25 = vld [vmem:[#allocation2 + $0x94] sm:$0xff]  ;;  %v5366_v38 = vadd.f32 %v15001_v7, %v5016_v45  ;;  %v5367_v0 = vadd.f32 %v15012_v11, %v5017_v50  ;;  %v5425_v11 = vld [vmem:[#allocation2 + $0xa3] sm:$0xff]  ;;  %v5368_v50 = vadd.f32 %v15023_v31, %v15019_v13  ;;  %v5426_v13 = vld [vmem:[#allocation2 + $0xab] sm:$0xff] }
 0x495   : > { %v4941_v41 = vpop.f32.mrf.mxu3  ;;  %v5090_v45 = vld [vmem:[#allocation2 + $0x11a] sm:$0xff]  ;;  %v15279_v31 = vld [vmem:[#allocation2 + $0xac] sm:$0xff] }
 0x496   : > { %v15221_v35 = vadd.f32 %v4941_v41, %v14887_v32 }
 0x497   : > { %v4704_v44 = vpop.f32.mrf.mxu2  ;;  %v15226_v1 = vpop.f32.mrf.mxu0 }
 0x498   : > { %v15224_v3 = vadd.f32 %v4704_v44, %v4438_v57  ;;  %v5593_v43 = vpop.f32.mrf.mxu1 }
 0x499   : > { %v5716_v32 = vadd.f32 %v5593_v43, %v5366_v38 }
 0x49a   : > { %11875 = vmatmul.msk.f32.gmra.mxu3 %vm387_vm1, %v5088_v4  ;;  %11917 = vmatmul.msk.f32.gmra.mxu0 %vm387_vm1, %v5089_v8 }
 0x49b   : > { %11944 = vmatmul.msk.f32.gmra.mxu1 %vm387_vm1, %v5423_v20  ;;  %v5424_v20 = vld [vmem:[#allocation2 + $0x9b] sm:$0xff] }
 0x49c   : > { %11987 = vmatmul.msk.f32.gmra.mxu2 %vm387_vm1, %v15230_v25 }
 0x49d   : > { %v4944_v46 = vpop.f32.mrf.mxu3 }
 0x49e   : > { %v15239_v57 = vadd.f32 %v4944_v46, %v14900_v51  ;;  %v5091_v46 = vld [vmem:[#allocation2 + $0x122] sm:$0xff] }
 0x49f   : > { %v5943_v4 = vpop.f32.mrf.mxu2  ;;  %v15244_v44 = vpop.f32.mrf.mxu0 }
 0x4a0   : > { %v15242_v41 = vadd.f32 %v5943_v4, %v5716_v32  ;;  %v5596_v7 = vpop.f32.mrf.mxu1  ;;  %v15263_v4 = vld [vmem:[#allocation2 + $0xa4] sm:$0xff] }
 0x4a1   : > { %v5717_v51 = vadd.f32 %v5596_v7, %v5367_v0 }
 0x4a2   : > { %11876 = vmatmul.msk.f32.gmra.mxu3 %vm387_vm1, %v5089_v8  ;;  %11918 = vmatmul.msk.f32.gmra.mxu0 %vm387_vm1, %v5090_v45 }
 0x4a3   : > { %11945 = vmatmul.msk.f32.gmra.mxu1 %vm387_vm1, %v5424_v20 }
 0x4a4   : > { %11988 = vmatmul.msk.f32.gmra.mxu2 %vm387_vm1, %v15248_v28 }
 0x4a5   : > { %v4947_v29 = vpop.f32.mrf.mxu3 }
 0x4a6   : > { %v15255_v43 = vadd.f32 %v4947_v29, %v14913_v12 }
 0x4a7   : > { %v5946_v38 = vpop.f32.mrf.mxu2  ;;  %v15259_v8 = vpop.f32.mrf.mxu0 }
 0x4a8   : > { %v15257_v39 = vadd.f32 %v5946_v38, %v5717_v51  ;;  %v5599_v32 = vpop.f32.mrf.mxu1  ;;  %v5092_v38 = vld [vmem:[#allocation2 + $0x12a] sm:$0xff] }
 0x4a9   : > { %v5718_v12 = vadd.f32 %v5599_v32, %v5368_v50  ;;  %v5369_v32 = vadd.f32 %v15037_v49, %v15033_v47  ;;  %v5427_v47 = vld [vmem:[#allocation2 + $0xb3] sm:$0xff] }
 0x4aa   : > { %11877 = vmatmul.msk.f32.gmra.mxu3 %vm387_vm1, %v5090_v45  ;;  %11919 = vmatmul.msk.f32.gmra.mxu0 %vm387_vm1, %v5091_v46  ;;  %v15295_v49 = vld [vmem:[#allocation2 + $0xb4] sm:$0xff] }
 0x4ab   : > { %11946 = vmatmul.msk.f32.gmra.mxu1 %vm387_vm1, %v5425_v11 }
 0x4ac   : > { %11989 = vmatmul.msk.f32.gmra.mxu2 %vm387_vm1, %v15263_v4 }
 0x4ad   : > { %v4950_v7 = vpop.f32.mrf.mxu3 }
 0x4ae   : > { %v15271_v20 = vadd.f32 %v4950_v7, %v14926_v34 }
 0x4af   : > { %v5949_v0 = vpop.f32.mrf.mxu2  ;;  %v15275_v51 = vpop.f32.mrf.mxu0 }
 0x4b0   : > { %v15273_v45 = vadd.f32 %v5949_v0, %v5718_v12  ;;  %18347 = vst [vmem:[#allocation85_spill] sm:$0xff] %v15275_v51  ;;  %v5602_v29 = vpop.f32.mrf.mxu1  ;;  %v5093_v51 = vld [vmem:[#allocation2 + $0x132] sm:$0xff] }
 0x4b1   : > { %v5719_v34 = vadd.f32 %v5602_v29, %v5369_v32  ;;  %v5370_v29 = vadd.f32 %v15051_v58, %v15047_v17  ;;  %v5428_v17 = vld [vmem:[#allocation2 + $0xbb] sm:$0xff] }
 0x4b2   : > { %11878 = vmatmul.msk.f32.gmra.mxu3 %vm387_vm1, %v5091_v46  ;;  %11920 = vmatmul.msk.f32.gmra.mxu0 %vm387_vm1, %v5092_v38  ;;  %v15311_v58 = vld [vmem:[#allocation2 + $0xbc] sm:$0xff] }
 0x4b3   : > { %11947 = vmatmul.msk.f32.gmra.mxu1 %vm387_vm1, %v5426_v13 }
 0x4b4   : > { %11990 = vmatmul.msk.f32.gmra.mxu2 %vm387_vm1, %v15279_v31 }
 0x4b5   : > { %v4953_v11 = vpop.f32.mrf.mxu3 }
 0x4b6   : > { %v15287_v50 = vadd.f32 %v4953_v11, %v14939_v14 }
 0x4b7   : > { %v5952_v12 = vpop.f32.mrf.mxu2  ;;  %v15291_v7 = vpop.f32.mrf.mxu0 }
 0x4b8   : > { %v15289_v46 = vadd.f32 %v5952_v12, %v5719_v34  ;;  %18348 = vst [vmem:[#allocation86_spill] sm:$0xff] %v15291_v7  ;;  %v5605_v0 = vpop.f32.mrf.mxu1  ;;  %v5094_v7 = vld [vmem:[#allocation2 + $0x13a] sm:$0xff] }
 0x4b9   : > { %v5720_v14 = vadd.f32 %v5605_v0, %v5370_v29  ;;  %v5371_v0 = vadd.f32 %v15065_v27, %v15061_v26  ;;  %v5429_v26 = vld [vmem:[#allocation2 + $0xc3] sm:$0xff] }
 0x4ba   : > { %11879 = vmatmul.msk.f32.gmra.mxu3 %vm387_vm1, %v5092_v38  ;;  %11921 = vmatmul.msk.f32.gmra.mxu0 %vm387_vm1, %v5093_v51  ;;  %v15327_v27 = vld [vmem:[#allocation2 + $0xc4] sm:$0xff] }
 0x4bb   : > { %11948 = vmatmul.msk.f32.gmra.mxu1 %vm387_vm1, %v5427_v47 }
 0x4bc   : > { %11991 = vmatmul.msk.f32.gmra.mxu2 %vm387_vm1, %v15295_v49 }
 0x4bd   : > { %v4956_v13 = vpop.f32.mrf.mxu3 }
 0x4be   : > { %v15303_v32 = vadd.f32 %v4956_v13, %v14964_v23 }
 0x4bf   : > { %v5955_v34 = vpop.f32.mrf.mxu2  ;;  %v15307_v11 = vpop.f32.mrf.mxu0 }
 0x4c0   : > { %v15305_v38 = vadd.f32 %v5955_v34, %v5720_v14  ;;  %18349 = vst [vmem:[#allocation88_spill] sm:$0xff] %v15307_v11  ;;  %v5608_v12 = vpop.f32.mrf.mxu1  ;;  %v5095_v11 = vld [vmem:[#allocation2 + $0x142] sm:$0xff] }
 0x4c1   : > { %v5721_v23 = vadd.f32 %v5608_v12, %v5371_v0  ;;  %v5372_v12 = vadd.f32 %v15079_v54, %v15075_v10  ;;  %v5430_v10 = vld [vmem:[#allocation2 + $0xcb] sm:$0xff] }
 0x4c2   : > { %11880 = vmatmul.msk.f32.gmra.mxu3 %vm387_vm1, %v5093_v51  ;;  %11922 = vmatmul.msk.f32.gmra.mxu0 %vm387_vm1, %v5094_v7  ;;  %v15343_v54 = vld [vmem:[#allocation2 + $0xcc] sm:$0xff] }
 0x4c3   : > { %11949 = vmatmul.msk.f32.gmra.mxu1 %vm387_vm1, %v5428_v17 }
 0x4c4   : > { %11992 = vmatmul.msk.f32.gmra.mxu2 %vm387_vm1, %v15311_v58 }
 0x4c5   : > { %v4959_v47 = vpop.f32.mrf.mxu3 }
 0x4c6   : > { %v15319_v29 = vadd.f32 %v4959_v47, %v14977_v37 }
 0x4c7   : > { %v5958_v14 = vpop.f32.mrf.mxu2  ;;  %v15323_v13 = vpop.f32.mrf.mxu0 }
 0x4c8   : > { %v15321_v51 = vadd.f32 %v5958_v14, %v5721_v23  ;;  %18350 = vst [vmem:[#allocation90_spill] sm:$0xff] %v15323_v13  ;;  %v5611_v34 = vpop.f32.mrf.mxu1  ;;  %v5096_v13 = vld [vmem:[#allocation2 + $0x14a] sm:$0xff] }
 0x4c9   : > { %v5722_v37 = vadd.f32 %v5611_v34, %v5372_v12  ;;  %v5373_v34 = vadd.f32 %v15093_v30, %v15089_v52  ;;  %v5431_v52 = vld [vmem:[#allocation2 + $0xd3] sm:$0xff] }
 0x4ca   : > { %11881 = vmatmul.msk.f32.gmra.mxu3 %vm387_vm1, %v5094_v7  ;;  %11923 = vmatmul.msk.f32.gmra.mxu0 %vm387_vm1, %v5095_v11  ;;  %v15360_v30 = vld [vmem:[#allocation2 + $0xd4] sm:$0xff] }
 0x4cb   : > { %11950 = vmatmul.msk.f32.gmra.mxu1 %vm387_vm1, %v5429_v26 }
 0x4cc   : > { %11993 = vmatmul.msk.f32.gmra.mxu2 %vm387_vm1, %v15327_v27 }
 0x4cd   : > { %v4962_v17 = vpop.f32.mrf.mxu3 }
 0x4ce   : > { %v15335_v0 = vadd.f32 %v4962_v17, %v14988_v5 }
 0x4cf   : > { %v5961_v23 = vpop.f32.mrf.mxu2  ;;  %v15339_v47 = vpop.f32.mrf.mxu0 }
 0x4d0   : > { %18351 = vst [vmem:[#allocation91_spill] sm:$0xff] %v15335_v0  ;;  %v15337_v7 = vadd.f32 %v5961_v23, %v5722_v37  ;;  %v5614_v14 = vpop.f32.mrf.mxu1  ;;  %v5097_v23 = vld [vmem:[#allocation2 + $0x152] sm:$0xff] }
 0x4d1   : > { %18352 = vst [vmem:[#allocation56_spill] sm:$0xff] %v15339_v47  ;;  %v5723_v5 = vadd.f32 %v5614_v14, %v5373_v34  ;;  %v5374_v14 = vadd.f32 %v15107_v19, %v15103_v15  ;;  %v5432_v15 = vld [vmem:[#allocation2 + $0xdb] sm:$0xff] }
 0x4d2   : > { %11882 = vmatmul.msk.f32.gmra.mxu3 %vm387_vm1, %v5095_v11  ;;  %11924 = vmatmul.msk.f32.gmra.mxu0 %vm387_vm1, %v5096_v13  ;;  %v15377_v19 = vld [vmem:[#allocation2 + $0xdc] sm:$0xff] }
 0x4d3   : > { %11951 = vmatmul.msk.f32.gmra.mxu1 %vm387_vm1, %v5430_v10  ;;  %v6471_v47 = vld [vmem:[#allocation2 + $0x95] sm:$0xff] }
 0x4d4   : > { %11994 = vmatmul.msk.f32.gmra.mxu2 %vm387_vm1, %v15343_v54 }
 0x4d5   : > { %v4965_v26 = vpop.f32.mrf.mxu3 }
 0x4d6   : > { %v15351_v12 = vadd.f32 %v4965_v26, %v14999_v42 }
 0x4d7   : > { %v5964_v37 = vpop.f32.mrf.mxu2  ;;  %v15355_v13 = vpop.f32.mrf.mxu0 }
 0x4d8   : > { %18353 = vst [vmem:[#allocation60_spill] sm:$0xff] %v15351_v12  ;;  %v15353_v11 = vadd.f32 %v5964_v37, %v5723_v5  ;;  %v5617_v17 = vpop.f32.mrf.mxu1  ;;  %v6470_v12 = vld [vmem:[#allocation2 + $0x8d] sm:$0xff] }
 0x4d9   : > { %18354 = vst [vmem:[#allocation64_spill] sm:$0xff] %v15355_v13  ;;  %v5724_v42 = vadd.f32 %v5617_v17, %v5374_v14  ;;  %v5375_v17 = vadd.f32 %v15121_v22, %v15117_v59  ;;  %v5433_v59 = vld [vmem:[#allocation2 + $0xe3] sm:$0xff] }
 0x4da   : > { %11925 = vmatmul.msk.f32.gmra.mxu0 %vm387_vm1, %v5097_v23  ;;  %12014 = vmatmul.msk.f32.vlgmr.msra.gmra.mxu3 %vm387_vm1, %v15027_v48  ;;  %v6457_v23 = vld [vmem:[#allocation2 + $0x25] sm:$0xff]  ;;  %v15575_v13 = vld [vmem:[#allocation2 + $0x13c] sm:$0xff] }
 0x4db   : > { %11952 = vmatmul.msk.f32.gmra.mxu1 %vm387_vm1, %v5431_v52  ;;  %v15394_v22 = vld [vmem:[#allocation2 + $0xe4] sm:$0xff] }
 0x4dc   : > { %11995 = vmatmul.msk.f32.gmra.mxu2 %vm387_vm1, %v15360_v30 }
 0x4dd   : > { %v4968_v10 = vpop.f32.mrf.mxu3 }
 0x4de   : > { %v15368_v34 = vadd.f32 %v4968_v10, %v15010_v40 }
 0x4df   : > { %v5967_v5 = vpop.f32.mrf.mxu2  ;;  %v15372_v48 = vpop.f32.mrf.mxu0 }
 0x4e0   : > { %18355 = vst [vmem:[#allocation68_spill] sm:$0xff] %v15368_v34  ;;  %v15370_v26 = vadd.f32 %v5967_v5, %v5724_v42  ;;  %v5620_v37 = vpop.f32.mrf.mxu1  ;;  %v6469_v34 = vld [vmem:[#allocation2 + $0x85] sm:$0xff] }
 0x4e1   : > { %18356 = vst [vmem:[#allocation72_spill] sm:$0xff] %v15372_v48  ;;  %v5725_v40 = vadd.f32 %v5620_v37, %v5375_v17  ;;  %v5376_v37 = vadd.f32 %v15135_v21, %v15131_v36  ;;  %v5434_v21 = vld [vmem:[#allocation2 + $0xeb] sm:$0xff]  ;;  %v15560_v48 = vld [vmem:[#allocation2 + $0x134] sm:$0xff] }
 0x4e2   : > { %12015 = vmatmul.msk.f32.gmra.mxu3 %vm387_vm1, %v15041_v16  ;;  %12057 = vmatmul.msk.f32.vlgmr.msra.gmra.mxu0 %vm387_vm1, %v6457_v23  ;;  %v6458_v23 = vld [vmem:[#allocation2 + $0x2d] sm:$0xff] }
 0x4e3   : > { %11953 = vmatmul.msk.f32.gmra.mxu1 %vm387_vm1, %v5432_v15  ;;  %v15411_v36 = vld [vmem:[#allocation2 + $0xec] sm:$0xff] }
 0x4e4   : > { %11996 = vmatmul.msk.f32.gmra.mxu2 %vm387_vm1, %v15377_v19 }
 0x4e5   : > { %v4971_v52 = vpop.f32.mrf.mxu3 }
 0x4e6   : > { %v15385_v14 = vadd.f32 %v4971_v52, %v15021_v62 }
 0x4e7   : > { %v5970_v42 = vpop.f32.mrf.mxu2  ;;  %v15389_v10 = vpop.f32.mrf.mxu0 }
 0x4e8   : > { %18357 = vst [vmem:[#allocation76_spill] sm:$0xff] %v15385_v14  ;;  %v15387_v16 = vadd.f32 %v5970_v42, %v5725_v40  ;;  %v5623_v5 = vpop.f32.mrf.mxu1  ;;  %v6468_v14 = vld [vmem:[#allocation2 + $0x7d] sm:$0xff] }
 0x4e9   : > { %18358 = vst [vmem:[#allocation80_spill] sm:$0xff] %v15389_v10  ;;  %v5726_v62 = vadd.f32 %v5623_v5, %v5376_v37  ;;  %v5377_v5 = vadd.f32 %v15149_v61, %v15145_v63  ;;  %v5435_v61 = vld [vmem:[#allocation2 + $0xf3] sm:$0xff]  ;;  %v18381_v10 = vld [vmem:[#allocation65_spill] sm:$0xff] }
 0x4ea   : > { %12016 = vmatmul.msk.f32.gmra.mxu3 %vm387_vm1, %v15055_v6  ;;  %12058 = vmatmul.msk.f32.gmra.mxu0 %vm387_vm1, %v6458_v23  ;;  %v6459_v23 = vld [vmem:[#allocation2 + $0x35] sm:$0xff] }
 0x4eb   : > { %11954 = vmatmul.msk.f32.gmra.mxu1 %vm387_vm1, %v5433_v59  ;;  %v15428_v63 = vld [vmem:[#allocation2 + $0xf4] sm:$0xff] }
 0x4ec   : > { %11997 = vmatmul.msk.f32.gmra.mxu2 %vm387_vm1, %v15394_v22 }
 0x4ed   : > { %v4974_v15 = vpop.f32.mrf.mxu3 }
 0x4ee   : > { %v15402_v17 = vadd.f32 %v4974_v15, %v15035_v55 }
 0x4ef   : > { %v5973_v40 = vpop.f32.mrf.mxu2  ;;  %v15406_v52 = vpop.f32.mrf.mxu0 }
 0x4f0   : > { %18359 = vst [vmem:[#allocation84_spill] sm:$0xff] %v15402_v17  ;;  %v15404_v6 = vadd.f32 %v5973_v40, %v5726_v62  ;;  %v5626_v42 = vpop.f32.mrf.mxu1  ;;  %v6464_v17 = vld [vmem:[#allocation2 + $0x5d] sm:$0xff] }
 0x4f1   : > { %18360 = vst [vmem:[#allocation87_spill] sm:$0xff] %v15406_v52  ;;  %v5727_v55 = vadd.f32 %v5626_v42, %v5377_v5  ;;  %v5378_v42 = vadd.f32 %v15163_v18, %v15159_v2  ;;  %v5436_v18 = vld [vmem:[#allocation2 + $0xfb] sm:$0xff]  ;;  %v18375_v52 = vld [vmem:[#allocation62_spill] sm:$0xff] }
 0x4f2   : > { %12017 = vmatmul.msk.f32.gmra.mxu3 %vm387_vm1, %v15069_v53  ;;  %12059 = vmatmul.msk.f32.gmra.mxu0 %vm387_vm1, %v6459_v23  ;;  %v6460_v23 = vld [vmem:[#allocation2 + $0x3d] sm:$0xff] }
 0x4f3   : > { %11955 = vmatmul.msk.f32.gmra.mxu1 %vm387_vm1, %v5434_v21  ;;  %v15445_v2 = vld [vmem:[#allocation2 + $0xfc] sm:$0xff] }
 0x4f4   : > { %11998 = vmatmul.msk.f32.gmra.mxu2 %vm387_vm1, %v15411_v36 }
 0x4f5   : > { %v4977_v59 = vpop.f32.mrf.mxu3 }
 0x4f6   : > { %v15419_v37 = vadd.f32 %v4977_v59, %v15049_v56 }
 0x4f7   : > { %v5976_v62 = vpop.f32.mrf.mxu2  ;;  %v15423_v15 = vpop.f32.mrf.mxu0 }
 0x4f8   : > { %18361 = vst [vmem:[#allocation89_spill] sm:$0xff] %v15419_v37  ;;  %v15421_v53 = vadd.f32 %v5976_v62, %v5727_v55  ;;  %v5629_v40 = vpop.f32.mrf.mxu1  ;;  %v18370_v37 = vld [vmem:[#allocation59_spill] sm:$0xff] }
 0x4f9   : > { %18362 = vst [vmem:[#allocation23_spill] sm:$0xff] %v15423_v15  ;;  %v5728_v56 = vadd.f32 %v5629_v40, %v5378_v42  ;;  %v18365_v15 = vld [vmem:[#allocation57_spill] sm:$0xff] }
 0x4fa   : > { %12018 = vmatmul.msk.f32.gmra.mxu3 %vm387_vm1, %v15083_v9  ;;  %12060 = vmatmul.msk.f32.gmra.mxu0 %vm387_vm1, %v6460_v23  ;;  %v6461_v23 = vld [vmem:[#allocation2 + $0x45] sm:$0xff] }
 0x4fb   : > { %11956 = vmatmul.msk.f32.gmra.mxu1 %vm387_vm1, %v5435_v61  ;;  %v18366_v40 = vld [vmem:[#allocation73_spill] sm:$0xff] }
 0x4fc   : > { %11999 = vmatmul.msk.f32.gmra.mxu2 %vm387_vm1, %v15428_v63  ;;  %v5379_v61 = vadd.f32 %v18366_v40, %v15177_v60  ;;  %v5437_v60 = vld [vmem:[#allocation2 + $0x103] sm:$0xff] }
 0x4fd   : > { %v4980_v21 = vpop.f32.mrf.mxu3 }
 0x4fe   : > { %v15436_v5 = vadd.f32 %v4980_v21, %v15063_v33 }
 0x4ff   : > { %v5979_v55 = vpop.f32.mrf.mxu2  ;;  %v15440_v59 = vpop.f32.mrf.mxu0 }
 0x500   : > { %18363 = vst [vmem:[#allocation4_spill] sm:$0xff] %v15436_v5  ;;  %v15438_v9 = vadd.f32 %v5979_v55, %v5728_v56  ;;  %v5632_v62 = vpop.f32.mrf.mxu1  ;;  %v18367_v56 = vld [vmem:[#allocation54_spill] sm:$0xff] }
 0x501   : > { %18364 = vst [vmem:[#allocation5_spill] sm:$0xff] %v15440_v59  ;;  %v5729_v33 = vadd.f32 %v5632_v62, %v5379_v61  ;;  %v6462_v5 = vld [vmem:[#allocation2 + $0x4d] sm:$0xff] }
 0x502   : > { %12019 = vmatmul.msk.f32.gmra.mxu3 %vm387_vm1, %v18365_v15  ;;  %12061 = vmatmul.msk.f32.gmra.mxu0 %vm387_vm1, %v6461_v23  ;;  %v18371_v62 = vld [vmem:[#allocation77_spill] sm:$0xff] }
 0x503   : > { %11957 = vmatmul.msk.f32.gmra.mxu1 %vm387_vm1, %v5436_v18  ;;  %v15462_v18 = vld [vmem:[#allocation2 + $0x104] sm:$0xff]  ;;  %v5380_v40 = vadd.f32 %v18371_v62, %v15191_v24  ;;  %v18377_v62 = vld [vmem:[#allocation82_spill] sm:$0xff] }
 0x504   : > { %12000 = vmatmul.msk.f32.gmra.mxu2 %vm387_vm1, %v15445_v2  ;;  %v5438_v24 = vld [vmem:[#allocation2 + $0x10b] sm:$0xff] }
 0x505   : > { %v4983_v42 = vpop.f32.mrf.mxu3 }
 0x506   : > { %v15453_v21 = vadd.f32 %v4983_v42, %v18367_v56  ;;  %v18372_v42 = vld [vmem:[#allocation55_spill] sm:$0xff] }
 0x507   : > { %v5982_v55 = vpop.f32.mrf.mxu2  ;;  %v15457_v23 = vpop.f32.mrf.mxu0 }
 0x508   : > { %18368 = vst [vmem:[#allocation24_spill] sm:$0xff] %v15453_v21  ;;  %v15455_v15 = vadd.f32 %v5982_v55, %v5729_v33  ;;  %v5635_v59 = vpop.f32.mrf.mxu1  ;;  %v6463_v21 = vld [vmem:[#allocation2 + $0x55] sm:$0xff] }
 0x509   : > { %18369 = vst [vmem:[#allocation27_spill] sm:$0xff] %v15457_v23  ;;  %v5730_v61 = vadd.f32 %v5635_v59, %v5380_v40  ;;  %v18376_v59 = vld [vmem:[#allocation79_spill] sm:$0xff] }
 0x50a   : > { %12020 = vmatmul.msk.f32.gmra.mxu3 %vm387_vm1, %v18370_v37  ;;  %12062 = vmatmul.msk.f32.gmra.mxu0 %vm387_vm1, %v6462_v5  ;;  %v5381_v40 = vadd.f32 %v18377_v62, %v18376_v59  ;;  %v15496_v59 = vld [vmem:[#allocation2 + $0x114] sm:$0xff] }
 0x50b   : > { %11958 = vmatmul.msk.f32.gmra.mxu1 %vm387_vm1, %v5437_v60  ;;  %v15479_v60 = vld [vmem:[#allocation2 + $0x10c] sm:$0xff] }
 0x50c   : > { %12001 = vmatmul.msk.f32.gmra.mxu2 %vm387_vm1, %v15462_v18 }
 0x50d   : > { %v4986_v33 = vpop.f32.mrf.mxu3 }
 0x50e   : > { %v15470_v56 = vadd.f32 %v4986_v33, %v18372_v42  ;;  %v18378_v42 = vld [vmem:[#allocation58_spill] sm:$0xff] }
 0x50f   : > { %v5985_v55 = vpop.f32.mrf.mxu2  ;;  %v15474_v5 = vpop.f32.mrf.mxu0 }
 0x510   : > { %18373 = vst [vmem:[#allocation6_spill] sm:$0xff] %v15470_v56  ;;  %v15472_v37 = vadd.f32 %v5985_v55, %v5730_v61  ;;  %v5638_v23 = vpop.f32.mrf.mxu1 }
 0x511   : > { %18374 = vst [vmem:[#allocation44_spill] sm:$0xff] %v15474_v5  ;;  %v5731_v61 = vadd.f32 %v5638_v23, %v5381_v40  ;;  %v5382_v23 = vadd.f32 %v15226_v1, %v15221_v35  ;;  %v18382_v40 = vld [vmem:[#allocation61_spill] sm:$0xff]  ;;  %v5440_v1 = vld [vmem:[#allocation2 + $0x11b] sm:$0xff] }
 0x512   : > { %12021 = vmatmul.msk.f32.gmra.mxu3 %vm387_vm1, %v18375_v52  ;;  %12063 = vmatmul.msk.f32.gmra.mxu0 %vm387_vm1, %v6463_v21  ;;  %v15515_v35 = vld [vmem:[#allocation2 + $0x11c] sm:$0xff] }
 0x513   : > { %11959 = vmatmul.msk.f32.gmra.mxu1 %vm387_vm1, %v5438_v24  ;;  %v5439_v24 = vld [vmem:[#allocation2 + $0x113] sm:$0xff] }
 0x514   : > { %12002 = vmatmul.msk.f32.gmra.mxu2 %vm387_vm1, %v15479_v60 }
 0x515   : > { %v4989_v33 = vpop.f32.mrf.mxu3 }
 0x516   : > { %v15487_v55 = vadd.f32 %v4989_v33, %v18378_v42 }
 0x517   : > { %v5988_v5 = vpop.f32.mrf.mxu2  ;;  %v15491_v21 = vpop.f32.mrf.mxu0 }
 0x518   : > { %18379 = vst [vmem:[#allocation30_spill] sm:$0xff] %v15487_v55  ;;  %v15489_v52 = vadd.f32 %v5988_v5, %v5731_v61  ;;  %v5641_v56 = vpop.f32.mrf.mxu1  ;;  %v18385_v55 = vld [vmem:[#allocation67_spill] sm:$0xff] }
 0x519   : > { %18380 = vst [vmem:[#allocation33_spill] sm:$0xff] %v15491_v21  ;;  %v5732_v5 = vadd.f32 %v5641_v56, %v5382_v23  ;;  %v6465_v21 = vld [vmem:[#allocation2 + $0x65] sm:$0xff] }
 0x51a   : > { %12022 = vmatmul.msk.f32.gmra.mxu3 %vm387_vm1, %v18381_v10  ;;  %12064 = vmatmul.msk.f32.gmra.mxu0 %vm387_vm1, %v6464_v17 }
 0x51b   : > { %11960 = vmatmul.msk.f32.gmra.mxu1 %vm387_vm1, %v5439_v24  ;;  %v18386_v24 = vld [vmem:[#allocation63_spill] sm:$0xff] }
 0x51c   : > { %12003 = vmatmul.msk.f32.gmra.mxu2 %vm387_vm1, %v15496_v59 }
 0x51d   : > { %v4992_v62 = vpop.f32.mrf.mxu3 }
 0x51e   : > { %v15504_v61 = vadd.f32 %v4992_v62, %v18382_v40  ;;  %v6466_v40 = vld [vmem:[#allocation2 + $0x6d] sm:$0xff] }
 0x51f   : > { %v5991_v33 = vpop.f32.mrf.mxu2  ;;  %v15508_v17 = vpop.f32.mrf.mxu0 }
 0x520   : > { %18383 = vst [vmem:[#allocation7_spill] sm:$0xff] %v15504_v61  ;;  %v15506_v10 = vadd.f32 %v5991_v33, %v5732_v5  ;;  %v15510_v42 = vpop.f32.mrf.mxu1  ;;  %v15530_v33 = vld [vmem:[#allocation2 + $0x124] sm:$0xff]  ;;  %v15545_v61 = vld [vmem:[#allocation2 + $0x12c] sm:$0xff] }
 0x521   : > { %18384 = vst [vmem:[#allocation8_spill] sm:$0xff] %v15508_v17  ;;  %v6467_v17 = vld [vmem:[#allocation2 + $0x75] sm:$0xff] }
 0x522   : > { %12023 = vmatmul.msk.f32.gmra.mxu3 %vm387_vm1, %v18385_v55  ;;  %12065 = vmatmul.msk.f32.gmra.mxu0 %vm387_vm1, %v6465_v21  ;;  %v18389_v55 = vld [vmem:[#allocation70_spill] sm:$0xff]  ;;  %v5441_v21 = vld [vmem:[#allocation2 + $0x123] sm:$0xff] }
 0x523   : > { %11961 = vmatmul.msk.f32.gmra.mxu1 %vm387_vm1, %v5440_v1 }
 0x524   : > { %12004 = vmatmul.msk.f32.gmra.mxu2 %vm387_vm1, %v15515_v35 }
 0x525   : > { %v4995_v56 = vpop.f32.mrf.mxu3 }
 0x526   : > { %v15521_v23 = vadd.f32 %v4995_v56, %v18386_v24  ;;  %v18390_v56 = vld [vmem:[#allocation66_spill] sm:$0xff] }
 0x527   : > { %v15523_v5 = vpop.f32.mrf.mxu0 }
 0x528   : > { %18387 = vst [vmem:[#allocation34_spill] sm:$0xff] %v15521_v23  ;;  %v15525_v62 = vpop.f32.mrf.mxu1 }
 0x529   : > { %18388 = vst [vmem:[#allocation37_spill] sm:$0xff] %v15523_v5 }
 0x52a   : > { %12024 = vmatmul.msk.f32.gmra.mxu3 %vm387_vm1, %v18389_v55  ;;  %12066 = vmatmul.msk.f32.gmra.mxu0 %vm387_vm1, %v6466_v40  ;;  %v18393_v55 = vld [vmem:[#allocation74_spill] sm:$0xff] }
 0x52b   : > { %11962 = vmatmul.msk.f32.gmra.mxu1 %vm387_vm1, %v5441_v21  ;;  %v5442_v40 = vld [vmem:[#allocation2 + $0x12b] sm:$0xff] }
 0x52c   : > { %12005 = vmatmul.msk.f32.gmra.mxu2 %vm387_vm1, %v15530_v33 }
 0x52d   : > { %v4998_v1 = vpop.f32.mrf.mxu3 }
 0x52e   : > { %v15536_v24 = vadd.f32 %v4998_v1, %v18390_v56  ;;  %v18394_v1 = vld [vmem:[#allocation69_spill] sm:$0xff] }
 0x52f   : > { %v15538_v5 = vpop.f32.mrf.mxu0 }
 0x530   : > { %18391 = vst [vmem:[#allocation9_spill] sm:$0xff] %v15536_v24  ;;  %v15540_v23 = vpop.f32.mrf.mxu1 }
 0x531   : > { %18392 = vst [vmem:[#allocation40_spill] sm:$0xff] %v15538_v5 }
 0x532   : > { %12025 = vmatmul.msk.f32.gmra.mxu3 %vm387_vm1, %v18393_v55  ;;  %12067 = vmatmul.msk.f32.gmra.mxu0 %vm387_vm1, %v6467_v17  ;;  %v18397_v55 = vld [vmem:[#allocation78_spill] sm:$0xff] }
 0x533   : > { %11963 = vmatmul.msk.f32.gmra.mxu1 %vm387_vm1, %v5442_v40  ;;  %v5443_v17 = vld [vmem:[#allocation2 + $0x133] sm:$0xff] }
 0x534   : > { %12006 = vmatmul.msk.f32.gmra.mxu2 %vm387_vm1, %v15545_v61 }
 0x535   : > { %v5001_v21 = vpop.f32.mrf.mxu3 }
 0x536   : > { %v15551_v56 = vadd.f32 %v5001_v21, %v18394_v1  ;;  %v18398_v21 = vld [vmem:[#allocation71_spill] sm:$0xff] }
 0x537   : > { %v15553_v5 = vpop.f32.mrf.mxu0 }
 0x538   : > { %18395 = vst [vmem:[#allocation38_spill] sm:$0xff] %v15551_v56  ;;  %v15555_v24 = vpop.f32.mrf.mxu1 }
 0x539   : > { %18396 = vst [vmem:[#allocation39_spill] sm:$0xff] %v15553_v5 }
 0x53a   : > { %12026 = vmatmul.msk.f32.gmra.mxu3 %vm387_vm1, %v18397_v55  ;;  %12068 = vmatmul.msk.f32.gmra.mxu0 %vm387_vm1, %v6468_v14  ;;  %v18401_v55 = vld [vmem:[#allocation83_spill] sm:$0xff] }
 0x53b   : > { %11964 = vmatmul.msk.f32.gmra.mxu1 %vm387_vm1, %v5443_v17  ;;  %v5444_v14 = vld [vmem:[#allocation2 + $0x13b] sm:$0xff] }
 0x53c   : > { %12007 = vmatmul.msk.f32.gmra.mxu2 %vm387_vm1, %v15560_v48 }
 0x53d   : > { %v5004_v40 = vpop.f32.mrf.mxu3 }
 0x53e   : > { %v15566_v1 = vadd.f32 %v5004_v40, %v18398_v21  ;;  %v18402_v40 = vld [vmem:[#allocation75_spill] sm:$0xff] }
 0x53f   : > { %v15568_v5 = vpop.f32.mrf.mxu0 }
 0x540   : > { %18399 = vst [vmem:[#allocation10_spill] sm:$0xff] %v15566_v1  ;;  %v15570_v56 = vpop.f32.mrf.mxu1 }
 0x541   : > { %18400 = vst [vmem:[#allocation11_spill] sm:$0xff] %v15568_v5 }
 0x542   : > { %12027 = vmatmul.msk.f32.gmra.mxu3 %vm387_vm1, %v18401_v55  ;;  %12069 = vmatmul.msk.f32.gmra.mxu0 %vm387_vm1, %v6469_v34  ;;  %v5445_v34 = vld [vmem:[#allocation2 + $0x143] sm:$0xff] }
 0x543   : > { %11965 = vmatmul.msk.f32.gmra.mxu1 %vm387_vm1, %v5444_v14  ;;  %v15590_v55 = vld [vmem:[#allocation2 + $0x144] sm:$0xff] }
 0x544   : > { %12008 = vmatmul.msk.f32.gmra.mxu2 %vm387_vm1, %v15575_v13 }
 0x545   : > { %v5007_v17 = vpop.f32.mrf.mxu3 }
 0x546   : > { %v15581_v21 = vadd.f32 %v5007_v17, %v18402_v40  ;;  %v18405_v17 = vld [vmem:[#allocation81_spill] sm:$0xff] }
 0x547   : > { %v15583_v5 = vpop.f32.mrf.mxu0 }
 0x548   : > { %18403 = vst [vmem:[#allocation41_spill] sm:$0xff] %v15581_v21  ;;  %v15585_v1 = vpop.f32.mrf.mxu1 }
 0x549   : > { %18404 = vst [vmem:[#allocation12_spill] sm:$0xff] %v15583_v5 }
 0x54a   : > { %12028 = vmatmul.msk.f32.gmra.mxu3 %vm387_vm1, %v15230_v25  ;;  %12070 = vmatmul.msk.f32.gmra.mxu0 %vm387_vm1, %v6470_v12  ;;  %v5446_v25 = vld [vmem:[#allocation2 + $0x14b] sm:$0xff] }
 0x54b   : > { %11966 = vmatmul.msk.f32.gmra.mxu1 %vm387_vm1, %v5445_v34  ;;  %v15605_v12 = vld [vmem:[#allocation2 + $0x14c] sm:$0xff] }
 0x54c   : > { %12009 = vmatmul.msk.f32.gmra.mxu2 %vm387_vm1, %v15590_v55 }
 0x54d   : > { %v5010_v14 = vpop.f32.mrf.mxu3 }
 0x54e   : > { %v15596_v40 = vadd.f32 %v5010_v14, %v18405_v17 }
 0x54f   : > { %v15598_v5 = vpop.f32.mrf.mxu0 }
 0x550   : > { %18406 = vst [vmem:[#allocation45_spill] sm:$0xff] %v15596_v40  ;;  %v15600_v21 = vpop.f32.mrf.mxu1  ;;  %v6472_v40 = vld [vmem:[#allocation2 + $0x9d] sm:$0xff] }
 0x551   : > { %18407 = vst [vmem:[#allocation42_spill] sm:$0xff] %v15598_v5 }
 0x552   : > { %18408 = vst [vmem:[#allocation13_spill] sm:$0xff] %v15600_v21  ;;  %12029 = vmatmul.msk.f32.gmra.mxu3 %vm387_vm1, %v15248_v28  ;;  %12071 = vmatmul.msk.f32.gmra.mxu0 %vm387_vm1, %v6471_v47  ;;  %v5447_v28 = vld [vmem:[#allocation2 + $0x153] sm:$0xff] }
 0x553   : > { %11967 = vmatmul.msk.f32.gmra.mxu1 %vm387_vm1, %v5446_v25  ;;  %v15620_v47 = vld [vmem:[#allocation2 + $0x154] sm:$0xff] }
 0x554   : > { %12010 = vmatmul.msk.f32.gmra.mxu2 %vm387_vm1, %v15605_v12  ;;  %18412 = vst [vmem:[#allocation49_spill] sm:$0xff] %v15620_v47 }
 0x555   : > { %v5013_v34 = vpop.f32.mrf.mxu3 }
 0x556   : > { %v15611_v14 = vadd.f32 %v5013_v34, %v15224_v3 }
 0x557   : > { %v15613_v17 = vpop.f32.mrf.mxu0 }
 0x558   : > { %18409 = vst [vmem:[#allocation14_spill] sm:$0xff] %v15611_v14  ;;  %v15615_v5 = vpop.f32.mrf.mxu1  ;;  %v6473_v14 = vld [vmem:[#allocation2 + $0xa5] sm:$0xff] }
 0x559   : > { %18410 = vst [vmem:[#allocation43_spill] sm:$0xff] %v15613_v17 }
 0x55a   : > { %18411 = vst [vmem:[#allocation15_spill] sm:$0xff] %v15615_v5  ;;  %12030 = vmatmul.msk.f32.gmra.mxu3 %vm387_vm1, %v15263_v4  ;;  %12072 = vmatmul.msk.f32.gmra.mxu0 %vm387_vm1, %v6472_v40  ;;  %v6807_v4 = vld [vmem:[#allocation2 + $0x26] sm:$0xff] }
 0x55b   : > { %11968 = vmatmul.msk.f32.gmra.mxu1 %vm387_vm1, %v5447_v28 }
 0x55c   : > { %12011 = vmatmul.msk.f32.gmra.mxu2 %vm387_vm1, %v15620_v47 }
 0x55d   : > { %v6293_v3 = vpop.f32.mrf.mxu3 }
 0x55e   : > { %v15626_v25 = vadd.f32 %v6293_v3, %v15242_v41  ;;  %v6474_v3 = vld [vmem:[#allocation2 + $0xad] sm:$0xff] }
 0x55f   : > { %v15628_v34 = vpop.f32.mrf.mxu0 }
 0x560   : > { %v15630_v17 = vpop.f32.mrf.mxu1 }
 0x561   : > { %18413 = vst [vmem:[#allocation16_spill] sm:$0xff] %v15630_v17 }
 0x562   : > { %12031 = vmatmul.msk.f32.gmra.mxu3 %vm387_vm1, %v15279_v31  ;;  %12073 = vmatmul.msk.f32.gmra.mxu0 %vm387_vm1, %v6473_v14  ;;  %v6808_v31 = vld [vmem:[#allocation2 + $0x2e] sm:$0xff] }
 0x563   : > { %12100 = vmatmul.msk.f32.vlgmr.msra.gmra.mxu1 %vm387_vm1, %v6807_v4 }
 0x565   : > { %v6296_v40 = vpop.f32.mrf.mxu3 }
 0x566   : > { %v15637_v28 = vadd.f32 %v6296_v40, %v15257_v39  ;;  %v6475_v40 = vld [vmem:[#allocation2 + $0xb5] sm:$0xff] }
 0x567   : > { %v15639_v5 = vpop.f32.mrf.mxu0 }
 0x568   : > { %v15641_v41 = vpop.f32.mrf.mxu1 }
 0x569   : > { %18414 = vst [vmem:[#allocation17_spill] sm:$0xff] %v15641_v41 }
 0x56a   : > { %12032 = vmatmul.msk.f32.gmra.mxu3 %vm387_vm1, %v15295_v49  ;;  %12074 = vmatmul.msk.f32.gmra.mxu0 %vm387_vm1, %v6474_v3  ;;  %v6809_v49 = vld [vmem:[#allocation2 + $0x36] sm:$0xff]  ;;  %v15658_v3 = vpop.f32.mrf.mxu2 }
 0x56b   : > { %12101 = vmatmul.msk.f32.gmra.mxu1 %vm387_vm1, %v6808_v31 }
 0x56d   : > { %v6299_v14 = vpop.f32.mrf.mxu3 }
 0x56e   : > { %v15648_v4 = vadd.f32 %v6299_v14, %v15273_v45 }
 0x56f   : > { %v15650_v17 = vpop.f32.mrf.mxu0 }
 0x570   : > { %v15652_v39 = vpop.f32.mrf.mxu1 }
 0x571   : > { %18415 = vst [vmem:[#allocation46_spill] sm:$0xff] %v15652_v39  ;;  %v6476_v39 = vld [vmem:[#allocation2 + $0xbd] sm:$0xff] }
 0x572   : > { %12033 = vmatmul.msk.f32.gmra.mxu3 %vm387_vm1, %v15311_v58  ;;  %12075 = vmatmul.msk.f32.gmra.mxu0 %vm387_vm1, %v6475_v40  ;;  %v6810_v58 = vld [vmem:[#allocation2 + $0x3e] sm:$0xff]  ;;  %v15674_v21 = vpop.f32.mrf.mxu2 }
 0x573   : > { %12102 = vmatmul.msk.f32.gmra.mxu1 %vm387_vm1, %v6809_v49 }
 0x575   : > { %v6302_v31 = vpop.f32.mrf.mxu3 }
 0x576   : > { %v15661_v41 = vadd.f32 %v6302_v31, %v15289_v46 }
 0x577   : > { %v15663_v45 = vpop.f32.mrf.mxu0 }
 0x578   : > { %v15665_v14 = vpop.f32.mrf.mxu1 }
 0x579   : > { %18416 = vst [vmem:[#allocation18_spill] sm:$0xff] %v15665_v14  ;;  %v6477_v14 = vld [vmem:[#allocation2 + $0xc5] sm:$0xff] }
 0x57a   : > { %12034 = vmatmul.msk.f32.gmra.mxu3 %vm387_vm1, %v15327_v27  ;;  %12076 = vmatmul.msk.f32.gmra.mxu0 %vm387_vm1, %v6476_v39  ;;  %v6811_v27 = vld [vmem:[#allocation2 + $0x46] sm:$0xff]  ;;  %v15691_v0 = vpop.f32.mrf.mxu2 }
 0x57b   : > { %12103 = vmatmul.msk.f32.gmra.mxu1 %vm387_vm1, %v6810_v58 }
 0x57d   : > { %v6305_v40 = vpop.f32.mrf.mxu3 }
 0x57e   : > { %v15672_v49 = vadd.f32 %v6305_v40, %v15305_v38 }
 0x57f   : > { %v15676_v46 = vpop.f32.mrf.mxu0 }
 0x580   : > { %v15678_v31 = vpop.f32.mrf.mxu1 }
 0x581   : > { %18417 = vst [vmem:[#allocation53_spill] sm:$0xff] %v15678_v31  ;;  %v6478_v31 = vld [vmem:[#allocation2 + $0xcd] sm:$0xff] }
 0x582   : > { %12035 = vmatmul.msk.f32.gmra.mxu3 %vm387_vm1, %v15343_v54  ;;  %12077 = vmatmul.msk.f32.gmra.mxu0 %vm387_vm1, %v6477_v14  ;;  %v6812_v54 = vld [vmem:[#allocation2 + $0x4e] sm:$0xff]  ;;  %v15707_v47 = vpop.f32.mrf.mxu2 }
 0x583   : > { %12104 = vmatmul.msk.f32.gmra.mxu1 %vm387_vm1, %v6811_v27 }
 0x585   : > { %v6308_v39 = vpop.f32.mrf.mxu3 }
 0x586   : > { %v15685_v58 = vadd.f32 %v6308_v39, %v15321_v51 }
 0x587   : > { %v15687_v38 = vpop.f32.mrf.mxu0 }
 0x588   : > { %v15689_v40 = vpop.f32.mrf.mxu1 }
 0x589   : > { %18418 = vst [vmem:[#allocation47_spill] sm:$0xff] %v15689_v40  ;;  %v6479_v40 = vld [vmem:[#allocation2 + $0xd5] sm:$0xff] }
 0x58a   : > { %12036 = vmatmul.msk.f32.gmra.mxu3 %vm387_vm1, %v15360_v30  ;;  %12078 = vmatmul.msk.f32.gmra.mxu0 %vm387_vm1, %v6478_v31  ;;  %v6813_v30 = vld [vmem:[#allocation2 + $0x56] sm:$0xff] }
 0x58b   : > { %12105 = vmatmul.msk.f32.gmra.mxu1 %vm387_vm1, %v6812_v54 }
 0x58d   : > { %v6311_v14 = vpop.f32.mrf.mxu3 }
 0x58e   : > { %v15698_v27 = vadd.f32 %v6311_v14, %v15337_v7 }
 0x58f   : > { %v15700_v51 = vpop.f32.mrf.mxu0 }
 0x590   : > { %18419 = vst [vmem:[#allocation19_spill] sm:$0xff] %v15700_v51  ;;  %v15702_v39 = vpop.f32.mrf.mxu1 }
 0x591   : > { %18420 = vst [vmem:[#allocation20_spill] sm:$0xff] %v15702_v39  ;;  %v6480_v39 = vld [vmem:[#allocation2 + $0xdd] sm:$0xff] }
 0x592   : > { %12037 = vmatmul.msk.f32.gmra.mxu3 %vm387_vm1, %v15377_v19  ;;  %12079 = vmatmul.msk.f32.gmra.mxu0 %vm387_vm1, %v6479_v40  ;;  %v6814_v19 = vld [vmem:[#allocation2 + $0x5e] sm:$0xff]  ;;  %v15721_v40 = vpop.f32.mrf.mxu2 }
 0x593   : > { %12106 = vmatmul.msk.f32.gmra.mxu1 %vm387_vm1, %v6813_v30 }
 0x595   : > { %v6314_v31 = vpop.f32.mrf.mxu3 }
 0x596   : > { %v15711_v54 = vadd.f32 %v6314_v31, %v15353_v11 }
 0x597   : > { %v15713_v7 = vpop.f32.mrf.mxu0 }
 0x598   : > { %18421 = vst [vmem:[#allocation48_spill] sm:$0xff] %v15713_v7  ;;  %v15715_v14 = vpop.f32.mrf.mxu1 }
 0x599   : > { %18422 = vst [vmem:[#allocation21_spill] sm:$0xff] %v15715_v14  ;;  %v6481_v14 = vld [vmem:[#allocation2 + $0xe5] sm:$0xff] }
 0x59a   : > { %12038 = vmatmul.msk.f32.gmra.mxu3 %vm387_vm1, %v15394_v22  ;;  %12080 = vmatmul.msk.f32.gmra.mxu0 %vm387_vm1, %v6480_v39  ;;  %v6815_v22 = vld [vmem:[#allocation2 + $0x66] sm:$0xff]  ;;  %v15737_v7 = vpop.f32.mrf.mxu2 }
 0x59b   : > { %12107 = vmatmul.msk.f32.gmra.mxu1 %vm387_vm1, %v6814_v19 }
 0x59d   : > { %v6317_v30 = vpop.f32.mrf.mxu3 }
 0x59e   : > { %v15724_v51 = vadd.f32 %v6317_v30, %v15370_v26 }
 0x59f   : > { %v15726_v11 = vpop.f32.mrf.mxu0 }
 0x5a0   : > { %v15728_v31 = vpop.f32.mrf.mxu1 }
 0x5a1   : > { %18423 = vst [vmem:[#allocation22_spill] sm:$0xff] %v15728_v31  ;;  %v6482_v31 = vld [vmem:[#allocation2 + $0xed] sm:$0xff] }
 0x5a2   : > { %12039 = vmatmul.msk.f32.gmra.mxu3 %vm387_vm1, %v15411_v36  ;;  %12081 = vmatmul.msk.f32.gmra.mxu0 %vm387_vm1, %v6481_v14  ;;  %v6816_v36 = vld [vmem:[#allocation2 + $0x6e] sm:$0xff] }
 0x5a3   : > { %12108 = vmatmul.msk.f32.gmra.mxu1 %vm387_vm1, %v6815_v22 }
 0x5a5   : > { %v6320_v39 = vpop.f32.mrf.mxu3 }
 0x5a6   : > { %v15735_v19 = vadd.f32 %v6320_v39, %v15387_v16 }
 0x5a7   : > { %v15739_v26 = vpop.f32.mrf.mxu0 }
 0x5a8   : > { %18424 = vst [vmem:[#allocation25_spill] sm:$0xff] %v15739_v26  ;;  %v15741_v30 = vpop.f32.mrf.mxu1  ;;  %v15754_v26 = vpop.f32.mrf.mxu2 }
 0x5a9   : > { %18425 = vst [vmem:[#allocation26_spill] sm:$0xff] %v15741_v30  ;;  %v6483_v30 = vld [vmem:[#allocation2 + $0xf5] sm:$0xff] }
 0x5aa   : > { %12040 = vmatmul.msk.f32.gmra.mxu3 %vm387_vm1, %v15428_v63  ;;  %12082 = vmatmul.msk.f32.gmra.mxu0 %vm387_vm1, %v6482_v31  ;;  %v6817_v63 = vld [vmem:[#allocation2 + $0x76] sm:$0xff] }
 0x5ab   : > { %12109 = vmatmul.msk.f32.gmra.mxu1 %vm387_vm1, %v6816_v36 }
 0x5ad   : > { %v6323_v14 = vpop.f32.mrf.mxu3 }
 0x5ae   : > { %v15748_v22 = vadd.f32 %v6323_v14, %v15404_v6 }
 0x5af   : > { %v15750_v16 = vpop.f32.mrf.mxu0 }
 0x5b0   : > { %18426 = vst [vmem:[#allocation50_spill] sm:$0xff] %v15750_v16  ;;  %v15752_v39 = vpop.f32.mrf.mxu1  ;;  %v15770_v16 = vpop.f32.mrf.mxu2 }
 0x5b1   : > { %18427 = vst [vmem:[#allocation28_spill] sm:$0xff] %v15752_v39  ;;  %v6484_v39 = vld [vmem:[#allocation2 + $0xfd] sm:$0xff] }
 0x5b2   : > { %12041 = vmatmul.msk.f32.gmra.mxu3 %vm387_vm1, %v15445_v2  ;;  %12083 = vmatmul.msk.f32.gmra.mxu0 %vm387_vm1, %v6483_v30  ;;  %v6818_v2 = vld [vmem:[#allocation2 + $0x7e] sm:$0xff] }
 0x5b3   : > { %12110 = vmatmul.msk.f32.gmra.mxu1 %vm387_vm1, %v6817_v63 }
 0x5b5   : > { %v6326_v31 = vpop.f32.mrf.mxu3 }
 0x5b6   : > { %v15761_v36 = vadd.f32 %v6326_v31, %v15421_v53  ;;  %v7739_v31 = vld [vmem:[%s18026_s7] sm:$0x3] }
 0x5b7   : > { %v15763_v6 = vpop.f32.mrf.mxu0  ;;  %12184 = vmatpush.msk.msrb.mxu3 %vm7906_vm14, %v7739_v31 }
 0x5b8   : > { %v15765_v14 = vpop.f32.mrf.mxu1 }
 0x5b9   : > { %18428 = vst [vmem:[#allocation29_spill] sm:$0xff] %v15765_v14  ;;  %v18429_v14 = vmov 0.0  }
 0x5ba   : > { %12042 = vmatmul.msk.f32.gmra.mxu3 %vm387_vm1, %v15462_v18  ;;  %12084 = vmatmul.msk.f32.gmra.mxu0 %vm387_vm1, %v6484_v39  ;;  %437 = vst.msk [vmem:[#allocation3 + $0x10] sm:$0xff] %vm434_vm15, %v18429_v14  ;;  %v6485_v39 = vld [vmem:[#allocation2 + $0x105] sm:$0xff] }
 0x5bb   : > { %12111 = vmatmul.msk.f32.gmra.mxu1 %vm387_vm1, %v6818_v2  ;;  %438 = vst.msk [vmem:[#allocation3 + $0x18] sm:$0xff] %vm434_vm15, %v18429_v14  ;;  %v15800_v2 = vpop.f32.mrf.mxu2 }
 0x5bc   : > { %435 = vst.msk [vmem:[#allocation3] sm:$0xff] %vm434_vm15, %v18429_v14 }
 0x5bd   : > { %v6329_v30 = vpop.f32.mrf.mxu3  ;;  %436 = vst.msk [vmem:[#allocation3 + $0x8] sm:$0xff] %vm434_vm15, %v18429_v14 }
 0x5be   : > { %v15774_v63 = vadd.f32 %v6329_v30, %v15438_v9  ;;  %v6819_v9 = vld [vmem:[#allocation2 + $0x86] sm:$0xff]  ;;  %439 = vst.msk [vmem:[#allocation3 + $0x20] sm:$0xff] %vm434_vm15, %v18429_v14 }
 0x5bf   : > { %v15776_v53 = vpop.f32.mrf.mxu0  ;;  %440 = vst.msk [vmem:[#allocation3 + $0x28] sm:$0xff] %vm434_vm15, %v18429_v14 }
 0x5c0   : > { %v15783_v18 = vpop.f32.mrf.mxu1  ;;  %441 = vst.msk [vmem:[#allocation3 + $0x30] sm:$0xff] %vm434_vm15, %v18429_v14 }
 0x5c1   : > { %18430 = vst [vmem:[#allocation51_spill] sm:$0xff] %v15783_v18 }
 0x5c2   : > { %12043 = vmatmul.msk.f32.gmra.mxu3 %vm387_vm1, %v15479_v60  ;;  %12085 = vmatmul.msk.f32.gmra.mxu0 %vm387_vm1, %v6485_v39  ;;  %442 = vst.msk [vmem:[#allocation3 + $0x38] sm:$0xff] %vm434_vm15, %v18429_v14 }
 0x5c3   : > { %12112 = vmatmul.msk.f32.gmra.mxu1 %vm387_vm1, %v6819_v9  ;;  %443 = vst.msk [vmem:[#allocation3 + $0x40] sm:$0xff] %vm434_vm15, %v18429_v14  ;;  %v6486_v9 = vld [vmem:[#allocation2 + $0x10d] sm:$0xff] }
 0x5c4   : > { %444 = vst.msk [vmem:[#allocation3 + $0x48] sm:$0xff] %vm434_vm15, %v18429_v14  ;;  %v7740_v18 = vld [vmem:[#allocation3 + $0x1] sm:$0xff] }
 0x5c5   : > { %v6332_v30 = vpop.f32.mrf.mxu3  ;;  %445 = vst.msk [vmem:[#allocation3 + $0x50] sm:$0xff] %vm434_vm15, %v18429_v14  ;;  %12143 = vmatmul.msk.f32.vlgmr.msra.gmra.mxu2 %vm434_vm15, %v7740_v18  ;;  %v15845_v18 = vpop.f32.mrf.mxu2 }
 0x5c6   : > { %v15805_v60 = vadd.f32 %v6332_v30, %v15455_v15  ;;  %v6820_v15 = vld [vmem:[#allocation2 + $0x8e] sm:$0xff]  ;;  %446 = vst.msk [vmem:[#allocation3 + $0x58] sm:$0xff] %vm434_vm15, %v18429_v14 }
 0x5c7   : > { %v15809_v31 = vpop.f32.mrf.mxu0  ;;  %447 = vst.msk [vmem:[#allocation3 + $0x60] sm:$0xff] %vm434_vm15, %v18429_v14 }
 0x5c8   : > { %18431 = vst [vmem:[#allocation31_spill] sm:$0xff] %v15809_v31  ;;  %v15813_v39 = vpop.f32.mrf.mxu1 }
 0x5c9   : > { %18432 = vst [vmem:[#allocation32_spill] sm:$0xff] %v15813_v39 }
 0x5ca   : > { %12044 = vmatmul.msk.f32.gmra.mxu3 %vm387_vm1, %v15496_v59  ;;  %12086 = vmatmul.msk.f32.gmra.mxu0 %vm387_vm1, %v6486_v9  ;;  %448 = vst.msk [vmem:[#allocation3 + $0x68] sm:$0xff] %vm434_vm15, %v18429_v14  ;;  %v12312_v59 = vld [vmem:[%s18026_s7 + $0x8] sm:$0x3]  ;;  %v12226_v9 = vld [vmem:[%s18026_s7 + $0x4] sm:$0x3] }
 0x5cb   : > { %12113 = vmatmul.msk.f32.gmra.mxu1 %vm387_vm1, %v6820_v15  ;;  %449 = vst.msk [vmem:[#allocation3 + $0x70] sm:$0xff] %vm434_vm15, %v18429_v14  ;;  %12313 = vmatpush.msk.msrb.mxu2 %vm7906_vm14, %v12312_v59  ;;  %v6821_v59 = vld [vmem:[#allocation2 + $0x96] sm:$0xff] }
 0x5cc   : > { %450 = vst.msk [vmem:[#allocation3 + $0x78] sm:$0xff] %vm434_vm15, %v18429_v14  ;;  %12227 = vmatpush.msk.msrb.mxu0 %vm7906_vm14, %v12226_v9 }
 0x5cd   : > { %v6335_v30 = vpop.f32.mrf.mxu3  ;;  %451 = vst.msk [vmem:[#allocation3 + $0x80] sm:$0xff] %vm434_vm15, %v18429_v14 }
 0x5ce   : > { %v15839_v15 = vadd.f32 %v6335_v30, %v15472_v37  ;;  %452 = vst.msk [vmem:[#allocation3 + $0x88] sm:$0xff] %vm434_vm15, %v18429_v14  ;;  %v7741_v37 = vld [vmem:[#allocation3 + $0x9] sm:$0xff] }
 0x5cf   : > { %v15847_v39 = vpop.f32.mrf.mxu0  ;;  %v6487_v30 = vld [vmem:[#allocation2 + $0x115] sm:$0xff]  ;;  %453 = vst.msk [vmem:[#allocation3 + $0x90] sm:$0xff] %vm434_vm15, %v18429_v14  ;;  %12144 = vmatmul.msk.f32.gmra.mxu2 %vm434_vm15, %v7741_v37 }
 0x5d0   : > { %18433 = vst [vmem:[#allocation35_spill] sm:$0xff] %v15847_v39  ;;  %v15851_v31 = vpop.f32.mrf.mxu1  ;;  %v6488_v39 = vld [vmem:[#allocation2 + $0x11d] sm:$0xff] }
 0x5d1   : > { %18434 = vst [vmem:[#allocation36_spill] sm:$0xff] %v15851_v31  ;;  %v15887_v31 = vpop.f32.mrf.mxu2 }
 0x5d2   : > { %12045 = vmatmul.msk.f32.gmra.mxu3 %vm387_vm1, %v15515_v35  ;;  %12087 = vmatmul.msk.f32.gmra.mxu0 %vm387_vm1, %v6487_v30  ;;  %454 = vst.msk [vmem:[#allocation3 + $0x98] sm:$0xff] %vm434_vm15, %v18429_v14  ;;  %v12269_v35 = vld [vmem:[%s18026_s7 + $0x6] sm:$0x3] }
 0x5d3   : > { %12114 = vmatmul.msk.f32.gmra.mxu1 %vm387_vm1, %v6821_v59  ;;  %455 = vst.msk [vmem:[#allocation3 + $0xa0] sm:$0xff] %vm434_vm15, %v18429_v14 }
 0x5d4   : > { %456 = vst.msk [vmem:[#allocation3 + $0xa8] sm:$0xff] %vm434_vm15, %v18429_v14  ;;  %12270 = vmatpush.msk.msrb.mxu1 %vm7906_vm14, %v12269_v35 }
 0x5d5   : > { %v6338_v9 = vpop.f32.mrf.mxu3  ;;  %457 = vst.msk [vmem:[#allocation3 + $0xb0] sm:$0xff] %vm434_vm15, %v18429_v14 }
 0x5d6   : > { %v15875_v30 = vadd.f32 %v6338_v9, %v15489_v52  ;;  %458 = vst.msk [vmem:[#allocation3 + $0xb8] sm:$0xff] %vm434_vm15, %v18429_v14  ;;  %v6822_v52 = vld [vmem:[#allocation2 + $0x9e] sm:$0xff] }
 0x5d7   : > { %v15879_v37 = vpop.f32.mrf.mxu0  ;;  %459 = vst.msk [vmem:[#allocation3 + $0xc0] sm:$0xff] %vm434_vm15, %v18429_v14 }
 0x5d8   : > { %v15883_v59 = vpop.f32.mrf.mxu1  ;;  %460 = vst.msk [vmem:[#allocation3 + $0xc8] sm:$0xff] %vm434_vm15, %v18429_v14 }
 0x5d9   : > { %18435 = vst [vmem:[#allocation52_spill] sm:$0xff] %v15883_v59 }
 0x5da   : > { %461 = vst.msk [vmem:[#allocation3 + $0xd0] sm:$0xff] %vm434_vm15, %v18429_v14  ;;  %12046 = vmatmul.msk.f32.gmra.mxu3 %vm387_vm1, %v15530_v33  ;;  %12088 = vmatmul.msk.f32.gmra.mxu0 %vm387_vm1, %v6488_v39  ;;  %v6766_v39 = vadd.f32 %v15628_v34, %v15626_v25  ;;  %v15926_v25 = vld [vmem:[%s18025_s6] ss:$0 sm:$0xff]  ;;  %v6489_v34 = vld [vmem:[#allocation2 + $0x125] sm:$0xff] }
 0x5db   : > { %462 = vst.msk [vmem:[#allocation3 + $0xd8] sm:$0xff] %vm434_vm15, %v18429_v14  ;;  %12115 = vmatmul.msk.f32.gmra.mxu1 %vm387_vm1, %v6822_v52  ;;  %v15915_v52 = vld [vmem:[%s18024_s5] ss:$0 sm:$0xff] }
 0x5dc   : > { %463 = vst.msk [vmem:[#allocation3 + $0xe0] sm:$0xff] %vm434_vm15, %v18429_v14 }
 0x5dd   : > { %464 = vst.msk [vmem:[#allocation3 + $0xe8] sm:$0xff] %vm434_vm15, %v18429_v14  ;;  %v6341_v35 = vpop.f32.mrf.mxu3 }
 0x5de   : > { %465 = vst.msk [vmem:[#allocation3 + $0xf0] sm:$0xff] %vm434_vm15, %v18429_v14  ;;  %v15904_v33 = vadd.f32 %v6341_v35, %v15506_v10  ;;  %v5383_v10 = vadd.f32 %v15244_v44, %v15239_v57  ;;  %v6823_v57 = vld [vmem:[#allocation2 + $0xa6] sm:$0xff]  ;;  %v15936_v44 = vpop.f32.mrf.mxu2 }
 0x5df   : > { %466 = vst.msk [vmem:[#allocation3 + $0xf8] sm:$0xff] %vm434_vm15, %v18429_v14  ;;  %v15910_v9 = vpop.f32.mrf.mxu0 }
 0x5e0   : > { %18436 = vst [vmem:[#allocation57_spill] sm:$0xff] %v15910_v9  ;;  %v6993_v35 = vpop.f32.mrf.mxu1  ;;  %v5733_v9 = vadd.f32 %v15510_v42, %v5383_v10 }
 0x5e1   : > { %467 = vst.msk [vmem:[#allocation3 + $0x100] sm:$0xff] %vm434_vm15, %v18429_v14  ;;  %v7116_v59 = vadd.f32 %v6993_v35, %v6766_v39  ;;  %v6767_v35 = vadd.f32 %v15639_v5, %v15637_v28  ;;  %v6490_v28 = vld [vmem:[#allocation2 + $0x12d] sm:$0xff] }
 0x5e2   : > { %468 = vst.msk [vmem:[#allocation3 + $0x108] sm:$0xff] %vm434_vm15, %v18429_v14  ;;  %12047 = vmatmul.msk.f32.gmra.mxu3 %vm387_vm1, %v15545_v61  ;;  %12089 = vmatmul.msk.f32.gmra.mxu0 %vm387_vm1, %v6489_v34  ;;  %v6083_v42 = vadd.f32 %v15658_v3, %v5733_v9  ;;  %v5384_v9 = vadd.f32 %v15259_v8, %v15255_v43  ;;  %v6824_v43 = vld [vmem:[#allocation2 + $0xae] sm:$0xff] }
 0x5e3   : > { %469 = vst.msk [vmem:[#allocation3 + $0x110] sm:$0xff] %vm434_vm15, %v18429_v14  ;;  %v7161_v39 = vmul.f32 %v15915_v52, %v7116_v59  ;;  %12116 = vmatmul.msk.f32.gmra.mxu1 %vm387_vm1, %v6823_v57 }
 0x5e4   : > { %470 = vst.msk [vmem:[#allocation3 + $0x118] sm:$0xff] %vm434_vm15, %v18429_v14 }
 0x5e5   : > { %471 = vst.msk [vmem:[#allocation3 + $0x120] sm:$0xff] %vm434_vm15, %v18429_v14  ;;  %v7206_v10 = vadd.f32 %v15926_v25, %v7161_v39  ;;  %v6344_v61 = vpop.f32.mrf.mxu3  ;;  %v7414_v39 = vpop.permute.xlu2 %7413 }
 0x5e6   : > { %472 = vst.msk [vmem:[#allocation3 + $0x128] sm:$0xff] %vm434_vm15, %v18429_v14  ;;  %v15950_v59 = vadd.f32 %v6344_v61, %v6083_v42  ;;  %v5734_v61 = vadd.f32 %v15525_v62, %v5384_v9  ;;  %v15976_v62 = vpop.f32.mrf.mxu2  ;;  %v6768_v9 = vadd.f32 %v15650_v17, %v15648_v4  ;;  %v6825_v17 = vld [vmem:[#allocation2 + $0xb6] sm:$0xff] }
 0x5e7   : > { %473 = vst.msk [vmem:[#allocation3 + $0x130] sm:$0xff] %vm434_vm15, %v18429_v14  ;;  %vm7247_vm2 = vcmp.ge.f32.partialorder %v7206_v10, 0.0  ;;  %v7288_v34 = vmul.f32 0.1, %v7206_v10  ;;  %v15956_v3 = vpop.f32.mrf.mxu0 }
 0x5e8   : > { %474 = vst.msk [vmem:[#allocation3 + $0x138] sm:$0xff] %vm434_vm15, %v18429_v14  ;;  %v6996_v57 = vpop.f32.mrf.mxu1 }
 0x5e9   : > { %18437 = vst [vmem:[#allocation73_spill] sm:$0xff] %v15950_v59  ;;  %v7329_v42 = vsel %vm7247_vm2, %v7206_v10, %v7288_v34  ;;  %v7117_v5 = vadd.f32 %v6996_v57, %v6767_v35  ;;  %v6084_v10 = vadd.f32 %v15674_v21, %v5734_v61  ;;  %v18438_v21 = vld [vmem:[#allocation85_spill] sm:$0xff] }
 0x5ea   : > { %475 = vst.msk [vmem:[#allocation3 + $0x140] sm:$0xff] %vm434_vm15, %v18429_v14  ;;  %v7616_v59 = vmul.f32 %v7414_v39, %v7329_v42  ;;  %12048 = vmatmul.msk.f32.gmra.mxu3 %vm387_vm1, %v15560_v48  ;;  %12090 = vmatmul.msk.f32.gmra.mxu0 %vm387_vm1, %v6490_v28 }
 0x5eb   : > { %476 = vst.msk [vmem:[#allocation3 + $0x148] sm:$0xff] %vm434_vm15, %v18429_v14  ;;  %v7162_v8 = vmul.f32 %v15915_v52, %v7117_v5  ;;  %12117 = vmatmul.msk.f32.gmra.mxu1 %vm387_vm1, %v6824_v43  ;;  %v7419_v5 = vpop.permute.xlu0 %7418 }
 0x5ec   : > { %477 = vst.msk [vmem:[#allocation3 + $0x150] sm:$0xff] %vm434_vm15, %v18429_v14 }
 0x5ed   : > { %478 = vst.msk [vmem:[#allocation3 + $0x158] sm:$0xff] %vm434_vm15, %v18429_v14  ;;  %v7207_v48 = vadd.f32 %v15926_v25, %v7162_v8  ;;  %v6347_v35 = vpop.f32.mrf.mxu3 }
 0x5ee   : > { %479 = vst.msk [vmem:[#allocation3 + $0x160] sm:$0xff] %vm434_vm15, %v18429_v14  ;;  %v15981_v34 = vadd.f32 %v6347_v35, %v6084_v10 }
 0x5ef   : > { %7657 = vst.msk [vmem:[#allocation3 + $0x13] sm:$0xff] %vm434_vm15, %v7616_v59  ;;  %vm7248_vm3 = vcmp.ge.f32.partialorder %v7207_v48, 0.0  ;;  %v7289_v57 = vmul.f32 0.1, %v7207_v48  ;;  %v15985_v39 = vpop.f32.mrf.mxu0  ;;  %v5385_v59 = vadd.f32 %v18438_v21, %v15271_v20 }
 0x5f0   : > { %480 = vst.msk [vmem:[#allocation3 + $0x168] sm:$0xff] %vm434_vm15, %v18429_v14  ;;  %v6999_v42 = vpop.f32.mrf.mxu1  ;;  %v6491_v14 = vld [vmem:[#allocation2 + $0x135] sm:$0xff] }
 0x5f1   : > { %v7330_v28 = vsel %vm7248_vm3, %v7207_v48, %v7289_v57  ;;  %v7118_v61 = vadd.f32 %v6999_v42, %v6768_v9  ;;  %v5735_v43 = vadd.f32 %v15540_v23, %v5385_v59  ;;  %v16003_v9 = vpop.f32.mrf.mxu2 }
 0x5f2   : > { %v7617_v8 = vmul.f32 %v7419_v5, %v7330_v28  ;;  %12049 = vmatmul.msk.f32.gmra.mxu3 %vm387_vm1, %v15575_v13  ;;  %12091 = vmatmul.msk.f32.gmra.mxu0 %vm387_vm1, %v6491_v14  ;;  %v6769_v13 = vadd.f32 %v15663_v45, %v15661_v41  ;;  %v7424_v5 = vpop.permute.xlu1 %7423  ;;  %v6492_v14 = vld [vmem:[#allocation2 + $0x13d] sm:$0xff] }
 0x5f3   : > { %v7163_v4 = vmul.f32 %v15915_v52, %v7118_v61  ;;  %12118 = vmatmul.msk.f32.gmra.mxu1 %vm387_vm1, %v6825_v17  ;;  %v6085_v20 = vadd.f32 %v15691_v0, %v5735_v43  ;;  %v18439_v0 = vld [vmem:[#allocation86_spill] sm:$0xff]  ;;  %v6826_v41 = vld [vmem:[#allocation2 + $0xbe] sm:$0xff] }
 0x5f4   : > { %7658 = vst.msk [vmem:[#allocation3 + $0x1b] sm:$0xff] %vm434_vm15, %v7617_v8  ;;  %v5386_v59 = vadd.f32 %v18439_v0, %v15287_v50 }
 0x5f5   : > { %v7208_v23 = vadd.f32 %v15926_v25, %v7163_v4  ;;  %v6350_v48 = vpop.f32.mrf.mxu3 }
 0x5f6   : > { %v7742_v10 = vld [vmem:[#allocation3 + $0x11] sm:$0xff]  ;;  %v15999_v35 = vadd.f32 %v6350_v48, %v6085_v20  ;;  %v5736_v43 = vadd.f32 %v15555_v24, %v5386_v59 }
 0x5f7   : > { %12145 = vmatmul.msk.f32.gmra.mxu2 %vm434_vm15, %v7742_v10  ;;  %vm7249_vm4 = vcmp.ge.f32.partialorder %v7208_v23, 0.0  ;;  %v7290_v57 = vmul.f32 0.1, %v7208_v23  ;;  %v16005_v21 = vpop.f32.mrf.mxu0  ;;  %v18440_v48 = vld [vmem:[#allocation88_spill] sm:$0xff] }
 0x5f8   : > { %v7002_v42 = vpop.f32.mrf.mxu1  ;;  %v6086_v50 = vadd.f32 %v15707_v47, %v5736_v43 }
 0x5f9   : > { %v7331_v28 = vsel %vm7249_vm4, %v7208_v23, %v7290_v57  ;;  %v7119_v61 = vadd.f32 %v7002_v42, %v6769_v13  ;;  %v5387_v13 = vadd.f32 %v18440_v48, %v15303_v32  ;;  %v7429_v57 = vpop.permute.xlu2 %7428  ;;  %v16027_v0 = vpop.f32.mrf.mxu2 }
 0x5fa   : > { %v7618_v8 = vmul.f32 %v7424_v5, %v7331_v28  ;;  %12050 = vmatmul.msk.f32.gmra.mxu3 %vm387_vm1, %v15590_v55  ;;  %12092 = vmatmul.msk.f32.gmra.mxu0 %vm387_vm1, %v6492_v14  ;;  %v6770_v55 = vadd.f32 %v15676_v46, %v15672_v49  ;;  %v6493_v5 = vld [vmem:[#allocation2 + $0x145] sm:$0xff] }
 0x5fb   : > { %v7164_v45 = vmul.f32 %v15915_v52, %v7119_v61  ;;  %12119 = vmatmul.msk.f32.gmra.mxu1 %vm387_vm1, %v6826_v41  ;;  %v7743_v17 = vld [vmem:[#allocation3 + $0x19] sm:$0xff]  ;;  %v5737_v28 = vadd.f32 %v15570_v56, %v5387_v13 }
 0x5fc   : > { %7659 = vst.msk [vmem:[#allocation3 + $0x23] sm:$0xff] %vm434_vm15, %v7618_v8  ;;  %v6827_v49 = vld [vmem:[#allocation2 + $0xc6] sm:$0xff] }
 0x5fd   : > { %v7209_v24 = vadd.f32 %v15926_v25, %v7164_v45  ;;  %v6353_v4 = vpop.f32.mrf.mxu3  ;;  %v6087_v14 = vadd.f32 %v15721_v40, %v5737_v28  ;;  %v18443_v28 = vld [vmem:[#allocation19_spill] sm:$0xff] }
 0x5fe   : > { %v16019_v10 = vadd.f32 %v6353_v4, %v6086_v50 }
 0x5ff   : > { %12146 = vmatmul.msk.f32.gmra.mxu2 %vm434_vm15, %v7743_v17  ;;  %vm7250_vm5 = vcmp.ge.f32.partialorder %v7209_v24, 0.0  ;;  %v7291_v20 = vmul.f32 0.1, %v7209_v24  ;;  %v16023_v23 = vpop.f32.mrf.mxu0  ;;  %v18441_v17 = vld [vmem:[#allocation90_spill] sm:$0xff] }
 0x600   : > { %v7005_v47 = vpop.f32.mrf.mxu1  ;;  %v5388_v50 = vadd.f32 %v18441_v17, %v15319_v29 }
 0x601   : > { %v7332_v59 = vsel %vm7250_vm5, %v7209_v24, %v7291_v20  ;;  %v7120_v42 = vadd.f32 %v7005_v47, %v6770_v55  ;;  %v7434_v24 = vpop.permute.xlu0 %7433  ;;  %v6494_v20 = vld [vmem:[#allocation2 + $0x14d] sm:$0xff] }
 0x602   : > { %v7619_v61 = vmul.f32 %v7429_v57, %v7332_v59  ;;  %12051 = vmatmul.msk.f32.gmra.mxu3 %vm387_vm1, %v15605_v12  ;;  %12093 = vmatmul.msk.f32.gmra.mxu0 %vm387_vm1, %v6493_v5  ;;  %v6771_v12 = vadd.f32 %v15687_v38, %v15685_v58  ;;  %v5738_v48 = vadd.f32 %v15585_v1, %v5388_v50  ;;  %v18442_v47 = vld [vmem:[#allocation49_spill] sm:$0xff]  ;;  %v16051_v38 = vpop.f32.mrf.mxu2  ;;  %v6495_v50 = vld [vmem:[#allocation2 + $0x155] sm:$0xff] }
 0x603   : > { %v7165_v46 = vmul.f32 %v15915_v52, %v7120_v42  ;;  %12120 = vmatmul.msk.f32.gmra.mxu1 %vm387_vm1, %v6827_v49  ;;  %v7744_v32 = vld [vmem:[#allocation3 + $0x21] sm:$0xff] }
 0x604   : > { %7660 = vst.msk [vmem:[#allocation3 + $0x2b] sm:$0xff] %vm434_vm15, %v7619_v61  ;;  %v6828_v58 = vld [vmem:[#allocation2 + $0xce] sm:$0xff]  ;;  %v6088_v59 = vadd.f32 %v15737_v7, %v5738_v48  ;;  %v6772_v61 = vadd.f32 %v18443_v28, %v15698_v27  ;;  %v6829_v27 = vld [vmem:[#allocation2 + $0xd6] sm:$0xff]  ;;  %v6147_v28 = vld [vmem:[#allocation2 + $0x164] sm:$0xff] }
 0x605   : > { %v7210_v56 = vadd.f32 %v15926_v25, %v7165_v46  ;;  %v6356_v43 = vpop.f32.mrf.mxu3 }
 0x606   : > { %v16039_v8 = vadd.f32 %v6356_v43, %v6087_v14  ;;  %v18444_v14 = vld [vmem:[#allocation91_spill] sm:$0xff] }
 0x607   : > { %12147 = vmatmul.msk.f32.gmra.mxu2 %vm434_vm15, %v7744_v32  ;;  %vm7251_vm6 = vcmp.ge.f32.partialorder %v7210_v56, 0.0  ;;  %v7292_v41 = vmul.f32 0.1, %v7210_v56  ;;  %v16043_v45 = vpop.f32.mrf.mxu0  ;;  %v6146_v32 = vld [vmem:[#allocation2 + $0x15c] sm:$0xff] }
 0x608   : > { %v7008_v40 = vpop.f32.mrf.mxu1 }
 0x609   : > { %v7333_v4 = vsel %vm7251_vm6, %v7210_v56, %v7292_v41  ;;  %v7121_v55 = vadd.f32 %v7008_v40, %v6771_v12  ;;  %v18445_v56 = vld [vmem:[#allocation56_spill] sm:$0xff]  ;;  %v7439_v12 = vpop.permute.xlu1 %7438  ;;  %v18446_v40 = vld [vmem:[#allocation13_spill] sm:$0xff] }
 0x60a   : > { %v7620_v13 = vmul.f32 %v7434_v24, %v7333_v4  ;;  %12052 = vmatmul.msk.f32.gmra.mxu3 %vm387_vm1, %v18442_v47  ;;  %12094 = vmatmul.msk.f32.gmra.mxu0 %vm387_vm1, %v6494_v20  ;;  %v5389_v7 = vadd.f32 %v18445_v56, %v18444_v14  ;;  %v7444_v56 = vpop.permute.xlu2 %7443 }
 0x60b   : > { %v7166_v57 = vmul.f32 %v15915_v52, %v7121_v55  ;;  %12121 = vmatmul.msk.f32.gmra.mxu1 %vm387_vm1, %v6828_v58  ;;  %v7745_v29 = vld [vmem:[#allocation3 + $0x29] sm:$0xff] }
 0x60c   : > { %7661 = vst.msk [vmem:[#allocation3 + $0x33] sm:$0xff] %vm434_vm15, %v7620_v13  ;;  %v5739_v24 = vadd.f32 %v18446_v40, %v5389_v7  ;;  %v16075_v13 = vpop.f32.mrf.mxu2 }
 0x60d   : > { %v7211_v1 = vadd.f32 %v15926_v25, %v7166_v57  ;;  %v6359_v42 = vpop.f32.mrf.mxu3 }
 0x60e   : > { %v16059_v5 = vadd.f32 %v6359_v42, %v6088_v59  ;;  %v6089_v48 = vadd.f32 %v15754_v26, %v5739_v24  ;;  %v6496_v26 = vld [vmem:[#allocation2 + $0x15d] sm:$0xff] }
 0x60f   : > { %12148 = vmatmul.msk.f32.gmra.mxu2 %vm434_vm15, %v7745_v29  ;;  %vm7252_vm7 = vcmp.ge.f32.partialorder %v7211_v1, 0.0  ;;  %v7293_v49 = vmul.f32 0.1, %v7211_v1  ;;  %v16063_v46 = vpop.f32.mrf.mxu0  ;;  %v18447_v29 = vld [vmem:[#allocation48_spill] sm:$0xff] }
 0x610   : > { %v7011_v43 = vpop.f32.mrf.mxu1  ;;  %v6773_v59 = vadd.f32 %v18447_v29, %v15711_v54  ;;  %v6830_v54 = vld [vmem:[#allocation2 + $0xde] sm:$0xff] }
 0x611   : > { %v7334_v41 = vsel %vm7252_vm7, %v7211_v1, %v7293_v49  ;;  %v7122_v17 = vadd.f32 %v7011_v43, %v6772_v61  ;;  %v18448_v61 = vld [vmem:[#allocation60_spill] sm:$0xff] }
 0x612   : > { %v7621_v4 = vmul.f32 %v7439_v12, %v7334_v41  ;;  %12053 = vmatmul.msk.f32.gmra.mxu3 %vm387_vm1, %v6146_v32  ;;  %12095 = vmatmul.msk.f32.gmra.mxu0 %vm387_vm1, %v6495_v50  ;;  %v18449_v49 = vld [vmem:[#allocation64_spill] sm:$0xff]  ;;  %v18450_v12 = vld [vmem:[#allocation15_spill] sm:$0xff] }
 0x613   : > { %v7167_v55 = vmul.f32 %v15915_v52, %v7122_v17  ;;  %12122 = vmatmul.msk.f32.gmra.mxu1 %vm387_vm1, %v6829_v27  ;;  %v7746_v20 = vld [vmem:[#allocation3 + $0x31] sm:$0xff]  ;;  %v5390_v32 = vadd.f32 %v18449_v49, %v18448_v61  ;;  %v7449_v61 = vpop.permute.xlu0 %7448 }
 0x614   : > { %7662 = vst.msk [vmem:[#allocation3 + $0x3b] sm:$0xff] %vm434_vm15, %v7621_v4  ;;  %v6497_v29 = vld [vmem:[#allocation2 + $0x165] sm:$0xff] }
 0x615   : > { %v7212_v47 = vadd.f32 %v15926_v25, %v7167_v55  ;;  %v6362_v58 = vpop.f32.mrf.mxu3  ;;  %v5740_v41 = vadd.f32 %v18450_v12, %v5390_v32 }
 0x616   : > { %v16078_v57 = vadd.f32 %v6362_v58, %v6089_v48  ;;  %v16099_v48 = vpop.f32.mrf.mxu2 }
 0x617   : > { %12149 = vmatmul.msk.f32.gmra.mxu2 %vm434_vm15, %v7746_v20  ;;  %vm7253_vm8 = vcmp.ge.f32.partialorder %v7212_v47, 0.0  ;;  %v7294_v1 = vmul.f32 0.1, %v7212_v47  ;;  %v16082_v42 = vpop.f32.mrf.mxu0  ;;  %v6090_v24 = vadd.f32 %v15770_v16, %v5740_v41  ;;  %v6774_v20 = vadd.f32 %v15726_v11, %v15724_v51  ;;  %v7698_v16 = vld [vmem:[#allocation3] sm:$0xff]  ;;  %v6831_v51 = vld [vmem:[#allocation2 + $0xe6] sm:$0xff] }
 0x618   : > { %v7014_v14 = vpop.f32.mrf.mxu1 }
 0x619   : > { %v7335_v7 = vsel %vm7253_vm8, %v7212_v47, %v7294_v1  ;;  %v7123_v43 = vadd.f32 %v7014_v14, %v6773_v59  ;;  %v18451_v59 = vld [vmem:[#allocation68_spill] sm:$0xff] }
 0x61a   : > { %v7622_v17 = vmul.f32 %v7444_v56, %v7335_v7  ;;  %12054 = vmatmul.msk.f32.gmra.mxu3 %vm387_vm1, %v6147_v28  ;;  %12096 = vmatmul.msk.f32.gmra.mxu0 %vm387_vm1, %v6496_v26  ;;  %v18452_v1 = vld [vmem:[#allocation72_spill] sm:$0xff] }
 0x61b   : > { %v7168_v50 = vmul.f32 %v15915_v52, %v7123_v43  ;;  %12123 = vmatmul.msk.f32.gmra.mxu1 %vm387_vm1, %v6830_v54  ;;  %v7747_v40 = vld [vmem:[#allocation3 + $0x39] sm:$0xff]  ;;  %v5391_v28 = vadd.f32 %v18452_v1, %v18451_v59  ;;  %v18453_v14 = vld [vmem:[#allocation16_spill] sm:$0xff]  ;;  %v7454_v59 = vpop.permute.xlu1 %7453 }
 0x61c   : > { %7663 = vst.msk [vmem:[#allocation3 + $0x43] sm:$0xff] %vm434_vm15, %v7622_v17 }
 0x61d   : > { %v7213_v4 = vadd.f32 %v15926_v25, %v7168_v50  ;;  %v6365_v27 = vpop.f32.mrf.mxu3  ;;  %v5741_v56 = vadd.f32 %v18453_v14, %v5391_v28  ;;  %v18454_v50 = vld [vmem:[#allocation25_spill] sm:$0xff] }
 0x61e   : > { %v16095_v55 = vadd.f32 %v6365_v27, %v6090_v24  ;;  %v7699_v27 = vld [vmem:[#allocation3 + $0x8] sm:$0xff]  ;;  %v16122_v1 = vpop.f32.mrf.mxu2 }
 0x61f   : > { %12150 = vmatmul.msk.f32.gmra.mxu2 %vm434_vm15, %v7747_v40  ;;  %vm7254_vm9 = vcmp.ge.f32.partialorder %v7213_v4, 0.0  ;;  %v7295_v47 = vmul.f32 0.1, %v7213_v4  ;;  %v16101_v58 = vpop.f32.mrf.mxu0  ;;  %v6091_v12 = vadd.f32 %v15800_v2, %v5741_v56  ;;  %v6775_v40 = vadd.f32 %v18454_v50, %v15735_v19  ;;  %v18456_v2 = vld [vmem:[#allocation80_spill] sm:$0xff]  ;;  %v6832_v19 = vld [vmem:[#allocation2 + $0xee] sm:$0xff] }
 0x620   : > { %v7017_v26 = vpop.f32.mrf.mxu1 }
 0x621   : > { %v7336_v49 = vsel %vm7254_vm9, %v7213_v4, %v7295_v47  ;;  %v7124_v32 = vadd.f32 %v7017_v26, %v6774_v20  ;;  %v8316_v20 = vld [vmem:[#allocation3 + $0x2] sm:$0xff]  ;;  %v18455_v47 = vld [vmem:[#allocation76_spill] sm:$0xff] }
 0x622   : > { %v7623_v7 = vmul.f32 %v7449_v61, %v7336_v49  ;;  %12097 = vmatmul.msk.f32.gmra.mxu0 %vm387_vm1, %v6497_v29  ;;  %12185 = vmatmul.msk.f32.vlgmr.msrb.gmra.mxu3 %vm434_vm15, %v7698_v16  ;;  %v5392_v29 = vadd.f32 %v18456_v2, %v18455_v47  ;;  %v18457_v61 = vld [vmem:[#allocation17_spill] sm:$0xff]  ;;  %v7459_v47 = vpop.permute.xlu2 %7458 }
 0x623   : > { %v7169_v11 = vmul.f32 %v15915_v52, %v7124_v32  ;;  %12124 = vmatmul.msk.f32.gmra.mxu1 %vm387_vm1, %v6831_v51  ;;  %v7748_v43 = vld [vmem:[#allocation3 + $0x41] sm:$0xff] }
 0x624   : > { %7664 = vst.msk [vmem:[#allocation3 + $0x4b] sm:$0xff] %vm434_vm15, %v7623_v7  ;;  %v5742_v49 = vadd.f32 %v18457_v61, %v5392_v29 }
 0x625   : > { %v7214_v41 = vadd.f32 %v15926_v25, %v7169_v11  ;;  %v6368_v17 = vpop.f32.mrf.mxu3 }
 0x626   : > { %v16114_v54 = vadd.f32 %v6368_v17, %v6091_v12  ;;  %v6092_v7 = vadd.f32 %v15845_v18, %v5742_v49  ;;  %v18458_v12 = vld [vmem:[#allocation50_spill] sm:$0xff]  ;;  %v16144_v61 = vpop.f32.mrf.mxu2 }
 0x627   : > { %12151 = vmatmul.msk.f32.gmra.mxu2 %vm434_vm15, %v7748_v43  ;;  %vm7255_vm10 = vcmp.ge.f32.partialorder %v7214_v41, 0.0  ;;  %v7296_v24 = vmul.f32 0.1, %v7214_v41  ;;  %v16118_v4 = vpop.f32.mrf.mxu0 }
 0x628   : > { %v7020_v16 = vpop.f32.mrf.mxu1 }
 0x629   : > { %v7337_v28 = vsel %vm7255_vm10, %v7214_v41, %v7296_v24  ;;  %v7125_v26 = vadd.f32 %v7020_v16, %v6775_v40  ;;  %v6776_v41 = vadd.f32 %v18458_v12, %v15748_v22  ;;  %v8317_v40 = vld [vmem:[#allocation3 + $0xa] sm:$0xff] }
 0x62a   : > { %v7624_v32 = vmul.f32 %v7454_v59, %v7337_v28  ;;  %12186 = vmatmul.msk.f32.gmra.mxu3 %vm434_vm15, %v7699_v27  ;;  %12228 = vmatmul.msk.f32.vlgmr.msrb.gmra.mxu0 %vm434_vm15, %v8316_v20  ;;  %v18459_v24 = vld [vmem:[#allocation84_spill] sm:$0xff]  ;;  %v18460_v27 = vld [vmem:[#allocation87_spill] sm:$0xff]  ;;  %v18461_v59 = vld [vmem:[#allocation46_spill] sm:$0xff] }
 0x62b   : > { %v7170_v14 = vmul.f32 %v15915_v52, %v7125_v26  ;;  %12125 = vmatmul.msk.f32.gmra.mxu1 %vm387_vm1, %v6832_v19  ;;  %v7749_v56 = vld [vmem:[#allocation3 + $0x49] sm:$0xff]  ;;  %v5393_v18 = vadd.f32 %v18460_v27, %v18459_v24  ;;  %v7464_v24 = vpop.permute.xlu0 %7463 }
 0x62c   : > { %7665 = vst.msk [vmem:[#allocation3 + $0x53] sm:$0xff] %vm434_vm15, %v7624_v32  ;;  %v7700_v16 = vld [vmem:[#allocation3 + $0x10] sm:$0xff]  ;;  %v6833_v22 = vld [vmem:[#allocation2 + $0xf6] sm:$0xff] }
 0x62d   : > { %v7215_v51 = vadd.f32 %v15926_v25, %v7170_v14  ;;  %v6371_v11 = vpop.f32.mrf.mxu3  ;;  %v5743_v28 = vadd.f32 %v18461_v59, %v5393_v18 }
 0x62e   : > { %v16133_v43 = vadd.f32 %v6371_v11, %v6092_v7 }
 0x62f   : > { %12152 = vmatmul.msk.f32.gmra.mxu2 %vm434_vm15, %v7749_v56  ;;  %vm7256_vm11 = vcmp.ge.f32.partialorder %v7215_v51, 0.0  ;;  %v7297_v17 = vmul.f32 0.1, %v7215_v51  ;;  %v16137_v50 = vpop.f32.mrf.mxu0  ;;  %v6093_v19 = vadd.f32 %v15887_v31, %v5743_v28 }
 0x630   : > { %v7023_v20 = vpop.f32.mrf.mxu1 }
 0x631   : > { %v7338_v2 = vsel %vm7256_vm11, %v7215_v51, %v7297_v17  ;;  %v7126_v29 = vadd.f32 %v7023_v20, %v6776_v41  ;;  %v6777_v51 = vadd.f32 %v15763_v6, %v15761_v36  ;;  %v18462_v41 = vld [vmem:[#allocation89_spill] sm:$0xff]  ;;  %v18463_v17 = vld [vmem:[#allocation23_spill] sm:$0xff] }
 0x632   : > { %v7625_v26 = vmul.f32 %v7459_v47, %v7338_v2  ;;  %12187 = vmatmul.msk.f32.gmra.mxu3 %vm434_vm15, %v7700_v16  ;;  %12229 = vmatmul.msk.f32.gmra.mxu0 %vm434_vm15, %v8317_v40  ;;  %v5394_v40 = vadd.f32 %v18463_v17, %v18462_v41  ;;  %v7701_v20 = vld [vmem:[#allocation3 + $0x18] sm:$0xff]  ;;  %v18464_v2 = vld [vmem:[#allocation18_spill] sm:$0xff]  ;;  %v6834_v36 = vld [vmem:[#allocation2 + $0xfe] sm:$0xff]  ;;  %v7469_v17 = vpop.permute.xlu1 %7468 }
 0x633   : > { %v7171_v49 = vmul.f32 %v15915_v52, %v7126_v29  ;;  %12126 = vmatmul.msk.f32.gmra.mxu1 %vm387_vm1, %v6833_v22  ;;  %v7750_v32 = vld [vmem:[#allocation3 + $0x51] sm:$0xff] }
 0x634   : > { %7666 = vst.msk [vmem:[#allocation3 + $0x5b] sm:$0xff] %vm434_vm15, %v7625_v26  ;;  %v16160_v47 = vld [vmem:[#allocation3 + $0x12] sm:$0xff]  ;;  %v5744_v29 = vadd.f32 %v18464_v2, %v5394_v40  ;;  %v16171_v26 = vpop.f32.mrf.mxu2 }
 0x635   : > { %v7216_v14 = vadd.f32 %v15926_v25, %v7171_v49  ;;  %v6374_v56 = vpop.f32.mrf.mxu3 }
 0x636   : > { %v16152_v7 = vadd.f32 %v6374_v56, %v6093_v19  ;;  %v6094_v28 = vadd.f32 %v15936_v44, %v5744_v29  ;;  %v6778_v19 = vadd.f32 %v15776_v53, %v15774_v63  ;;  %v18466_v44 = vld [vmem:[#allocation5_spill] sm:$0xff] }
 0x637   : > { %12153 = vmatmul.msk.f32.gmra.mxu2 %vm434_vm15, %v7750_v32  ;;  %vm7257_vm0 = vcmp.ge.f32.partialorder %v7216_v14, 0.0  ;;  %v7298_v11 = vmul.f32 0.1, %v7216_v14  ;;  %v16156_v12 = vpop.f32.mrf.mxu0  ;;  %v6835_v63 = vld [vmem:[#allocation2 + $0x106] sm:$0xff] }
 0x638   : > { %v7026_v31 = vpop.f32.mrf.mxu1 }
 0x639   : > { %v7339_v27 = vsel %vm7257_vm0, %v7216_v14, %v7298_v11  ;;  %v7127_v18 = vadd.f32 %v7026_v31, %v6777_v51  ;;  %v18465_v51 = vld [vmem:[#allocation4_spill] sm:$0xff] }
 0x63a   : > { %v7626_v16 = vmul.f32 %v7464_v24, %v7339_v27  ;;  %12188 = vmatmul.msk.f32.gmra.mxu3 %vm434_vm15, %v7701_v20  ;;  %12230 = vmatmul.msk.f32.gmra.mxu0 %vm434_vm15, %v16160_v47  ;;  %v5395_v11 = vadd.f32 %v18466_v44, %v18465_v51  ;;  %v7702_v24 = vld [vmem:[#allocation3 + $0x20] sm:$0xff]  ;;  %v18469_v51 = vld [vmem:[#allocation24_spill] sm:$0xff] }
 0x63b   : > { %v7172_v6 = vmul.f32 %v15915_v52, %v7127_v18  ;;  %12127 = vmatmul.msk.f32.gmra.mxu1 %vm387_vm1, %v6834_v36  ;;  %v7751_v59 = vld [vmem:[#allocation3 + $0x59] sm:$0xff] }
 0x63c   : > { %7667 = vst.msk [vmem:[#allocation3 + $0x63] sm:$0xff] %vm434_vm15, %v7626_v16  ;;  %v16182_v27 = vld [vmem:[#allocation3 + $0x1a] sm:$0xff] }
 0x63d   : > { %v7217_v22 = vadd.f32 %v15926_v25, %v7172_v6  ;;  %v6377_v49 = vpop.f32.mrf.mxu3  ;;  %v18467_v18 = vld [vmem:[#allocation53_spill] sm:$0xff] }
 0x63e   : > { %v16174_v32 = vadd.f32 %v6377_v49, %v6094_v28  ;;  %v5745_v20 = vadd.f32 %v18467_v18, %v5395_v11  ;;  %v18468_v28 = vld [vmem:[#allocation31_spill] sm:$0xff]  ;;  %v16198_v49 = vpop.f32.mrf.mxu2 }
 0x63f   : > { %12154 = vmatmul.msk.f32.gmra.mxu2 %vm434_vm15, %v7751_v59  ;;  %vm7258_vm12 = vcmp.ge.f32.partialorder %v7217_v22, 0.0  ;;  %v7299_v14 = vmul.f32 0.1, %v7217_v22  ;;  %v16178_v56 = vpop.f32.mrf.mxu0  ;;  %v18471_v18 = vld [vmem:[#allocation47_spill] sm:$0xff] }
 0x640   : > { %v7029_v41 = vpop.f32.mrf.mxu1  ;;  %v6095_v16 = vadd.f32 %v15976_v62, %v5745_v20  ;;  %v18470_v62 = vld [vmem:[#allocation27_spill] sm:$0xff] }
 0x641   : > { %v7340_v40 = vsel %vm7258_vm12, %v7217_v22, %v7299_v14  ;;  %v7128_v31 = vadd.f32 %v7029_v41, %v6778_v19  ;;  %v6779_v22 = vadd.f32 %v18468_v28, %v15805_v60  ;;  %v5396_v44 = vadd.f32 %v18470_v62, %v18469_v51  ;;  %v7474_v41 = vpop.permute.xlu2 %7473  ;;  %v6836_v60 = vld [vmem:[#allocation2 + $0x10e] sm:$0xff]  ;;  %v18472_v28 = vld [vmem:[#allocation35_spill] sm:$0xff] }
 0x642   : > { %v7627_v2 = vmul.f32 %v7469_v17, %v7340_v40  ;;  %12189 = vmatmul.msk.f32.gmra.mxu3 %vm434_vm15, %v7702_v24  ;;  %12231 = vmatmul.msk.f32.gmra.mxu0 %vm434_vm15, %v16182_v27  ;;  %v16204_v24 = vld [vmem:[#allocation3 + $0x22] sm:$0xff] }
 0x643   : > { %v7173_v53 = vmul.f32 %v15915_v52, %v7128_v31  ;;  %12128 = vmatmul.msk.f32.gmra.mxu1 %vm387_vm1, %v6835_v63  ;;  %v7752_v29 = vld [vmem:[#allocation3 + $0x61] sm:$0xff]  ;;  %v5746_v20 = vadd.f32 %v18471_v18, %v5396_v44  ;;  %v18474_v44 = vld [vmem:[#allocation44_spill] sm:$0xff] }
 0x644   : > { %7668 = vst.msk [vmem:[#allocation3 + $0x6b] sm:$0xff] %vm434_vm15, %v7627_v2  ;;  %v7703_v31 = vld [vmem:[#allocation3 + $0x28] sm:$0xff]  ;;  %v18473_v62 = vld [vmem:[#allocation6_spill] sm:$0xff]  ;;  %v7704_v18 = vld [vmem:[#allocation3 + $0x30] sm:$0xff] }
 0x645   : > { %v7218_v36 = vadd.f32 %v15926_v25, %v7173_v53  ;;  %v6380_v6 = vpop.f32.mrf.mxu3 }
 0x646   : > { %v16194_v59 = vadd.f32 %v6380_v6, %v6095_v16 }
 0x647   : > { %12155 = vmatmul.msk.f32.gmra.mxu2 %vm434_vm15, %v7752_v29  ;;  %vm7259_vm13 = vcmp.ge.f32.partialorder %v7218_v36, 0.0  ;;  %v7300_v19 = vmul.f32 0.1, %v7218_v36  ;;  %v16200_v14 = vpop.f32.mrf.mxu0  ;;  %v6096_v29 = vadd.f32 %v16003_v9, %v5746_v20  ;;  %v16226_v20 = vld [vmem:[#allocation3 + $0x2a] sm:$0xff] }
 0x648   : > { %v7032_v11 = vpop.f32.mrf.mxu1 }
 0x649   : > { %v7341_v17 = vsel %vm7259_vm13, %v7218_v36, %v7300_v19  ;;  %v7129_v40 = vadd.f32 %v7032_v11, %v6779_v22  ;;  %v6780_v22 = vadd.f32 %v18472_v28, %v15839_v15  ;;  %v5397_v11 = vadd.f32 %v18474_v44, %v18473_v62  ;;  %v6837_v15 = vld [vmem:[#allocation2 + $0x116] sm:$0xff] }
 0x64a   : > { %v7628_v2 = vmul.f32 %v7474_v41, %v7341_v17  ;;  %12190 = vmatmul.msk.f32.gmra.mxu3 %vm434_vm15, %v7703_v31  ;;  %12232 = vmatmul.msk.f32.gmra.mxu0 %vm434_vm15, %v16204_v24  ;;  %v7479_v41 = vpop.permute.xlu0 %7478  ;;  %v16224_v17 = vpop.f32.mrf.mxu2 }
 0x64b   : > { %v7174_v63 = vmul.f32 %v15915_v52, %v7129_v40  ;;  %12129 = vmatmul.msk.f32.gmra.mxu1 %vm387_vm1, %v6836_v60  ;;  %v7753_v53 = vld [vmem:[#allocation3 + $0x69] sm:$0xff] }
 0x64c   : > { %7669 = vst.msk [vmem:[#allocation3 + $0x73] sm:$0xff] %vm434_vm15, %v7628_v2  ;;  %v18475_v2 = vld [vmem:[#allocation20_spill] sm:$0xff] }
 0x64d   : > { %v7219_v16 = vadd.f32 %v15926_v25, %v7174_v63  ;;  %v6383_v36 = vpop.f32.mrf.mxu3  ;;  %v5747_v60 = vadd.f32 %v18475_v2, %v5397_v11  ;;  %v18476_v11 = vld [vmem:[#allocation30_spill] sm:$0xff]  ;;  %v7705_v2 = vld [vmem:[#allocation3 + $0x38] sm:$0xff] }
 0x64e   : > { %v16216_v6 = vadd.f32 %v6383_v36, %v6096_v29 }
 0x64f   : > { %12156 = vmatmul.msk.f32.gmra.mxu2 %vm434_vm15, %v7753_v53  ;;  %vm7260_vm2 = vcmp.ge.f32.partialorder %v7219_v16, 0.0  ;;  %v7301_v19 = vmul.f32 0.1, %v7219_v16  ;;  %v16220_v51 = vpop.f32.mrf.mxu0 }
 0x650   : > { %v7035_v9 = vpop.f32.mrf.mxu1 }
 0x651   : > { %v7342_v40 = vsel %vm7260_vm2, %v7219_v16, %v7301_v19  ;;  %v7130_v31 = vadd.f32 %v7035_v9, %v6780_v22  ;;  %v6097_v16 = vadd.f32 %v16027_v0, %v5747_v60  ;;  %v6781_v19 = vadd.f32 %v15879_v37, %v15875_v30  ;;  %v18477_v9 = vld [vmem:[#allocation33_spill] sm:$0xff]  ;;  %v6838_v30 = vld [vmem:[#allocation2 + $0x11e] sm:$0xff] }
 0x652   : > { %v7629_v63 = vmul.f32 %v7479_v41, %v7342_v40  ;;  %12191 = vmatmul.msk.f32.gmra.mxu3 %vm434_vm15, %v7704_v18  ;;  %12233 = vmatmul.msk.f32.gmra.mxu0 %vm434_vm15, %v16226_v20  ;;  %v5398_v41 = vadd.f32 %v18477_v9, %v18476_v11  ;;  %v7484_v40 = vpop.permute.xlu1 %7483  ;;  %v16246_v60 = vld [vmem:[#allocation3 + $0x32] sm:$0xff]  ;;  %v16252_v37 = vpop.f32.mrf.mxu2 }
 0x653   : > { %v7175_v53 = vmul.f32 %v15915_v52, %v7130_v31  ;;  %12130 = vmatmul.msk.f32.gmra.mxu1 %vm387_vm1, %v6837_v15  ;;  %v7754_v29 = vld [vmem:[#allocation3 + $0x71] sm:$0xff] }
 0x654   : > { %7670 = vst.msk [vmem:[#allocation3 + $0x7b] sm:$0xff] %vm434_vm15, %v7629_v63  ;;  %v18478_v63 = vld [vmem:[#allocation21_spill] sm:$0xff] }
 0x655   : > { %v7220_v36 = vadd.f32 %v15926_v25, %v7175_v53  ;;  %v6386_v28 = vpop.f32.mrf.mxu3  ;;  %v5748_v15 = vadd.f32 %v18478_v63, %v5398_v41  ;;  %v18479_v11 = vld [vmem:[#allocation57_spill] sm:$0xff] }
 0x656   : > { %v16238_v22 = vadd.f32 %v6386_v28, %v6097_v16  ;;  %v6782_v9 = vadd.f32 %v18479_v11, %v15904_v33  ;;  %v6839_v33 = vld [vmem:[#allocation2 + $0x126] sm:$0xff] }
 0x657   : > { %12157 = vmatmul.msk.f32.gmra.mxu2 %vm434_vm15, %v7754_v29  ;;  %vm7261_vm3 = vcmp.ge.f32.partialorder %v7220_v36, 0.0  ;;  %v7302_v62 = vmul.f32 0.1, %v7220_v36  ;;  %v16242_v44 = vpop.f32.mrf.mxu0 }
 0x658   : > { %v7038_v0 = vpop.f32.mrf.mxu1 }
 0x659   : > { %v7343_v31 = vsel %vm7261_vm3, %v7220_v36, %v7302_v62  ;;  %v7131_v18 = vadd.f32 %v7038_v0, %v6781_v19  ;;  %v6098_v36 = vadd.f32 %v16051_v38, %v5748_v15 }
 0x65a   : > { %v7630_v53 = vmul.f32 %v7484_v40, %v7343_v31  ;;  %12192 = vmatmul.msk.f32.gmra.mxu3 %vm434_vm15, %v7705_v2  ;;  %12234 = vmatmul.msk.f32.gmra.mxu0 %vm434_vm15, %v16246_v60  ;;  %v18480_v40 = vld [vmem:[#allocation7_spill] sm:$0xff]  ;;  %v18481_v31 = vld [vmem:[#allocation8_spill] sm:$0xff]  ;;  %v7489_v2 = vpop.permute.xlu2 %7488 }
 0x65b   : > { %v7176_v29 = vmul.f32 %v15915_v52, %v7131_v18  ;;  %12131 = vmatmul.msk.f32.gmra.mxu1 %vm387_vm1, %v6838_v30  ;;  %v7755_v16 = vld [vmem:[#allocation3 + $0x79] sm:$0xff]  ;;  %v5399_v18 = vadd.f32 %v18481_v31, %v18480_v40  ;;  %v16276_v40 = vpop.f32.mrf.mxu2 }
 0x65c   : > { %7671 = vst.msk [vmem:[#allocation3 + $0x83] sm:$0xff] %vm434_vm15, %v7630_v53  ;;  %v7706_v53 = vld [vmem:[#allocation3 + $0x40] sm:$0xff] }
 0x65d   : > { %v7221_v28 = vadd.f32 %v15926_v25, %v7176_v29  ;;  %v6389_v19 = vpop.f32.mrf.mxu3  ;;  %v16268_v30 = vld [vmem:[#allocation3 + $0x3a] sm:$0xff]  ;;  %18483 = vst [vmem:[#allocation54_spill] sm:$0xff] %v16276_v40  ;;  %v16290_v40 = vld [vmem:[#allocation3 + $0x42] sm:$0xff] }
 0x65e   : > { %v16260_v62 = vadd.f32 %v6389_v19, %v6098_v36  ;;  %v18482_v29 = vld [vmem:[#allocation22_spill] sm:$0xff] }
 0x65f   : > { %12158 = vmatmul.msk.f32.gmra.mxu2 %vm434_vm15, %v7755_v16  ;;  %vm7262_vm4 = vcmp.ge.f32.partialorder %v7221_v28, 0.0  ;;  %v7303_v41 = vmul.f32 0.1, %v7221_v28  ;;  %v16264_v0 = vpop.f32.mrf.mxu0  ;;  %v5749_v16 = vadd.f32 %v18482_v29, %v5399_v18  ;;  %v18484_v18 = vld [vmem:[#allocation73_spill] sm:$0xff] }
 0x660   : > { %v7041_v38 = vpop.f32.mrf.mxu1 }
 0x661   : > { %v7344_v63 = vsel %vm7262_vm4, %v7221_v28, %v7303_v41  ;;  %v7132_v15 = vadd.f32 %v7041_v38, %v6782_v9  ;;  %v6099_v28 = vadd.f32 %v16075_v13, %v5749_v16  ;;  %v6783_v38 = vadd.f32 %v15956_v3, %v18484_v18  ;;  %v7494_v16 = vpop.permute.xlu0 %7493  ;;  %v6840_v3 = vld [vmem:[#allocation2 + $0x12e] sm:$0xff] }
 0x662   : > { %v7631_v36 = vmul.f32 %v7489_v2, %v7344_v63  ;;  %12193 = vmatmul.msk.f32.gmra.mxu3 %vm434_vm15, %v7706_v53  ;;  %12235 = vmatmul.msk.f32.gmra.mxu0 %vm434_vm15, %v16268_v30  ;;  %v18487_v53 = vld [vmem:[#allocation37_spill] sm:$0xff] }
 0x663   : > { %v7177_v19 = vmul.f32 %v15915_v52, %v7132_v15  ;;  %12132 = vmatmul.msk.f32.gmra.mxu1 %vm387_vm1, %v6839_v33  ;;  %v7756_v11 = vld [vmem:[#allocation3 + $0x81] sm:$0xff] }
 0x664   : > { %7672 = vst.msk [vmem:[#allocation3 + $0x8b] sm:$0xff] %vm434_vm15, %v7631_v36  ;;  %v18486_v15 = vld [vmem:[#allocation34_spill] sm:$0xff] }
 0x665   : > { %v7222_v9 = vadd.f32 %v15926_v25, %v7177_v19  ;;  %v6392_v41 = vpop.f32.mrf.mxu3  ;;  %v5400_v29 = vadd.f32 %v18487_v53, %v18486_v15  ;;  %v18488_v19 = vld [vmem:[#allocation26_spill] sm:$0xff]  ;;  %v16302_v53 = vpop.f32.mrf.mxu2 }
 0x666   : > { %v16282_v31 = vadd.f32 %v6392_v41, %v6099_v28 }
 0x667   : > { %12159 = vmatmul.msk.f32.gmra.mxu2 %vm434_vm15, %v7756_v11  ;;  %vm7263_vm5 = vcmp.ge.f32.partialorder %v7222_v9, 0.0  ;;  %v7304_v2 = vmul.f32 0.1, %v7222_v9  ;;  %v16286_v63 = vpop.f32.mrf.mxu0  ;;  %v7707_v11 = vld [vmem:[#allocation3 + $0x48] sm:$0xff]  ;;  %v5750_v28 = vadd.f32 %v18488_v19, %v5400_v29 }
 0x668   : > { %18485 = vst [vmem:[#allocation59_spill] sm:$0xff] %v16286_v63  ;;  %v7044_v13 = vpop.f32.mrf.mxu1  ;;  %v18491_v63 = vld [vmem:[#allocation28_spill] sm:$0xff] }
 0x669   : > { %v7345_v36 = vsel %vm7263_vm5, %v7222_v9, %v7304_v2  ;;  %v7133_v33 = vadd.f32 %v7044_v13, %v6783_v38  ;;  %v6100_v9 = vadd.f32 %v16099_v48, %v5750_v28  ;;  %v6784_v13 = vadd.f32 %v15985_v39, %v15981_v34  ;;  %v18490_v48 = vld [vmem:[#allocation40_spill] sm:$0xff]  ;;  %v7499_v28 = vpop.permute.xlu1 %7498  ;;  %v6841_v34 = vld [vmem:[#allocation2 + $0x136] sm:$0xff] }
 0x66a   : > { %v7632_v41 = vmul.f32 %v7494_v16, %v7345_v36  ;;  %12194 = vmatmul.msk.f32.gmra.mxu3 %vm434_vm15, %v7707_v11  ;;  %12236 = vmatmul.msk.f32.gmra.mxu0 %vm434_vm15, %v16290_v40 }
 0x66b   : > { %v7178_v18 = vmul.f32 %v15915_v52, %v7133_v33  ;;  %12133 = vmatmul.msk.f32.gmra.mxu1 %vm387_vm1, %v6840_v3  ;;  %v7757_v15 = vld [vmem:[#allocation3 + $0x89] sm:$0xff]  ;;  %v18489_v33 = vld [vmem:[#allocation9_spill] sm:$0xff] }
 0x66c   : > { %7673 = vst.msk [vmem:[#allocation3 + $0x93] sm:$0xff] %vm434_vm15, %v7632_v41  ;;  %v5401_v11 = vadd.f32 %v18490_v48, %v18489_v33  ;;  %v6785_v48 = vadd.f32 %v16005_v21, %v15999_v35  ;;  %v6842_v35 = vld [vmem:[#allocation2 + $0x13e] sm:$0xff] }
 0x66d   : > { %v7223_v38 = vadd.f32 %v15926_v25, %v7178_v18  ;;  %v6395_v2 = vpop.f32.mrf.mxu3  ;;  %v7708_v18 = vld [vmem:[#allocation3 + $0x50] sm:$0xff] }
 0x66e   : > { %v16304_v29 = vadd.f32 %v6395_v2, %v6100_v9  ;;  %v5751_v9 = vadd.f32 %v18491_v63, %v5401_v11 }
 0x66f   : > { %12160 = vmatmul.msk.f32.gmra.mxu2 %vm434_vm15, %v7757_v15  ;;  %vm7264_vm6 = vcmp.ge.f32.partialorder %v7223_v38, 0.0  ;;  %v7305_v16 = vmul.f32 0.1, %v7223_v38  ;;  %v16308_v36 = vpop.f32.mrf.mxu0  ;;  %v16312_v15 = vld [vmem:[#allocation3 + $0x4a] sm:$0xff] }
 0x670   : > { %v7047_v19 = vpop.f32.mrf.mxu1 }
 0x671   : > { %v7346_v41 = vsel %vm7264_vm6, %v7223_v38, %v7305_v16  ;;  %v7134_v3 = vadd.f32 %v7047_v19, %v6784_v13  ;;  %v6101_v38 = vadd.f32 %v16122_v1, %v5751_v9  ;;  %v18494_v1 = vld [vmem:[#allocation39_spill] sm:$0xff]  ;;  %v7504_v9 = vpop.permute.xlu2 %7503 }
 0x672   : > { %v7633_v2 = vmul.f32 %v7499_v28, %v7346_v41  ;;  %12195 = vmatmul.msk.f32.gmra.mxu3 %vm434_vm15, %v7708_v18  ;;  %12237 = vmatmul.msk.f32.gmra.mxu0 %vm434_vm15, %v16312_v15  ;;  %v18493_v41 = vld [vmem:[#allocation38_spill] sm:$0xff] }
 0x673   : > { %v7179_v39 = vmul.f32 %v15915_v52, %v7134_v3  ;;  %12134 = vmatmul.msk.f32.gmra.mxu1 %vm387_vm1, %v6841_v34  ;;  %v7758_v33 = vld [vmem:[#allocation3 + $0x91] sm:$0xff]  ;;  %v5402_v3 = vadd.f32 %v18494_v1, %v18493_v41 }
 0x674   : > { %7674 = vst.msk [vmem:[#allocation3 + $0x9b] sm:$0xff] %vm434_vm15, %v7633_v2 }
 0x675   : > { %v7224_v63 = vadd.f32 %v15926_v25, %v7179_v39  ;;  %v6398_v13 = vpop.f32.mrf.mxu3  ;;  %v7709_v39 = vld [vmem:[#allocation3 + $0x58] sm:$0xff] }
 0x676   : > { %v16324_v16 = vadd.f32 %v6398_v13, %v6101_v38  ;;  %v18495_v38 = vld [vmem:[#allocation29_spill] sm:$0xff] }
 0x677   : > { %12161 = vmatmul.msk.f32.gmra.mxu2 %vm434_vm15, %v7758_v33  ;;  %vm7265_vm7 = vcmp.ge.f32.partialorder %v7224_v63, 0.0  ;;  %v7306_v11 = vmul.f32 0.1, %v7224_v63  ;;  %v16328_v19 = vpop.f32.mrf.mxu0  ;;  %v16334_v33 = vld [vmem:[#allocation3 + $0x52] sm:$0xff]  ;;  %v5752_v13 = vadd.f32 %v18495_v38, %v5402_v3  ;;  %v6786_v3 = vadd.f32 %v16023_v23, %v16019_v10  ;;  %v16365_v23 = vld [vmem:[%s18024_s5] ss:$0 sm:$0xff] }
 0x678   : > { %18492 = vst [vmem:[#allocation77_spill] sm:$0xff] %v16324_v16  ;;  %v7050_v18 = vpop.f32.mrf.mxu1  ;;  %v6843_v10 = vld [vmem:[#allocation2 + $0x146] sm:$0xff] }
 0x679   : > { %v7347_v2 = vsel %vm7265_vm7, %v7224_v63, %v7306_v11  ;;  %v7135_v34 = vadd.f32 %v7050_v18, %v6785_v48  ;;  %v6102_v63 = vadd.f32 %v16144_v61, %v5752_v13  ;;  %v18498_v61 = vld [vmem:[#allocation11_spill] sm:$0xff] }
 0x67a   : > { %v16330_v28 = vpop.f32.mrf.mxu2  ;;  %v7634_v16 = vmul.f32 %v7504_v9, %v7347_v2  ;;  %12196 = vmatmul.msk.f32.gmra.mxu3 %vm434_vm15, %v7709_v39  ;;  %12238 = vmatmul.msk.f32.gmra.mxu0 %vm434_vm15, %v16334_v33  ;;  %v18497_v2 = vld [vmem:[#allocation10_spill] sm:$0xff]  ;;  %v7509_v39 = vpop.permute.xlu0 %7508 }
 0x67b   : > { %v7180_v21 = vmul.f32 %v15915_v52, %v7135_v34  ;;  %12135 = vmatmul.msk.f32.gmra.mxu1 %vm387_vm1, %v6842_v35  ;;  %v7759_v41 = vld [vmem:[#allocation3 + $0x99] sm:$0xff]  ;;  %v5403_v34 = vadd.f32 %v18498_v61, %v18497_v2 }
 0x67c   : > { %7675 = vst.msk [vmem:[#allocation3 + $0xa3] sm:$0xff] %vm434_vm15, %v7634_v16  ;;  %v16356_v35 = vld [vmem:[#allocation3 + $0x5a] sm:$0xff] }
 0x67d   : > { %v7225_v48 = vadd.f32 %v15926_v25, %v7180_v21  ;;  %v6401_v11 = vpop.f32.mrf.mxu3  ;;  %v7710_v25 = vld [vmem:[#allocation3 + $0x60] sm:$0xff]  ;;  %v18499_v21 = vld [vmem:[#allocation51_spill] sm:$0xff] }
 0x67e   : > { %v16346_v1 = vadd.f32 %v6401_v11, %v6102_v63 }
 0x67f   : > { %12162 = vmatmul.msk.f32.gmra.mxu2 %vm434_vm15, %v7759_v41  ;;  %vm7266_vm8 = vcmp.ge.f32.partialorder %v7225_v48, 0.0  ;;  %v7307_v18 = vmul.f32 0.1, %v7225_v48  ;;  %v16350_v52 = vpop.f32.mrf.mxu0  ;;  %v5753_v41 = vadd.f32 %v18499_v21, %v5403_v34 }
 0x680   : > { %18496 = vst [vmem:[#allocation55_spill] sm:$0xff] %v16350_v52  ;;  %v7053_v16 = vpop.f32.mrf.mxu1  ;;  %v16388_v52 = vld [vmem:[#allocation3 + $0x62] sm:$0xff] }
 0x681   : > { %v7348_v38 = vsel %vm7266_vm8, %v7225_v48, %v7307_v18  ;;  %v7136_v13 = vadd.f32 %v7053_v16, %v6786_v3  ;;  %v6103_v3 = vadd.f32 %v16171_v26, %v5753_v41  ;;  %v16375_v18 = vld [vmem:[%s18025_s6] ss:$0 sm:$0xff]  ;;  %v6787_v16 = vadd.f32 %v16043_v45, %v16039_v8  ;;  %v6844_v8 = vld [vmem:[#allocation2 + $0x14e] sm:$0xff] }
 0x682   : > { %v16352_v9 = vpop.f32.mrf.mxu2  ;;  %v7635_v63 = vmul.f32 %v7509_v39, %v7348_v38  ;;  %12197 = vmatmul.msk.f32.gmra.mxu3 %vm434_vm15, %v7710_v25  ;;  %12239 = vmatmul.msk.f32.gmra.mxu0 %vm434_vm15, %v16356_v35  ;;  %v18502_v25 = vld [vmem:[#allocation12_spill] sm:$0xff] }
 0x683   : > { %v7181_v48 = vmul.f32 %v16365_v23, %v7136_v13  ;;  %12136 = vmatmul.msk.f32.gmra.mxu1 %vm387_vm1, %v6843_v10  ;;  %v7760_v11 = vld [vmem:[#allocation3 + $0xa1] sm:$0xff]  ;;  %v18501_v13 = vld [vmem:[#allocation41_spill] sm:$0xff] }
 0x684   : > { %7676 = vst.msk [vmem:[#allocation3 + $0xab] sm:$0xff] %vm434_vm15, %v7635_v63  ;;  %v5404_v21 = vadd.f32 %v18502_v25, %v18501_v13  ;;  %v7514_v63 = vpop.permute.xlu1 %7513 }
 0x685   : > { %v7226_v2 = vadd.f32 %v16375_v18, %v7181_v48  ;;  %v6404_v61 = vpop.f32.mrf.mxu3  ;;  %v7711_v48 = vld [vmem:[#allocation3 + $0x68] sm:$0xff] }
 0x686   : > { %v16378_v34 = vadd.f32 %v6404_v61, %v6103_v3  ;;  %v18503_v3 = vld [vmem:[#allocation32_spill] sm:$0xff] }
 0x687   : > { %12163 = vmatmul.msk.f32.gmra.mxu2 %vm434_vm15, %v7760_v11  ;;  %vm7267_vm9 = vcmp.ge.f32.partialorder %v7226_v2, 0.0  ;;  %v7308_v39 = vmul.f32 0.1, %v7226_v2  ;;  %v16382_v26 = vpop.f32.mrf.mxu0  ;;  %v5754_v61 = vadd.f32 %v18503_v3, %v5404_v21  ;;  %v6788_v21 = vadd.f32 %v16063_v46, %v16059_v5  ;;  %v7519_v3 = vpop.permute.xlu2 %7518  ;;  %v6845_v5 = vld [vmem:[#allocation2 + $0x156] sm:$0xff] }
 0x688   : > { %18500 = vst [vmem:[#allocation62_spill] sm:$0xff] %v16378_v34  ;;  %v7056_v41 = vpop.f32.mrf.mxu1 }
 0x689   : > { %v7349_v10 = vsel %vm7267_vm9, %v7226_v2, %v7308_v39  ;;  %v7137_v11 = vadd.f32 %v7056_v41, %v6787_v16  ;;  %v6104_v2 = vadd.f32 %v16198_v49, %v5754_v61  ;;  %v18506_v49 = vld [vmem:[#allocation42_spill] sm:$0xff] }
 0x68a   : > { %v16384_v38 = vpop.f32.mrf.mxu2  ;;  %v7636_v34 = vmul.f32 %v7514_v63, %v7349_v10  ;;  %12198 = vmatmul.msk.f32.gmra.mxu3 %vm434_vm15, %v7711_v48  ;;  %12240 = vmatmul.msk.f32.gmra.mxu0 %vm434_vm15, %v16388_v52 }
 0x68b   : > { %v7182_v45 = vmul.f32 %v16365_v23, %v7137_v11  ;;  %12137 = vmatmul.msk.f32.gmra.mxu1 %vm387_vm1, %v6844_v8  ;;  %v7761_v13 = vld [vmem:[#allocation3 + $0xa9] sm:$0xff]  ;;  %v18505_v11 = vld [vmem:[#allocation45_spill] sm:$0xff] }
 0x68c   : > { %7677 = vst.msk [vmem:[#allocation3 + $0xb3] sm:$0xff] %vm434_vm15, %v7636_v34  ;;  %v5405_v48 = vadd.f32 %v18506_v49, %v18505_v11 }
 0x68d   : > { %v7227_v16 = vadd.f32 %v16375_v18, %v7182_v45  ;;  %v6407_v39 = vpop.f32.mrf.mxu3  ;;  %v7712_v45 = vld [vmem:[#allocation3 + $0x70] sm:$0xff] }
 0x68e   : > { %v16400_v25 = vadd.f32 %v6407_v39, %v6104_v2  ;;  %v18507_v2 = vld [vmem:[#allocation36_spill] sm:$0xff] }
 0x68f   : > { %12164 = vmatmul.msk.f32.gmra.mxu2 %vm434_vm15, %v7761_v13  ;;  %vm7268_vm10 = vcmp.ge.f32.partialorder %v7227_v16, 0.0  ;;  %v7309_v41 = vmul.f32 0.1, %v7227_v16  ;;  %v16404_v63 = vpop.f32.mrf.mxu0  ;;  %v16410_v13 = vld [vmem:[#allocation3 + $0x6a] sm:$0xff]  ;;  %v5755_v39 = vadd.f32 %v18507_v2, %v5405_v48  ;;  %v6789_v48 = vadd.f32 %v16082_v42, %v16078_v57 }
 0x690   : > { %18504 = vst [vmem:[#allocation79_spill] sm:$0xff] %v16400_v25  ;;  %v7059_v34 = vpop.f32.mrf.mxu1  ;;  %v6846_v2 = vld [vmem:[#allocation2 + $0x15e] sm:$0xff] }
 0x691   : > { %v7350_v61 = vsel %vm7268_vm10, %v7227_v16, %v7309_v41  ;;  %v7138_v8 = vadd.f32 %v7059_v34, %v6788_v21  ;;  %v6105_v16 = vadd.f32 %v16224_v17, %v5755_v39  ;;  %v18510_v17 = vld [vmem:[#allocation43_spill] sm:$0xff]  ;;  %v7524_v39 = vpop.permute.xlu0 %7523 }
 0x692   : > { %v16406_v10 = vpop.f32.mrf.mxu2  ;;  %v7637_v25 = vmul.f32 %v7519_v3, %v7350_v61  ;;  %12199 = vmatmul.msk.f32.gmra.mxu3 %vm434_vm15, %v7712_v45  ;;  %12241 = vmatmul.msk.f32.gmra.mxu0 %vm434_vm15, %v16410_v13 }
 0x693   : > { %v7183_v46 = vmul.f32 %v16365_v23, %v7138_v8  ;;  %12138 = vmatmul.msk.f32.gmra.mxu1 %vm387_vm1, %v6845_v5  ;;  %v7762_v11 = vld [vmem:[#allocation3 + $0xb1] sm:$0xff]  ;;  %v18509_v8 = vld [vmem:[#allocation14_spill] sm:$0xff] }
 0x694   : > { %7678 = vst.msk [vmem:[#allocation3 + $0xbb] sm:$0xff] %vm434_vm15, %v7637_v25  ;;  %v5406_v45 = vadd.f32 %v18510_v17, %v18509_v8 }
 0x695   : > { %v7228_v21 = vadd.f32 %v16375_v18, %v7183_v46  ;;  %v6410_v41 = vpop.f32.mrf.mxu3 }
 0x696   : > { %v16422_v49 = vadd.f32 %v6410_v41, %v6105_v16  ;;  %v16432_v16 = vld [vmem:[#allocation3 + $0x72] sm:$0xff] }
 0x697   : > { %12165 = vmatmul.msk.f32.gmra.mxu2 %vm434_vm15, %v7762_v11  ;;  %vm7269_vm11 = vcmp.ge.f32.partialorder %v7228_v21, 0.0  ;;  %v7310_v34 = vmul.f32 0.1, %v7228_v21  ;;  %v16426_v3 = vpop.f32.mrf.mxu0  ;;  %v7713_v11 = vld [vmem:[#allocation3 + $0x78] sm:$0xff]  ;;  %v18511_v41 = vld [vmem:[#allocation52_spill] sm:$0xff] }
 0x698   : > { %18508 = vst [vmem:[#allocation82_spill] sm:$0xff] %v16422_v49  ;;  %v7062_v25 = vpop.f32.mrf.mxu1  ;;  %v5756_v49 = vadd.f32 %v18511_v41, %v5406_v45  ;;  %v6790_v45 = vadd.f32 %v16101_v58, %v16095_v55  ;;  %v7714_v41 = vld [vmem:[#allocation3 + $0x80] sm:$0xff] }
 0x699   : > { %v7351_v5 = vsel %vm7269_vm11, %v7228_v21, %v7310_v34  ;;  %v7139_v46 = vadd.f32 %v7062_v25, %v6789_v48 }
 0x69a   : > { %v16428_v61 = vpop.f32.mrf.mxu2  ;;  %v7638_v57 = vmul.f32 %v7524_v39, %v7351_v5  ;;  %12200 = vmatmul.msk.f32.gmra.mxu3 %vm434_vm15, %v7713_v11  ;;  %12242 = vmatmul.msk.f32.gmra.mxu0 %vm434_vm15, %v16432_v16  ;;  %v6106_v17 = vadd.f32 %v16252_v37, %v5756_v49  ;;  %v6847_v37 = vld [vmem:[#allocation2 + $0x166] sm:$0xff]  ;;  %v7529_v49 = vpop.permute.xlu1 %7528 }
 0x69b   : > { %v7184_v42 = vmul.f32 %v16365_v23, %v7139_v46  ;;  %12139 = vmatmul.msk.f32.gmra.mxu1 %vm387_vm1, %v6846_v2  ;;  %v7763_v8 = vld [vmem:[#allocation3 + $0xb9] sm:$0xff] }
 0x69c   : > { %7679 = vst.msk [vmem:[#allocation3 + $0xc3] sm:$0xff] %vm434_vm15, %v7638_v57  ;;  %v16452_v57 = vld [vmem:[#allocation3 + $0x7a] sm:$0xff] }
 0x69d   : > { %v7229_v21 = vadd.f32 %v16375_v18, %v7184_v42  ;;  %v6413_v48 = vpop.f32.mrf.mxu3 }
 0x69e   : > { %v16444_v34 = vadd.f32 %v6413_v48, %v6106_v17 }
 0x69f   : > { %12166 = vmatmul.msk.f32.gmra.mxu2 %vm434_vm15, %v7763_v8  ;;  %vm7270_vm0 = vcmp.ge.f32.partialorder %v7229_v21, 0.0  ;;  %v7311_v25 = vmul.f32 0.1, %v7229_v21  ;;  %v16448_v39 = vpop.f32.mrf.mxu0 }
 0x6a0   : > { %v7065_v5 = vpop.f32.mrf.mxu1 }
 0x6a1   : > { %v7352_v46 = vsel %vm7270_vm0, %v7229_v21, %v7311_v25  ;;  %v7140_v11 = vadd.f32 %v7065_v5, %v6790_v45  ;;  %v6791_v21 = vadd.f32 %v16118_v4, %v16114_v54 }
 0x6a2   : > { %v16450_v2 = vpop.f32.mrf.mxu2  ;;  %v7639_v42 = vmul.f32 %v7529_v49, %v7352_v46  ;;  %12201 = vmatmul.msk.f32.gmra.mxu3 %vm434_vm15, %v7714_v41  ;;  %12243 = vmatmul.msk.f32.gmra.mxu0 %vm434_vm15, %v16452_v57  ;;  %v16470_v41 = vld [vmem:[#allocation3 + $0x82] sm:$0xff] }
 0x6a3   : > { %v7185_v55 = vmul.f32 %v16365_v23, %v7140_v11  ;;  %12140 = vmatmul.msk.f32.gmra.mxu1 %vm387_vm1, %v6847_v37  ;;  %v7764_v58 = vld [vmem:[#allocation3 + $0xc1] sm:$0xff]  ;;  %v7534_v37 = vpop.permute.xlu2 %7533 }
 0x6a4   : > { %7680 = vst.msk [vmem:[#allocation3 + $0xcb] sm:$0xff] %vm434_vm15, %v7639_v42  ;;  %v7715_v11 = vld [vmem:[#allocation3 + $0x88] sm:$0xff] }
 0x6a5   : > { %v7230_v8 = vadd.f32 %v16375_v18, %v7185_v55  ;;  %v16462_v17 = vpop.f32.mrf.mxu3 }
 0x6a7   : > { %12167 = vmatmul.msk.f32.gmra.mxu2 %vm434_vm15, %v7764_v58  ;;  %vm7271_vm12 = vcmp.ge.f32.partialorder %v7230_v8, 0.0  ;;  %v7312_v48 = vmul.f32 0.1, %v7230_v8  ;;  %v16468_v25 = vpop.f32.mrf.mxu0 }
 0x6a8   : > { %v7068_v5 = vpop.f32.mrf.mxu1 }
 0x6a9   : > { %v7353_v49 = vsel %vm7271_vm12, %v7230_v8, %v7312_v48  ;;  %v7141_v46 = vadd.f32 %v7068_v5, %v6791_v21  ;;  %v6792_v21 = vadd.f32 %v16137_v50, %v16133_v43 }
 0x6aa   : > { %v16466_v45 = vpop.f32.mrf.mxu2  ;;  %v7640_v42 = vmul.f32 %v7534_v37, %v7353_v49  ;;  %12202 = vmatmul.msk.f32.gmra.mxu3 %vm434_vm15, %v7715_v11  ;;  %12244 = vmatmul.msk.f32.gmra.mxu0 %vm434_vm15, %v16470_v41  ;;  %v7539_v49 = vpop.permute.xlu0 %7538 }
 0x6ab   : > { %v7186_v54 = vmul.f32 %v16365_v23, %v7141_v46  ;;  %12271 = vmatmul.msk.f32.vlgmr.msrb.gmra.mxu1 %vm434_vm15, %v16160_v47  ;;  %v7765_v4 = vld [vmem:[#allocation3 + $0xc9] sm:$0xff] }
 0x6ac   : > { %7681 = vst.msk [vmem:[#allocation3 + $0xd3] sm:$0xff] %vm434_vm15, %v7640_v42  ;;  %v7716_v42 = vld [vmem:[#allocation3 + $0x90] sm:$0xff] }
 0x6ad   : > { %v7231_v55 = vadd.f32 %v16375_v18, %v7186_v54  ;;  %v8196_v58 = vpop.f32.mrf.mxu3 }
 0x6ae   : > { %v16482_v8 = vadd.f32 %v8196_v58, %v16302_v53 }
 0x6af   : > { %12168 = vmatmul.msk.f32.gmra.mxu2 %vm434_vm15, %v7765_v4  ;;  %vm7272_vm1 = vcmp.ge.f32.partialorder %v7231_v55, 0.0  ;;  %v7313_v48 = vmul.f32 0.1, %v7231_v55  ;;  %v16488_v37 = vpop.f32.mrf.mxu0  ;;  %v16490_v4 = vld [vmem:[#allocation3 + $0x8a] sm:$0xff] }
 0x6b0   : > { %v7071_v47 = vpop.f32.mrf.mxu1 }
 0x6b1   : > { %v7354_v46 = vsel %vm7272_vm1, %v7231_v55, %v7313_v48  ;;  %v7142_v11 = vadd.f32 %v7071_v47, %v6792_v21  ;;  %v6793_v21 = vadd.f32 %v16156_v12, %v16152_v7 }
 0x6b2   : > { %v16486_v5 = vpop.f32.mrf.mxu2  ;;  %v7641_v54 = vmul.f32 %v7539_v49, %v7354_v46  ;;  %12203 = vmatmul.msk.f32.gmra.mxu3 %vm434_vm15, %v7716_v42  ;;  %12245 = vmatmul.msk.f32.gmra.mxu0 %vm434_vm15, %v16490_v4  ;;  %v7544_v46 = vpop.permute.xlu1 %7543 }
 0x6b3   : > { %v7187_v43 = vmul.f32 %v16365_v23, %v7142_v11  ;;  %12272 = vmatmul.msk.f32.gmra.mxu1 %vm434_vm15, %v16182_v27  ;;  %v7766_v50 = vld [vmem:[#allocation3 + $0xd1] sm:$0xff] }
 0x6b4   : > { %7682 = vst.msk [vmem:[#allocation3 + $0xdb] sm:$0xff] %vm434_vm15, %v7641_v54  ;;  %v7717_v54 = vld [vmem:[#allocation3 + $0x98] sm:$0xff] }
 0x6b5   : > { %v7232_v53 = vadd.f32 %v16375_v18, %v7187_v43  ;;  %v8199_v55 = vpop.f32.mrf.mxu3 }
 0x6b6   : > { %v16502_v58 = vadd.f32 %v8199_v55, %v16330_v28 }
 0x6b7   : > { %12169 = vmatmul.msk.f32.gmra.mxu2 %vm434_vm15, %v7766_v50  ;;  %vm7273_vm13 = vcmp.ge.f32.partialorder %v7232_v53, 0.0  ;;  %v7314_v48 = vmul.f32 0.1, %v7232_v53  ;;  %v16508_v49 = vpop.f32.mrf.mxu0  ;;  %v16510_v50 = vld [vmem:[#allocation3 + $0x92] sm:$0xff] }
 0x6b8   : > { %v7074_v27 = vpop.f32.mrf.mxu1 }
 0x6b9   : > { %v7355_v11 = vsel %vm7273_vm13, %v7232_v53, %v7314_v48  ;;  %v7143_v42 = vadd.f32 %v7074_v27, %v6793_v21  ;;  %v6794_v21 = vadd.f32 %v16178_v56, %v16174_v32 }
 0x6ba   : > { %v16506_v47 = vpop.f32.mrf.mxu2  ;;  %v7642_v43 = vmul.f32 %v7544_v46, %v7355_v11  ;;  %12204 = vmatmul.msk.f32.gmra.mxu3 %vm434_vm15, %v7717_v54  ;;  %12246 = vmatmul.msk.f32.gmra.mxu0 %vm434_vm15, %v16510_v50  ;;  %v7549_v11 = vpop.permute.xlu2 %7548 }
 0x6bb   : > { %v7188_v7 = vmul.f32 %v16365_v23, %v7143_v42  ;;  %12273 = vmatmul.msk.f32.gmra.mxu1 %vm434_vm15, %v16204_v24  ;;  %v7767_v12 = vld [vmem:[#allocation3 + $0xd9] sm:$0xff] }
 0x6bc   : > { %7683 = vst.msk [vmem:[#allocation3 + $0xe3] sm:$0xff] %vm434_vm15, %v7642_v43  ;;  %v7718_v43 = vld [vmem:[#allocation3 + $0xa0] sm:$0xff] }
 0x6bd   : > { %v7233_v28 = vadd.f32 %v16375_v18, %v7188_v7  ;;  %v8202_v53 = vpop.f32.mrf.mxu3 }
 0x6be   : > { %v16522_v55 = vadd.f32 %v8202_v53, %v16352_v9 }
 0x6bf   : > { %12170 = vmatmul.msk.f32.gmra.mxu2 %vm434_vm15, %v7767_v12  ;;  %vm7274_vm2 = vcmp.ge.f32.partialorder %v7233_v28, 0.0  ;;  %v7315_v48 = vmul.f32 0.1, %v7233_v28  ;;  %v16528_v46 = vpop.f32.mrf.mxu0  ;;  %v16530_v12 = vld [vmem:[#allocation3 + $0x9a] sm:$0xff] }
 0x6c0   : > { %v7077_v24 = vpop.f32.mrf.mxu1 }
 0x6c1   : > { %v7356_v42 = vsel %vm7274_vm2, %v7233_v28, %v7315_v48  ;;  %v7144_v54 = vadd.f32 %v7077_v24, %v6794_v21  ;;  %v6795_v21 = vadd.f32 %v16200_v14, %v16194_v59 }
 0x6c2   : > { %v16526_v27 = vpop.f32.mrf.mxu2  ;;  %v7643_v7 = vmul.f32 %v7549_v11, %v7356_v42  ;;  %12205 = vmatmul.msk.f32.gmra.mxu3 %vm434_vm15, %v7718_v43  ;;  %12247 = vmatmul.msk.f32.gmra.mxu0 %vm434_vm15, %v16530_v12  ;;  %v7554_v42 = vpop.permute.xlu0 %7553 }
 0x6c3   : > { %v7189_v32 = vmul.f32 %v16365_v23, %v7144_v54  ;;  %12274 = vmatmul.msk.f32.gmra.mxu1 %vm434_vm15, %v16226_v20  ;;  %v7768_v56 = vld [vmem:[#allocation3 + $0xe1] sm:$0xff] }
 0x6c4   : > { %7684 = vst.msk [vmem:[#allocation3 + $0xeb] sm:$0xff] %vm434_vm15, %v7643_v7  ;;  %v7719_v7 = vld [vmem:[#allocation3 + $0xa8] sm:$0xff] }
 0x6c5   : > { %v7234_v9 = vadd.f32 %v16375_v18, %v7189_v32  ;;  %v8205_v28 = vpop.f32.mrf.mxu3 }
 0x6c6   : > { %v16542_v53 = vadd.f32 %v8205_v28, %v16384_v38 }
 0x6c7   : > { %12171 = vmatmul.msk.f32.gmra.mxu2 %vm434_vm15, %v7768_v56  ;;  %vm7275_vm3 = vcmp.ge.f32.partialorder %v7234_v9, 0.0  ;;  %v7316_v48 = vmul.f32 0.1, %v7234_v9  ;;  %v16548_v11 = vpop.f32.mrf.mxu0  ;;  %v16550_v56 = vld [vmem:[#allocation3 + $0xa2] sm:$0xff] }
 0x6c8   : > { %v7080_v20 = vpop.f32.mrf.mxu1 }
 0x6c9   : > { %v7357_v54 = vsel %vm7275_vm3, %v7234_v9, %v7316_v48  ;;  %v7145_v43 = vadd.f32 %v7080_v20, %v6795_v21  ;;  %v6796_v21 = vadd.f32 %v16220_v51, %v16216_v6 }
 0x6ca   : > { %v16546_v24 = vpop.f32.mrf.mxu2  ;;  %v7644_v32 = vmul.f32 %v7554_v42, %v7357_v54  ;;  %12206 = vmatmul.msk.f32.gmra.mxu3 %vm434_vm15, %v7719_v7  ;;  %12248 = vmatmul.msk.f32.gmra.mxu0 %vm434_vm15, %v16550_v56  ;;  %v7559_v54 = vpop.permute.xlu1 %7558 }
 0x6cb   : > { %v7190_v59 = vmul.f32 %v16365_v23, %v7145_v43  ;;  %12275 = vmatmul.msk.f32.gmra.mxu1 %vm434_vm15, %v16246_v60  ;;  %v7769_v14 = vld [vmem:[#allocation3 + $0xe9] sm:$0xff] }
 0x6cc   : > { %7685 = vst.msk [vmem:[#allocation3 + $0xf3] sm:$0xff] %vm434_vm15, %v7644_v32  ;;  %v7720_v32 = vld [vmem:[#allocation3 + $0xb0] sm:$0xff] }
 0x6cd   : > { %v7235_v38 = vadd.f32 %v16375_v18, %v7190_v59  ;;  %v8208_v9 = vpop.f32.mrf.mxu3 }
 0x6ce   : > { %v16562_v28 = vadd.f32 %v8208_v9, %v16406_v10 }
 0x6cf   : > { %12172 = vmatmul.msk.f32.gmra.mxu2 %vm434_vm15, %v7769_v14  ;;  %vm7276_vm4 = vcmp.ge.f32.partialorder %v7235_v38, 0.0  ;;  %v7317_v48 = vmul.f32 0.1, %v7235_v38  ;;  %v16568_v42 = vpop.f32.mrf.mxu0  ;;  %v16570_v14 = vld [vmem:[#allocation3 + $0xaa] sm:$0xff] }
 0x6d0   : > { %v7083_v60 = vpop.f32.mrf.mxu1 }
 0x6d1   : > { %v7358_v43 = vsel %vm7276_vm4, %v7235_v38, %v7317_v48  ;;  %v7146_v7 = vadd.f32 %v7083_v60, %v6796_v21  ;;  %v6797_v21 = vadd.f32 %v16242_v44, %v16238_v22 }
 0x6d2   : > { %v16566_v20 = vpop.f32.mrf.mxu2  ;;  %v7645_v59 = vmul.f32 %v7559_v54, %v7358_v43  ;;  %12207 = vmatmul.msk.f32.gmra.mxu3 %vm434_vm15, %v7720_v32  ;;  %12249 = vmatmul.msk.f32.gmra.mxu0 %vm434_vm15, %v16570_v14  ;;  %v7564_v43 = vpop.permute.xlu2 %7563 }
 0x6d3   : > { %v7191_v6 = vmul.f32 %v16365_v23, %v7146_v7  ;;  %12276 = vmatmul.msk.f32.gmra.mxu1 %vm434_vm15, %v16268_v30  ;;  %v7770_v51 = vld [vmem:[#allocation3 + $0xf1] sm:$0xff] }
 0x6d4   : > { %7686 = vst.msk [vmem:[#allocation3 + $0xfb] sm:$0xff] %vm434_vm15, %v7645_v59  ;;  %v7721_v59 = vld [vmem:[#allocation3 + $0xb8] sm:$0xff] }
 0x6d5   : > { %v7236_v10 = vadd.f32 %v16375_v18, %v7191_v6  ;;  %v8211_v38 = vpop.f32.mrf.mxu3 }
 0x6d6   : > { %v16582_v9 = vadd.f32 %v8211_v38, %v16428_v61 }
 0x6d7   : > { %12173 = vmatmul.msk.f32.gmra.mxu2 %vm434_vm15, %v7770_v51  ;;  %vm7277_vm5 = vcmp.ge.f32.partialorder %v7236_v10, 0.0  ;;  %v7318_v48 = vmul.f32 0.1, %v7236_v10  ;;  %v16588_v54 = vpop.f32.mrf.mxu0  ;;  %v16590_v51 = vld [vmem:[#allocation3 + $0xb2] sm:$0xff] }
 0x6d8   : > { %v7086_v30 = vpop.f32.mrf.mxu1 }
 0x6d9   : > { %v7359_v7 = vsel %vm7277_vm5, %v7236_v10, %v7318_v48  ;;  %v7147_v32 = vadd.f32 %v7086_v30, %v6797_v21  ;;  %v6798_v21 = vadd.f32 %v16264_v0, %v16260_v62 }
 0x6da   : > { %v16586_v60 = vpop.f32.mrf.mxu2  ;;  %v7646_v6 = vmul.f32 %v7564_v43, %v7359_v7  ;;  %12208 = vmatmul.msk.f32.gmra.mxu3 %vm434_vm15, %v7721_v59  ;;  %12250 = vmatmul.msk.f32.gmra.mxu0 %vm434_vm15, %v16590_v51  ;;  %v7569_v7 = vpop.permute.xlu0 %7568 }
 0x6db   : > { %v7192_v22 = vmul.f32 %v16365_v23, %v7147_v32  ;;  %12277 = vmatmul.msk.f32.gmra.mxu1 %vm434_vm15, %v16290_v40  ;;  %v7771_v44 = vld [vmem:[#allocation3 + $0xf9] sm:$0xff] }
 0x6dc   : > { %7687 = vst.msk [vmem:[#allocation3 + $0x103] sm:$0xff] %vm434_vm15, %v7646_v6  ;;  %v7722_v6 = vld [vmem:[#allocation3 + $0xc0] sm:$0xff] }
 0x6dd   : > { %v7237_v61 = vadd.f32 %v16375_v18, %v7192_v22  ;;  %v8214_v10 = vpop.f32.mrf.mxu3 }
 0x6de   : > { %v16602_v38 = vadd.f32 %v8214_v10, %v16450_v2 }
 0x6df   : > { %12174 = vmatmul.msk.f32.gmra.mxu2 %vm434_vm15, %v7771_v44  ;;  %vm7278_vm6 = vcmp.ge.f32.partialorder %v7237_v61, 0.0  ;;  %v7319_v48 = vmul.f32 0.1, %v7237_v61  ;;  %v16608_v43 = vpop.f32.mrf.mxu0  ;;  %v16610_v44 = vld [vmem:[#allocation3 + $0xba] sm:$0xff] }
 0x6e0   : > { %18512 = vst [vmem:[#allocation58_spill] sm:$0xff] %v16608_v43  ;;  %v7089_v40 = vpop.f32.mrf.mxu1  ;;  %v16630_v43 = vld [vmem:[#allocation3 + $0xc2] sm:$0xff] }
 0x6e1   : > { %v7360_v32 = vsel %vm7278_vm6, %v7237_v61, %v7319_v48  ;;  %v7148_v59 = vadd.f32 %v7089_v40, %v6798_v21  ;;  %v18513_v21 = vld [vmem:[#allocation59_spill] sm:$0xff] }
 0x6e2   : > { %v16606_v30 = vpop.f32.mrf.mxu2  ;;  %v7647_v22 = vmul.f32 %v7569_v7, %v7360_v32  ;;  %12209 = vmatmul.msk.f32.gmra.mxu3 %vm434_vm15, %v7722_v6  ;;  %12251 = vmatmul.msk.f32.gmra.mxu0 %vm434_vm15, %v16610_v44  ;;  %v6799_v48 = vadd.f32 %v18513_v21, %v16282_v31 }
 0x6e3   : > { %v7193_v62 = vmul.f32 %v16365_v23, %v7148_v59  ;;  %12278 = vmatmul.msk.f32.gmra.mxu1 %vm434_vm15, %v16312_v15  ;;  %v7772_v0 = vld [vmem:[#allocation3 + $0x101] sm:$0xff]  ;;  %v7574_v59 = vpop.permute.xlu1 %7573 }
 0x6e4   : > { %7688 = vst.msk [vmem:[#allocation3 + $0x10b] sm:$0xff] %vm434_vm15, %v7647_v22 }
 0x6e5   : > { %v7238_v2 = vadd.f32 %v16375_v18, %v7193_v62  ;;  %v8217_v61 = vpop.f32.mrf.mxu3 }
 0x6e6   : > { %v16622_v10 = vadd.f32 %v8217_v61, %v16466_v45 }
 0x6e7   : > { %12175 = vmatmul.msk.f32.gmra.mxu2 %vm434_vm15, %v7772_v0  ;;  %vm7279_vm7 = vcmp.ge.f32.partialorder %v7238_v2, 0.0  ;;  %v7320_v40 = vmul.f32 0.1, %v7238_v2  ;;  %v16628_v32 = vpop.f32.mrf.mxu0  ;;  %v7723_v0 = vld [vmem:[#allocation3 + $0xc8] sm:$0xff] }
 0x6e8   : > { %v7092_v15 = vpop.f32.mrf.mxu1 }
 0x6e9   : > { %v7361_v6 = vsel %vm7279_vm7, %v7238_v2, %v7320_v40  ;;  %v7149_v22 = vadd.f32 %v7092_v15, %v6799_v48  ;;  %v6800_v48 = vadd.f32 %v16308_v36, %v16304_v29 }
 0x6ea   : > { %v16626_v7 = vpop.f32.mrf.mxu2  ;;  %v7648_v62 = vmul.f32 %v7574_v59, %v7361_v6  ;;  %12210 = vmatmul.msk.f32.gmra.mxu3 %vm434_vm15, %v7723_v0  ;;  %12252 = vmatmul.msk.f32.gmra.mxu0 %vm434_vm15, %v16630_v43  ;;  %v7579_v6 = vpop.permute.xlu2 %7578 }
 0x6eb   : > { %v7194_v31 = vmul.f32 %v16365_v23, %v7149_v22  ;;  %12279 = vmatmul.msk.f32.gmra.mxu1 %vm434_vm15, %v16334_v33  ;;  %v7773_v45 = vld [vmem:[#allocation3 + $0x109] sm:$0xff] }
 0x6ec   : > { %7689 = vst.msk [vmem:[#allocation3 + $0x113] sm:$0xff] %vm434_vm15, %v7648_v62  ;;  %v7724_v62 = vld [vmem:[#allocation3 + $0xd0] sm:$0xff] }
 0x6ed   : > { %v7239_v2 = vadd.f32 %v16375_v18, %v7194_v31  ;;  %v8220_v61 = vpop.f32.mrf.mxu3 }
 0x6ee   : > { %v16642_v21 = vadd.f32 %v8220_v61, %v16486_v5 }
 0x6ef   : > { %12176 = vmatmul.msk.f32.gmra.mxu2 %vm434_vm15, %v7773_v45  ;;  %vm7280_vm8 = vcmp.ge.f32.partialorder %v7239_v2, 0.0  ;;  %v7321_v40 = vmul.f32 0.1, %v7239_v2  ;;  %v16648_v59 = vpop.f32.mrf.mxu0  ;;  %v16650_v45 = vld [vmem:[#allocation3 + $0xca] sm:$0xff] }
 0x6f0   : > { %18514 = vst [vmem:[#allocation65_spill] sm:$0xff] %v16648_v59  ;;  %v7095_v33 = vpop.f32.mrf.mxu1  ;;  %v16670_v59 = vld [vmem:[#allocation3 + $0xd2] sm:$0xff] }
 0x6f1   : > { %v7362_v22 = vsel %vm7280_vm8, %v7239_v2, %v7321_v40  ;;  %v7150_v0 = vadd.f32 %v7095_v33, %v6800_v48  ;;  %v18515_v48 = vld [vmem:[#allocation77_spill] sm:$0xff] }
 0x6f2   : > { %v16646_v15 = vpop.f32.mrf.mxu2  ;;  %v7649_v31 = vmul.f32 %v7579_v6, %v7362_v22  ;;  %12211 = vmatmul.msk.f32.gmra.mxu3 %vm434_vm15, %v7724_v62  ;;  %12253 = vmatmul.msk.f32.gmra.mxu0 %vm434_vm15, %v16650_v45  ;;  %v6801_v40 = vadd.f32 %v16328_v19, %v18515_v48 }
 0x6f3   : > { %v7195_v29 = vmul.f32 %v16365_v23, %v7150_v0  ;;  %12280 = vmatmul.msk.f32.gmra.mxu1 %vm434_vm15, %v16356_v35  ;;  %v7774_v36 = vld [vmem:[#allocation3 + $0x111] sm:$0xff]  ;;  %v7584_v0 = vpop.permute.xlu0 %7583 }
 0x6f4   : > { %7690 = vst.msk [vmem:[#allocation3 + $0x11b] sm:$0xff] %vm434_vm15, %v7649_v31 }
 0x6f5   : > { %v7240_v5 = vadd.f32 %v16375_v18, %v7195_v29  ;;  %v8223_v2 = vpop.f32.mrf.mxu3 }
 0x6f6   : > { %v16662_v61 = vadd.f32 %v8223_v2, %v16506_v47 }
 0x6f7   : > { %12177 = vmatmul.msk.f32.gmra.mxu2 %vm434_vm15, %v7774_v36  ;;  %vm7281_vm9 = vcmp.ge.f32.partialorder %v7240_v5, 0.0  ;;  %v7322_v33 = vmul.f32 0.1, %v7240_v5  ;;  %v16668_v22 = vpop.f32.mrf.mxu0  ;;  %v7725_v36 = vld [vmem:[#allocation3 + $0xd8] sm:$0xff] }
 0x6f8   : > { %18516 = vst [vmem:[#allocation61_spill] sm:$0xff] %v16668_v22  ;;  %v7098_v35 = vpop.f32.mrf.mxu1  ;;  %v16690_v22 = vld [vmem:[#allocation3 + $0xda] sm:$0xff] }
 0x6f9   : > { %v7363_v62 = vsel %vm7281_vm9, %v7240_v5, %v7322_v33  ;;  %v7151_v31 = vadd.f32 %v7098_v35, %v6801_v40  ;;  %v18517_v40 = vld [vmem:[#allocation55_spill] sm:$0xff] }
 0x6fa   : > { %v16666_v6 = vpop.f32.mrf.mxu2  ;;  %v7650_v29 = vmul.f32 %v7584_v0, %v7363_v62  ;;  %12212 = vmatmul.msk.f32.gmra.mxu3 %vm434_vm15, %v7725_v36  ;;  %12254 = vmatmul.msk.f32.gmra.mxu0 %vm434_vm15, %v16670_v59  ;;  %v6802_v33 = vadd.f32 %v18517_v40, %v16346_v1 }
 0x6fb   : > { %v7196_v19 = vmul.f32 %v16365_v23, %v7151_v31  ;;  %12281 = vmatmul.msk.f32.gmra.mxu1 %vm434_vm15, %v16388_v52  ;;  %v7775_v47 = vld [vmem:[#allocation3 + $0x119] sm:$0xff]  ;;  %v7589_v31 = vpop.permute.xlu1 %7588 }
 0x6fc   : > { %7691 = vst.msk [vmem:[#allocation3 + $0x123] sm:$0xff] %vm434_vm15, %v7650_v29 }
 0x6fd   : > { %v7241_v5 = vadd.f32 %v16375_v18, %v7196_v19  ;;  %v8226_v2 = vpop.f32.mrf.mxu3 }
 0x6fe   : > { %v16682_v48 = vadd.f32 %v8226_v2, %v16526_v27 }
 0x6ff   : > { %12178 = vmatmul.msk.f32.gmra.mxu2 %vm434_vm15, %v7775_v47  ;;  %vm7282_vm10 = vcmp.ge.f32.partialorder %v7241_v5, 0.0  ;;  %v7323_v35 = vmul.f32 0.1, %v7241_v5  ;;  %v16688_v62 = vpop.f32.mrf.mxu0  ;;  %v7726_v47 = vld [vmem:[#allocation3 + $0xe0] sm:$0xff] }
 0x700   : > { %18518 = vst [vmem:[#allocation67_spill] sm:$0xff] %v16688_v62  ;;  %v7101_v52 = vpop.f32.mrf.mxu1  ;;  %v16710_v62 = vld [vmem:[#allocation3 + $0xe2] sm:$0xff] }
 0x701   : > { %v7364_v36 = vsel %vm7282_vm10, %v7241_v5, %v7323_v35  ;;  %v7152_v29 = vadd.f32 %v7101_v52, %v6802_v33  ;;  %v18519_v33 = vld [vmem:[#allocation62_spill] sm:$0xff] }
 0x702   : > { %v16686_v0 = vpop.f32.mrf.mxu2  ;;  %v7651_v19 = vmul.f32 %v7589_v31, %v7364_v36  ;;  %12213 = vmatmul.msk.f32.gmra.mxu3 %vm434_vm15, %v7726_v47  ;;  %12255 = vmatmul.msk.f32.gmra.mxu0 %vm434_vm15, %v16690_v22  ;;  %v6803_v35 = vadd.f32 %v16382_v26, %v18519_v33 }
 0x703   : > { %v7197_v1 = vmul.f32 %v16365_v23, %v7152_v29  ;;  %12282 = vmatmul.msk.f32.gmra.mxu1 %vm434_vm15, %v16410_v13  ;;  %v7776_v27 = vld [vmem:[#allocation3 + $0x121] sm:$0xff]  ;;  %v7594_v29 = vpop.permute.xlu2 %7593 }
 0x704   : > { %7692 = vst.msk [vmem:[#allocation3 + $0x12b] sm:$0xff] %vm434_vm15, %v7651_v19 }
 0x705   : > { %v7242_v5 = vadd.f32 %v16375_v18, %v7197_v1  ;;  %v8229_v2 = vpop.f32.mrf.mxu3 }
 0x706   : > { %v16702_v40 = vadd.f32 %v8229_v2, %v16546_v24  ;;  %v12484_v2 = vld [vmem:[%s18026_s7 + $0x10] sm:$0x3] }
 0x707   : > { %12179 = vmatmul.msk.f32.gmra.mxu2 %vm434_vm15, %v7776_v27  ;;  %vm7283_vm11 = vcmp.ge.f32.partialorder %v7242_v5, 0.0  ;;  %v7324_v52 = vmul.f32 0.1, %v7242_v5  ;;  %v16708_v36 = vpop.f32.mrf.mxu0  ;;  %v7727_v27 = vld [vmem:[#allocation3 + $0xe8] sm:$0xff] }
 0x708   : > { %v7104_v13 = vpop.f32.mrf.mxu1  ;;  %12485 = vmatpush.msk.msra.mxu2 %vm7906_vm14, %v12484_v2  ;;  %v16742_v2 = vld [vmem:[#allocation3 + $0xea] sm:$0xff] }
 0x709   : > { %v7365_v47 = vsel %vm7283_vm11, %v7242_v5, %v7324_v52  ;;  %v7153_v19 = vadd.f32 %v7104_v13, %v6803_v35  ;;  %v12355_v5 = vld [vmem:[%s18026_s7 + $0xa] sm:$0x3]  ;;  %v12398_v52 = vld [vmem:[%s18026_s7 + $0xc] sm:$0x3]  ;;  %v18521_v13 = vld [vmem:[#allocation79_spill] sm:$0xff] }
 0x70a   : > { %v16706_v31 = vpop.f32.mrf.mxu2  ;;  %v7652_v1 = vmul.f32 %v7594_v29, %v7365_v47  ;;  %12214 = vmatmul.msk.f32.gmra.mxu3 %vm434_vm15, %v7727_v27  ;;  %12256 = vmatmul.msk.f32.gmra.mxu0 %vm434_vm15, %v16710_v62  ;;  %v6804_v29 = vadd.f32 %v16404_v63, %v18521_v13 }
 0x70b   : > { %v7198_v26 = vmul.f32 %v16365_v23, %v7153_v19  ;;  %12283 = vmatmul.msk.f32.gmra.mxu1 %vm434_vm15, %v16432_v16  ;;  %v7777_v24 = vld [vmem:[#allocation3 + $0x129] sm:$0xff]  ;;  %12356 = vmatpush.msk.msra.mxu3 %vm7906_vm14, %v12355_v5 }
 0x70c   : > { %7693 = vst.msk [vmem:[#allocation3 + $0x133] sm:$0xff] %vm434_vm15, %v7652_v1  ;;  %12399 = vmatpush.msk.msra.mxu0 %vm7906_vm14, %v12398_v52  ;;  %v7728_v5 = vld [vmem:[#allocation3 + $0xf0] sm:$0xff] }
 0x70d   : > { %v7243_v33 = vadd.f32 %v16375_v18, %v7198_v26  ;;  %v8232_v35 = vpop.f32.mrf.mxu3  ;;  %v7599_v26 = vpop.permute.xlu0 %7598 }
 0x70e   : > { %v16730_v16 = vadd.f32 %v8232_v35, %v16566_v20  ;;  %v12441_v35 = vld [vmem:[%s18026_s7 + $0xe] sm:$0x3] }
 0x70f   : > { %12180 = vmatmul.msk.f32.gmra.mxu2 %vm434_vm15, %v7777_v24  ;;  %vm7284_vm0 = vcmp.ge.f32.partialorder %v7243_v33, 0.0  ;;  %v7325_v47 = vmul.f32 0.1, %v7243_v33  ;;  %v16739_v27 = vpop.f32.mrf.mxu0  ;;  %12442 = vmatpush.msk.msra.mxu1 %vm7906_vm14, %v12441_v35  ;;  %v7729_v35 = vld [vmem:[#allocation3 + $0xf8] sm:$0xff] }
 0x710   : > { %18520 = vst [vmem:[#allocation63_spill] sm:$0xff] %v16730_v16  ;;  %v7107_v1 = vpop.f32.mrf.mxu1  ;;  %v16766_v16 = vld [vmem:[#allocation3 + $0xf2] sm:$0xff] }
 0x711   : > { %18522 = vst [vmem:[#allocation70_spill] sm:$0xff] %v16739_v27  ;;  %v7366_v24 = vsel %vm7284_vm0, %v7243_v33, %v7325_v47  ;;  %v7154_v20 = vadd.f32 %v7107_v1, %v6804_v29  ;;  %v18523_v1 = vld [vmem:[#allocation82_spill] sm:$0xff] }
 0x712   : > { %v16737_v19 = vpop.f32.mrf.mxu2  ;;  %v7653_v63 = vmul.f32 %v7599_v26, %v7366_v24  ;;  %12215 = vmatmul.msk.f32.gmra.mxu3 %vm434_vm15, %v7728_v5  ;;  %12257 = vmatmul.msk.f32.gmra.mxu0 %vm434_vm15, %v16742_v2  ;;  %v6805_v26 = vadd.f32 %v16426_v3, %v18523_v1 }
 0x713   : > { %v7199_v13 = vmul.f32 %v16365_v23, %v7154_v20  ;;  %12284 = vmatmul.msk.f32.gmra.mxu1 %vm434_vm15, %v16452_v57  ;;  %v7778_v33 = vld [vmem:[#allocation3 + $0x131] sm:$0xff] }
 0x714   : > { %7694 = vst.msk [vmem:[#allocation3 + $0x13b] sm:$0xff] %vm434_vm15, %v7653_v63  ;;  %v7604_v63 = vpop.permute.xlu1 %7603 }
 0x715   : > { %v7244_v52 = vadd.f32 %v16375_v18, %v7199_v13  ;;  %v8235_v29 = vpop.f32.mrf.mxu3 }
 0x716   : > { %v16758_v47 = vadd.f32 %v8235_v29, %v16586_v60 }
 0x717   : > { %12181 = vmatmul.msk.f32.gmra.mxu2 %vm434_vm15, %v7778_v33  ;;  %vm7285_vm12 = vcmp.ge.f32.partialorder %v7244_v52, 0.0  ;;  %v7326_v24 = vmul.f32 0.1, %v7244_v52  ;;  %v16764_v57 = vpop.f32.mrf.mxu0 }
 0x718   : > { %18524 = vst [vmem:[#allocation66_spill] sm:$0xff] %v16764_v57  ;;  %v7110_v5 = vpop.f32.mrf.mxu1 }
 0x719   : > { %v7367_v33 = vsel %vm7285_vm12, %v7244_v52, %v7326_v24  ;;  %v7155_v27 = vadd.f32 %v7110_v5, %v6805_v26  ;;  %v6806_v26 = vadd.f32 %v16448_v39, %v16444_v34 }
 0x71a   : > { %v16762_v20 = vpop.f32.mrf.mxu2  ;;  %v7654_v13 = vmul.f32 %v7604_v63, %v7367_v33  ;;  %12216 = vmatmul.msk.f32.gmra.mxu3 %vm434_vm15, %v7729_v35  ;;  %12258 = vmatmul.msk.f32.gmra.mxu0 %vm434_vm15, %v16766_v16  ;;  %v7609_v63 = vpop.permute.xlu2 %7608 }
 0x71b   : > { %v7200_v3 = vmul.f32 %v16365_v23, %v7155_v27  ;;  %12285 = vmatmul.msk.f32.gmra.mxu1 %vm434_vm15, %v16470_v41  ;;  %v7779_v60 = vld [vmem:[#allocation3 + $0x139] sm:$0xff] }
 0x71c   : > { %7695 = vst.msk [vmem:[#allocation3 + $0x143] sm:$0xff] %vm434_vm15, %v7654_v13  ;;  %v7730_v13 = vld [vmem:[#allocation3 + $0x100] sm:$0xff] }
 0x71d   : > { %v7245_v52 = vadd.f32 %v16375_v18, %v7200_v3  ;;  %v8238_v29 = vpop.f32.mrf.mxu3 }
 0x71e   : > { %v16778_v1 = vadd.f32 %v8238_v29, %v16606_v30 }
 0x71f   : > { %12182 = vmatmul.msk.f32.gmra.mxu2 %vm434_vm15, %v7779_v60  ;;  %vm7286_vm14 = vcmp.ge.f32.partialorder %v7245_v52, 0.0  ;;  %v7327_v24 = vmul.f32 0.1, %v7245_v52  ;;  %v16784_v5 = vpop.f32.mrf.mxu0  ;;  %v16786_v60 = vld [vmem:[#allocation3 + $0xfa] sm:$0xff] }
 0x720   : > { %18525 = vst [vmem:[#allocation74_spill] sm:$0xff] %v16778_v1  ;;  %v7113_v41 = vpop.f32.mrf.mxu1  ;;  %v9716_v1 = vld [vmem:[#allocation3 + $0x24] sm:$0xff] }
 0x721   : > { %18526 = vst [vmem:[#allocation69_spill] sm:$0xff] %v16784_v5  ;;  %v7368_v33 = vsel %vm7286_vm14, %v7245_v52, %v7327_v24  ;;  %v7156_v35 = vadd.f32 %v7113_v41, %v6806_v26  ;;  %v9366_v5 = vld [vmem:[#allocation3 + $0x14] sm:$0xff] }
 0x722   : > { %v16782_v27 = vpop.f32.mrf.mxu2  ;;  %v7655_v3 = vmul.f32 %v7609_v63, %v7368_v33  ;;  %12217 = vmatmul.msk.f32.gmra.mxu3 %vm434_vm15, %v7730_v13  ;;  %12259 = vmatmul.msk.f32.gmra.mxu0 %vm434_vm15, %v16786_v60  ;;  %v7731_v33 = vld [vmem:[#allocation3 + $0x108] sm:$0xff] }
 0x723   : > { %v7201_v34 = vmul.f32 %v16365_v23, %v7156_v35  ;;  %12286 = vmatmul.msk.f32.gmra.mxu1 %vm434_vm15, %v16490_v4  ;;  %v7780_v39 = vld [vmem:[#allocation3 + $0x141] sm:$0xff]  ;;  %v7614_v4 = vpop.permute.xlu0 %7613 }
 0x724   : > { %7696 = vst.msk [vmem:[#allocation3 + $0x14b] sm:$0xff] %vm434_vm15, %v7655_v3  ;;  %v16806_v35 = vld [vmem:[#allocation3 + $0x102] sm:$0xff] }
 0x725   : > { %v7246_v30 = vadd.f32 %v16375_v18, %v7201_v34  ;;  %v8241_v52 = vpop.f32.mrf.mxu3  ;;  %v9016_v18 = vld [vmem:[#allocation3 + $0x13] sm:$0xff] }
 0x726   : > { %v16798_v29 = vadd.f32 %v8241_v52, %v16626_v7  ;;  %v7732_v52 = vld [vmem:[#allocation3 + $0x110] sm:$0xff] }
 0x727   : > { %12183 = vmatmul.msk.f32.gmra.mxu2 %vm434_vm15, %v7780_v39  ;;  %vm7287_vm1 = vcmp.ge.f32.partialorder %v7246_v30, 0.0  ;;  %v7328_v26 = vmul.f32 0.1, %v7246_v30  ;;  %v16802_v41 = vpop.f32.mrf.mxu0 }
 0x728   : > { %18527 = vst [vmem:[#allocation78_spill] sm:$0xff] %v16798_v29  ;;  %v16804_v23 = vpop.f32.mrf.mxu1  ;;  %v16926_v29 = vld [vmem:[#allocation3 + $0x13a] sm:$0xff] }
 0x729   : > { %18528 = vst [vmem:[#allocation71_spill] sm:$0xff] %v16802_v41  ;;  %v7369_v63 = vsel %vm7287_vm1, %v7246_v30, %v7328_v26  ;;  %v16824_v26 = vld [vmem:[#allocation3 + $0x10a] sm:$0xff]  ;;  %v16909_v41 = vld [vmem:[#allocation3 + $0x132] sm:$0xff] }
 0x72a   : > { %v16800_v24 = vpop.f32.mrf.mxu2  ;;  %v7656_v13 = vmul.f32 %v7614_v4, %v7369_v63  ;;  %12218 = vmatmul.msk.f32.gmra.mxu3 %vm434_vm15, %v7731_v33  ;;  %12260 = vmatmul.msk.f32.gmra.mxu0 %vm434_vm15, %v16806_v35 }
 0x72b   : > { %12287 = vmatmul.msk.f32.gmra.mxu1 %vm434_vm15, %v16510_v50  ;;  %v9017_v50 = vld [vmem:[#allocation3 + $0x1b] sm:$0xff] }
 0x72c   : > { %7697 = vst.msk [vmem:[#allocation3 + $0x153] sm:$0xff] %vm434_vm15, %v7656_v13 }
 0x72d   : > { %v8244_v7 = vpop.f32.mrf.mxu3 }
 0x72e   : > { %v16816_v3 = vadd.f32 %v8244_v7, %v16646_v15  ;;  %v16841_v7 = vld [vmem:[#allocation3 + $0x112] sm:$0xff] }
 0x72f   : > { %12314 = vmatmul.msk.f32.vlgmr.msrb.gmra.mxu2 %vm434_vm15, %v9016_v18  ;;  %v16820_v39 = vpop.f32.mrf.mxu0  ;;  %v7733_v18 = vld [vmem:[#allocation3 + $0x118] sm:$0xff] }
 0x730   : > { %18529 = vst [vmem:[#allocation83_spill] sm:$0xff] %v16816_v3  ;;  %v16822_v30 = vpop.f32.mrf.mxu1  ;;  %v16892_v3 = vld [vmem:[#allocation3 + $0x12a] sm:$0xff] }
 0x731   : > { %18530 = vst [vmem:[#allocation75_spill] sm:$0xff] %v16820_v39  ;;  %v16875_v39 = vld [vmem:[#allocation3 + $0x122] sm:$0xff] }
 0x732   : > { %v16818_v34 = vpop.f32.mrf.mxu2  ;;  %12219 = vmatmul.msk.f32.gmra.mxu3 %vm434_vm15, %v7732_v52  ;;  %12261 = vmatmul.msk.f32.gmra.mxu0 %vm434_vm15, %v16824_v26 }
 0x733   : > { %12288 = vmatmul.msk.f32.gmra.mxu1 %vm434_vm15, %v16530_v12  ;;  %v9018_v12 = vld [vmem:[#allocation3 + $0x23] sm:$0xff] }
 0x735   : > { %v8247_v15 = vpop.f32.mrf.mxu3 }
 0x736   : > { %v16833_v4 = vadd.f32 %v8247_v15, %v16666_v6 }
 0x737   : > { %12315 = vmatmul.msk.f32.gmra.mxu2 %vm434_vm15, %v9017_v50  ;;  %v16837_v33 = vpop.f32.mrf.mxu0 }
 0x738   : > { %18531 = vst [vmem:[#allocation81_spill] sm:$0xff] %v16833_v4  ;;  %v16839_v13 = vpop.f32.mrf.mxu1  ;;  %v16858_v4 = vld [vmem:[#allocation3 + $0x11a] sm:$0xff] }
 0x739   : > { %18532 = vst [vmem:[#allocation85_spill] sm:$0xff] %v16837_v33 }
 0x73a   : > { %v16835_v63 = vpop.f32.mrf.mxu2  ;;  %12220 = vmatmul.msk.f32.gmra.mxu3 %vm434_vm15, %v7733_v18  ;;  %12262 = vmatmul.msk.f32.gmra.mxu0 %vm434_vm15, %v16841_v7  ;;  %v7734_v18 = vld [vmem:[#allocation3 + $0x120] sm:$0xff] }
 0x73b   : > { %12289 = vmatmul.msk.f32.gmra.mxu1 %vm434_vm15, %v16550_v56  ;;  %v9019_v56 = vld [vmem:[#allocation3 + $0x2b] sm:$0xff] }
 0x73d   : > { %v8250_v6 = vpop.f32.mrf.mxu3 }
 0x73e   : > { %v16850_v52 = vadd.f32 %v8250_v6, %v16686_v0 }
 0x73f   : > { %12316 = vmatmul.msk.f32.gmra.mxu2 %vm434_vm15, %v9018_v12  ;;  %v16854_v15 = vpop.f32.mrf.mxu0 }
 0x740   : > { %18533 = vst [vmem:[#allocation86_spill] sm:$0xff] %v16850_v52  ;;  %v16856_v33 = vpop.f32.mrf.mxu1 }
 0x741   : > { %18534 = vst [vmem:[#allocation88_spill] sm:$0xff] %v16854_v15 }
 0x742   : > { %v16852_v50 = vpop.f32.mrf.mxu2  ;;  %12221 = vmatmul.msk.f32.gmra.mxu3 %vm434_vm15, %v7734_v18  ;;  %12263 = vmatmul.msk.f32.gmra.mxu0 %vm434_vm15, %v16858_v4  ;;  %v7735_v18 = vld [vmem:[#allocation3 + $0x128] sm:$0xff] }
 0x743   : > { %12290 = vmatmul.msk.f32.gmra.mxu1 %vm434_vm15, %v16570_v14  ;;  %v9020_v14 = vld [vmem:[#allocation3 + $0x33] sm:$0xff] }
 0x745   : > { %v8253_v0 = vpop.f32.mrf.mxu3 }
 0x746   : > { %v16867_v12 = vadd.f32 %v8253_v0, %v16706_v31 }
 0x747   : > { %12317 = vmatmul.msk.f32.gmra.mxu2 %vm434_vm15, %v9019_v56  ;;  %v16871_v15 = vpop.f32.mrf.mxu0 }
 0x748   : > { %18535 = vst [vmem:[#allocation90_spill] sm:$0xff] %v16867_v12  ;;  %v16873_v52 = vpop.f32.mrf.mxu1 }
 0x749   : > { %18536 = vst [vmem:[#allocation49_spill] sm:$0xff] %v16871_v15 }
 0x74a   : > { %v16869_v6 = vpop.f32.mrf.mxu2  ;;  %12222 = vmatmul.msk.f32.gmra.mxu3 %vm434_vm15, %v7735_v18  ;;  %12264 = vmatmul.msk.f32.gmra.mxu0 %vm434_vm15, %v16875_v39  ;;  %v7736_v18 = vld [vmem:[#allocation3 + $0x130] sm:$0xff] }
 0x74b   : > { %12291 = vmatmul.msk.f32.gmra.mxu1 %vm434_vm15, %v16590_v51  ;;  %v9021_v51 = vld [vmem:[#allocation3 + $0x3b] sm:$0xff] }
 0x74d   : > { %v8256_v31 = vpop.f32.mrf.mxu3 }
 0x74e   : > { %v16884_v56 = vadd.f32 %v8256_v31, %v16737_v19 }
 0x74f   : > { %12318 = vmatmul.msk.f32.gmra.mxu2 %vm434_vm15, %v9020_v14  ;;  %v16888_v15 = vpop.f32.mrf.mxu0 }
 0x750   : > { %18537 = vst [vmem:[#allocation19_spill] sm:$0xff] %v16884_v56  ;;  %v16890_v12 = vpop.f32.mrf.mxu1 }
 0x751   : > { %18538 = vst [vmem:[#allocation91_spill] sm:$0xff] %v16888_v15 }
 0x752   : > { %v16886_v0 = vpop.f32.mrf.mxu2  ;;  %12223 = vmatmul.msk.f32.gmra.mxu3 %vm434_vm15, %v7736_v18  ;;  %12265 = vmatmul.msk.f32.gmra.mxu0 %vm434_vm15, %v16892_v3  ;;  %v7737_v18 = vld [vmem:[#allocation3 + $0x138] sm:$0xff] }
 0x753   : > { %12292 = vmatmul.msk.f32.gmra.mxu1 %vm434_vm15, %v16610_v44  ;;  %v9022_v44 = vld [vmem:[#allocation3 + $0x43] sm:$0xff] }
 0x755   : > { %v8259_v19 = vpop.f32.mrf.mxu3 }
 0x756   : > { %v16901_v14 = vadd.f32 %v8259_v19, %v16762_v20 }
 0x757   : > { %12319 = vmatmul.msk.f32.gmra.mxu2 %vm434_vm15, %v9021_v51  ;;  %v16905_v15 = vpop.f32.mrf.mxu0 }
 0x758   : > { %18539 = vst [vmem:[#allocation56_spill] sm:$0xff] %v16901_v14  ;;  %v16907_v56 = vpop.f32.mrf.mxu1 }
 0x759   : > { %18540 = vst [vmem:[#allocation13_spill] sm:$0xff] %v16905_v15 }
 0x75a   : > { %v16903_v31 = vpop.f32.mrf.mxu2  ;;  %12224 = vmatmul.msk.f32.gmra.mxu3 %vm434_vm15, %v7737_v18  ;;  %12266 = vmatmul.msk.f32.gmra.mxu0 %vm434_vm15, %v16909_v41  ;;  %v7738_v18 = vld [vmem:[#allocation3 + $0x140] sm:$0xff] }
 0x75b   : > { %12293 = vmatmul.msk.f32.gmra.mxu1 %vm434_vm15, %v16630_v43  ;;  %v9023_v43 = vld [vmem:[#allocation3 + $0x4b] sm:$0xff] }
 0x75d   : > { %v8262_v20 = vpop.f32.mrf.mxu3 }
 0x75e   : > { %v16918_v51 = vadd.f32 %v8262_v20, %v16782_v27 }
 0x75f   : > { %12320 = vmatmul.msk.f32.gmra.mxu2 %vm434_vm15, %v9022_v44  ;;  %v16922_v15 = vpop.f32.mrf.mxu0 }
 0x760   : > { %18541 = vst [vmem:[#allocation48_spill] sm:$0xff] %v16918_v51  ;;  %v16924_v14 = vpop.f32.mrf.mxu1 }
 0x761   : > { %18542 = vst [vmem:[#allocation60_spill] sm:$0xff] %v16922_v15 }
 0x762   : > { %v16920_v19 = vpop.f32.mrf.mxu2  ;;  %12225 = vmatmul.msk.f32.gmra.mxu3 %vm434_vm15, %v7738_v18  ;;  %12267 = vmatmul.msk.f32.gmra.mxu0 %vm434_vm15, %v16926_v29  ;;  %v16943_v18 = vld [vmem:[#allocation3 + $0x142] sm:$0xff] }
 0x763   : > { %12294 = vmatmul.msk.f32.gmra.mxu1 %vm434_vm15, %v16650_v45  ;;  %v9024_v45 = vld [vmem:[#allocation3 + $0x53] sm:$0xff] }
 0x765   : > { %v8265_v27 = vpop.f32.mrf.mxu3 }
 0x766   : > { %v16935_v44 = vadd.f32 %v8265_v27, %v16800_v24 }
 0x767   : > { %12321 = vmatmul.msk.f32.gmra.mxu2 %vm434_vm15, %v9023_v43  ;;  %v16939_v15 = vpop.f32.mrf.mxu0 }
 0x768   : > { %18543 = vst [vmem:[#allocation64_spill] sm:$0xff] %v16935_v44  ;;  %v16941_v51 = vpop.f32.mrf.mxu1  ;;  %v9367_v44 = vld [vmem:[#allocation3 + $0x1c] sm:$0xff] }
 0x769   : > { %18544 = vst [vmem:[#allocation15_spill] sm:$0xff] %v16939_v15 }
 0x76a   : > { %v16937_v20 = vpop.f32.mrf.mxu2  ;;  %12268 = vmatmul.msk.f32.gmra.mxu0 %vm434_vm15, %v16943_v18  ;;  %12357 = vmatmul.msk.f32.vlgmr.msra.gmra.mxu3 %vm434_vm15, %v9366_v5 }
 0x76b   : > { %12295 = vmatmul.msk.f32.gmra.mxu1 %vm434_vm15, %v16670_v59  ;;  %v9025_v59 = vld [vmem:[#allocation3 + $0x5b] sm:$0xff] }
 0x76d   : > { %v8268_v24 = vpop.f32.mrf.mxu3 }
 0x76e   : > { %v16952_v43 = vadd.f32 %v8268_v24, %v16818_v34 }
 0x76f   : > { %12322 = vmatmul.msk.f32.gmra.mxu2 %vm434_vm15, %v9024_v45  ;;  %v16958_v57 = vpop.f32.mrf.mxu0 }
 0x770   : > { %18545 = vst [vmem:[#allocation68_spill] sm:$0xff] %v16952_v43  ;;  %v16956_v15 = vpop.f32.mrf.mxu1  ;;  %v9717_v43 = vld [vmem:[#allocation3 + $0x2c] sm:$0xff] }
 0x771   : > { %18546 = vst [vmem:[#allocation72_spill] sm:$0xff] %v16958_v57  ;;  %v9718_v57 = vld [vmem:[#allocation3 + $0x34] sm:$0xff] }
 0x772   : > { %v16954_v27 = vpop.f32.mrf.mxu2  ;;  %12358 = vmatmul.msk.f32.gmra.mxu3 %vm434_vm15, %v9367_v44  ;;  %12400 = vmatmul.msk.f32.vlgmr.msra.gmra.mxu0 %vm434_vm15, %v9716_v1 }
 0x773   : > { %12296 = vmatmul.msk.f32.gmra.mxu1 %vm434_vm15, %v16690_v22  ;;  %v9026_v22 = vld [vmem:[#allocation3 + $0x63] sm:$0xff] }
 0x775   : > { %v8271_v5 = vpop.f32.mrf.mxu3 }
 0x776   : > { %v16966_v34 = vadd.f32 %v8271_v5, %v16835_v63 }
 0x777   : > { %12323 = vmatmul.msk.f32.gmra.mxu2 %vm434_vm15, %v9025_v59  ;;  %v16976_v44 = vpop.f32.mrf.mxu0 }
 0x778   : > { %18547 = vst [vmem:[#allocation16_spill] sm:$0xff] %v16966_v34  ;;  %v16970_v24 = vpop.f32.mrf.mxu1 }
 0x779   : > { %18548 = vst [vmem:[#allocation25_spill] sm:$0xff] %v16976_v44  ;;  %v9719_v44 = vld [vmem:[#allocation3 + $0x3c] sm:$0xff] }
 0x77a   : > { %v16968_v45 = vpop.f32.mrf.mxu2  ;;  %12359 = vmatmul.msk.f32.gmra.mxu3 %vm434_vm15, %v9716_v1  ;;  %12401 = vmatmul.msk.f32.gmra.mxu0 %vm434_vm15, %v9717_v43 }
 0x77b   : > { %12297 = vmatmul.msk.f32.gmra.mxu1 %vm434_vm15, %v16710_v62  ;;  %v9027_v62 = vld [vmem:[#allocation3 + $0x6b] sm:$0xff] }
 0x77d   : > { %v8274_v59 = vpop.f32.mrf.mxu3 }
 0x77e   : > { %v16980_v63 = vadd.f32 %v8274_v59, %v16852_v50 }
 0x77f   : > { %12324 = vmatmul.msk.f32.gmra.mxu2 %vm434_vm15, %v9026_v22  ;;  %v16991_v22 = vpop.f32.mrf.mxu0 }
 0x780   : > { %18549 = vst [vmem:[#allocation76_spill] sm:$0xff] %v16980_v63  ;;  %v16984_v34 = vpop.f32.mrf.mxu1 }
 0x781   : > { %18550 = vst [vmem:[#allocation80_spill] sm:$0xff] %v16991_v22  ;;  %v9720_v22 = vld [vmem:[#allocation3 + $0x44] sm:$0xff] }
 0x782   : > { %v16982_v5 = vpop.f32.mrf.mxu2  ;;  %12360 = vmatmul.msk.f32.gmra.mxu3 %vm434_vm15, %v9717_v43  ;;  %12402 = vmatmul.msk.f32.gmra.mxu0 %vm434_vm15, %v9718_v57 }
 0x783   : > { %12298 = vmatmul.msk.f32.gmra.mxu1 %vm434_vm15, %v16742_v2  ;;  %v9028_v2 = vld [vmem:[#allocation3 + $0x73] sm:$0xff] }
 0x785   : > { %v8277_v1 = vpop.f32.mrf.mxu3 }
 0x786   : > { %v16994_v50 = vadd.f32 %v8277_v1, %v16869_v6 }
 0x787   : > { %12325 = vmatmul.msk.f32.gmra.mxu2 %vm434_vm15, %v9027_v62  ;;  %v17010_v1 = vpop.f32.mrf.mxu0 }
 0x788   : > { %18551 = vst [vmem:[#allocation17_spill] sm:$0xff] %v16994_v50  ;;  %v16998_v63 = vpop.f32.mrf.mxu1 }
 0x789   : > { %18553 = vst [vmem:[#allocation84_spill] sm:$0xff] %v17010_v1 }
 0x78a   : > { %v16996_v59 = vpop.f32.mrf.mxu2  ;;  %12361 = vmatmul.msk.f32.gmra.mxu3 %vm434_vm15, %v9718_v57  ;;  %12403 = vmatmul.msk.f32.gmra.mxu0 %vm434_vm15, %v9719_v44 }
 0x78b   : > { %12299 = vmatmul.msk.f32.gmra.mxu1 %vm434_vm15, %v16766_v16  ;;  %v9029_v16 = vld [vmem:[#allocation3 + $0x7b] sm:$0xff] }
 0x78d   : > { %v8280_v43 = vpop.f32.mrf.mxu3 }
 0x78e   : > { %v17006_v62 = vadd.f32 %v8280_v43, %v16886_v0 }
 0x78f   : > { %12326 = vmatmul.msk.f32.gmra.mxu2 %vm434_vm15, %v9028_v2  ;;  %v17026_v1 = vpop.f32.mrf.mxu0 }
 0x790   : > { %18552 = vst [vmem:[#allocation50_spill] sm:$0xff] %v17006_v62  ;;  %v17012_v50 = vpop.f32.mrf.mxu1  ;;  %v9721_v62 = vld [vmem:[#allocation3 + $0x4c] sm:$0xff] }
 0x791   : > { %18555 = vst [vmem:[#allocation46_spill] sm:$0xff] %v17026_v1 }
 0x792   : > { %v17008_v6 = vpop.f32.mrf.mxu2  ;;  %12362 = vmatmul.msk.f32.gmra.mxu3 %vm434_vm15, %v9719_v44  ;;  %12404 = vmatmul.msk.f32.gmra.mxu0 %vm434_vm15, %v9720_v22 }
 0x793   : > { %12300 = vmatmul.msk.f32.gmra.mxu1 %vm434_vm15, %v16786_v60  ;;  %v9030_v60 = vld [vmem:[#allocation3 + $0x83] sm:$0xff] }
 0x795   : > { %v8283_v57 = vpop.f32.mrf.mxu3 }
 0x796   : > { %v17020_v0 = vadd.f32 %v8283_v57, %v16903_v31 }
 0x797   : > { %12327 = vmatmul.msk.f32.gmra.mxu2 %vm434_vm15, %v9029_v16 }
 0x798   : > { %18554 = vst [vmem:[#allocation87_spill] sm:$0xff] %v17020_v0  ;;  %v17024_v43 = vpop.f32.mrf.mxu1  ;;  %v9722_v0 = vld [vmem:[#allocation3 + $0x54] sm:$0xff] }
 0x79a   : > { %v17022_v2 = vpop.f32.mrf.mxu2  ;;  %12363 = vmatmul.msk.f32.gmra.mxu3 %vm434_vm15, %v9720_v22  ;;  %12405 = vmatmul.msk.f32.gmra.mxu0 %vm434_vm15, %v9721_v62  ;;  %v17044_v22 = vpop.f32.mrf.mxu0 }
 0x79b   : > { %12301 = vmatmul.msk.f32.gmra.mxu1 %vm434_vm15, %v16806_v35  ;;  %v9031_v35 = vld [vmem:[#allocation3 + $0x8b] sm:$0xff]  ;;  %18558 = vst [vmem:[#allocation18_spill] sm:$0xff] %v17044_v22 }
 0x79d   : > { %v8286_v44 = vpop.f32.mrf.mxu3 }
 0x79e   : > { %v17034_v31 = vadd.f32 %v8286_v44, %v16920_v19 }
 0x79f   : > { %12328 = vmatmul.msk.f32.gmra.mxu2 %vm434_vm15, %v9030_v60 }
 0x7a0   : > { %18556 = vst [vmem:[#allocation89_spill] sm:$0xff] %v17034_v31  ;;  %v17038_v57 = vpop.f32.mrf.mxu1  ;;  %v18560_v31 = vld [vmem:[#allocation54_spill] sm:$0xff] }
 0x7a1   : > { %18557 = vst [vmem:[#allocation23_spill] sm:$0xff] %v17038_v57  ;;  %v8194_v1 = vadd.f32 %v16462_v17, %v18560_v31  ;;  %v9723_v57 = vld [vmem:[#allocation3 + $0x5c] sm:$0xff] }
 0x7a2   : > { %v17036_v16 = vpop.f32.mrf.mxu2  ;;  %12364 = vmatmul.msk.f32.gmra.mxu3 %vm434_vm15, %v9721_v62  ;;  %12406 = vmatmul.msk.f32.gmra.mxu0 %vm434_vm15, %v9722_v0 }
 0x7a3   : > { %12302 = vmatmul.msk.f32.gmra.mxu1 %vm434_vm15, %v16824_v26  ;;  %v9032_v26 = vld [vmem:[#allocation3 + $0x93] sm:$0xff] }
 0x7a5   : > { %v8289_v60 = vpop.f32.mrf.mxu3 }
 0x7a6   : > { %v17048_v19 = vadd.f32 %v8289_v60, %v16937_v20 }
 0x7a7   : > { %12329 = vmatmul.msk.f32.gmra.mxu2 %vm434_vm15, %v9031_v35  ;;  %v8625_v35 = vadd.f32 %v16468_v25, %v8194_v1  ;;  %v9033_v25 = vld [vmem:[#allocation3 + $0x9b] sm:$0xff] }
 0x7a8   : > { %18559 = vst [vmem:[#allocation4_spill] sm:$0xff] %v17048_v19  ;;  %v17054_v62 = vpop.f32.mrf.mxu1  ;;  %v17063_v19 = vpop.f32.mrf.mxu0 }
 0x7a9   : > { %18561 = vst [vmem:[#allocation5_spill] sm:$0xff] %v17054_v62  ;;  %v8975_v60 = vadd.f32 %v16804_v23, %v8625_v35  ;;  %v9724_v62 = vld [vmem:[#allocation3 + $0x64] sm:$0xff]  ;;  %v8626_v23 = vadd.f32 %v16488_v37, %v16482_v8  ;;  %v8627_v37 = vadd.f32 %v16508_v49, %v16502_v58  ;;  %v8628_v49 = vadd.f32 %v16528_v46, %v16522_v55  ;;  %v9036_v55 = vld [vmem:[#allocation3 + $0xb3] sm:$0xff] }
 0x7aa   : > { %v17050_v44 = vpop.f32.mrf.mxu2  ;;  %12365 = vmatmul.msk.f32.gmra.mxu3 %vm434_vm15, %v9722_v0  ;;  %12407 = vmatmul.msk.f32.gmra.mxu0 %vm434_vm15, %v9723_v57  ;;  %v9034_v8 = vld [vmem:[#allocation3 + $0xa3] sm:$0xff]  ;;  %v9035_v58 = vld [vmem:[#allocation3 + $0xab] sm:$0xff]  ;;  %v8629_v46 = vadd.f32 %v16548_v11, %v16542_v53  ;;  %v9037_v53 = vld [vmem:[#allocation3 + $0xbb] sm:$0xff]  ;;  %v8630_v11 = vadd.f32 %v16568_v42, %v16562_v28  ;;  %v8631_v42 = vadd.f32 %v16588_v54, %v16582_v9 }
 0x7ab   : > { %12303 = vmatmul.msk.f32.gmra.mxu1 %vm434_vm15, %v16841_v7  ;;  %v9038_v28 = vld [vmem:[#allocation3 + $0xc3] sm:$0xff]  ;;  %v9039_v54 = vld [vmem:[#allocation3 + $0xcb] sm:$0xff] }
 0x7ac   : > { %v8705_v9 = vld [vmem:[#allocation3 + $0x14a] sm:$0xff] }
 0x7ad   : > { %v8292_v20 = vpop.f32.mrf.mxu3 }
 0x7ae   : > { %v17066_v17 = vadd.f32 %v8292_v20, %v16954_v27  ;;  %v8976_v27 = vadd.f32 %v16822_v30, %v8626_v23  ;;  %v9726_v23 = vld [vmem:[#allocation3 + $0x74] sm:$0xff] }
 0x7af   : > { %12330 = vmatmul.msk.f32.gmra.mxu2 %vm434_vm15, %v9032_v26 }
 0x7b0   : > { %v17070_v22 = vpop.f32.mrf.mxu1  ;;  %v17083_v35 = vpop.f32.mrf.mxu0 }
 0x7b2   : > { %v9202_v31 = vpop.f32.mrf.mxu2  ;;  %12366 = vmatmul.msk.f32.gmra.mxu3 %vm434_vm15, %v9723_v57  ;;  %12408 = vmatmul.msk.f32.gmra.mxu0 %vm434_vm15, %v9724_v62 }
 0x7b3   : > { %v17068_v0 = vadd.f32 %v9202_v31, %v8975_v60  ;;  %12304 = vmatmul.msk.f32.gmra.mxu1 %vm434_vm15, %v16858_v4  ;;  %v9725_v4 = vld [vmem:[#allocation3 + $0x6c] sm:$0xff] }
 0x7b5   : > { %v8295_v7 = vpop.f32.mrf.mxu3 }
 0x7b6   : > { %v17081_v1 = vadd.f32 %v8295_v7, %v16968_v45  ;;  %v8977_v45 = vadd.f32 %v16839_v13, %v8627_v37  ;;  %v8978_v13 = vadd.f32 %v16856_v33, %v8628_v49 }
 0x7b7   : > { %12331 = vmatmul.msk.f32.gmra.mxu2 %vm434_vm15, %v9033_v25 }
 0x7b8   : > { %v17087_v20 = vpop.f32.mrf.mxu1  ;;  %v17104_v7 = vpop.f32.mrf.mxu0 }
 0x7ba   : > { %v9205_v26 = vpop.f32.mrf.mxu2  ;;  %12367 = vmatmul.msk.f32.gmra.mxu3 %vm434_vm15, %v9724_v62  ;;  %12409 = vmatmul.msk.f32.gmra.mxu0 %vm434_vm15, %v9725_v4 }
 0x7bb   : > { %v17085_v57 = vadd.f32 %v9205_v26, %v8976_v27  ;;  %12305 = vmatmul.msk.f32.gmra.mxu1 %vm434_vm15, %v16875_v39 }
 0x7bd   : > { %v8298_v30 = vpop.f32.mrf.mxu3 }
 0x7be   : > { %v17098_v60 = vadd.f32 %v8298_v30, %v16982_v5 }
 0x7bf   : > { %12332 = vmatmul.msk.f32.gmra.mxu2 %vm434_vm15, %v9034_v8  ;;  %v9727_v8 = vld [vmem:[#allocation3 + $0x7c] sm:$0xff] }
 0x7c0   : > { %v17102_v62 = vpop.f32.mrf.mxu1 }
 0x7c2   : > { %v9208_v31 = vpop.f32.mrf.mxu2  ;;  %12368 = vmatmul.msk.f32.gmra.mxu3 %vm434_vm15, %v9725_v4  ;;  %12410 = vmatmul.msk.f32.gmra.mxu0 %vm434_vm15, %v9726_v23 }
 0x7c3   : > { %v17100_v25 = vadd.f32 %v9208_v31, %v8977_v45  ;;  %12306 = vmatmul.msk.f32.gmra.mxu1 %vm434_vm15, %v16892_v3  ;;  %v17127_v3 = vpop.f32.mrf.mxu0 }
 0x7c5   : > { %v8301_v39 = vpop.f32.mrf.mxu3 }
 0x7c6   : > { %v17115_v5 = vadd.f32 %v8301_v39, %v16996_v59  ;;  %v8979_v59 = vadd.f32 %v16873_v52, %v8629_v46 }
 0x7c7   : > { %12333 = vmatmul.msk.f32.gmra.mxu2 %vm434_vm15, %v9035_v58 }
 0x7c8   : > { %v17119_v4 = vpop.f32.mrf.mxu1 }
 0x7ca   : > { %v9211_v27 = vpop.f32.mrf.mxu2  ;;  %12369 = vmatmul.msk.f32.gmra.mxu3 %vm434_vm15, %v9726_v23  ;;  %12411 = vmatmul.msk.f32.gmra.mxu0 %vm434_vm15, %v9727_v8 }
 0x7cb   : > { %v17117_v26 = vadd.f32 %v9211_v27, %v8978_v13  ;;  %12307 = vmatmul.msk.f32.gmra.mxu1 %vm434_vm15, %v16909_v41  ;;  %v9728_v41 = vld [vmem:[#allocation3 + $0x84] sm:$0xff]  ;;  %v17146_v23 = vpop.f32.mrf.mxu0 }
 0x7cd   : > { %v8304_v33 = vpop.f32.mrf.mxu3 }
 0x7ce   : > { %v17132_v37 = vadd.f32 %v8304_v33, %v17008_v6  ;;  %v8980_v6 = vadd.f32 %v16890_v12, %v8630_v11 }
 0x7cf   : > { %12334 = vmatmul.msk.f32.gmra.mxu2 %vm434_vm15, %v9036_v55 }
 0x7d0   : > { %v17136_v31 = vpop.f32.mrf.mxu1 }
 0x7d2   : > { %v9214_v30 = vpop.f32.mrf.mxu2  ;;  %12370 = vmatmul.msk.f32.gmra.mxu3 %vm434_vm15, %v9727_v8  ;;  %12412 = vmatmul.msk.f32.gmra.mxu0 %vm434_vm15, %v9728_v41 }
 0x7d3   : > { %v17134_v45 = vadd.f32 %v9214_v30, %v8979_v59  ;;  %12308 = vmatmul.msk.f32.gmra.mxu1 %vm434_vm15, %v16926_v29  ;;  %v9729_v29 = vld [vmem:[#allocation3 + $0x8c] sm:$0xff]  ;;  %v17166_v55 = vpop.f32.mrf.mxu0 }
 0x7d5   : > { %v8307_v52 = vpop.f32.mrf.mxu3 }
 0x7d6   : > { %v17149_v58 = vadd.f32 %v8307_v52, %v17022_v2  ;;  %v8981_v2 = vadd.f32 %v16907_v56, %v8631_v42  ;;  %v18562_v56 = vld [vmem:[#allocation58_spill] sm:$0xff] }
 0x7d7   : > { %12335 = vmatmul.msk.f32.gmra.mxu2 %vm434_vm15, %v9037_v53 }
 0x7d8   : > { %v17153_v13 = vpop.f32.mrf.mxu1 }
 0x7da   : > { %v9217_v49 = vpop.f32.mrf.mxu2  ;;  %12371 = vmatmul.msk.f32.gmra.mxu3 %vm434_vm15, %v9728_v41  ;;  %12413 = vmatmul.msk.f32.gmra.mxu0 %vm434_vm15, %v9729_v29 }
 0x7db   : > { %v17151_v39 = vadd.f32 %v9217_v49, %v8980_v6  ;;  %12309 = vmatmul.msk.f32.gmra.mxu1 %vm434_vm15, %v16943_v18  ;;  %v9730_v18 = vld [vmem:[#allocation3 + $0x94] sm:$0xff]  ;;  %v9731_v6 = vld [vmem:[#allocation3 + $0x9c] sm:$0xff]  ;;  %v17186_v49 = vpop.f32.mrf.mxu0 }
 0x7dd   : > { %v8310_v12 = vpop.f32.mrf.mxu3 }
 0x7de   : > { %v17164_v27 = vadd.f32 %v8310_v12, %v17036_v16  ;;  %v8632_v16 = vadd.f32 %v18562_v56, %v16602_v38  ;;  %v8706_v38 = vld [vmem:[#allocation3 + $0x152] sm:$0xff] }
 0x7df   : > { %12336 = vmatmul.msk.f32.gmra.mxu2 %vm434_vm15, %v9038_v28 }
 0x7e0   : > { %v17170_v33 = vpop.f32.mrf.mxu1  ;;  %v8982_v30 = vadd.f32 %v16924_v14, %v8632_v16  ;;  %v8633_v14 = vadd.f32 %v16628_v32, %v16622_v10  ;;  %v9041_v10 = vld [vmem:[#allocation3 + $0xdb] sm:$0xff] }
 0x7e1   : > { %v18563_v32 = vld [vmem:[#allocation65_spill] sm:$0xff] }
 0x7e2   : > { %v9220_v8 = vpop.f32.mrf.mxu2  ;;  %12372 = vmatmul.msk.f32.gmra.mxu3 %vm434_vm15, %v9729_v29  ;;  %12414 = vmatmul.msk.f32.gmra.mxu0 %vm434_vm15, %v9730_v18  ;;  %v9040_v29 = vld [vmem:[#allocation3 + $0xd3] sm:$0xff]  ;;  %v8983_v28 = vadd.f32 %v16941_v51, %v8633_v14  ;;  %v8634_v51 = vadd.f32 %v18563_v32, %v16642_v21  ;;  %v9042_v21 = vld [vmem:[#allocation3 + $0xe3] sm:$0xff] }
 0x7e3   : > { %v17168_v46 = vadd.f32 %v9220_v8, %v8981_v2  ;;  %12310 = vmatmul.msk.f32.gmra.mxu1 %vm434_vm15, %v8705_v9  ;;  %v9732_v8 = vld [vmem:[#allocation3 + $0xa4] sm:$0xff] }
 0x7e4   : > { %v8984_v56 = vadd.f32 %v16956_v15, %v8634_v51  ;;  %v18565_v32 = vld [vmem:[#allocation67_spill] sm:$0xff] }
 0x7e5   : > { %v8313_v59 = vpop.f32.mrf.mxu3 }
 0x7e6   : > { %v17180_v41 = vadd.f32 %v8313_v59, %v17050_v44 }
 0x7e7   : > { %12337 = vmatmul.msk.f32.gmra.mxu2 %vm434_vm15, %v9039_v54  ;;  %v17207_v54 = vpop.f32.mrf.mxu0 }
 0x7e8   : > { %v17184_v52 = vpop.f32.mrf.mxu1 }
 0x7ea   : > { %v9223_v53 = vpop.f32.mrf.mxu2  ;;  %12373 = vmatmul.msk.f32.gmra.mxu3 %vm434_vm15, %v9730_v18  ;;  %12415 = vmatmul.msk.f32.gmra.mxu0 %vm434_vm15, %v9731_v6  ;;  %v10066_v18 = vld [vmem:[#allocation3 + $0x25] sm:$0xff] }
 0x7eb   : > { %v17182_v11 = vadd.f32 %v9223_v53, %v8982_v30  ;;  %12311 = vmatmul.msk.f32.gmra.mxu1 %vm434_vm15, %v8706_v38  ;;  %v9733_v53 = vld [vmem:[#allocation3 + $0xac] sm:$0xff]  ;;  %v18564_v38 = vld [vmem:[#allocation61_spill] sm:$0xff] }
 0x7ed   : > { %v9552_v44 = vpop.f32.mrf.mxu3 }
 0x7ee   : > { %v17196_v42 = vadd.f32 %v9552_v44, %v17068_v0 }
 0x7ef   : > { %12338 = vmatmul.msk.f32.gmra.mxu2 %vm434_vm15, %v9040_v29  ;;  %v8635_v29 = vadd.f32 %v18564_v38, %v16662_v61  ;;  %v17225_v44 = vpop.f32.mrf.mxu0  ;;  %v10068_v61 = vld [vmem:[#allocation3 + $0x35] sm:$0xff] }
 0x7f0   : > { %v17202_v9 = vpop.f32.mrf.mxu1  ;;  %v9044_v38 = vld [vmem:[#allocation3 + $0xf3] sm:$0xff] }
 0x7f1   : > { %v8985_v14 = vadd.f32 %v16970_v24, %v8635_v29  ;;  %v8636_v24 = vadd.f32 %v18565_v32, %v16682_v48  ;;  %v10069_v48 = vld [vmem:[#allocation3 + $0x3d] sm:$0xff] }
 0x7f2   : > { %v9226_v12 = vpop.f32.mrf.mxu2  ;;  %12374 = vmatmul.msk.f32.gmra.mxu3 %vm434_vm15, %v9731_v6  ;;  %12416 = vmatmul.msk.f32.gmra.mxu0 %vm434_vm15, %v9732_v8  ;;  %v10067_v6 = vld [vmem:[#allocation3 + $0x2d] sm:$0xff]  ;;  %v18567_v32 = vld [vmem:[#allocation70_spill] sm:$0xff] }
 0x7f3   : > { %v17198_v2 = vadd.f32 %v9226_v12, %v8983_v28  ;;  %12443 = vmatmul.msk.f32.vlgmr.msra.gmra.mxu1 %vm434_vm15, %v10066_v18  ;;  %v9734_v18 = vld [vmem:[#allocation3 + $0xb4] sm:$0xff] }
 0x7f5   : > { %v9555_v0 = vpop.f32.mrf.mxu3 }
 0x7f6   : > { %v17212_v16 = vadd.f32 %v9555_v0, %v17085_v57 }
 0x7f7   : > { %12339 = vmatmul.msk.f32.gmra.mxu2 %vm434_vm15, %v9041_v10  ;;  %v9043_v10 = vld [vmem:[#allocation3 + $0xeb] sm:$0xff] }
 0x7f8   : > { %v17222_v15 = vpop.f32.mrf.mxu1 }
 0x7fa   : > { %v9229_v59 = vpop.f32.mrf.mxu2  ;;  %12375 = vmatmul.msk.f32.gmra.mxu3 %vm434_vm15, %v9732_v8  ;;  %12417 = vmatmul.msk.f32.gmra.mxu0 %vm434_vm15, %v9733_v53 }
 0x7fb   : > { %v17214_v30 = vadd.f32 %v9229_v59, %v8984_v56  ;;  %12444 = vmatmul.msk.f32.gmra.mxu1 %vm434_vm15, %v10067_v6 }
 0x7fd   : > { %v9558_v57 = vpop.f32.mrf.mxu3 }
 0x7fe   : > { %v17228_v28 = vadd.f32 %v9558_v57, %v17100_v25  ;;  %v8986_v25 = vadd.f32 %v16984_v34, %v8636_v24  ;;  %v8637_v34 = vadd.f32 %v16708_v36, %v16702_v40  ;;  %v10070_v40 = vld [vmem:[#allocation3 + $0x45] sm:$0xff]  ;;  %v9045_v36 = vld [vmem:[#allocation3 + $0xfb] sm:$0xff] }
 0x7ff   : > { %12340 = vmatmul.msk.f32.gmra.mxu2 %vm434_vm15, %v9042_v21  ;;  %v9735_v21 = vld [vmem:[#allocation3 + $0xbc] sm:$0xff] }
 0x800   : > { %v17242_v56 = vpop.f32.mrf.mxu1  ;;  %v8987_v29 = vadd.f32 %v16998_v63, %v8637_v34  ;;  %v18566_v63 = vld [vmem:[#allocation63_spill] sm:$0xff] }
 0x802   : > { %v9232_v12 = vpop.f32.mrf.mxu2  ;;  %12376 = vmatmul.msk.f32.gmra.mxu3 %vm434_vm15, %v9733_v53  ;;  %12418 = vmatmul.msk.f32.gmra.mxu0 %vm434_vm15, %v9734_v18  ;;  %v17244_v53 = vpop.f32.mrf.mxu0 }
 0x803   : > { %v17230_v8 = vadd.f32 %v9232_v12, %v8985_v14  ;;  %12445 = vmatmul.msk.f32.gmra.mxu1 %vm434_vm15, %v10068_v61  ;;  %v9736_v61 = vld [vmem:[#allocation3 + $0xc4] sm:$0xff] }
 0x805   : > { %v9561_v51 = vpop.f32.mrf.mxu3 }
 0x806   : > { %v17240_v0 = vadd.f32 %v9561_v51, %v17117_v26 }
 0x807   : > { %12341 = vmatmul.msk.f32.gmra.mxu2 %vm434_vm15, %v9043_v10 }
 0x80a   : > { %v9235_v59 = vpop.f32.mrf.mxu2  ;;  %12377 = vmatmul.msk.f32.gmra.mxu3 %vm434_vm15, %v9734_v18  ;;  %12419 = vmatmul.msk.f32.gmra.mxu0 %vm434_vm15, %v9735_v21  ;;  %v17260_v18 = vpop.f32.mrf.mxu1 }
 0x80b   : > { %v17246_v6 = vadd.f32 %v9235_v59, %v8986_v25  ;;  %12446 = vmatmul.msk.f32.gmra.mxu1 %vm434_vm15, %v10069_v48  ;;  %v17262_v10 = vpop.f32.mrf.mxu0 }
 0x80d   : > { %v9564_v26 = vpop.f32.mrf.mxu3 }
 0x80e   : > { %v17256_v57 = vadd.f32 %v9564_v26, %v17134_v45  ;;  %v8638_v45 = vadd.f32 %v18567_v32, %v18566_v63  ;;  %v9046_v26 = vld [vmem:[#allocation3 + $0x103] sm:$0xff]  ;;  %v9738_v32 = vld [vmem:[#allocation3 + $0xd4] sm:$0xff] }
 0x80f   : > { %12342 = vmatmul.msk.f32.gmra.mxu2 %vm434_vm15, %v9044_v38  ;;  %v10071_v38 = vld [vmem:[#allocation3 + $0x4d] sm:$0xff] }
 0x810   : > { %v8988_v51 = vadd.f32 %v17012_v50, %v8638_v45  ;;  %v10072_v45 = vld [vmem:[#allocation3 + $0x55] sm:$0xff] }
 0x812   : > { %v9238_v14 = vpop.f32.mrf.mxu2  ;;  %12378 = vmatmul.msk.f32.gmra.mxu3 %vm434_vm15, %v9735_v21  ;;  %12420 = vmatmul.msk.f32.gmra.mxu0 %vm434_vm15, %v9736_v61  ;;  %v9737_v21 = vld [vmem:[#allocation3 + $0xcc] sm:$0xff]  ;;  %v17278_v34 = vpop.f32.mrf.mxu1 }
 0x813   : > { %v17258_v12 = vadd.f32 %v9238_v14, %v8987_v29  ;;  %12447 = vmatmul.msk.f32.gmra.mxu1 %vm434_vm15, %v10070_v40  ;;  %v18569_v29 = vld [vmem:[#allocation66_spill] sm:$0xff]  ;;  %v17283_v14 = vpop.f32.mrf.mxu0 }
 0x814   : > { %v8639_v50 = vadd.f32 %v18569_v29, %v16758_v47  ;;  %v9047_v47 = vld [vmem:[#allocation3 + $0x10b] sm:$0xff] }
 0x815   : > { %v9567_v24 = vpop.f32.mrf.mxu3 }
 0x816   : > { %v17272_v25 = vadd.f32 %v9567_v24, %v17151_v39  ;;  %v8989_v40 = vadd.f32 %v17024_v43, %v8639_v50  ;;  %v18571_v24 = vld [vmem:[#allocation74_spill] sm:$0xff] }
 0x817   : > { %12343 = vmatmul.msk.f32.gmra.mxu2 %vm434_vm15, %v9045_v36 }
 0x818   : > { %18568 = vst [vmem:[#allocation53_spill] sm:$0xff] %v17272_v25 }
 0x81a   : > { %v9241_v59 = vpop.f32.mrf.mxu2  ;;  %12379 = vmatmul.msk.f32.gmra.mxu3 %vm434_vm15, %v9736_v61  ;;  %12421 = vmatmul.msk.f32.gmra.mxu0 %vm434_vm15, %v9737_v21  ;;  %v17298_v43 = vpop.f32.mrf.mxu1 }
 0x81b   : > { %v17274_v48 = vadd.f32 %v9241_v59, %v8988_v51  ;;  %12448 = vmatmul.msk.f32.gmra.mxu1 %vm434_vm15, %v10071_v38  ;;  %v18572_v51 = vld [vmem:[#allocation69_spill] sm:$0xff]  ;;  %v18573_v38 = vld [vmem:[#allocation23_spill] sm:$0xff]  ;;  %v17301_v29 = vpop.f32.mrf.mxu0 }
 0x81c   : > { %v8640_v59 = vadd.f32 %v18572_v51, %v18571_v24  ;;  %v18576_v24 = vld [vmem:[#allocation71_spill] sm:$0xff] }
 0x81d   : > { %v9570_v39 = vpop.f32.mrf.mxu3 }
 0x81e   : > { %v17288_v61 = vadd.f32 %v9570_v39, %v17168_v46 }
 0x81f   : > { %12344 = vmatmul.msk.f32.gmra.mxu2 %vm434_vm15, %v9046_v26  ;;  %v8990_v26 = vadd.f32 %v18573_v38, %v8640_v59 }
 0x820   : > { %18570 = vst [vmem:[#allocation31_spill] sm:$0xff] %v17288_v61  ;;  %v9741_v61 = vld [vmem:[#allocation3 + $0xec] sm:$0xff] }
 0x822   : > { %v9244_v36 = vpop.f32.mrf.mxu2  ;;  %12380 = vmatmul.msk.f32.gmra.mxu3 %vm434_vm15, %v9737_v21  ;;  %12422 = vmatmul.msk.f32.gmra.mxu0 %vm434_vm15, %v9738_v32 }
 0x823   : > { %v17290_v63 = vadd.f32 %v9244_v36, %v8989_v40  ;;  %12449 = vmatmul.msk.f32.gmra.mxu1 %vm434_vm15, %v10072_v45  ;;  %v9739_v40 = vld [vmem:[#allocation3 + $0xdc] sm:$0xff]  ;;  %v9048_v45 = vld [vmem:[#allocation3 + $0x113] sm:$0xff] }
 0x824   : > { %v10073_v36 = vld [vmem:[#allocation3 + $0x5d] sm:$0xff] }
 0x825   : > { %v9573_v46 = vpop.f32.mrf.mxu3 }
 0x826   : > { %v17304_v21 = vadd.f32 %v9573_v46, %v17182_v11  ;;  %v18577_v11 = vld [vmem:[#allocation5_spill] sm:$0xff] }
 0x827   : > { %12345 = vmatmul.msk.f32.gmra.mxu2 %vm434_vm15, %v9047_v47  ;;  %v18575_v47 = vld [vmem:[#allocation78_spill] sm:$0xff] }
 0x828   : > { %18574 = vst [vmem:[#allocation24_spill] sm:$0xff] %v17304_v21  ;;  %v8641_v51 = vadd.f32 %v18576_v24, %v18575_v47  ;;  %v10074_v47 = vld [vmem:[#allocation3 + $0x65] sm:$0xff] }
 0x829   : > { %v18579_v24 = vld [vmem:[#allocation83_spill] sm:$0xff] }
 0x82a   : > { %v9247_v50 = vpop.f32.mrf.mxu2  ;;  %12381 = vmatmul.msk.f32.gmra.mxu3 %vm434_vm15, %v9738_v32  ;;  %12423 = vmatmul.msk.f32.gmra.mxu0 %vm434_vm15, %v9739_v40  ;;  %v8991_v46 = vadd.f32 %v18577_v11, %v8641_v51  ;;  %v18580_v51 = vld [vmem:[#allocation75_spill] sm:$0xff] }
 0x82b   : > { %v17306_v39 = vadd.f32 %v9247_v50, %v8990_v26  ;;  %12450 = vmatmul.msk.f32.gmra.mxu1 %vm434_vm15, %v10073_v36  ;;  %v17318_v26 = vpop.f32.mrf.mxu1  ;;  %v17320_v50 = vpop.f32.mrf.mxu0  ;;  %v9740_v36 = vld [vmem:[#allocation3 + $0xe4] sm:$0xff] }
 0x82d   : > { %v9576_v59 = vpop.f32.mrf.mxu3 }
 0x82e   : > { %v17316_v38 = vadd.f32 %v9576_v59, %v17198_v2  ;;  %v8642_v2 = vadd.f32 %v18580_v51, %v18579_v24  ;;  %v18583_v24 = vld [vmem:[#allocation85_spill] sm:$0xff] }
 0x82f   : > { %12346 = vmatmul.msk.f32.gmra.mxu2 %vm434_vm15, %v9048_v45  ;;  %v9049_v45 = vld [vmem:[#allocation3 + $0x11b] sm:$0xff] }
 0x830   : > { %18578 = vst [vmem:[#allocation27_spill] sm:$0xff] %v17316_v38  ;;  %v8992_v11 = vadd.f32 %v17070_v22, %v8642_v2  ;;  %v18582_v22 = vld [vmem:[#allocation81_spill] sm:$0xff] }
 0x832   : > { %v9250_v32 = vpop.f32.mrf.mxu2  ;;  %12382 = vmatmul.msk.f32.gmra.mxu3 %vm434_vm15, %v9739_v40  ;;  %12424 = vmatmul.msk.f32.gmra.mxu0 %vm434_vm15, %v9740_v36 }
 0x833   : > { %v17322_v21 = vadd.f32 %v9250_v32, %v8991_v46  ;;  %12451 = vmatmul.msk.f32.gmra.mxu1 %vm434_vm15, %v10074_v47  ;;  %v17336_v40 = vpop.f32.mrf.mxu1  ;;  %v17338_v25 = vpop.f32.mrf.mxu0  ;;  %v10075_v47 = vld [vmem:[#allocation3 + $0x6d] sm:$0xff] }
 0x835   : > { %v9579_v59 = vpop.f32.mrf.mxu3 }
 0x836   : > { %v17332_v46 = vadd.f32 %v9579_v59, %v17214_v30  ;;  %v8643_v30 = vadd.f32 %v18583_v24, %v18582_v22  ;;  %v18586_v22 = vld [vmem:[#allocation86_spill] sm:$0xff]  ;;  %v18587_v24 = vld [vmem:[#allocation88_spill] sm:$0xff] }
 0x837   : > { %12347 = vmatmul.msk.f32.gmra.mxu2 %vm434_vm15, %v9049_v45  ;;  %v9050_v45 = vld [vmem:[#allocation3 + $0x123] sm:$0xff] }
 0x838   : > { %v8993_v2 = vadd.f32 %v17087_v20, %v8643_v30  ;;  %v8644_v20 = vadd.f32 %v18587_v24, %v18586_v22  ;;  %v9052_v22 = vld [vmem:[#allocation3 + $0x133] sm:$0xff]  ;;  %v18589_v24 = vld [vmem:[#allocation90_spill] sm:$0xff] }
 0x83a   : > { %v9253_v32 = vpop.f32.mrf.mxu2  ;;  %12383 = vmatmul.msk.f32.gmra.mxu3 %vm434_vm15, %v9740_v36  ;;  %12425 = vmatmul.msk.f32.gmra.mxu0 %vm434_vm15, %v9741_v61  ;;  %v9742_v36 = vld [vmem:[#allocation3 + $0xf4] sm:$0xff] }
 0x83b   : > { %v17334_v38 = vadd.f32 %v9253_v32, %v8992_v11  ;;  %12452 = vmatmul.msk.f32.gmra.mxu1 %vm434_vm15, %v10075_v47  ;;  %v10076_v47 = vld [vmem:[#allocation3 + $0x75] sm:$0xff]  ;;  %v17359_v30 = vpop.f32.mrf.mxu0 }
 0x83d   : > { %18581 = vst [vmem:[#allocation47_spill] sm:$0xff] %v17334_v38  ;;  %v9582_v51 = vpop.f32.mrf.mxu3  ;;  %v17354_v38 = vpop.f32.mrf.mxu1 }
 0x83e   : > { %v17348_v59 = vadd.f32 %v9582_v51, %v17230_v8  ;;  %v8994_v51 = vadd.f32 %v17102_v62, %v8644_v20 }
 0x83f   : > { %12348 = vmatmul.msk.f32.gmra.mxu2 %vm434_vm15, %v9050_v45  ;;  %v9051_v45 = vld [vmem:[#allocation3 + $0x12b] sm:$0xff] }
 0x840   : > { %18584 = vst [vmem:[#allocation35_spill] sm:$0xff] %v17348_v59 }
 0x842   : > { %v9256_v11 = vpop.f32.mrf.mxu2  ;;  %12384 = vmatmul.msk.f32.gmra.mxu3 %vm434_vm15, %v9741_v61  ;;  %12426 = vmatmul.msk.f32.gmra.mxu0 %vm434_vm15, %v9742_v36 }
 0x843   : > { %v17350_v32 = vadd.f32 %v9256_v11, %v8993_v2  ;;  %12453 = vmatmul.msk.f32.gmra.mxu1 %vm434_vm15, %v10076_v47  ;;  %v10077_v47 = vld [vmem:[#allocation3 + $0x7d] sm:$0xff] }
 0x845   : > { %18585 = vst [vmem:[#allocation6_spill] sm:$0xff] %v17350_v32  ;;  %v9585_v8 = vpop.f32.mrf.mxu3  ;;  %v9743_v32 = vld [vmem:[#allocation3 + $0xfc] sm:$0xff]  ;;  %v17374_v62 = vpop.f32.mrf.mxu1 }
 0x846   : > { %v17364_v61 = vadd.f32 %v9585_v8, %v17246_v6  ;;  %v17377_v8 = vpop.f32.mrf.mxu0 }
 0x847   : > { %12349 = vmatmul.msk.f32.gmra.mxu2 %vm434_vm15, %v9051_v45  ;;  %v18590_v45 = vld [vmem:[#allocation49_spill] sm:$0xff] }
 0x848   : > { %v8645_v59 = vadd.f32 %v18590_v45, %v18589_v24  ;;  %v10078_v24 = vld [vmem:[#allocation3 + $0x85] sm:$0xff] }
 0x849   : > { %v18593_v45 = vld [vmem:[#allocation19_spill] sm:$0xff] }
 0x84a   : > { %v9259_v2 = vpop.f32.mrf.mxu2  ;;  %12385 = vmatmul.msk.f32.gmra.mxu3 %vm434_vm15, %v9742_v36  ;;  %12427 = vmatmul.msk.f32.gmra.mxu0 %vm434_vm15, %v9743_v32  ;;  %v8995_v20 = vadd.f32 %v17119_v4, %v8645_v59 }
 0x84b   : > { %v17366_v11 = vadd.f32 %v9259_v2, %v8994_v51  ;;  %12454 = vmatmul.msk.f32.gmra.mxu1 %vm434_vm15, %v10077_v47  ;;  %v9744_v47 = vld [vmem:[#allocation3 + $0x104] sm:$0xff] }
 0x84d   : > { %18588 = vst [vmem:[#allocation44_spill] sm:$0xff] %v17366_v11  ;;  %v9588_v6 = vpop.f32.mrf.mxu3  ;;  %v18594_v11 = vld [vmem:[#allocation91_spill] sm:$0xff] }
 0x84e   : > { %v17380_v36 = vadd.f32 %v9588_v6, %v17258_v12  ;;  %v8646_v4 = vadd.f32 %v18594_v11, %v18593_v45  ;;  %v10079_v11 = vld [vmem:[#allocation3 + $0x8d] sm:$0xff]  ;;  %v18598_v45 = vld [vmem:[#allocation13_spill] sm:$0xff] }
 0x84f   : > { %12350 = vmatmul.msk.f32.gmra.mxu2 %vm434_vm15, %v9052_v22  ;;  %v9053_v22 = vld [vmem:[#allocation3 + $0x13b] sm:$0xff] }
 0x850   : > { %18591 = vst [vmem:[#allocation20_spill] sm:$0xff] %v17380_v36  ;;  %v8996_v12 = vadd.f32 %v17136_v31, %v8646_v4  ;;  %v18597_v31 = vld [vmem:[#allocation56_spill] sm:$0xff] }
 0x852   : > { %v9262_v51 = vpop.f32.mrf.mxu2  ;;  %12386 = vmatmul.msk.f32.gmra.mxu3 %vm434_vm15, %v9743_v32  ;;  %12428 = vmatmul.msk.f32.gmra.mxu0 %vm434_vm15, %v9744_v47 }
 0x853   : > { %v17382_v2 = vadd.f32 %v9262_v51, %v8995_v20  ;;  %12455 = vmatmul.msk.f32.gmra.mxu1 %vm434_vm15, %v10078_v24  ;;  %v17394_v20 = vpop.f32.mrf.mxu1  ;;  %v17396_v51 = vpop.f32.mrf.mxu0  ;;  %v9745_v24 = vld [vmem:[#allocation3 + $0x10c] sm:$0xff] }
 0x855   : > { %18592 = vst [vmem:[#allocation30_spill] sm:$0xff] %v17382_v2  ;;  %v9591_v59 = vpop.f32.mrf.mxu3 }
 0x856   : > { %v17392_v6 = vadd.f32 %v9591_v59, %v17274_v48  ;;  %v8647_v48 = vadd.f32 %v18598_v45, %v18597_v31  ;;  %v18602_v31 = vld [vmem:[#allocation60_spill] sm:$0xff] }
 0x857   : > { %12351 = vmatmul.msk.f32.gmra.mxu2 %vm434_vm15, %v9053_v22  ;;  %v9054_v22 = vld [vmem:[#allocation3 + $0x143] sm:$0xff] }
 0x858   : > { %18595 = vst [vmem:[#allocation33_spill] sm:$0xff] %v17392_v6  ;;  %v8997_v59 = vadd.f32 %v17153_v13, %v8647_v48  ;;  %v9746_v6 = vld [vmem:[#allocation3 + $0x114] sm:$0xff] }
 0x859   : > { %v18601_v13 = vld [vmem:[#allocation48_spill] sm:$0xff] }
 0x85a   : > { %v9265_v32 = vpop.f32.mrf.mxu2  ;;  %12387 = vmatmul.msk.f32.gmra.mxu3 %vm434_vm15, %v9744_v47  ;;  %12429 = vmatmul.msk.f32.gmra.mxu0 %vm434_vm15, %v9745_v24 }
 0x85b   : > { %v17398_v2 = vadd.f32 %v9265_v32, %v8996_v12  ;;  %12456 = vmatmul.msk.f32.gmra.mxu1 %vm434_vm15, %v10079_v11  ;;  %v17412_v47 = vpop.f32.mrf.mxu1  ;;  %v17414_v36 = vpop.f32.mrf.mxu0  ;;  %v10080_v11 = vld [vmem:[#allocation3 + $0x95] sm:$0xff] }
 0x85d   : > { %18596 = vst [vmem:[#allocation21_spill] sm:$0xff] %v17398_v2  ;;  %v9594_v4 = vpop.f32.mrf.mxu3 }
 0x85e   : > { %v17408_v12 = vadd.f32 %v9594_v4, %v17290_v63  ;;  %v8648_v63 = vadd.f32 %v18602_v31, %v18601_v13  ;;  %v18605_v13 = vld [vmem:[#allocation64_spill] sm:$0xff]  ;;  %v18606_v31 = vld [vmem:[#allocation15_spill] sm:$0xff] }
 0x85f   : > { %12352 = vmatmul.msk.f32.gmra.mxu2 %vm434_vm15, %v9054_v22  ;;  %v9055_v22 = vld [vmem:[#allocation3 + $0x14b] sm:$0xff] }
 0x860   : > { %18599 = vst [vmem:[#allocation57_spill] sm:$0xff] %v17408_v12  ;;  %v8998_v48 = vadd.f32 %v17170_v33, %v8648_v63  ;;  %v8649_v33 = vadd.f32 %v18606_v31, %v18605_v13  ;;  %v10416_v13 = vld [vmem:[#allocation3 + $0x26] sm:$0xff]  ;;  %v18609_v31 = vld [vmem:[#allocation68_spill] sm:$0xff] }
 0x861   : > { %v18621_v12 = vld [vmem:[#allocation50_spill] sm:$0xff] }
 0x862   : > { %v9268_v32 = vpop.f32.mrf.mxu2  ;;  %12388 = vmatmul.msk.f32.gmra.mxu3 %vm434_vm15, %v9745_v24  ;;  %12430 = vmatmul.msk.f32.gmra.mxu0 %vm434_vm15, %v9746_v6  ;;  %v9747_v24 = vld [vmem:[#allocation3 + $0x11c] sm:$0xff] }
 0x863   : > { %v17410_v2 = vadd.f32 %v9268_v32, %v8997_v59  ;;  %12457 = vmatmul.msk.f32.gmra.mxu1 %vm434_vm15, %v10080_v11  ;;  %v10081_v11 = vld [vmem:[#allocation3 + $0x9d] sm:$0xff]  ;;  %v17435_v63 = vpop.f32.mrf.mxu0 }
 0x865   : > { %18600 = vst [vmem:[#allocation7_spill] sm:$0xff] %v17410_v2  ;;  %v9597_v45 = vpop.f32.mrf.mxu3  ;;  %v17430_v2 = vpop.f32.mrf.mxu1 }
 0x866   : > { %v17424_v4 = vadd.f32 %v9597_v45, %v17306_v39  ;;  %v8999_v45 = vadd.f32 %v17184_v52, %v8649_v33 }
 0x867   : > { %12353 = vmatmul.msk.f32.gmra.mxu2 %vm434_vm15, %v9055_v22  ;;  %v9056_v22 = vld [vmem:[#allocation3 + $0x153] sm:$0xff] }
 0x868   : > { %18603 = vst [vmem:[#allocation8_spill] sm:$0xff] %v17424_v4 }
 0x86a   : > { %v9271_v59 = vpop.f32.mrf.mxu2  ;;  %12389 = vmatmul.msk.f32.gmra.mxu3 %vm434_vm15, %v9746_v6  ;;  %12431 = vmatmul.msk.f32.gmra.mxu0 %vm434_vm15, %v9747_v24 }
 0x86b   : > { %v17426_v32 = vadd.f32 %v9271_v59, %v8998_v48  ;;  %12458 = vmatmul.msk.f32.gmra.mxu1 %vm434_vm15, %v10081_v11  ;;  %v10082_v11 = vld [vmem:[#allocation3 + $0xa5] sm:$0xff]  ;;  %v17453_v33 = vpop.f32.mrf.mxu0 }
 0x86d   : > { %18604 = vst [vmem:[#allocation22_spill] sm:$0xff] %v17426_v32  ;;  %v9600_v39 = vpop.f32.mrf.mxu3  ;;  %v9748_v32 = vld [vmem:[#allocation3 + $0x124] sm:$0xff]  ;;  %v17450_v52 = vpop.f32.mrf.mxu1 }
 0x86e   : > { %v17440_v6 = vadd.f32 %v9600_v39, %v17322_v21 }
 0x86f   : > { %12354 = vmatmul.msk.f32.gmra.mxu2 %vm434_vm15, %v9056_v22  ;;  %v18610_v22 = vld [vmem:[#allocation72_spill] sm:$0xff] }
 0x870   : > { %18607 = vst [vmem:[#allocation73_spill] sm:$0xff] %v17440_v6  ;;  %v8650_v4 = vadd.f32 %v18610_v22, %v18609_v31  ;;  %v18612_v31 = vld [vmem:[#allocation16_spill] sm:$0xff] }
 0x872   : > { %v9274_v48 = vpop.f32.mrf.mxu2  ;;  %12390 = vmatmul.msk.f32.gmra.mxu3 %vm434_vm15, %v9747_v24  ;;  %12432 = vmatmul.msk.f32.gmra.mxu0 %vm434_vm15, %v9748_v32  ;;  %v9000_v21 = vadd.f32 %v17202_v9, %v8650_v4  ;;  %v9749_v24 = vld [vmem:[#allocation3 + $0x12c] sm:$0xff] }
 0x873   : > { %v17442_v59 = vadd.f32 %v9274_v48, %v8999_v45  ;;  %12459 = vmatmul.msk.f32.gmra.mxu1 %vm434_vm15, %v10082_v11  ;;  %v10083_v48 = vld [vmem:[#allocation3 + $0xad] sm:$0xff] }
 0x874   : > { %v10417_v11 = vld [vmem:[#allocation3 + $0x2e] sm:$0xff] }
 0x875   : > { %18608 = vst [vmem:[#allocation34_spill] sm:$0xff] %v17442_v59  ;;  %v17464_v4 = vpop.f32.mrf.mxu1 }
 0x877   : > { %12486 = vmatmul.msk.f32.vlgmr.msra.gmra.mxu2 %vm434_vm15, %v10416_v13  ;;  %v18613_v13 = vld [vmem:[#allocation25_spill] sm:$0xff] }
 0x878   : > { %v8651_v22 = vadd.f32 %v18613_v13, %v18612_v31  ;;  %v10418_v31 = vld [vmem:[#allocation3 + $0x36] sm:$0xff] }
 0x879   : > { %v18615_v13 = vld [vmem:[#allocation76_spill] sm:$0xff] }
 0x87a   : > { %v9277_v39 = vpop.f32.mrf.mxu2  ;;  %12391 = vmatmul.msk.f32.gmra.mxu3 %vm434_vm15, %v9748_v32  ;;  %12433 = vmatmul.msk.f32.gmra.mxu0 %vm434_vm15, %v9749_v24  ;;  %v9001_v9 = vadd.f32 %v17222_v15, %v8651_v22  ;;  %v9750_v32 = vld [vmem:[#allocation3 + $0x134] sm:$0xff] }
 0x87b   : > { %v17455_v45 = vadd.f32 %v9277_v39, %v9000_v21  ;;  %12460 = vmatmul.msk.f32.gmra.mxu1 %vm434_vm15, %v10083_v48  ;;  %v17466_v39 = vpop.f32.mrf.mxu0  ;;  %v10084_v48 = vld [vmem:[#allocation3 + $0xb5] sm:$0xff] }
 0x87d   : > { %18611 = vst [vmem:[#allocation37_spill] sm:$0xff] %v17455_v45 }
 0x87f   : > { %12487 = vmatmul.msk.f32.gmra.mxu2 %vm434_vm15, %v10417_v11  ;;  %v18616_v11 = vld [vmem:[#allocation80_spill] sm:$0xff] }
 0x880   : > { %v8652_v59 = vadd.f32 %v18616_v11, %v18615_v13  ;;  %v10419_v13 = vld [vmem:[#allocation3 + $0x3e] sm:$0xff] }
 0x881   : > { %v18618_v11 = vld [vmem:[#allocation17_spill] sm:$0xff] }
 0x882   : > { %v9280_v21 = vpop.f32.mrf.mxu2  ;;  %12392 = vmatmul.msk.f32.gmra.mxu3 %vm434_vm15, %v9749_v24  ;;  %12434 = vmatmul.msk.f32.gmra.mxu0 %vm434_vm15, %v9750_v32  ;;  %v9002_v15 = vadd.f32 %v17242_v56, %v8652_v59 }
 0x883   : > { %v17468_v45 = vadd.f32 %v9280_v21, %v9001_v9  ;;  %12461 = vmatmul.msk.f32.gmra.mxu1 %vm434_vm15, %v10084_v48  ;;  %v17479_v9 = vpop.f32.mrf.mxu1  ;;  %v9751_v21 = vld [vmem:[#allocation3 + $0x13c] sm:$0xff]  ;;  %v17481_v24 = vpop.f32.mrf.mxu0 }
 0x884   : > { %v10085_v48 = vld [vmem:[#allocation3 + $0xbd] sm:$0xff] }
 0x885   : > { %18614 = vst [vmem:[#allocation26_spill] sm:$0xff] %v17468_v45 }
 0x887   : > { %12488 = vmatmul.msk.f32.gmra.mxu2 %vm434_vm15, %v10418_v31  ;;  %v18619_v31 = vld [vmem:[#allocation84_spill] sm:$0xff] }
 0x888   : > { %v8653_v45 = vadd.f32 %v18619_v31, %v18618_v11  ;;  %v18622_v11 = vld [vmem:[#allocation46_spill] sm:$0xff] }
 0x889   : > { %v8654_v31 = vadd.f32 %v18622_v11, %v18621_v12  ;;  %v18625_v12 = vld [vmem:[#allocation18_spill] sm:$0xff] }
 0x88a   : > { %v9283_v22 = vpop.f32.mrf.mxu2  ;;  %12393 = vmatmul.msk.f32.gmra.mxu3 %vm434_vm15, %v9750_v32  ;;  %12435 = vmatmul.msk.f32.gmra.mxu0 %vm434_vm15, %v9751_v21  ;;  %v9003_v56 = vadd.f32 %v17260_v18, %v8653_v45  ;;  %v10086_v32 = vld [vmem:[#allocation3 + $0xc5] sm:$0xff] }
 0x88b   : > { %v17477_v6 = vadd.f32 %v9283_v22, %v9002_v15  ;;  %12462 = vmatmul.msk.f32.gmra.mxu1 %vm434_vm15, %v10085_v48  ;;  %v9752_v22 = vld [vmem:[#allocation3 + $0x144] sm:$0xff]  ;;  %v9004_v18 = vadd.f32 %v17278_v34, %v8654_v31 }
 0x88c   : > { %v10420_v48 = vld [vmem:[#allocation3 + $0x46] sm:$0xff] }
 0x88d   : > { %18617 = vst [vmem:[#allocation9_spill] sm:$0xff] %v17477_v6  ;;  %v17494_v6 = vpop.f32.mrf.mxu1 }
 0x88f   : > { %12489 = vmatmul.msk.f32.gmra.mxu2 %vm434_vm15, %v10419_v13  ;;  %v17499_v13 = vpop.f32.mrf.mxu0 }
 0x892   : > { %v9286_v59 = vpop.f32.mrf.mxu2  ;;  %12394 = vmatmul.msk.f32.gmra.mxu3 %vm434_vm15, %v9751_v21  ;;  %12436 = vmatmul.msk.f32.gmra.mxu0 %vm434_vm15, %v9752_v22  ;;  %v9753_v21 = vld [vmem:[#allocation3 + $0x14c] sm:$0xff] }
 0x893   : > { %v17490_v15 = vadd.f32 %v9286_v59, %v9003_v56  ;;  %12463 = vmatmul.msk.f32.gmra.mxu1 %vm434_vm15, %v10086_v32  ;;  %v10087_v59 = vld [vmem:[#allocation3 + $0xcd] sm:$0xff] }
 0x894   : > { %v10421_v32 = vld [vmem:[#allocation3 + $0x4e] sm:$0xff] }
 0x895   : > { %18620 = vst [vmem:[#allocation40_spill] sm:$0xff] %v17490_v15  ;;  %v18624_v15 = vld [vmem:[#allocation87_spill] sm:$0xff] }
 0x896   : > { %v8655_v11 = vadd.f32 %v18625_v12, %v18624_v15  ;;  %v10422_v15 = vld [vmem:[#allocation3 + $0x56] sm:$0xff] }
 0x897   : > { %12490 = vmatmul.msk.f32.gmra.mxu2 %vm434_vm15, %v10420_v48  ;;  %v17511_v48 = vpop.f32.mrf.mxu1  ;;  %v17514_v31 = vpop.f32.mrf.mxu0  ;;  %v18627_v12 = vld [vmem:[#allocation89_spill] sm:$0xff] }
 0x898   : > { %v9005_v34 = vadd.f32 %v17298_v43, %v8655_v11 }
 0x89a   : > { %v9289_v45 = vpop.f32.mrf.mxu2  ;;  %12395 = vmatmul.msk.f32.gmra.mxu3 %vm434_vm15, %v9752_v22  ;;  %12437 = vmatmul.msk.f32.gmra.mxu0 %vm434_vm15, %v9753_v21  ;;  %v9754_v22 = vld [vmem:[#allocation3 + $0x154] sm:$0xff] }
 0x89b   : > { %v17503_v56 = vadd.f32 %v9289_v45, %v9004_v18  ;;  %12464 = vmatmul.msk.f32.gmra.mxu1 %vm434_vm15, %v10087_v59  ;;  %v10088_v59 = vld [vmem:[#allocation3 + $0xd5] sm:$0xff] }
 0x89d   : > { %18623 = vst [vmem:[#allocation28_spill] sm:$0xff] %v17503_v56  ;;  %v9756_v56 = vld [vmem:[#allocation3 + $0x164] sm:$0xff] }
 0x89f   : > { %12491 = vmatmul.msk.f32.gmra.mxu2 %vm434_vm15, %v10421_v32  ;;  %v8656_v32 = vadd.f32 %v17063_v19, %v18627_v12  ;;  %v17525_v11 = vpop.f32.mrf.mxu1  ;;  %v10423_v19 = vld [vmem:[#allocation3 + $0x5e] sm:$0xff]  ;;  %v18629_v12 = vld [vmem:[#allocation4_spill] sm:$0xff] }
 0x8a1   : > { %v9006_v43 = vadd.f32 %v17318_v26, %v8656_v32 }
 0x8a2   : > { %v9292_v18 = vpop.f32.mrf.mxu2  ;;  %12396 = vmatmul.msk.f32.gmra.mxu3 %vm434_vm15, %v9753_v21  ;;  %12438 = vmatmul.msk.f32.gmra.mxu0 %vm434_vm15, %v9754_v22 }
 0x8a3   : > { %v17516_v45 = vadd.f32 %v9292_v18, %v9005_v34  ;;  %12465 = vmatmul.msk.f32.gmra.mxu1 %vm434_vm15, %v10088_v59  ;;  %v9755_v18 = vld [vmem:[#allocation3 + $0x15c] sm:$0xff] }
 0x8a4   : > { %v10089_v59 = vld [vmem:[#allocation3 + $0xdd] sm:$0xff] }
 0x8a5   : > { %18626 = vst [vmem:[#allocation38_spill] sm:$0xff] %v17516_v45  ;;  %v17527_v45 = vpop.f32.mrf.mxu0 }
 0x8a6   : > { %18628 = vst [vmem:[#allocation39_spill] sm:$0xff] %v17527_v45 }
 0x8a7   : > { %12492 = vmatmul.msk.f32.gmra.mxu2 %vm434_vm15, %v10422_v15  ;;  %v8657_v15 = vadd.f32 %v17083_v35, %v18629_v12  ;;  %v8658_v35 = vadd.f32 %v17104_v7, %v17066_v17  ;;  %v10091_v12 = vld [vmem:[#allocation3 + $0xed] sm:$0xff] }
 0x8a9   : > { %v9007_v26 = vadd.f32 %v17336_v40, %v8657_v15  ;;  %v9008_v40 = vadd.f32 %v17354_v38, %v8658_v35  ;;  %v10092_v38 = vld [vmem:[#allocation3 + $0xf5] sm:$0xff] }
 0x8aa   : > { %v9295_v34 = vpop.f32.mrf.mxu2  ;;  %12397 = vmatmul.msk.f32.gmra.mxu3 %vm434_vm15, %v9754_v22  ;;  %12439 = vmatmul.msk.f32.gmra.mxu0 %vm434_vm15, %v9755_v18  ;;  %v10424_v18 = vld [vmem:[#allocation3 + $0x66] sm:$0xff] }
 0x8ab   : > { %v17529_v21 = vadd.f32 %v9295_v34, %v9006_v43  ;;  %12466 = vmatmul.msk.f32.gmra.mxu1 %vm434_vm15, %v10089_v59  ;;  %v17540_v43 = vpop.f32.mrf.mxu1  ;;  %v10090_v34 = vld [vmem:[#allocation3 + $0xe5] sm:$0xff] }
 0x8ad   : > { %v17542_v22 = vpop.f32.mrf.mxu0 }
 0x8af   : > { %12493 = vmatmul.msk.f32.gmra.mxu2 %vm434_vm15, %v10423_v19 }
 0x8b2   : > { %v9298_v32 = vpop.f32.mrf.mxu2  ;;  %12440 = vmatmul.msk.f32.gmra.mxu0 %vm434_vm15, %v9756_v56  ;;  %v10425_v56 = vld [vmem:[#allocation3 + $0x6e] sm:$0xff] }
 0x8b3   : > { %v17538_v45 = vadd.f32 %v9298_v32, %v9007_v26  ;;  %12467 = vmatmul.msk.f32.gmra.mxu1 %vm434_vm15, %v10090_v34  ;;  %v17552_v15 = vpop.f32.mrf.mxu1  ;;  %v8659_v26 = vadd.f32 %v17127_v3, %v17081_v1  ;;  %v10426_v34 = vld [vmem:[#allocation3 + $0x76] sm:$0xff] }
 0x8b5   : > { %v9009_v17 = vadd.f32 %v17374_v62, %v8659_v26  ;;  %v10093_v62 = vld [vmem:[#allocation3 + $0xfd] sm:$0xff] }
 0x8b7   : > { %12494 = vmatmul.msk.f32.gmra.mxu2 %vm434_vm15, %v10424_v18  ;;  %v8660_v18 = vadd.f32 %v17146_v23, %v17098_v60 }
 0x8b9   : > { %v9010_v1 = vadd.f32 %v17394_v20, %v8660_v18  ;;  %v10094_v20 = vld [vmem:[#allocation3 + $0x105] sm:$0xff]  ;;  %v10429_v18 = vld [vmem:[#allocation3 + $0x8e] sm:$0xff] }
 0x8ba   : > { %v9301_v59 = vpop.f32.mrf.mxu2 }
 0x8bb   : > { %v17550_v19 = vadd.f32 %v9301_v59, %v9008_v40  ;;  %12468 = vmatmul.msk.f32.gmra.mxu1 %vm434_vm15, %v10091_v12  ;;  %v17565_v35 = vpop.f32.mrf.mxu1  ;;  %v10427_v59 = vld [vmem:[#allocation3 + $0x7e] sm:$0xff]  ;;  %v8661_v12 = vadd.f32 %v17166_v55, %v17115_v5 }
 0x8bd   : > { %v9011_v60 = vadd.f32 %v17412_v47, %v8661_v12  ;;  %v8664_v12 = vadd.f32 %v17225_v44, %v17164_v27 }
 0x8bf   : > { %12495 = vmatmul.msk.f32.gmra.mxu2 %vm434_vm15, %v10425_v56 }
 0x8c2   : > { %v9304_v7 = vpop.f32.mrf.mxu2 }
 0x8c3   : > { %v17559_v32 = vadd.f32 %v9304_v7, %v9009_v17  ;;  %12469 = vmatmul.msk.f32.gmra.mxu1 %vm434_vm15, %v10092_v38  ;;  %v17575_v23 = vpop.f32.mrf.mxu1  ;;  %v10428_v17 = vld [vmem:[#allocation3 + $0x86] sm:$0xff]  ;;  %v8662_v7 = vadd.f32 %v17186_v49, %v17132_v37 }
 0x8c5   : > { %v9012_v5 = vadd.f32 %v17430_v2, %v8662_v7  ;;  %v10096_v2 = vld [vmem:[#allocation3 + $0x115] sm:$0xff] }
 0x8c7   : > { %12496 = vmatmul.msk.f32.gmra.mxu2 %vm434_vm15, %v10426_v34  ;;  %v10095_v34 = vld [vmem:[#allocation3 + $0x10d] sm:$0xff] }
 0x8ca   : > { %v9307_v3 = vpop.f32.mrf.mxu2 }
 0x8cb   : > { %v17568_v40 = vadd.f32 %v9307_v3, %v9010_v1  ;;  %12470 = vmatmul.msk.f32.gmra.mxu1 %vm434_vm15, %v10093_v62  ;;  %v17586_v47 = vpop.f32.mrf.mxu1  ;;  %v8663_v1 = vadd.f32 %v17207_v54, %v17149_v58  ;;  %v9014_v58 = vadd.f32 %v17464_v4, %v8664_v12  ;;  %v10098_v4 = vld [vmem:[#allocation3 + $0x125] sm:$0xff] }
 0x8cd   : > { %v9013_v37 = vadd.f32 %v17450_v52, %v8663_v1  ;;  %v10097_v52 = vld [vmem:[#allocation3 + $0x11d] sm:$0xff]  ;;  %v17628_v1 = vld [vmem:[%s18028_s9] ss:$0 sm:$0xff] }
 0x8cf   : > { %12497 = vmatmul.msk.f32.gmra.mxu2 %vm434_vm15, %v10427_v59  ;;  %v10430_v59 = vld [vmem:[#allocation3 + $0x96] sm:$0xff] }
 0x8d2   : > { %v9310_v56 = vpop.f32.mrf.mxu2 }
 0x8d3   : > { %v17577_v26 = vadd.f32 %v9310_v56, %v9011_v60  ;;  %12471 = vmatmul.msk.f32.gmra.mxu1 %vm434_vm15, %v10094_v20  ;;  %v17595_v62 = vpop.f32.mrf.mxu1  ;;  %v10431_v56 = vld [vmem:[#allocation3 + $0x9e] sm:$0xff]  ;;  %v8665_v20 = vadd.f32 %v17244_v53, %v17180_v41  ;;  %v17621_v53 = vld [vmem:[%s18027_s8] ss:$0 sm:$0xff] }
 0x8d5   : > { %v9015_v27 = vadd.f32 %v17479_v9, %v8665_v20  ;;  %v10100_v20 = vld [vmem:[#allocation3 + $0x135] sm:$0xff] }
 0x8d7   : > { %12498 = vmatmul.msk.f32.gmra.mxu2 %vm434_vm15, %v10428_v17 }
 0x8da   : > { %v9313_v55 = vpop.f32.mrf.mxu2 }
 0x8db   : > { %v17584_v38 = vadd.f32 %v9313_v55, %v9012_v5  ;;  %12472 = vmatmul.msk.f32.gmra.mxu1 %vm434_vm15, %v10095_v34  ;;  %v17608_v17 = vpop.f32.mrf.mxu1  ;;  %v10432_v5 = vld [vmem:[#allocation3 + $0xa6] sm:$0xff]  ;;  %v10025_v55 = vadd.f32 %v17262_v10, %v17196_v42 }
 0x8dc   : > { %v10099_v10 = vld [vmem:[#allocation3 + $0x12d] sm:$0xff] }
 0x8dd   : > { %v10375_v41 = vadd.f32 %v17494_v6, %v10025_v55  ;;  %v10433_v6 = vld [vmem:[#allocation3 + $0xae] sm:$0xff] }
 0x8df   : > { %12499 = vmatmul.msk.f32.gmra.mxu2 %vm434_vm15, %v10429_v18 }
 0x8e2   : > { %v9316_v49 = vpop.f32.mrf.mxu2 }
 0x8e3   : > { %v17593_v3 = vadd.f32 %v9316_v49, %v9013_v37  ;;  %12473 = vmatmul.msk.f32.gmra.mxu1 %vm434_vm15, %v10096_v2  ;;  %v17623_v9 = vpop.f32.mrf.mxu1  ;;  %v10026_v37 = vadd.f32 %v17283_v14, %v17212_v16 }
 0x8e5   : > { %v10376_v2 = vadd.f32 %v17511_v48, %v10026_v37  ;;  %v10434_v48 = vld [vmem:[#allocation3 + $0xb6] sm:$0xff] }
 0x8e7   : > { %12500 = vmatmul.msk.f32.gmra.mxu2 %vm434_vm15, %v10430_v59 }
 0x8ea   : > { %v9319_v54 = vpop.f32.mrf.mxu2 }
 0x8eb   : > { %v17602_v60 = vadd.f32 %v9319_v54, %v9014_v58  ;;  %12474 = vmatmul.msk.f32.gmra.mxu1 %vm434_vm15, %v10097_v52  ;;  %v11023_v58 = vpop.permute.xlu1 %11022  ;;  %v17643_v16 = vpop.f32.mrf.mxu1 }
 0x8ef   : > { %12501 = vmatmul.msk.f32.gmra.mxu2 %vm434_vm15, %v10431_v56 }
 0x8f2   : > { %v9322_v44 = vpop.f32.mrf.mxu2 }
 0x8f3   : > { %v17611_v7 = vadd.f32 %v9322_v44, %v9015_v27  ;;  %12475 = vmatmul.msk.f32.gmra.mxu1 %vm434_vm15, %v10098_v4  ;;  %v10027_v27 = vadd.f32 %v17301_v29, %v17228_v28  ;;  %v17655_v37 = vpop.f32.mrf.mxu1  ;;  %v10435_v28 = vld [vmem:[#allocation3 + $0xbe] sm:$0xff]  ;;  %v10028_v29 = vadd.f32 %v17320_v50, %v17240_v0  ;;  %v10436_v0 = vld [vmem:[#allocation3 + $0xc6] sm:$0xff]  ;;  %v10029_v50 = vadd.f32 %v17338_v25, %v17256_v57  ;;  %v10437_v57 = vld [vmem:[#allocation3 + $0xce] sm:$0xff] }
 0x8f4   : > { %v18630_v25 = vld [vmem:[#allocation53_spill] sm:$0xff] }
 0x8f5   : > { %v10377_v4 = vadd.f32 %v17525_v11, %v10027_v27 }
 0x8f7   : > { %12502 = vmatmul.msk.f32.gmra.mxu2 %vm434_vm15, %v10432_v5 }
 0x8fa   : > { %v10602_v34 = vpop.f32.mrf.mxu2 }
 0x8fb   : > { %v10725_v18 = vadd.f32 %v10602_v34, %v10375_v41  ;;  %12476 = vmatmul.msk.f32.gmra.mxu1 %vm434_vm15, %v10099_v10  ;;  %v11028_v41 = vpop.permute.xlu2 %11027 }
 0x8fd   : > { %v10770_v42 = vmul.f32 %v17621_v53, %v10725_v18 }
 0x8ff   : > { %v10815_v49 = vadd.f32 %v17628_v1, %v10770_v42  ;;  %12503 = vmatmul.msk.f32.gmra.mxu2 %vm434_vm15, %v10433_v6  ;;  %v10101_v6 = vld [vmem:[#allocation3 + $0x13d] sm:$0xff] }
 0x901   : > { %vm10856_vm13 = vcmp.ge.f32.partialorder %v10815_v49, 0.0  ;;  %v10897_v59 = vmul.f32 0.1, %v10815_v49 }
 0x902   : > { %v10605_v12 = vpop.f32.mrf.mxu2 }
 0x903   : > { %v10938_v54 = vsel %vm10856_vm13, %v10815_v49, %v10897_v59  ;;  %v10726_v52 = vadd.f32 %v10605_v12, %v10376_v2  ;;  %12477 = vmatmul.msk.f32.gmra.mxu1 %vm434_vm15, %v10100_v20  ;;  %v10378_v49 = vadd.f32 %v17540_v43, %v10028_v29  ;;  %v11033_v12 = vpop.permute.xlu0 %11032  ;;  %v17673_v20 = vpop.f32.mrf.mxu1 }
 0x904   : > { %v11225_v14 = vmul.f32 %v11023_v58, %v10938_v54 }
 0x905   : > { %v10771_v56 = vmul.f32 %v17621_v53, %v10726_v52 }
 0x906   : > { %11266 = vst.msk [vmem:[%s17641_s14] sm:$0xff] %vm434_vm15, %v11225_v14 }
 0x907   : > { %v10816_v44 = vadd.f32 %v17628_v1, %v10771_v56  ;;  %12504 = vmatmul.msk.f32.gmra.mxu2 %vm434_vm15, %v10434_v48  ;;  %v10102_v56 = vld [vmem:[#allocation3 + $0x145] sm:$0xff]  ;;  %v10379_v48 = vadd.f32 %v17552_v15, %v10029_v50 }
 0x909   : > { %vm10857_vm2 = vcmp.ge.f32.partialorder %v10816_v44, 0.0  ;;  %v10898_v5 = vmul.f32 0.1, %v10816_v44 }
 0x90a   : > { %v10608_v55 = vpop.f32.mrf.mxu2 }
 0x90b   : > { %v10939_v34 = vsel %vm10857_vm2, %v10816_v44, %v10898_v5  ;;  %v10727_v18 = vadd.f32 %v10608_v55, %v10377_v4  ;;  %12478 = vmatmul.msk.f32.gmra.mxu1 %vm434_vm15, %v10101_v6  ;;  %v11038_v4 = vpop.permute.xlu1 %11037  ;;  %v11048_v50 = vpop.permute.xlu0 %11047 }
 0x90c   : > { %v11226_v42 = vmul.f32 %v11028_v41, %v10939_v34 }
 0x90d   : > { %v10772_v10 = vmul.f32 %v17621_v53, %v10727_v18  ;;  %v10103_v18 = vld [vmem:[#allocation3 + $0x14d] sm:$0xff] }
 0x90e   : > { %11267 = vst.msk [vmem:[%s17641_s14 + $0x8] sm:$0xff] %vm434_vm15, %v11226_v42  ;;  %v10030_v42 = vadd.f32 %v17359_v30, %v18630_v25  ;;  %v10438_v30 = vld [vmem:[#allocation3 + $0xd6] sm:$0xff] }
 0x90f   : > { %v10817_v11 = vadd.f32 %v17628_v1, %v10772_v10  ;;  %12505 = vmatmul.msk.f32.gmra.mxu2 %vm434_vm15, %v10435_v28  ;;  %v17685_v28 = vpop.f32.mrf.mxu1 }
 0x910   : > { %v10380_v10 = vadd.f32 %v17565_v35, %v10030_v42 }
 0x911   : > { %vm10858_vm3 = vcmp.ge.f32.partialorder %v10817_v11, 0.0  ;;  %v10899_v2 = vmul.f32 0.1, %v10817_v11 }
 0x912   : > { %v10611_v59 = vpop.f32.mrf.mxu2 }
 0x913   : > { %v10940_v58 = vsel %vm10858_vm3, %v10817_v11, %v10899_v2  ;;  %v10728_v54 = vadd.f32 %v10611_v59, %v10378_v49  ;;  %12479 = vmatmul.msk.f32.gmra.mxu1 %vm434_vm15, %v10102_v56  ;;  %v11043_v11 = vpop.permute.xlu2 %11042  ;;  %v11053_v25 = vpop.permute.xlu1 %11052 }
 0x914   : > { %v11227_v52 = vmul.f32 %v11033_v12, %v10940_v58  ;;  %v10104_v58 = vld [vmem:[#allocation3 + $0x155] sm:$0xff] }
 0x915   : > { %v10773_v14 = vmul.f32 %v17621_v53, %v10728_v54  ;;  %v18631_v54 = vld [vmem:[#allocation31_spill] sm:$0xff] }
 0x916   : > { %11268 = vst.msk [vmem:[%s17641_s14 + $0x10] sm:$0xff] %vm434_vm15, %v11227_v52  ;;  %v10031_v35 = vadd.f32 %v17377_v8, %v18631_v54  ;;  %v10439_v8 = vld [vmem:[#allocation3 + $0xde] sm:$0xff] }
 0x917   : > { %v10818_v43 = vadd.f32 %v17628_v1, %v10773_v14  ;;  %12506 = vmatmul.msk.f32.gmra.mxu2 %vm434_vm15, %v10436_v0 }
 0x918   : > { %v10381_v14 = vadd.f32 %v17575_v23, %v10031_v35 }
 0x919   : > { %vm10859_vm4 = vcmp.ge.f32.partialorder %v10818_v43, 0.0  ;;  %v10900_v27 = vmul.f32 0.1, %v10818_v43 }
 0x91a   : > { %v10614_v44 = vpop.f32.mrf.mxu2 }
 0x91b   : > { %v10941_v5 = vsel %vm10859_vm4, %v10818_v43, %v10900_v27  ;;  %v10729_v55 = vadd.f32 %v10614_v44, %v10379_v48  ;;  %12480 = vmatmul.msk.f32.gmra.mxu1 %vm434_vm15, %v10103_v18  ;;  %v10105_v27 = vld [vmem:[#allocation3 + $0x15d] sm:$0xff]  ;;  %v17696_v44 = vpop.f32.mrf.mxu1 }
 0x91c   : > { %v11228_v41 = vmul.f32 %v11038_v4, %v10941_v5 }
 0x91d   : > { %v10774_v34 = vmul.f32 %v17621_v53, %v10729_v55  ;;  %v18632_v55 = vld [vmem:[#allocation24_spill] sm:$0xff] }
 0x91e   : > { %11269 = vst.msk [vmem:[%s17641_s14 + $0x18] sm:$0xff] %vm434_vm15, %v11228_v41  ;;  %v10032_v23 = vadd.f32 %v17396_v51, %v18632_v55  ;;  %v10440_v51 = vld [vmem:[#allocation3 + $0xe6] sm:$0xff]  ;;  %v10442_v55 = vld [vmem:[#allocation3 + $0xf6] sm:$0xff] }
 0x91f   : > { %v10819_v15 = vadd.f32 %v17628_v1, %v10774_v34  ;;  %12507 = vmatmul.msk.f32.gmra.mxu2 %vm434_vm15, %v10437_v57 }
 0x920   : > { %v10382_v34 = vadd.f32 %v17586_v47, %v10032_v23 }
 0x921   : > { %vm10860_vm5 = vcmp.ge.f32.partialorder %v10819_v15, 0.0  ;;  %v10901_v6 = vmul.f32 0.1, %v10819_v15 }
 0x922   : > { %v10617_v29 = vpop.f32.mrf.mxu2 }
 0x923   : > { %v10942_v49 = vsel %vm10860_vm5, %v10819_v15, %v10901_v6  ;;  %v10730_v2 = vadd.f32 %v10617_v29, %v10380_v10  ;;  %12481 = vmatmul.msk.f32.gmra.mxu1 %vm434_vm15, %v10104_v58  ;;  %v10106_v10 = vld [vmem:[#allocation3 + $0x165] sm:$0xff] }
 0x924   : > { %v11229_v59 = vmul.f32 %v11043_v11, %v10942_v49  ;;  %v17708_v11 = vpop.f32.mrf.mxu1  ;;  %v18633_v49 = vld [vmem:[#allocation27_spill] sm:$0xff] }
 0x925   : > { %v10775_v12 = vmul.f32 %v17621_v53, %v10730_v2  ;;  %v10033_v47 = vadd.f32 %v17414_v36, %v18633_v49  ;;  %v10034_v36 = vadd.f32 %v17435_v63, %v17332_v46  ;;  %v18634_v46 = vld [vmem:[#allocation35_spill] sm:$0xff] }
 0x926   : > { %11270 = vst.msk [vmem:[%s17641_s14 + $0x20] sm:$0xff] %vm434_vm15, %v11229_v59  ;;  %v10035_v63 = vadd.f32 %v17453_v33, %v18634_v46  ;;  %v10443_v33 = vld [vmem:[#allocation3 + $0xfe] sm:$0xff] }
 0x927   : > { %v10820_v52 = vadd.f32 %v17628_v1, %v10775_v12  ;;  %12508 = vmatmul.msk.f32.gmra.mxu2 %vm434_vm15, %v10438_v30  ;;  %v10383_v59 = vadd.f32 %v17595_v62, %v10033_v47  ;;  %v11058_v30 = vpop.permute.xlu2 %11057  ;;  %v10384_v62 = vadd.f32 %v17608_v17, %v10034_v36 }
 0x928   : > { %v10385_v17 = vadd.f32 %v17623_v9, %v10035_v63  ;;  %v10036_v9 = vadd.f32 %v17466_v39, %v17364_v61  ;;  %v10444_v61 = vld [vmem:[#allocation3 + $0x106] sm:$0xff]  ;;  %v18635_v39 = vld [vmem:[#allocation20_spill] sm:$0xff] }
 0x929   : > { %vm10861_vm6 = vcmp.ge.f32.partialorder %v10820_v52, 0.0  ;;  %v10902_v56 = vmul.f32 0.1, %v10820_v52 }
 0x92a   : > { %v10620_v0 = vpop.f32.mrf.mxu2  ;;  %v10386_v49 = vadd.f32 %v17643_v16, %v10036_v9 }
 0x92b   : > { %v10943_v43 = vsel %vm10861_vm6, %v10820_v52, %v10902_v56  ;;  %v10731_v48 = vadd.f32 %v10620_v0, %v10381_v14  ;;  %12482 = vmatmul.msk.f32.gmra.mxu1 %vm434_vm15, %v10105_v27  ;;  %v10441_v56 = vld [vmem:[#allocation3 + $0xee] sm:$0xff] }
 0x92c   : > { %v11230_v4 = vmul.f32 %v11048_v50, %v10943_v43 }
 0x92d   : > { %v10776_v5 = vmul.f32 %v17621_v53, %v10731_v48  ;;  %v11063_v48 = vpop.permute.xlu0 %11062 }
 0x92e   : > { %11271 = vst.msk [vmem:[%s17641_s14 + $0x28] sm:$0xff] %vm434_vm15, %v11230_v4 }
 0x92f   : > { %v10821_v41 = vadd.f32 %v17628_v1, %v10776_v5  ;;  %12509 = vmatmul.msk.f32.gmra.mxu2 %vm434_vm15, %v10439_v8 }
 0x931   : > { %vm10862_vm7 = vcmp.ge.f32.partialorder %v10821_v41, 0.0  ;;  %v10903_v18 = vmul.f32 0.1, %v10821_v41 }
 0x932   : > { %v10623_v57 = vpop.f32.mrf.mxu2 }
 0x933   : > { %v10944_v42 = vsel %vm10862_vm7, %v10821_v41, %v10903_v18  ;;  %v10732_v15 = vadd.f32 %v10623_v57, %v10382_v34  ;;  %12483 = vmatmul.msk.f32.gmra.mxu1 %vm434_vm15, %v10106_v10  ;;  %v17734_v34 = vpop.f32.mrf.mxu3  ;;  %v11068_v57 = vpop.permute.xlu1 %11067 }
 0x934   : > { %v11231_v6 = vmul.f32 %v11053_v25, %v10944_v42 }
 0x935   : > { %v10777_v29 = vmul.f32 %v17621_v53, %v10732_v15 }
 0x936   : > { %11272 = vst.msk [vmem:[%s17641_s14 + $0x30] sm:$0xff] %vm434_vm15, %v11231_v6  ;;  %v17737_v6 = vpop.f32.mrf.mxu0 }
 0x937   : > { %v10822_v2 = vadd.f32 %v17628_v1, %v10777_v29  ;;  %12510 = vmatmul.msk.f32.gmra.mxu2 %vm434_vm15, %v10440_v51  ;;  %v17745_v51 = vpop.f32.mrf.mxu1 }
 0x939   : > { %vm10863_vm8 = vcmp.ge.f32.partialorder %v10822_v2, 0.0  ;;  %v10904_v12 = vmul.f32 0.1, %v10822_v2 }
 0x93a   : > { %v10626_v58 = vpop.f32.mrf.mxu2 }
 0x93b   : > { %v10945_v54 = vsel %vm10863_vm8, %v10822_v2, %v10904_v12  ;;  %v10733_v35 = vadd.f32 %v10626_v58, %v10383_v59  ;;  %v11073_v59 = vpop.permute.xlu2 %11072 }
 0x93c   : > { %v11232_v52 = vmul.f32 %v11058_v30, %v10945_v54  ;;  %v17748_v30 = vpop.f32.mrf.mxu3 }
 0x93d   : > { %v10778_v14 = vmul.f32 %v17621_v53, %v10733_v35 }
 0x93e   : > { %11273 = vst.msk [vmem:[%s17641_s14 + $0x38] sm:$0xff] %vm434_vm15, %v11232_v52  ;;  %v10037_v52 = vadd.f32 %v17481_v24, %v18635_v39  ;;  %v18638_v39 = vld [vmem:[#allocation8_spill] sm:$0xff] }
 0x93f   : > { %v10823_v0 = vadd.f32 %v17628_v1, %v10778_v14  ;;  %12511 = vmatmul.msk.f32.gmra.mxu2 %vm434_vm15, %v10441_v56  ;;  %v17757_v14 = vpop.f32.mrf.mxu0 }
 0x940   : > { %v10387_v56 = vadd.f32 %v17655_v37, %v10037_v52  ;;  %v18639_v52 = vld [vmem:[#allocation39_spill] sm:$0xff] }
 0x941   : > { %vm10864_vm9 = vcmp.ge.f32.partialorder %v10823_v0, 0.0  ;;  %v10905_v50 = vmul.f32 0.1, %v10823_v0 }
 0x942   : > { %v10629_v43 = vpop.f32.mrf.mxu2 }
 0x943   : > { %v10946_v27 = vsel %vm10864_vm9, %v10823_v0, %v10905_v50  ;;  %v10734_v4 = vadd.f32 %v10629_v43, %v10384_v62  ;;  %v17760_v0 = vpop.f32.mrf.mxu1  ;;  %v11078_v50 = vpop.permute.xlu0 %11077 }
 0x944   : > { %v11233_v5 = vmul.f32 %v11063_v48, %v10946_v27  ;;  %v17763_v24 = vpop.f32.mrf.mxu3 }
 0x945   : > { %v10779_v8 = vmul.f32 %v17621_v53, %v10734_v4 }
 0x946   : > { %11274 = vst.msk [vmem:[%s17641_s14 + $0x40] sm:$0xff] %vm434_vm15, %v11233_v5  ;;  %v10445_v5 = vld [vmem:[#allocation3 + $0x10e] sm:$0xff] }
 0x947   : > { %v10824_v23 = vadd.f32 %v17628_v1, %v10779_v8  ;;  %12512 = vmatmul.msk.f32.gmra.mxu2 %vm434_vm15, %v10442_v55  ;;  %v18636_v8 = vld [vmem:[#allocation33_spill] sm:$0xff] }
 0x948   : > { %v10038_v37 = vadd.f32 %v17499_v13, %v18636_v8  ;;  %v10446_v13 = vld [vmem:[#allocation3 + $0x116] sm:$0xff] }
 0x949   : > { %vm10865_vm10 = vcmp.ge.f32.partialorder %v10824_v23, 0.0  ;;  %v10906_v41 = vmul.f32 0.1, %v10824_v23 }
 0x94a   : > { %v10632_v18 = vpop.f32.mrf.mxu2  ;;  %v10388_v46 = vadd.f32 %v17673_v20, %v10038_v37  ;;  %v10448_v37 = vld [vmem:[#allocation3 + $0x126] sm:$0xff] }
 0x94b   : > { %v10947_v25 = vsel %vm10865_vm10, %v10824_v23, %v10906_v41  ;;  %v10735_v42 = vadd.f32 %v10632_v18, %v10385_v17  ;;  %v17772_v23 = vpop.f32.mrf.mxu0  ;;  %v11083_v41 = vpop.permute.xlu1 %11082 }
 0x94c   : > { %v11234_v15 = vmul.f32 %v11068_v57, %v10947_v25  ;;  %v17774_v25 = vpop.f32.mrf.mxu1  ;;  %v17783_v9 = vpop.f32.mrf.mxu3 }
 0x94d   : > { %v10780_v10 = vmul.f32 %v17621_v53, %v10735_v42 }
 0x94e   : > { %11275 = vst.msk [vmem:[%s17641_s14 + $0x48] sm:$0xff] %vm434_vm15, %v11234_v15 }
 0x94f   : > { %v10825_v29 = vadd.f32 %v17628_v1, %v10780_v10  ;;  %12513 = vmatmul.msk.f32.gmra.mxu2 %vm434_vm15, %v10443_v33  ;;  %v18637_v10 = vld [vmem:[#allocation57_spill] sm:$0xff] }
 0x950   : > { %v10039_v20 = vadd.f32 %v17514_v31, %v18637_v10 }
 0x951   : > { %vm10866_vm11 = vcmp.ge.f32.partialorder %v10825_v29, 0.0  ;;  %v10907_v47 = vmul.f32 0.1, %v10825_v29 }
 0x952   : > { %v10635_v2 = vpop.f32.mrf.mxu2 }
 0x953   : > { %v10948_v12 = vsel %vm10866_vm11, %v10825_v29, %v10907_v47  ;;  %v10736_v58 = vadd.f32 %v10635_v2, %v10386_v49  ;;  %v10389_v29 = vadd.f32 %v17685_v28, %v10039_v20  ;;  %v11088_v2 = vpop.permute.xlu2 %11087  ;;  %v10040_v28 = vadd.f32 %v18639_v52, %v18638_v39 }
 0x954   : > { %v11235_v54 = vmul.f32 %v11073_v59, %v10948_v12  ;;  %v17789_v31 = vpop.f32.mrf.mxu1 }
 0x955   : > { %v10781_v35 = vmul.f32 %v17621_v53, %v10736_v58  ;;  %v17786_v58 = vpop.f32.mrf.mxu0 }
 0x956   : > { %11276 = vst.msk [vmem:[%s17641_s14 + $0x50] sm:$0xff] %vm434_vm15, %v11235_v54 }
 0x957   : > { %v10826_v16 = vadd.f32 %v17628_v1, %v10781_v35  ;;  %12514 = vmatmul.msk.f32.gmra.mxu2 %vm434_vm15, %v10444_v61  ;;  %v10447_v61 = vld [vmem:[#allocation3 + $0x11e] sm:$0xff] }
 0x959   : > { %vm10867_vm0 = vcmp.ge.f32.partialorder %v10826_v16, 0.0  ;;  %v10908_v36 = vmul.f32 0.1, %v10826_v16 }
 0x95a   : > { %v10638_v62 = vpop.f32.mrf.mxu2 }
 0x95b   : > { %v10949_v43 = vsel %vm10867_vm0, %v10826_v16, %v10908_v36  ;;  %v10737_v48 = vadd.f32 %v10638_v62, %v10387_v56  ;;  %v10390_v56 = vadd.f32 %v17696_v44, %v10040_v28  ;;  %v17798_v62 = vpop.f32.mrf.mxu3 }
 0x95c   : > { %v11236_v27 = vmul.f32 %v11078_v50, %v10949_v43  ;;  %v11093_v43 = vpop.permute.xlu0 %11092 }
 0x95d   : > { %v10782_v4 = vmul.f32 %v17621_v53, %v10737_v48  ;;  %v17801_v8 = vpop.f32.mrf.mxu0 }
 0x95e   : > { %11277 = vst.msk [vmem:[%s17641_s14 + $0x58] sm:$0xff] %vm434_vm15, %v11236_v27 }
 0x95f   : > { %v10827_v55 = vadd.f32 %v17628_v1, %v10782_v4  ;;  %12515 = vmatmul.msk.f32.gmra.mxu2 %vm434_vm15, %v10445_v5 }
 0x961   : > { %vm10868_vm12 = vcmp.ge.f32.partialorder %v10827_v55, 0.0  ;;  %v10909_v63 = vmul.f32 0.1, %v10827_v55 }
 0x962   : > { %v10641_v17 = vpop.f32.mrf.mxu2 }
 0x963   : > { %v10950_v18 = vsel %vm10868_vm12, %v10827_v55, %v10909_v63  ;;  %v10738_v57 = vadd.f32 %v10641_v17, %v10388_v46  ;;  %v18640_v55 = vld [vmem:[#allocation73_spill] sm:$0xff]  ;;  %v17809_v63 = vpop.f32.mrf.mxu1  ;;  %v17814_v20 = vpop.f32.mrf.mxu3 }
 0x964   : > { %v11237_v42 = vmul.f32 %v11083_v41, %v10950_v18  ;;  %v10041_v44 = vadd.f32 %v17542_v22, %v18640_v55 }
 0x965   : > { %v10783_v15 = vmul.f32 %v17621_v53, %v10738_v57  ;;  %v11098_v57 = vpop.permute.xlu1 %11097 }
 0x966   : > { %11278 = vst.msk [vmem:[%s17641_s14 + $0x60] sm:$0xff] %vm434_vm15, %v11237_v42  ;;  %v10391_v17 = vadd.f32 %v17708_v11, %v10041_v44  ;;  %v18641_v42 = vld [vmem:[#allocation47_spill] sm:$0xff] }
 0x967   : > { %v10828_v33 = vadd.f32 %v17628_v1, %v10783_v15  ;;  %12516 = vmatmul.msk.f32.gmra.mxu2 %vm434_vm15, %v10446_v13  ;;  %v9692_v15 = vadd.f32 %v17734_v34, %v18641_v42 }
 0x969   : > { %vm10869_vm14 = vcmp.ge.f32.partialorder %v10828_v33, 0.0  ;;  %v10910_v49 = vmul.f32 0.1, %v10828_v33 }
 0x96a   : > { %v10644_v47 = vpop.f32.mrf.mxu2 }
 0x96b   : > { %v10951_v59 = vsel %vm10869_vm14, %v10828_v33, %v10910_v49  ;;  %v10739_v12 = vadd.f32 %v10644_v47, %v10389_v29  ;;  %v10449_v29 = vld [vmem:[#allocation3 + $0x12e] sm:$0xff]  ;;  %v10042_v49 = vadd.f32 %v17737_v6, %v9692_v15  ;;  %v17822_v47 = vpop.f32.mrf.mxu0 }
 0x96c   : > { %v11238_v54 = vmul.f32 %v11088_v2, %v10951_v59  ;;  %v17825_v59 = vpop.f32.mrf.mxu1 }
 0x96d   : > { %v10784_v35 = vmul.f32 %v17621_v53, %v10739_v12  ;;  %v10392_v34 = vadd.f32 %v17745_v51, %v10042_v49  ;;  %v11113_v15 = vpop.permute.xlu1 %11112 }
 0x96e   : > { %11279 = vst.msk [vmem:[%s17641_s14 + $0x68] sm:$0xff] %vm434_vm15, %v11238_v54  ;;  %v11103_v54 = vpop.permute.xlu2 %11102 }
 0x96f   : > { %v10829_v16 = vadd.f32 %v17628_v1, %v10784_v35  ;;  %12517 = vmatmul.msk.f32.gmra.mxu2 %vm434_vm15, %v10447_v61  ;;  %v18642_v35 = vld [vmem:[#allocation6_spill] sm:$0xff] }
 0x970   : > { %v9693_v61 = vadd.f32 %v17748_v30, %v18642_v35 }
 0x971   : > { %vm10870_vm1 = vcmp.ge.f32.partialorder %v10829_v16, 0.0  ;;  %v10911_v36 = vmul.f32 0.1, %v10829_v16 }
 0x972   : > { %v10647_v50 = vpop.f32.mrf.mxu2  ;;  %v10043_v51 = vadd.f32 %v17757_v14, %v9693_v61 }
 0x973   : > { %v10952_v48 = vsel %vm10870_vm1, %v10829_v16, %v10911_v36  ;;  %v10740_v27 = vadd.f32 %v10647_v50, %v10390_v56  ;;  %v17830_v16 = vpop.f32.mrf.mxu3  ;;  %v10450_v56 = vld [vmem:[#allocation3 + $0x136] sm:$0xff] }
 0x974   : > { %v11239_v4 = vmul.f32 %v11093_v43, %v10952_v48  ;;  %v10393_v50 = vadd.f32 %v17760_v0, %v10043_v51  ;;  %v17838_v43 = vpop.f32.mrf.mxu0  ;;  %v17842_v44 = vpop.f32.mrf.mxu1 }
 0x975   : > { %v10785_v5 = vmul.f32 %v17621_v53, %v10740_v27  ;;  %v11108_v27 = vpop.permute.xlu0 %11107 }
 0x976   : > { %11280 = vst.msk [vmem:[%s17641_s14 + $0x70] sm:$0xff] %vm434_vm15, %v11239_v4  ;;  %v18643_v4 = vld [vmem:[#allocation44_spill] sm:$0xff]  ;;  %v11118_v61 = vpop.permute.xlu2 %11117 }
 0x977   : > { %v10830_v46 = vadd.f32 %v17628_v1, %v10785_v5  ;;  %12518 = vmatmul.msk.f32.gmra.mxu2 %vm434_vm15, %v10448_v37  ;;  %v9694_v5 = vadd.f32 %v17763_v24, %v18643_v4 }
 0x979   : > { %vm10871_vm13 = vcmp.ge.f32.partialorder %v10830_v46, 0.0  ;;  %v10912_v41 = vmul.f32 0.1, %v10830_v46  ;;  %v10044_v0 = vadd.f32 %v17772_v23, %v9694_v5  ;;  %v18646_v5 = vld [vmem:[#allocation7_spill] sm:$0xff] }
 0x97a   : > { %v10650_v18 = vpop.f32.mrf.mxu2 }
 0x97b   : > { %v10953_v13 = vsel %vm10871_vm13, %v10830_v46, %v10912_v41  ;;  %v10741_v10 = vadd.f32 %v10650_v18, %v10391_v17  ;;  %v10451_v17 = vld [vmem:[#allocation3 + $0x13e] sm:$0xff]  ;;  %v17850_v18 = vpop.f32.mrf.mxu3  ;;  %v10394_v24 = vadd.f32 %v17774_v25, %v10044_v0  ;;  %v10454_v0 = vld [vmem:[#allocation3 + $0x156] sm:$0xff] }
 0x97c   : > { %v11240_v22 = vmul.f32 %v11098_v57, %v10953_v13  ;;  %v18644_v13 = vld [vmem:[#allocation30_spill] sm:$0xff] }
 0x97d   : > { %v10786_v33 = vmul.f32 %v17621_v53, %v10741_v10  ;;  %v9695_v10 = vadd.f32 %v17783_v9, %v18644_v13  ;;  %v11123_v4 = vpop.permute.xlu0 %11122  ;;  %v11128_v13 = vpop.permute.xlu1 %11127 }
 0x97e   : > { %11281 = vst.msk [vmem:[%s17641_s14 + $0x78] sm:$0xff] %vm434_vm15, %v11240_v22 }
 0x97f   : > { %v10831_v11 = vadd.f32 %v17628_v1, %v10786_v33  ;;  %12519 = vmatmul.msk.f32.gmra.mxu2 %vm434_vm15, %v10449_v29  ;;  %v17855_v29 = vpop.f32.mrf.mxu0  ;;  %v10045_v25 = vadd.f32 %v17786_v58, %v9695_v10  ;;  %v18647_v10 = vld [vmem:[#allocation22_spill] sm:$0xff] }
 0x981   : > { %vm10872_vm2 = vcmp.ge.f32.partialorder %v10831_v11, 0.0  ;;  %v10913_v2 = vmul.f32 0.1, %v10831_v11  ;;  %v10395_v9 = vadd.f32 %v17789_v31, %v10045_v25 }
 0x982   : > { %v10653_v12 = vpop.f32.mrf.mxu2 }
 0x983   : > { %v10954_v39 = vsel %vm10872_vm2, %v10831_v11, %v10913_v2  ;;  %v10742_v6 = vadd.f32 %v10653_v12, %v10392_v34  ;;  %v17858_v11 = vpop.f32.mrf.mxu1  ;;  %v10452_v34 = vld [vmem:[#allocation3 + $0x146] sm:$0xff] }
 0x984   : > { %v11241_v52 = vmul.f32 %v11103_v54, %v10954_v39  ;;  %v17866_v54 = vpop.f32.mrf.mxu3  ;;  %v18645_v39 = vld [vmem:[#allocation21_spill] sm:$0xff] }
 0x985   : > { %v10787_v28 = vmul.f32 %v17621_v53, %v10742_v6  ;;  %v9696_v6 = vadd.f32 %v17798_v62, %v18645_v39  ;;  %v18648_v39 = vld [vmem:[#allocation34_spill] sm:$0xff] }
 0x986   : > { %11282 = vst.msk [vmem:[%s17641_s14 + $0x80] sm:$0xff] %vm434_vm15, %v11241_v52 }
 0x987   : > { %v10832_v36 = vadd.f32 %v17628_v1, %v10787_v28  ;;  %12520 = vmatmul.msk.f32.gmra.mxu2 %vm434_vm15, %v10450_v56  ;;  %v17871_v51 = vpop.f32.mrf.mxu0  ;;  %v10046_v31 = vadd.f32 %v17801_v8, %v9696_v6  ;;  %v9699_v6 = vadd.f32 %v17850_v18, %v18648_v39 }
 0x989   : > { %vm10873_vm3 = vcmp.ge.f32.partialorder %v10832_v36, 0.0  ;;  %v10914_v30 = vmul.f32 0.1, %v10832_v36  ;;  %v10396_v62 = vadd.f32 %v17809_v63, %v10046_v31  ;;  %v10049_v31 = vadd.f32 %v17855_v29, %v9699_v6 }
 0x98a   : > { %v10656_v48 = vpop.f32.mrf.mxu2 }
 0x98b   : > { %v10955_v37 = vsel %vm10873_vm3, %v10832_v36, %v10914_v30  ;;  %v10743_v55 = vadd.f32 %v10656_v48, %v10393_v50  ;;  %v10453_v36 = vld [vmem:[#allocation3 + $0x14e] sm:$0xff]  ;;  %v17878_v30 = vpop.f32.mrf.mxu1 }
 0x98c   : > { %v11242_v14 = vmul.f32 %v11108_v27, %v10955_v37  ;;  %v9697_v37 = vadd.f32 %v17814_v20, %v18646_v5 }
 0x98d   : > { %v10788_v46 = vmul.f32 %v17621_v53, %v10743_v55 }
 0x98e   : > { %11283 = vst.msk [vmem:[%s17641_s14 + $0x88] sm:$0xff] %vm434_vm15, %v11242_v14 }
 0x98f   : > { %v10833_v41 = vadd.f32 %v17628_v1, %v10788_v46  ;;  %12521 = vmatmul.msk.f32.gmra.mxu2 %vm434_vm15, %v10451_v17  ;;  %v17883_v46 = vpop.f32.mrf.mxu3 }
 0x991   : > { %vm10874_vm4 = vcmp.ge.f32.partialorder %v10833_v41, 0.0  ;;  %v10915_v57 = vmul.f32 0.1, %v10833_v41 }
 0x992   : > { %v10659_v42 = vpop.f32.mrf.mxu2 }
 0x993   : > { %v10956_v22 = vsel %vm10874_vm4, %v10833_v41, %v10915_v57  ;;  %v10744_v33 = vadd.f32 %v10659_v42, %v10394_v24  ;;  %v10047_v41 = vadd.f32 %v17822_v47, %v9697_v37  ;;  %v17891_v24 = vpop.f32.mrf.mxu0  ;;  %v17894_v42 = vpop.f32.mrf.mxu1 }
 0x994   : > { %v11243_v23 = vmul.f32 %v11113_v15, %v10956_v22  ;;  %v9698_v22 = vadd.f32 %v17830_v16, %v18647_v10 }
 0x995   : > { %v10789_v49 = vmul.f32 %v17621_v53, %v10744_v33  ;;  %v10397_v20 = vadd.f32 %v17825_v59, %v10047_v41 }
 0x996   : > { %11284 = vst.msk [vmem:[%s17641_s14 + $0x90] sm:$0xff] %vm434_vm15, %v11243_v23  ;;  %v10048_v59 = vadd.f32 %v17838_v43, %v9698_v22  ;;  %v10456_v43 = vld [vmem:[#allocation3 + $0x166] sm:$0xff] }
 0x997   : > { %v10834_v2 = vadd.f32 %v17628_v1, %v10789_v49  ;;  %12522 = vmatmul.msk.f32.gmra.mxu2 %vm434_vm15, %v10452_v34  ;;  %v10455_v49 = vld [vmem:[#allocation3 + $0x15e] sm:$0xff]  ;;  %v9633_v25 = vpop.f32.mrf.mxu3 }
 0x999   : > { %vm10875_vm5 = vcmp.ge.f32.partialorder %v10834_v2, 0.0  ;;  %v10916_v12 = vmul.f32 0.1, %v10834_v2 }
 0x99a   : > { %v10662_v35 = vpop.f32.mrf.mxu2 }
 0x99b   : > { %v10957_v52 = vsel %vm10875_vm5, %v10834_v2, %v10916_v12  ;;  %v10745_v28 = vadd.f32 %v10662_v35, %v10395_v9  ;;  %v10398_v9 = vadd.f32 %v17842_v44, %v10048_v59  ;;  %v9983_v12 = vpop.f32.mrf.mxu0 }
 0x99c   : > { %v11244_v56 = vmul.f32 %v11118_v61, %v10957_v52  ;;  %v11133_v61 = vpop.permute.xlu2 %11132 }
 0x99d   : > { %v10790_v58 = vmul.f32 %v17621_v53, %v10745_v28 }
 0x99e   : > { %11285 = vst.msk [vmem:[%s17641_s14 + $0x98] sm:$0xff] %vm434_vm15, %v11244_v56  ;;  %v10333_v56 = vpop.f32.mrf.mxu1 }
 0x99f   : > { %v10835_v50 = vadd.f32 %v17628_v1, %v10790_v58  ;;  %12523 = vmatmul.msk.f32.gmra.mxu2 %vm434_vm15, %v10453_v36 }
 0x9a1   : > { %vm10876_vm6 = vcmp.ge.f32.partialorder %v10835_v50, 0.0  ;;  %v10917_v48 = vmul.f32 0.1, %v10835_v50 }
 0x9a2   : > { %v10665_v27 = vpop.f32.mrf.mxu2 }
 0x9a3   : > { %v10958_v55 = vsel %vm10876_vm6, %v10835_v50, %v10917_v48  ;;  %v10746_v14 = vadd.f32 %v10665_v27, %v10396_v62  ;;  %v9636_v50 = vpop.f32.mrf.mxu3  ;;  %v10399_v62 = vadd.f32 %v17858_v11, %v10049_v31  ;;  %v11138_v27 = vpop.permute.xlu0 %11137 }
 0x9a4   : > { %v11245_v8 = vmul.f32 %v11123_v4, %v10958_v55  ;;  %v18649_v4 = vld [vmem:[#allocation37_spill] sm:$0xff] }
 0x9a5   : > { %v10791_v17 = vmul.f32 %v17621_v53, %v10746_v14  ;;  %v9700_v5 = vadd.f32 %v17866_v54, %v18649_v4  ;;  %v9986_v14 = vpop.f32.mrf.mxu0 }
 0x9a6   : > { %11286 = vst.msk [vmem:[%s17641_s14 + $0xa0] sm:$0xff] %vm434_vm15, %v11245_v8 }
 0x9a7   : > { %v10836_v63 = vadd.f32 %v17628_v1, %v10791_v17  ;;  %12524 = vmatmul.msk.f32.gmra.mxu2 %vm434_vm15, %v10454_v0  ;;  %v10336_v17 = vpop.f32.mrf.mxu1  ;;  %v10050_v0 = vadd.f32 %v17871_v51, %v9700_v5 }
 0x9a9   : > { %vm10877_vm7 = vcmp.ge.f32.partialorder %v10836_v63, 0.0  ;;  %v10918_v57 = vmul.f32 0.1, %v10836_v63  ;;  %v10400_v41 = vadd.f32 %v17878_v30, %v10050_v0 }
 0x9aa   : > { %v10668_v15 = vpop.f32.mrf.mxu2 }
 0x9ab   : > { %v10959_v33 = vsel %vm10877_vm7, %v10836_v63, %v10918_v57  ;;  %v10747_v47 = vadd.f32 %v10668_v15, %v10397_v20  ;;  %v9639_v20 = vpop.f32.mrf.mxu3  ;;  %v11143_v57 = vpop.permute.xlu1 %11142  ;;  %v18650_v15 = vld [vmem:[#allocation26_spill] sm:$0xff] }
 0x9ac   : > { %v11246_v23 = vmul.f32 %v11128_v13, %v10959_v33  ;;  %v9701_v13 = vadd.f32 %v17883_v46, %v18650_v15  ;;  %v11148_v46 = vpop.permute.xlu2 %11147 }
 0x9ad   : > { %v10792_v34 = vmul.f32 %v17621_v53, %v10747_v47 }
 0x9ae   : > { %11287 = vst.msk [vmem:[%s17641_s14 + $0xa8] sm:$0xff] %vm434_vm15, %v11246_v23  ;;  %v9989_v23 = vpop.f32.mrf.mxu0  ;;  %v10051_v51 = vadd.f32 %v17891_v24, %v9701_v13 }
 0x9af   : > { %v10837_v2 = vadd.f32 %v17628_v1, %v10792_v34  ;;  %12525 = vmatmul.msk.f32.gmra.mxu2 %vm434_vm15, %v10455_v49  ;;  %v10339_v49 = vpop.f32.mrf.mxu1 }
 0x9b0   : > { %v10401_v34 = vadd.f32 %v17894_v42, %v10051_v51  ;;  %v18654_v51 = vld [vmem:[#allocation38_spill] sm:$0xff] }
 0x9b1   : > { %vm10878_vm8 = vcmp.ge.f32.partialorder %v10837_v2, 0.0  ;;  %v10919_v16 = vmul.f32 0.1, %v10837_v2 }
 0x9b2   : > { %v10671_v35 = vpop.f32.mrf.mxu2 }
 0x9b3   : > { %v10960_v52 = vsel %vm10878_vm8, %v10837_v2, %v10919_v16  ;;  %v10748_v28 = vadd.f32 %v10671_v35, %v10398_v9  ;;  %v18651_v9 = vld [vmem:[#allocation9_spill] sm:$0xff]  ;;  %v9642_v39 = vpop.f32.mrf.mxu3  ;;  %v11158_v0 = vpop.permute.xlu1 %11157 }
 0x9b4   : > { %v11247_v58 = vmul.f32 %v11133_v61, %v10960_v52  ;;  %v9702_v16 = vadd.f32 %v9633_v25, %v18651_v9  ;;  %v18652_v25 = vld [vmem:[#allocation40_spill] sm:$0xff] }
 0x9b5   : > { %v10793_v36 = vmul.f32 %v17621_v53, %v10748_v28 }
 0x9b6   : > { %11288 = vst.msk [vmem:[%s17641_s14 + $0xb0] sm:$0xff] %vm434_vm15, %v11247_v58  ;;  %v10052_v24 = vadd.f32 %v9983_v12, %v9702_v16  ;;  %v9992_v58 = vpop.f32.mrf.mxu0 }
 0x9b7   : > { %v10838_v44 = vadd.f32 %v17628_v1, %v10793_v36  ;;  %12526 = vmatmul.msk.f32.gmra.mxu2 %vm434_vm15, %v10456_v43  ;;  %v10342_v36 = vpop.f32.mrf.mxu1 }
 0x9b8   : > { %v10402_v42 = vadd.f32 %v10333_v56, %v10052_v24 }
 0x9b9   : > { %vm10879_vm9 = vcmp.ge.f32.partialorder %v10838_v44, 0.0  ;;  %v10920_v18 = vmul.f32 0.1, %v10838_v44 }
 0x9ba   : > { %v10674_v48 = vpop.f32.mrf.mxu2 }
 0x9bb   : > { %v10961_v37 = vsel %vm10879_vm9, %v10838_v44, %v10920_v18  ;;  %v10749_v55 = vadd.f32 %v10674_v48, %v10399_v62  ;;  %v11153_v44 = vpop.permute.xlu0 %11152  ;;  %v9703_v62 = vadd.f32 %v9636_v50, %v18652_v25  ;;  %v9645_v5 = vpop.f32.mrf.mxu3 }
 0x9bc   : > { %v11248_v8 = vmul.f32 %v11138_v27, %v10961_v37 }
 0x9bd   : > { %v10794_v29 = vmul.f32 %v17621_v53, %v10749_v55  ;;  %v10053_v12 = vadd.f32 %v9986_v14, %v9703_v62 }
 0x9be   : > { %11289 = vst.msk [vmem:[%s17641_s14 + $0xb8] sm:$0xff] %vm434_vm15, %v11248_v8  ;;  %v9995_v8 = vpop.f32.mrf.mxu0 }
 0x9bf   : > { %v10839_v11 = vadd.f32 %v17628_v1, %v10794_v29  ;;  %v10403_v56 = vadd.f32 %v10336_v17, %v10053_v12 }
 0x9c1   : > { %vm10880_vm10 = vcmp.ge.f32.partialorder %v10839_v11, 0.0  ;;  %v10921_v63 = vmul.f32 0.1, %v10839_v11 }
 0x9c2   : > { %v10677_v54 = vpop.f32.mrf.mxu2 }
 0x9c3   : > { %v10962_v10 = vsel %vm10880_vm10, %v10839_v11, %v10921_v63  ;;  %v10750_v22 = vadd.f32 %v10677_v54, %v10400_v41  ;;  %v18653_v11 = vld [vmem:[#allocation28_spill] sm:$0xff]  ;;  %v10345_v54 = vpop.f32.mrf.mxu1  ;;  %v9648_v17 = vpop.f32.mrf.mxu3 }
 0x9c4   : > { %v11249_v33 = vmul.f32 %v11143_v57, %v10962_v10  ;;  %v9704_v50 = vadd.f32 %v9639_v20, %v18653_v11  ;;  %v9705_v20 = vadd.f32 %v9642_v39, %v18654_v51  ;;  %v9706_v39 = vadd.f32 %v9645_v5, %v17529_v21 }
 0x9c5   : > { %v10795_v47 = vmul.f32 %v17621_v53, %v10750_v22  ;;  %v9707_v21 = vadd.f32 %v9648_v17, %v17538_v45 }
 0x9c6   : > { %11290 = vst.msk [vmem:[%s17641_s14 + $0xc0] sm:$0xff] %vm434_vm15, %v11249_v33  ;;  %v10054_v14 = vadd.f32 %v9989_v23, %v9704_v50  ;;  %v10055_v23 = vadd.f32 %v9992_v58, %v9705_v20  ;;  %v10056_v58 = vadd.f32 %v9995_v8, %v9706_v39 }
 0x9c7   : > { %v10840_v30 = vadd.f32 %v17628_v1, %v10795_v47  ;;  %v11163_v47 = vpop.permute.xlu2 %11162 }
 0x9c8   : > { %v10404_v10 = vadd.f32 %v10339_v49, %v10054_v14  ;;  %v10405_v49 = vadd.f32 %v10342_v36, %v10055_v23  ;;  %v10406_v25 = vadd.f32 %v10345_v54, %v10056_v58 }
 0x9c9   : > { %vm10881_vm11 = vcmp.ge.f32.partialorder %v10840_v30, 0.0  ;;  %v10922_v59 = vmul.f32 0.1, %v10840_v30 }
 0x9ca   : > { %v10680_v2 = vpop.f32.mrf.mxu2 }
 0x9cb   : > { %v10963_v35 = vsel %vm10881_vm11, %v10840_v30, %v10922_v59  ;;  %v10751_v61 = vadd.f32 %v10680_v2, %v10401_v34  ;;  %v9998_v59 = vpop.f32.mrf.mxu0  ;;  %v10348_v9 = vpop.f32.mrf.mxu1 }
 0x9cc   : > { %v11250_v6 = vmul.f32 %v11148_v46, %v10963_v35 }
 0x9cd   : > { %v10796_v52 = vmul.f32 %v17621_v53, %v10751_v61  ;;  %v9651_v61 = vpop.f32.mrf.mxu3 }
 0x9ce   : > { %11291 = vst.msk [vmem:[%s17641_s14 + $0xc8] sm:$0xff] %vm434_vm15, %v11250_v6 }
 0x9cf   : > { %v10841_v28 = vadd.f32 %v17628_v1, %v10796_v52  ;;  %v11168_v52 = vpop.permute.xlu0 %11167  ;;  %v11178_v50 = vpop.permute.xlu2 %11177 }
 0x9d1   : > { %vm10882_vm0 = vcmp.ge.f32.partialorder %v10841_v28, 0.0  ;;  %v10923_v43 = vmul.f32 0.1, %v10841_v28 }
 0x9d2   : > { %v10683_v31 = vpop.f32.mrf.mxu2 }
 0x9d3   : > { %v10964_v18 = vsel %vm10882_vm0, %v10841_v28, %v10923_v43  ;;  %v10752_v48 = vadd.f32 %v10683_v31, %v10402_v42  ;;  %v10001_v31 = vpop.f32.mrf.mxu0  ;;  %v10351_v36 = vpop.f32.mrf.mxu1 }
 0x9d4   : > { %v11251_v27 = vmul.f32 %v11153_v44, %v10964_v18 }
 0x9d5   : > { %v10797_v4 = vmul.f32 %v17621_v53, %v10752_v48  ;;  %v11173_v48 = vpop.permute.xlu1 %11172  ;;  %v9654_v5 = vpop.f32.mrf.mxu3 }
 0x9d6   : > { %11292 = vst.msk [vmem:[%s17641_s14 + $0xd0] sm:$0xff] %vm434_vm15, %v11251_v27 }
 0x9d7   : > { %v10842_v37 = vadd.f32 %v17628_v1, %v10797_v4  ;;  %v11183_v51 = vpop.permute.xlu0 %11182 }
 0x9d9   : > { %vm10883_vm12 = vcmp.ge.f32.partialorder %v10842_v37, 0.0  ;;  %v10924_v55 = vmul.f32 0.1, %v10842_v37 }
 0x9da   : > { %v10686_v29 = vpop.f32.mrf.mxu2 }
 0x9db   : > { %v10965_v41 = vsel %vm10883_vm12, %v10842_v37, %v10924_v55  ;;  %v10753_v63 = vadd.f32 %v10686_v29, %v10403_v56  ;;  %v17967_v56 = vld [vmem:[%s18028_s9] ss:$0 sm:$0xff]  ;;  %v10004_v55 = vpop.f32.mrf.mxu0 }
 0x9dc   : > { %v11252_v57 = vmul.f32 %v11158_v0, %v10965_v41  ;;  %v10354_v0 = vpop.f32.mrf.mxu1  ;;  %v9708_v41 = vadd.f32 %v9651_v61, %v17550_v19  ;;  %v9709_v19 = vadd.f32 %v9654_v5, %v17559_v32 }
 0x9dd   : > { %v10798_v15 = vmul.f32 %v17621_v53, %v10753_v63  ;;  %v9657_v14 = vpop.f32.mrf.mxu3  ;;  %v11188_v61 = vpop.permute.xlu1 %11187 }
 0x9de   : > { %11293 = vst.msk [vmem:[%s17641_s14 + $0xd8] sm:$0xff] %vm434_vm15, %v11252_v57  ;;  %v9710_v32 = vadd.f32 %v9657_v14, %v17568_v40 }
 0x9df   : > { %v10843_v13 = vadd.f32 %v17628_v1, %v10798_v15 }
 0x9e1   : > { %vm10884_vm14 = vcmp.ge.f32.partialorder %v10843_v13, 0.0  ;;  %v10925_v22 = vmul.f32 0.1, %v10843_v13 }
 0x9e2   : > { %v10689_v33 = vpop.f32.mrf.mxu2 }
 0x9e3   : > { %v10966_v30 = vsel %vm10884_vm14, %v10843_v13, %v10925_v22  ;;  %v10754_v34 = vadd.f32 %v10689_v33, %v10404_v10  ;;  %v10058_v13 = vadd.f32 %v10001_v31, %v9708_v41  ;;  %v10007_v33 = vpop.f32.mrf.mxu0 }
 0x9e4   : > { %v11253_v2 = vmul.f32 %v11163_v47, %v10966_v30 }
 0x9e5   : > { %v10799_v46 = vmul.f32 %v17621_v53, %v10754_v34  ;;  %v10408_v10 = vadd.f32 %v10351_v36, %v10058_v13  ;;  %v10357_v34 = vpop.f32.mrf.mxu1  ;;  %v9660_v23 = vpop.f32.mrf.mxu3 }
 0x9e6   : > { %11294 = vst.msk [vmem:[%s17641_s14 + $0xe0] sm:$0xff] %vm434_vm15, %v11253_v2  ;;  %v9711_v40 = vadd.f32 %v9660_v23, %v17577_v26 }
 0x9e7   : > { %v10844_v16 = vadd.f32 %v17628_v1, %v10799_v46  ;;  %v10059_v46 = vadd.f32 %v10004_v55, %v9709_v19 }
 0x9e9   : > { %vm10885_vm1 = vcmp.ge.f32.partialorder %v10844_v16, 0.0  ;;  %v10926_v35 = vmul.f32 0.1, %v10844_v16 }
 0x9ea   : > { %v10692_v6 = vpop.f32.mrf.mxu2 }
 0x9eb   : > { %v10967_v24 = vsel %vm10885_vm1, %v10844_v16, %v10926_v35  ;;  %v10755_v28 = vadd.f32 %v10692_v6, %v10405_v49  ;;  %v10409_v16 = vadd.f32 %v10354_v0, %v10059_v46  ;;  %v10010_v39 = vpop.f32.mrf.mxu0 }
 0x9ec   : > { %v11254_v42 = vmul.f32 %v11168_v52, %v10967_v24  ;;  %v10061_v5 = vadd.f32 %v10010_v39, %v9711_v40 }
 0x9ed   : > { %v10800_v43 = vmul.f32 %v17621_v53, %v10755_v28  ;;  %v17959_v53 = vld [vmem:[%s18027_s8] ss:$0 sm:$0xff]  ;;  %v9663_v36 = vpop.f32.mrf.mxu3 }
 0x9ee   : > { %11295 = vst.msk [vmem:[%s17641_s14 + $0xe8] sm:$0xff] %vm434_vm15, %v11254_v42  ;;  %v10360_v42 = vpop.f32.mrf.mxu1  ;;  %v9712_v26 = vadd.f32 %v9663_v36, %v17584_v38 }
 0x9ef   : > { %v10845_v44 = vadd.f32 %v17628_v1, %v10800_v43  ;;  %v10057_v1 = vadd.f32 %v9998_v59, %v9707_v21  ;;  %v10060_v43 = vadd.f32 %v10007_v33, %v9710_v32 }
 0x9f1   : > { %vm10886_vm13 = vcmp.ge.f32.partialorder %v10845_v44, 0.0  ;;  %v10927_v62 = vmul.f32 0.1, %v10845_v44  ;;  %v10407_v8 = vadd.f32 %v10348_v9, %v10057_v1  ;;  %v10410_v58 = vadd.f32 %v10357_v34, %v10060_v43 }
 0x9f2   : > { %v10695_v18 = vpop.f32.mrf.mxu2  ;;  %v10411_v1 = vadd.f32 %v10360_v42, %v10061_v5 }
 0x9f3   : > { %v10968_v27 = vsel %vm10886_vm13, %v10845_v44, %v10927_v62  ;;  %v10756_v4 = vadd.f32 %v10695_v18, %v10406_v25  ;;  %v11193_v62 = vpop.permute.xlu2 %11192 }
 0x9f4   : > { %v11255_v12 = vmul.f32 %v11173_v48, %v10968_v27 }
 0x9f5   : > { %v10801_v37 = vmul.f32 %v17959_v53, %v10756_v4  ;;  %v10013_v4 = vpop.f32.mrf.mxu0 }
 0x9f6   : > { %11296 = vst.msk [vmem:[%s17641_s14 + $0xf0] sm:$0xff] %vm434_vm15, %v11255_v12 }
 0x9f7   : > { %v10846_v45 = vadd.f32 %v17967_v56, %v10801_v37  ;;  %v10363_v37 = vpop.f32.mrf.mxu1 }
 0x9f9   : > { %vm10887_vm2 = vcmp.ge.f32.partialorder %v10846_v45, 0.0  ;;  %v10928_v29 = vmul.f32 0.1, %v10846_v45 }
 0x9fa   : > { %v10698_v11 = vpop.f32.mrf.mxu2 }
 0x9fb   : > { %v10969_v63 = vsel %vm10887_vm2, %v10846_v45, %v10928_v29  ;;  %v10757_v54 = vadd.f32 %v10698_v11, %v10407_v8  ;;  %v11198_v8 = vpop.permute.xlu0 %11197  ;;  %v9666_v11 = vpop.f32.mrf.mxu3 }
 0x9fc   : > { %v11256_v57 = vmul.f32 %v11178_v50, %v10969_v63  ;;  %v10062_v63 = vadd.f32 %v10013_v4, %v9712_v26  ;;  %v9713_v38 = vadd.f32 %v9666_v11, %v17593_v3 }
 0x9fd   : > { %v10802_v15 = vmul.f32 %v17959_v53, %v10757_v54 }
 0x9fe   : > { %11297 = vst.msk [vmem:[%s17641_s14 + $0xf8] sm:$0xff] %vm434_vm15, %v11256_v57  ;;  %v10016_v57 = vpop.f32.mrf.mxu0 }
 0x9ff   : > { %v10847_v17 = vadd.f32 %v17967_v56, %v10802_v15  ;;  %v10412_v15 = vadd.f32 %v10363_v37, %v10062_v63  ;;  %v10366_v13 = vpop.f32.mrf.mxu1 }
 0xa01   : > { %vm10888_vm3 = vcmp.ge.f32.partialorder %v10847_v17, 0.0  ;;  %v10929_v22 = vmul.f32 0.1, %v10847_v17 }
 0xa02   : > { %v10701_v47 = vpop.f32.mrf.mxu2 }
 0xa03   : > { %v10970_v20 = vsel %vm10888_vm3, %v10847_v17, %v10929_v22  ;;  %v10758_v30 = vadd.f32 %v10701_v47, %v10408_v10  ;;  %v11203_v10 = vpop.permute.xlu1 %11202  ;;  %v9669_v19 = vpop.f32.mrf.mxu3 }
 0xa04   : > { %v11257_v59 = vmul.f32 %v11183_v51, %v10970_v20  ;;  %v10063_v20 = vadd.f32 %v10016_v57, %v9713_v38  ;;  %v9714_v3 = vadd.f32 %v9669_v19, %v17602_v60  ;;  %v11213_v42 = vpop.permute.xlu0 %11212 }
 0xa05   : > { %v10803_v2 = vmul.f32 %v17959_v53, %v10758_v30 }
 0xa06   : > { %11298 = vst.msk [vmem:[%s17641_s14 + $0x100] sm:$0xff] %vm434_vm15, %v11257_v59  ;;  %v10413_v34 = vadd.f32 %v10366_v13, %v10063_v20 }
 0xa07   : > { %v10848_v9 = vadd.f32 %v17967_v56, %v10803_v2  ;;  %v10019_v2 = vpop.f32.mrf.mxu0 }
 0xa08   : > { %v10064_v32 = vadd.f32 %v10019_v2, %v9714_v3 }
 0xa09   : > { %vm10889_vm4 = vcmp.ge.f32.partialorder %v10848_v9, 0.0  ;;  %v10930_v49 = vmul.f32 0.1, %v10848_v9 }
 0xa0a   : > { %v10704_v35 = vpop.f32.mrf.mxu2 }
 0xa0b   : > { %v10971_v6 = vsel %vm10889_vm4, %v10848_v9, %v10930_v49  ;;  %v10759_v52 = vadd.f32 %v10704_v35, %v10409_v16  ;;  %v11208_v9 = vpop.permute.xlu2 %11207  ;;  %v10369_v49 = vpop.f32.mrf.mxu1 }
 0xa0c   : > { %v11258_v24 = vmul.f32 %v11188_v61, %v10971_v6  ;;  %v10414_v39 = vadd.f32 %v10369_v49, %v10064_v32 }
 0xa0d   : > { %v10804_v28 = vmul.f32 %v17959_v53, %v10759_v52  ;;  %v9672_v52 = vpop.f32.mrf.mxu3 }
 0xa0e   : > { %11299 = vst.msk [vmem:[%s17641_s14 + $0x108] sm:$0xff] %vm434_vm15, %v11258_v24  ;;  %v9715_v60 = vadd.f32 %v9672_v52, %v17611_v7 }
 0xa0f   : > { %v10849_v31 = vadd.f32 %v17967_v56, %v10804_v28 }
 0xa11   : > { %vm10890_vm5 = vcmp.ge.f32.partialorder %v10849_v31, 0.0  ;;  %v10931_v44 = vmul.f32 0.1, %v10849_v31 }
 0xa12   : > { %v10707_v25 = vpop.f32.mrf.mxu2 }
 0xa13   : > { %v10972_v18 = vsel %vm10890_vm5, %v10849_v31, %v10931_v44  ;;  %v10760_v48 = vadd.f32 %v10707_v25, %v10410_v58  ;;  %v10022_v58 = vpop.f32.mrf.mxu0  ;;  %v10372_v25 = vpop.f32.mrf.mxu1 }
 0xa14   : > { %v11259_v21 = vmul.f32 %v11193_v62, %v10972_v18  ;;  %v10065_v62 = vadd.f32 %v10022_v58, %v9715_v60 }
 0xa15   : > { %v10805_v27 = vmul.f32 %v17959_v53, %v10760_v48 }
 0xa16   : > { %11300 = vst.msk [vmem:[%s17641_s14 + $0x110] sm:$0xff] %vm434_vm15, %v11259_v21  ;;  %v10415_v18 = vadd.f32 %v10372_v25, %v10065_v62 }
 0xa17   : > { %v10850_v12 = vadd.f32 %v17967_v56, %v10805_v27  ;;  %v11218_v27 = vpop.permute.xlu1 %11217 }
 0xa19   : > { %vm10891_vm6 = vcmp.ge.f32.partialorder %v10850_v12, 0.0  ;;  %v10932_v45 = vmul.f32 0.1, %v10850_v12 }
 0xa1a   : > { %v10710_v55 = vpop.f32.mrf.mxu2 }
 0xa1b   : > { %v10973_v29 = vsel %vm10891_vm6, %v10850_v12, %v10932_v45  ;;  %v10761_v0 = vadd.f32 %v10710_v55, %v10411_v1  ;;  %v11223_v45 = vpop.permute.xlu2 %11222 }
 0xa1c   : > { %v11260_v50 = vmul.f32 %v11198_v8, %v10973_v29 }
 0xa1d   : > { %v10806_v41 = vmul.f32 %v17959_v53, %v10761_v0 }
 0xa1e   : > { %11301 = vst.msk [vmem:[%s17641_s14 + $0x118] sm:$0xff] %vm434_vm15, %v11260_v50 }
 0xa1f   : > { %v10851_v54 = vadd.f32 %v17967_v56, %v10806_v41 }
 0xa21   : > { %vm10892_vm7 = vcmp.ge.f32.partialorder %v10851_v54, 0.0  ;;  %v10933_v14 = vmul.f32 0.1, %v10851_v54 }
 0xa22   : > { %v10713_v17 = vpop.f32.mrf.mxu2 }
 0xa23   : > { %v10974_v22 = vsel %vm10892_vm7, %v10851_v54, %v10933_v14  ;;  %v10762_v33 = vadd.f32 %v10713_v17, %v10412_v15 }
 0xa24   : > { %v11261_v47 = vmul.f32 %v11203_v10, %v10974_v22 }
 0xa25   : > { %v10807_v51 = vmul.f32 %v17959_v53, %v10762_v33 }
 0xa26   : > { %11302 = vst.msk [vmem:[%s17641_s14 + $0x120] sm:$0xff] %vm434_vm15, %v11261_v47 }
 0xa27   : > { %v10852_v30 = vadd.f32 %v17967_v56, %v10807_v51 }
 0xa29   : > { %vm10893_vm8 = vcmp.ge.f32.partialorder %v10852_v30, 0.0  ;;  %v10934_v59 = vmul.f32 0.1, %v10852_v30 }
 0xa2a   : > { %v10716_v46 = vpop.f32.mrf.mxu2 }
 0xa2b   : > { %v10975_v23 = vsel %vm10893_vm8, %v10852_v30, %v10934_v59  ;;  %v10763_v16 = vadd.f32 %v10716_v46, %v10413_v34 }
 0xa2c   : > { %v11262_v35 = vmul.f32 %v11208_v9, %v10975_v23 }
 0xa2d   : > { %v10808_v61 = vmul.f32 %v17959_v53, %v10763_v16 }
 0xa2e   : > { %11303 = vst.msk [vmem:[%s17641_s14 + $0x128] sm:$0xff] %vm434_vm15, %v11262_v35 }
 0xa2f   : > { %v10853_v6 = vadd.f32 %v17967_v56, %v10808_v61 }
 0xa31   : > { %vm10894_vm9 = vcmp.ge.f32.partialorder %v10853_v6, 0.0  ;;  %v10935_v24 = vmul.f32 0.1, %v10853_v6 }
 0xa32   : > { %v10719_v28 = vpop.f32.mrf.mxu2 }
 0xa33   : > { %v10976_v43 = vsel %vm10894_vm9, %v10853_v6, %v10935_v24  ;;  %v10764_v31 = vadd.f32 %v10719_v28, %v10414_v39 }
 0xa34   : > { %v11263_v44 = vmul.f32 %v11213_v42, %v10976_v43 }
 0xa35   : > { %v10809_v36 = vmul.f32 %v17959_v53, %v10764_v31 }
 0xa36   : > { %11304 = vst.msk [vmem:[%s17641_s14 + $0x130] sm:$0xff] %vm434_vm15, %v11263_v44 }
 0xa37   : > { %v10854_v40 = vadd.f32 %v17967_v56, %v10809_v36 }
 0xa39   : > { %vm10895_vm10 = vcmp.ge.f32.partialorder %v10854_v40, 0.0  ;;  %v10936_v48 = vmul.f32 0.1, %v10854_v40 }
 0xa3a   : > { %v10722_v21 = vpop.f32.mrf.mxu2 }
 0xa3b   : > { %v10977_v7 = vsel %vm10895_vm10, %v10854_v40, %v10936_v48  ;;  %v10765_v4 = vadd.f32 %v10722_v21, %v10415_v18 }
 0xa3c   : > { %v11264_v5 = vmul.f32 %v11218_v27, %v10977_v7 }
 0xa3d   : > { %v10810_v12 = vmul.f32 %v17959_v53, %v10765_v4 }
 0xa3e   : > { %11305 = vst.msk [vmem:[%s17641_s14 + $0x138] sm:$0xff] %vm434_vm15, %v11264_v5 }
 0xa3f   : > { %v10855_v37 = vadd.f32 %v17967_v56, %v10810_v12 }
 0xa41   : > { %vm10896_vm11 = vcmp.ge.f32.partialorder %v10855_v37, 0.0  ;;  %v10937_v1 = vmul.f32 0.1, %v10855_v37 }
 0xa43   : > { %v10978_v55 = vsel %vm10896_vm11, %v10855_v37, %v10937_v1 }
 0xa44   : > { %v11265_v8 = vmul.f32 %v11223_v45, %v10978_v55 }
 0xa46   : > { %11306 = vst.msk [vmem:[%s17641_s14 + $0x140] sm:$0xff] %vm434_vm15, %v11265_v8 }
 0xa47 PF: > { %s21_s17 = sadd.s32 1, %s12565_s17  }
 0xa48   : > { %p18_p4 = scmp.ge.s32.totalorder %s21_s17, 4  }
 0xa4a   :  { %20 = sbr.rel (!%p18_p4) target bundleno = 1 (0x1), region = 118 }

</bundles_post_ra>
